<compile_context>
chip_gen: v7x
topology: tpu7x:2x2x1
jax: 0.10.0
libtpu: 0.0.40
codegen_flags: <defaults>
</compile_context>

<pallas_src>
import functools

import jax
import jax.numpy as jnp
from jax.experimental import pallas as pl
from jax.experimental.pallas import tpu as pltpu

# ----------------------------- configuration ------------------------------
B = 2                  # batch
SEQ = 32               # input sequence length
INPUT_DIM = 16         # input feature dim
NUM_LATENTS = 8
LATENT_DIM = 32
NUM_QUERIES = 8
QUERY_DIM = 32
PROJECTION_DIM = 16    # decoder projection output dim
CROSS_HEADS = 1        # encoder cross-attention heads
SELF_HEADS = 4         # latent self-attention heads
DEC_HEADS = 1          # decoder cross-attention heads
WIDENING = 1           # MLP widening factor
NUM_BLOCKS = 2         # weight-shared repetitions of the self-attention stack
SELF_LAYERS_PER_BLOCK = 2
LN_EPS = 1e-5


# ------------------------- in-kernel building blocks ------------------------
# All of this operates on VMEM-resident values inside the single fused kernel.

def _layer_norm(x):
    # LN affine (g, b) is folded into the following linear at pack time, so
    # only the normalization remains here (PyTorch semantics: biased var).
    mu = jnp.mean(x, axis=-1, keepdims=True)
    var = jnp.mean((x - mu) ** 2, axis=-1, keepdims=True)
    return (x - mu) * jax.lax.rsqrt(var + LN_EPS)


def _erf(x):
    # Abramowitz & Stegun 7.1.26; the divide goes to the EUP via approx recip.
    a1, a2, a3, a4, a5 = (0.254829592, -0.284496736, 1.421413741,
                          -1.453152027, 1.061405429)
    pc = 0.3275911
    ax = jnp.abs(x)
    t = pl.reciprocal(1.0 + pc * ax, approx=True)
    poly = ((((a5 * t + a4) * t + a3) * t + a2) * t + a1) * t
    y = 1.0 - poly * jnp.exp(-ax * ax)
    return jnp.where(x >= 0, y, -y)


def _gelu(x):
    return 0.5 * x * (1.0 + _erf(x * 0.7071067811865476))


def _attend(q, k, v):
    # softmax(q k^T) v ; the dh**-0.5 scale is folded into the Q projection.
    s = jax.lax.dot_general(q, k, (((1,), (1,)), ((), ())),
                            preferred_element_type=jnp.float32)
    m = jnp.max(s, axis=-1, keepdims=True)
    e = jnp.exp(s - m)
    # exact divide (trivial op count; keeps parity with the reference)
    return jnp.dot(e / jnp.sum(e, axis=-1, keepdims=True), v,
                   preferred_element_type=jnp.float32)


def _multi_head_attend(qp, kp, vp, wo, num_heads):
    if num_heads == 1:
        merged = _attend(qp, kp, vp)
    else:
        d = qp.shape[-1]
        dh = d // num_heads
        dv = vp.shape[-1] // num_heads
        merged = jnp.concatenate(
            [_attend(qp[:, h * dh:(h + 1) * dh],
                     kp[:, h * dh:(h + 1) * dh],
                     vp[:, h * dv:(h + 1) * dv]) for h in range(num_heads)],
            axis=-1)
    # single head-merge + output projection matmul
    return jnp.dot(merged, wo, preferred_element_type=jnp.float32)


def _mlp(g, p, x):
    h = jnp.dot(x, g(p + ".mlp.w1"),
                preferred_element_type=jnp.float32) + g(p + ".mlp.b1")
    h = _gelu(h)
    return jnp.dot(h, g(p + ".mlp.w2"),
                   preferred_element_type=jnp.float32) + g(p + ".mlp.b2")


def _cross_block(g, p, kv_in, q_in, num_heads, use_query_residual):
    qp = jnp.dot(_layer_norm(q_in), g(p + ".wq"),
                 preferred_element_type=jnp.float32) + g(p + ".bq")
    kvp = jnp.dot(_layer_norm(kv_in), g(p + ".wkv"),
                  preferred_element_type=jnp.float32) + g(p + ".bkv")
    d = qp.shape[-1]
    attn = _multi_head_attend(qp, kvp[:, :d], kvp[:, d:], g(p + ".wo"),
                              num_heads) + g(p + ".bo")
    x = q_in + attn if use_query_residual else attn
    return x + _mlp(g, p, _layer_norm(x))


def _self_block(g, p, x, num_heads):
    qkv = jnp.dot(_layer_norm(x), g(p + ".wqkv"),
                  preferred_element_type=jnp.float32) + g(p + ".bqkv")
    d = x.shape[-1]
    attn = _multi_head_attend(qkv[:, :d], qkv[:, d:2 * d], qkv[:, 2 * d:],
                              g(p + ".wo"), num_heads) + g(p + ".bo")
    x = x + attn
    return x + _mlp(g, p, _layer_norm(x))


# ------------------------------ fused kernel --------------------------------

def _fused_perceiver_kernel(layout, inputs_ref, query_ref, params_ref, out_ref):
    # Lazy getter: each parameter is a static sublane-aligned slice of the one
    # packed VMEM buffer, loaded at its point of use (no big live-value set).
    def g(name):
        r0, nrows, ncols = layout[name]
        return params_ref[r0:r0 + nrows, 0:ncols]

    x_in = inputs_ref[0]      # (SEQ, INPUT_DIM)      -- this grid step's item
    q_in = query_ref[0]       # (NUM_QUERIES, QUERY_DIM)

    # encoder
    latents = g("latents")    # (NUM_LATENTS, LATENT_DIM), shared across batch
    latents = _cross_block(g, "enc", x_in, latents, CROSS_HEADS,
                           use_query_residual=True)
    for _ in range(NUM_BLOCKS):                 # weight-shared block stack
        for li in range(SELF_LAYERS_PER_BLOCK):
            latents = _self_block(g, f"self{li}", latents, SELF_HEADS)

    # decoder
    dec = _cross_block(g, "dec", latents, q_in, DEC_HEADS,
                       use_query_residual=False)
    out_ref[0] = (jnp.dot(dec, g("proj.w"),
                          preferred_element_type=jnp.float32) + g("proj.b"))


def perceiver_io_forward(layout, packed, inputs, query):
    batch = inputs.shape[0]
    rows = packed.shape[0]
    kern = functools.partial(_fused_perceiver_kernel, layout)
    return pl.pallas_call(
        kern,
        out_shape=jax.ShapeDtypeStruct((batch, NUM_QUERIES, PROJECTION_DIM),
                                       jnp.float32),
        grid=(batch,),
        in_specs=[
            pl.BlockSpec((1, SEQ, INPUT_DIM), lambda b: (b, 0, 0)),
            pl.BlockSpec((1, NUM_QUERIES, QUERY_DIM), lambda b: (b, 0, 0)),
            # single packed parameter buffer; constant block index => one DMA,
            # not re-fetched across grid steps
            pl.BlockSpec((rows, 128), lambda b: (0, 0)),
        ],
        out_specs=pl.BlockSpec((1, NUM_QUERIES, PROJECTION_DIM),
                               lambda b: (b, 0, 0)),
        compiler_params=pltpu.CompilerParams(
            dimension_semantics=("parallel",)),   # B=2 -> 2 TCs on v7x
    )(inputs, query, packed)


# ----------------------- init (raw, PyTorch-like params) --------------------

def _init_linear(key, din, dout, bias_scale=0.02):
    kw, kb = jax.random.split(key)
    return {"w": jax.random.normal(kw, (din, dout), jnp.float32) * din ** -0.5,
            "b": jax.random.normal(kb, (dout,), jnp.float32) * bias_scale}


def _init_ln(key, dim):
    # non-trivial affine so the LN-folding path is actually exercised
    kg, kb = jax.random.split(key)
    return {"g": 1.0 + 0.1 * jax.random.normal(kg, (dim,), jnp.float32),
            "b": 0.1 * jax.random.normal(kb, (dim,), jnp.float32)}


def _init_cross_raw(key, kv_dim, q_dim):
    ks = jax.random.split(key, 9)
    return {
        "q_ln": _init_ln(ks[0], q_dim),
        "kv_ln": _init_ln(ks[1], kv_dim),
        "final_ln": _init_ln(ks[2], q_dim),
        "q": _init_linear(ks[3], q_dim, q_dim),
        "k": _init_linear(ks[4], kv_dim, q_dim),
        "v": _init_linear(ks[5], kv_dim, q_dim),
        "o": _init_linear(ks[6], q_dim, q_dim),
        "mlp1": _init_linear(ks[7], q_dim, q_dim * WIDENING),
        "mlp2": _init_linear(ks[8], q_dim * WIDENING, q_dim),
    }


def _init_self_raw(key, dim):
    ks = jax.random.split(key, 8)
    return {
        "ln": _init_ln(ks[0], dim),
        "final_ln": _init_ln(ks[1], dim),
        "q": _init_linear(ks[2], dim, dim),
        "k": _init_linear(ks[3], dim, dim),
        "v": _init_linear(ks[4], dim, dim),
        "o": _init_linear(ks[5], dim, dim),
        "mlp1": _init_linear(ks[6], dim, dim * WIDENING),
        "mlp2": _init_linear(ks[7], dim * WIDENING, dim),
    }


# ------------------- host-side folding / fusion / packing -------------------

def _fold_ln(ln, lin):
    # LN(x; g, beta) @ W + b == norm(x) @ (g[:,None]*W) + (beta @ W + b)
    w = lin["w"] * ln["g"][:, None]
    b = lin["b"] + ln["b"] @ lin["w"]
    return w, b


def _fold_cross(raw, num_heads):
    wq, bq = _fold_ln(raw["q_ln"], raw["q"])
    wk, bk = _fold_ln(raw["kv_ln"], raw["k"])
    wv, bv = _fold_ln(raw["kv_ln"], raw["v"])
    w1, b1 = _fold_ln(raw["final_ln"], raw["mlp1"])
    scale = (wq.shape[1] // num_heads) ** -0.5     # fold softmax scale into Q
    return {
        "wq": wq * scale, "bq": (bq * scale)[None, :],
        "wkv": jnp.concatenate([wk, wv], axis=1),
        "bkv": jnp.concatenate([bk, bv])[None, :],
        "wo": raw["o"]["w"], "bo": raw["o"]["b"][None, :],
        "mlp.w1": w1, "mlp.b1": b1[None, :],
        "mlp.w2": raw["mlp2"]["w"], "mlp.b2": raw["mlp2"]["b"][None, :],
    }


def _fold_self(raw, num_heads):
    wq, bq = _fold_ln(raw["ln"], raw["q"])
    wk, bk = _fold_ln(raw["ln"], raw["k"])
    wv, bv = _fold_ln(raw["ln"], raw["v"])
    w1, b1 = _fold_ln(raw["final_ln"], raw["mlp1"])
    scale = (wq.shape[1] // num_heads) ** -0.5
    return {
        "wqkv": jnp.concatenate([wq * scale, wk, wv], axis=1),
        "bqkv": jnp.concatenate([bq * scale, bk, bv])[None, :],
        "wo": raw["o"]["w"], "bo": raw["o"]["b"][None, :],
        "mlp.w1": w1, "mlp.b1": b1[None, :],
        "mlp.w2": raw["mlp2"]["w"], "mlp.b2": raw["mlp2"]["b"][None, :],
    }


def fold_and_flatten(raw):
    flat = {"latents": raw["latents"]}
    for k, v in _fold_cross(raw["enc"], CROSS_HEADS).items():
        flat[f"enc.{k}"] = v
    for i, sl in enumerate(raw["self"]):
        for k, v in _fold_self(sl, SELF_HEADS).items():
            flat[f"self{i}.{k}"] = v
    for k, v in _fold_cross(raw["dec"], DEC_HEADS).items():
        flat[f"dec.{k}"] = v
    flat["proj.w"] = raw["proj"]["w"]
    flat["proj.b"] = raw["proj"]["b"][None, :]
    return flat


def pack_params(flat):
    """Pack all params into one (R, 128) f32 buffer; return (buffer, layout)."""
    layout = {}
    blocks = []
    row = 0
    for name, arr in flat.items():
        a = jnp.asarray(arr, jnp.float32)
        if a.ndim == 1:
            a = a[None, :]
        nr, nc = a.shape
        padded_r = -(-nr // 8) * 8            # sublane-align every row offset
        blk = jnp.zeros((padded_r, 128), jnp.float32).at[:nr, :nc].set(a)
        blocks.append(blk)
        layout[name] = (row, nr, nc)
        row += padded_r
    return jnp.concatenate(blocks, axis=0), layout


# ------------------------ pure-JAX reference (raw params) -------------------

def _ref_ln(x, ln):
    mu = x.mean(-1, keepdims=True)
    var = ((x - mu) ** 2).mean(-1, keepdims=True)
    return (x - mu) / jnp.sqrt(var + LN_EPS) * ln["g"] + ln["b"]


def _ref_gelu(x):
    return 0.5 * x * (1.0 + jax.scipy.special.erf(x * 0.7071067811865476))


def _ref_mha(raw, q_in, kv_in, num_heads):
    q = q_in @ raw["q"]["w"] + raw["q"]["b"]
    k = kv_in @ raw["k"]["w"] + raw["k"]["b"]
    v = kv_in @ raw["v"]["w"] + raw["v"]["b"]
    dh = q.shape[-1] // num_heads
    outs = []
    for h in range(num_heads):
        qh = q[:, h * dh:(h + 1) * dh]
        kh = k[:, h * dh:(h + 1) * dh]
        vh = v[:, h * dh:(h + 1) * dh]
        a = jax.nn.softmax((qh @ kh.T) * dh ** -0.5, axis=-1)
        outs.append(a @ vh)
    return jnp.concatenate(outs, axis=-1) @ raw["o"]["w"] + raw["o"]["b"]


def _ref_mlp(raw, x):
    h = _ref_gelu(x @ raw["mlp1"]["w"] + raw["mlp1"]["b"])
    return h @ raw["mlp2"]["w"] + raw["mlp2"]["b"]


def _ref_cross(raw, kv_in, q_in, num_heads, use_query_residual):
    attn = _ref_mha(raw, _ref_ln(q_in, raw["q_ln"]),
                    _ref_ln(kv_in, raw["kv_ln"]), num_heads)
    x = q_in + attn if use_query_residual else attn
    return x + _ref_mlp(raw, _ref_ln(x, raw["final_ln"]))


def _ref_self(raw, x, num_heads):
    xn = _ref_ln(x, raw["ln"])
    x = x + _ref_mha(raw, xn, xn, num_heads)
    return x + _ref_mlp(raw, _ref_ln(x, raw["final_ln"]))


def perceiver_reference(raw, inputs, query):
    outs = []
    for b in range(inputs.shape[0]):
        lat = raw["latents"]
        lat = _ref_cross(raw["enc"], inputs[b], lat, CROSS_HEADS, True)
        for _ in range(NUM_BLOCKS):
            for sl in raw["self"]:
                lat = _ref_self(sl, lat, SELF_HEADS)
        dec = _ref_cross(raw["dec"], lat, query[b], DEC_HEADS, False)
        outs.append(dec @ raw["proj"]["w"] + raw["proj"]["b"])
    return jnp.stack(outs)


# ----------------------------------- main -----------------------------------

if __name__ == "__main__":
    # keep the pure-JAX reference matmuls in full f32 (no bf16 demotion)
    jax.config.update("jax_default_matmul_precision", "highest")

    key = jax.random.PRNGKey(0)
    k_in, k_q, k_lat, k_enc, k_dec, k_proj, k_self = jax.random.split(key, 7)
    self_keys = jax.random.split(k_self, SELF_LAYERS_PER_BLOCK)

    inputs = jax.random.normal(k_in, (B, SEQ, INPUT_DIM), jnp.float32)
    query = jax.random.normal(k_q, (B, NUM_QUERIES, QUERY_DIM), jnp.float32)

    raw = {
        "latents": jax.random.normal(k_lat, (NUM_LATENTS, LATENT_DIM),
                                     jnp.float32),
        "enc": _init_cross_raw(k_enc, INPUT_DIM, LATENT_DIM),
        "self": [_init_self_raw(sk, LATENT_DIM) for sk in self_keys],
        "dec": _init_cross_raw(k_dec, LATENT_DIM, QUERY_DIM),
        "proj": _init_linear(k_proj, QUERY_DIM, PROJECTION_DIM),
    }

    packed, layout = pack_params(fold_and_flatten(raw))

    run = jax.jit(lambda p, x, q: perceiver_io_forward(layout, p, x, q))
    out = run(packed, inputs, query)
    jax.block_until_ready(out)

    assert out.shape == (B, NUM_QUERIES, PROJECTION_DIM), out.shape
    assert out.dtype == jnp.float32

    # correctness check vs. a pure-JAX reference of the original module
    # (tolerance covers the A&S erf-GELU + approx-reciprocal approximation)
    ref = perceiver_reference(raw, inputs, query)
    err = jnp.max(jnp.abs(out - ref))
    assert err < 2e-2, f"max abs error vs reference: {err}"

    print("KERNEL_OK")
</pallas_src>

<mosaic_0001>
module attributes {stable_mosaic.version = 11 : i64} {
  func.func @_fused_perceiver_kernel(%arg0: i32, %arg1: memref<1x32x16xf32, #tpu.memory_space<vmem>>, %arg2: memref<1x8x32xf32, #tpu.memory_space<vmem>>, %arg3: memref<752x128xf32, #tpu.memory_space<vmem>>, %arg4: memref<1x8x16xf32, #tpu.memory_space<vmem>>) attributes {dimension_semantics = [#tpu.dimension_semantics<parallel>], iteration_bounds = array<i64: 2>, scalar_prefetch = 0 : i64, scratch_operands = 0 : i64, tpu.core_type = #tpu.core_type<tc>, window_params = [{transform_indices = @transform_0, window_bounds = array<i64: 1, 32, 16>}, {transform_indices = @transform_1, window_bounds = array<i64: 1, 8, 32>}, {pipeline_mode = #tpu.pipeline_mode<synchronous>, transform_indices = @transform_2, window_bounds = array<i64: 752, 128>}, {transform_indices = @transform_3, window_bounds = array<i64: 1, 8, 16>}]} {
    %c0 = arith.constant 0 : index
    %c0_0 = arith.constant 0 : index
    %c0_1 = arith.constant 0 : index
    %0 = vector.load %arg1[%c0, %c0_0, %c0_1] : memref<1x32x16xf32, #tpu.memory_space<vmem>>, vector<1x32x16xf32>
    %1 = vector.shape_cast %0 : vector<1x32x16xf32> to vector<32x16xf32>
    %c0_2 = arith.constant 0 : index
    %c0_3 = arith.constant 0 : index
    %c0_4 = arith.constant 0 : index
    %2 = vector.load %arg2[%c0_2, %c0_3, %c0_4] : memref<1x8x32xf32, #tpu.memory_space<vmem>>, vector<1x8x32xf32>
    %3 = vector.shape_cast %2 : vector<1x8x32xf32> to vector<8x32xf32>
    %c0_5 = arith.constant 0 : index
    %c0_6 = arith.constant 0 : index
    %4 = vector.load %arg3[%c0_5, %c0_6] : memref<752x128xf32, #tpu.memory_space<vmem>>, vector<8x32xf32>
    %cst = arith.constant dense<0.000000e+00> : vector<8xf32>
    %5 = vector.multi_reduction <add>, %4, %cst [1] : vector<8x32xf32> to vector<8xf32>
    %6 = vector.shape_cast %5 : vector<8xf32> to vector<8x1xf32>
    %cst_7 = arith.constant 3.200000e+01 : f32
    %7 = vector.broadcast %cst_7 : f32 to vector<8x1xf32>
    %8 = arith.divf %6, %7 : vector<8x1xf32>
    %9 = vector.broadcast %8 : vector<8x1xf32> to vector<8x32xf32>
    %10 = arith.subf %4, %9 : vector<8x32xf32>
    %11 = arith.mulf %10, %10 : vector<8x32xf32>
    %cst_8 = arith.constant dense<0.000000e+00> : vector<8xf32>
    %12 = vector.multi_reduction <add>, %11, %cst_8 [1] : vector<8x32xf32> to vector<8xf32>
    %13 = vector.shape_cast %12 : vector<8xf32> to vector<8x1xf32>
    %cst_9 = arith.constant 3.200000e+01 : f32
    %14 = vector.broadcast %cst_9 : f32 to vector<8x1xf32>
    %15 = arith.divf %13, %14 : vector<8x1xf32>
    %16 = vector.broadcast %8 : vector<8x1xf32> to vector<8x32xf32>
    %17 = arith.subf %4, %16 : vector<8x32xf32>
    %cst_10 = arith.constant 9.99999974E-6 : f32
    %18 = vector.broadcast %cst_10 : f32 to vector<8x1xf32>
    %19 = arith.addf %15, %18 : vector<8x1xf32>
    %20 = math.rsqrt %19 : vector<8x1xf32>
    %21 = vector.broadcast %20 : vector<8x1xf32> to vector<8x32xf32>
    %22 = arith.mulf %17, %21 : vector<8x32xf32>
    %c8 = arith.constant 8 : index
    %c0_11 = arith.constant 0 : index
    %23 = vector.load %arg3[%c8, %c0_11] : memref<752x128xf32, #tpu.memory_space<vmem>>, vector<32x32xf32>
    %cst_12 = arith.constant dense<0.000000e+00> : vector<8x32xf32>
    %24 = tpu.matmul %22, %23, %cst_12 {dimension_numbers = #tpu.dot_dimension_numbers<[1], [0], [0], [1], [0, 0, 1, 1], [], []>, precision = #tpu.contract_precision<fp32>} : vector<8x32xf32>, vector<32x32xf32>, vector<8x32xf32> -> vector<8x32xf32>
    %c40 = arith.constant 40 : index
    %c0_13 = arith.constant 0 : index
    %25 = vector.load %arg3[%c40, %c0_13] : memref<752x128xf32, #tpu.memory_space<vmem>>, vector<1x32xf32>
    %26 = vector.broadcast %25 : vector<1x32xf32> to vector<8x32xf32>
    %27 = arith.addf %24, %26 : vector<8x32xf32>
    %cst_14 = arith.constant dense<0.000000e+00> : vector<32xf32>
    %28 = vector.multi_reduction <add>, %1, %cst_14 [1] : vector<32x16xf32> to vector<32xf32>
    %29 = vector.shape_cast %28 : vector<32xf32> to vector<32x1xf32>
    %cst_15 = arith.constant 1.600000e+01 : f32
    %30 = vector.broadcast %cst_15 : f32 to vector<32x1xf32>
    %31 = arith.divf %29, %30 : vector<32x1xf32>
    %32 = vector.broadcast %31 : vector<32x1xf32> to vector<32x16xf32>
    %33 = arith.subf %1, %32 : vector<32x16xf32>
    %34 = arith.mulf %33, %33 : vector<32x16xf32>
    %cst_16 = arith.constant dense<0.000000e+00> : vector<32xf32>
    %35 = vector.multi_reduction <add>, %34, %cst_16 [1] : vector<32x16xf32> to vector<32xf32>
    %36 = vector.shape_cast %35 : vector<32xf32> to vector<32x1xf32>
    %cst_17 = arith.constant 1.600000e+01 : f32
    %37 = vector.broadcast %cst_17 : f32 to vector<32x1xf32>
    %38 = arith.divf %36, %37 : vector<32x1xf32>
    %39 = vector.broadcast %31 : vector<32x1xf32> to vector<32x16xf32>
    %40 = arith.subf %1, %39 : vector<32x16xf32>
    %cst_18 = arith.constant 9.99999974E-6 : f32
    %41 = vector.broadcast %cst_18 : f32 to vector<32x1xf32>
    %42 = arith.addf %38, %41 : vector<32x1xf32>
    %43 = math.rsqrt %42 : vector<32x1xf32>
    %44 = vector.broadcast %43 : vector<32x1xf32> to vector<32x16xf32>
    %45 = arith.mulf %40, %44 : vector<32x16xf32>
    %c48 = arith.constant 48 : index
    %c0_19 = arith.constant 0 : index
    %46 = vector.load %arg3[%c48, %c0_19] : memref<752x128xf32, #tpu.memory_space<vmem>>, vector<16x64xf32>
    %cst_20 = arith.constant dense<0.000000e+00> : vector<32x64xf32>
    %47 = tpu.matmul %45, %46, %cst_20 {dimension_numbers = #tpu.dot_dimension_numbers<[1], [0], [0], [1], [0, 0, 1, 1], [], []>, precision = #tpu.contract_precision<fp32>} : vector<32x16xf32>, vector<16x64xf32>, vector<32x64xf32> -> vector<32x64xf32>
    %c64 = arith.constant 64 : index
    %c0_21 = arith.constant 0 : index
    %48 = vector.load %arg3[%c64, %c0_21] : memref<752x128xf32, #tpu.memory_space<vmem>>, vector<1x64xf32>
    %49 = vector.broadcast %48 : vector<1x64xf32> to vector<32x64xf32>
    %50 = arith.addf %47, %49 : vector<32x64xf32>
    %51 = vector.extract_strided_slice %50 {offsets = [0, 0], sizes = [32, 32], strides = [1, 1]} : vector<32x64xf32> to vector<32x32xf32>
    %52 = vector.extract_strided_slice %50 {offsets = [0, 32], sizes = [32, 32], strides = [1, 1]} : vector<32x64xf32> to vector<32x32xf32>
    %c72 = arith.constant 72 : index
    %c0_22 = arith.constant 0 : index
    %53 = vector.load %arg3[%c72, %c0_22] : memref<752x128xf32, #tpu.memory_space<vmem>>, vector<32x32xf32>
    %cst_23 = arith.constant dense<0.000000e+00> : vector<8x32xf32>
    %54 = tpu.matmul %27, %51, %cst_23 {dimension_numbers = #tpu.dot_dimension_numbers<[1], [1], [0], [0], [0, 0, 1, 0], [], []>, precision = #tpu.contract_precision<fp32>} : vector<8x32xf32>, vector<32x32xf32>, vector<8x32xf32> -> vector<8x32xf32>
    %cst_24 = arith.constant dense<0xFF800000> : vector<8xf32>
    %55 = vector.multi_reduction <maximumf>, %54, %cst_24 [1] : vector<8x32xf32> to vector<8xf32>
    %56 = vector.shape_cast %55 : vector<8xf32> to vector<8x1xf32>
    %57 = vector.broadcast %56 : vector<8x1xf32> to vector<8x32xf32>
    %58 = arith.subf %54, %57 : vector<8x32xf32>
    %59 = math.exp %58 : vector<8x32xf32>
    %cst_25 = arith.constant dense<0.000000e+00> : vector<8xf32>
    %60 = vector.multi_reduction <add>, %59, %cst_25 [1] : vector<8x32xf32> to vector<8xf32>
    %61 = vector.shape_cast %60 : vector<8xf32> to vector<8x1xf32>
    %62 = vector.broadcast %61 : vector<8x1xf32> to vector<8x32xf32>
    %63 = arith.divf %59, %62 : vector<8x32xf32>
    %cst_26 = arith.constant dense<0.000000e+00> : vector<8x32xf32>
    %64 = tpu.matmul %63, %52, %cst_26 {dimension_numbers = #tpu.dot_dimension_numbers<[1], [0], [0], [1], [0, 0, 1, 1], [], []>, precision = #tpu.contract_precision<fp32>} : vector<8x32xf32>, vector<32x32xf32>, vector<8x32xf32> -> vector<8x32xf32>
    %cst_27 = arith.constant dense<0.000000e+00> : vector<8x32xf32>
    %65 = tpu.matmul %64, %53, %cst_27 {dimension_numbers = #tpu.dot_dimension_numbers<[1], [0], [0], [1], [0, 0, 1, 1], [], []>, precision = #tpu.contract_precision<fp32>} : vector<8x32xf32>, vector<32x32xf32>, vector<8x32xf32> -> vector<8x32xf32>
    %c104 = arith.constant 104 : index
    %c0_28 = arith.constant 0 : index
    %66 = vector.load %arg3[%c104, %c0_28] : memref<752x128xf32, #tpu.memory_space<vmem>>, vector<1x32xf32>
    %67 = vector.broadcast %66 : vector<1x32xf32> to vector<8x32xf32>
    %68 = arith.addf %65, %67 : vector<8x32xf32>
    %69 = arith.addf %4, %68 : vector<8x32xf32>
    %cst_29 = arith.constant dense<0.000000e+00> : vector<8xf32>
    %70 = vector.multi_reduction <add>, %69, %cst_29 [1] : vector<8x32xf32> to vector<8xf32>
    %71 = vector.shape_cast %70 : vector<8xf32> to vector<8x1xf32>
    %cst_30 = arith.constant 3.200000e+01 : f32
    %72 = vector.broadcast %cst_30 : f32 to vector<8x1xf32>
    %73 = arith.divf %71, %72 : vector<8x1xf32>
    %74 = vector.broadcast %73 : vector<8x1xf32> to vector<8x32xf32>
    %75 = arith.subf %69, %74 : vector<8x32xf32>
    %76 = arith.mulf %75, %75 : vector<8x32xf32>
    %cst_31 = arith.constant dense<0.000000e+00> : vector<8xf32>
    %77 = vector.multi_reduction <add>, %76, %cst_31 [1] : vector<8x32xf32> to vector<8xf32>
    %78 = vector.shape_cast %77 : vector<8xf32> to vector<8x1xf32>
    %cst_32 = arith.constant 3.200000e+01 : f32
    %79 = vector.broadcast %cst_32 : f32 to vector<8x1xf32>
    %80 = arith.divf %78, %79 : vector<8x1xf32>
    %81 = vector.broadcast %73 : vector<8x1xf32> to vector<8x32xf32>
    %82 = arith.subf %69, %81 : vector<8x32xf32>
    %cst_33 = arith.constant 9.99999974E-6 : f32
    %83 = vector.broadcast %cst_33 : f32 to vector<8x1xf32>
    %84 = arith.addf %80, %83 : vector<8x1xf32>
    %85 = math.rsqrt %84 : vector<8x1xf32>
    %86 = vector.broadcast %85 : vector<8x1xf32> to vector<8x32xf32>
    %87 = arith.mulf %82, %86 : vector<8x32xf32>
    %c112 = arith.constant 112 : index
    %c0_34 = arith.constant 0 : index
    %88 = vector.load %arg3[%c112, %c0_34] : memref<752x128xf32, #tpu.memory_space<vmem>>, vector<32x32xf32>
    %cst_35 = arith.constant dense<0.000000e+00> : vector<8x32xf32>
    %89 = tpu.matmul %87, %88, %cst_35 {dimension_numbers = #tpu.dot_dimension_numbers<[1], [0], [0], [1], [0, 0, 1, 1], [], []>, precision = #tpu.contract_precision<fp32>} : vector<8x32xf32>, vector<32x32xf32>, vector<8x32xf32> -> vector<8x32xf32>
    %c144 = arith.constant 144 : index
    %c0_36 = arith.constant 0 : index
    %90 = vector.load %arg3[%c144, %c0_36] : memref<752x128xf32, #tpu.memory_space<vmem>>, vector<1x32xf32>
    %91 = vector.broadcast %90 : vector<1x32xf32> to vector<8x32xf32>
    %92 = arith.addf %89, %91 : vector<8x32xf32>
    %cst_37 = arith.constant 5.000000e-01 : f32
    %93 = vector.broadcast %cst_37 : f32 to vector<8x32xf32>
    %94 = arith.mulf %93, %92 : vector<8x32xf32>
    %cst_38 = arith.constant 0.707106769 : f32
    %95 = vector.broadcast %cst_38 : f32 to vector<8x32xf32>
    %96 = arith.mulf %92, %95 : vector<8x32xf32>
    %97 = math.absf %96 : vector<8x32xf32>
    %cst_39 = arith.constant 0.327591091 : f32
    %98 = vector.broadcast %cst_39 : f32 to vector<8x32xf32>
    %99 = arith.mulf %98, %97 : vector<8x32xf32>
    %cst_40 = arith.constant 1.000000e+00 : f32
    %100 = vector.broadcast %cst_40 : f32 to vector<8x32xf32>
    %101 = arith.addf %100, %99 : vector<8x32xf32>
    %102 = tpu.reciprocal %101 {approx = true} : vector<8x32xf32> -> vector<8x32xf32>
    %cst_41 = arith.constant 1.06140542 : f32
    %103 = vector.broadcast %cst_41 : f32 to vector<8x32xf32>
    %104 = arith.mulf %103, %102 : vector<8x32xf32>
    %cst_42 = arith.constant -1.45315206 : f32
    %105 = vector.broadcast %cst_42 : f32 to vector<8x32xf32>
    %106 = arith.addf %104, %105 : vector<8x32xf32>
    %107 = arith.mulf %106, %102 : vector<8x32xf32>
    %cst_43 = arith.constant 1.42141378 : f32
    %108 = vector.broadcast %cst_43 : f32 to vector<8x32xf32>
    %109 = arith.addf %107, %108 : vector<8x32xf32>
    %110 = arith.mulf %109, %102 : vector<8x32xf32>
    %cst_44 = arith.constant -0.284496725 : f32
    %111 = vector.broadcast %cst_44 : f32 to vector<8x32xf32>
    %112 = arith.addf %110, %111 : vector<8x32xf32>
    %113 = arith.mulf %112, %102 : vector<8x32xf32>
    %cst_45 = arith.constant 0.254829586 : f32
    %114 = vector.broadcast %cst_45 : f32 to vector<8x32xf32>
    %115 = arith.addf %113, %114 : vector<8x32xf32>
    %116 = arith.mulf %115, %102 : vector<8x32xf32>
    %cst_46 = arith.constant 0.000000e+00 : f32
    %117 = vector.broadcast %cst_46 : f32 to vector<8x32xf32>
    %118 = arith.subf %117, %97 : vector<8x32xf32>
    %119 = arith.mulf %118, %97 : vector<8x32xf32>
    %120 = math.exp %119 : vector<8x32xf32>
    %121 = arith.mulf %116, %120 : vector<8x32xf32>
    %cst_47 = arith.constant 1.000000e+00 : f32
    %122 = vector.broadcast %cst_47 : f32 to vector<8x32xf32>
    %123 = arith.subf %122, %121 : vector<8x32xf32>
    %cst_48 = arith.constant 0.000000e+00 : f32
    %124 = vector.broadcast %cst_48 : f32 to vector<8x32xf32>
    %125 = arith.cmpf oge, %96, %124 : vector<8x32xf32>
    %cst_49 = arith.constant 0.000000e+00 : f32
    %126 = vector.broadcast %cst_49 : f32 to vector<8x32xf32>
    %127 = arith.subf %126, %123 : vector<8x32xf32>
    %128 = arith.select %125, %123, %127 : vector<8x32xi1>, vector<8x32xf32>
    %cst_50 = arith.constant 1.000000e+00 : f32
    %129 = vector.broadcast %cst_50 : f32 to vector<8x32xf32>
    %130 = arith.addf %129, %128 : vector<8x32xf32>
    %131 = arith.mulf %94, %130 : vector<8x32xf32>
    %c152 = arith.constant 152 : index
    %c0_51 = arith.constant 0 : index
    %132 = vector.load %arg3[%c152, %c0_51] : memref<752x128xf32, #tpu.memory_space<vmem>>, vector<32x32xf32>
    %cst_52 = arith.constant dense<0.000000e+00> : vector<8x32xf32>
    %133 = tpu.matmul %131, %132, %cst_52 {dimension_numbers = #tpu.dot_dimension_numbers<[1], [0], [0], [1], [0, 0, 1, 1], [], []>, precision = #tpu.contract_precision<fp32>} : vector<8x32xf32>, vector<32x32xf32>, vector<8x32xf32> -> vector<8x32xf32>
    %c184 = arith.constant 184 : index
    %c0_53 = arith.constant 0 : index
    %134 = vector.load %arg3[%c184, %c0_53] : memref<752x128xf32, #tpu.memory_space<vmem>>, vector<1x32xf32>
    %135 = vector.broadcast %134 : vector<1x32xf32> to vector<8x32xf32>
    %136 = arith.addf %133, %135 : vector<8x32xf32>
    %137 = arith.addf %69, %136 : vector<8x32xf32>
    %cst_54 = arith.constant dense<0.000000e+00> : vector<8xf32>
    %138 = vector.multi_reduction <add>, %137, %cst_54 [1] : vector<8x32xf32> to vector<8xf32>
    %139 = vector.shape_cast %138 : vector<8xf32> to vector<8x1xf32>
    %cst_55 = arith.constant 3.200000e+01 : f32
    %140 = vector.broadcast %cst_55 : f32 to vector<8x1xf32>
    %141 = arith.divf %139, %140 : vector<8x1xf32>
    %142 = vector.broadcast %141 : vector<8x1xf32> to vector<8x32xf32>
    %143 = arith.subf %137, %142 : vector<8x32xf32>
    %144 = arith.mulf %143, %143 : vector<8x32xf32>
    %cst_56 = arith.constant dense<0.000000e+00> : vector<8xf32>
    %145 = vector.multi_reduction <add>, %144, %cst_56 [1] : vector<8x32xf32> to vector<8xf32>
    %146 = vector.shape_cast %145 : vector<8xf32> to vector<8x1xf32>
    %cst_57 = arith.constant 3.200000e+01 : f32
    %147 = vector.broadcast %cst_57 : f32 to vector<8x1xf32>
    %148 = arith.divf %146, %147 : vector<8x1xf32>
    %149 = vector.broadcast %141 : vector<8x1xf32> to vector<8x32xf32>
    %150 = arith.subf %137, %149 : vector<8x32xf32>
    %cst_58 = arith.constant 9.99999974E-6 : f32
    %151 = vector.broadcast %cst_58 : f32 to vector<8x1xf32>
    %152 = arith.addf %148, %151 : vector<8x1xf32>
    %153 = math.rsqrt %152 : vector<8x1xf32>
    %154 = vector.broadcast %153 : vector<8x1xf32> to vector<8x32xf32>
    %155 = arith.mulf %150, %154 : vector<8x32xf32>
    %c192 = arith.constant 192 : index
    %c0_59 = arith.constant 0 : index
    %156 = vector.load %arg3[%c192, %c0_59] : memref<752x128xf32, #tpu.memory_space<vmem>>, vector<32x96xf32>
    %cst_60 = arith.constant dense<0.000000e+00> : vector<8x96xf32>
    %157 = tpu.matmul %155, %156, %cst_60 {dimension_numbers = #tpu.dot_dimension_numbers<[1], [0], [0], [1], [0, 0, 1, 1], [], []>, precision = #tpu.contract_precision<fp32>} : vector<8x32xf32>, vector<32x96xf32>, vector<8x96xf32> -> vector<8x96xf32>
    %c224 = arith.constant 224 : index
    %c0_61 = arith.constant 0 : index
    %158 = vector.load %arg3[%c224, %c0_61] : memref<752x128xf32, #tpu.memory_space<vmem>>, vector<1x96xf32>
    %159 = vector.broadcast %158 : vector<1x96xf32> to vector<8x96xf32>
    %160 = arith.addf %157, %159 : vector<8x96xf32>
    %161 = vector.extract_strided_slice %160 {offsets = [0, 0], sizes = [8, 32], strides = [1, 1]} : vector<8x96xf32> to vector<8x32xf32>
    %162 = vector.extract_strided_slice %160 {offsets = [0, 32], sizes = [8, 32], strides = [1, 1]} : vector<8x96xf32> to vector<8x32xf32>
    %163 = vector.extract_strided_slice %160 {offsets = [0, 64], sizes = [8, 32], strides = [1, 1]} : vector<8x96xf32> to vector<8x32xf32>
    %c232 = arith.constant 232 : index
    %c0_62 = arith.constant 0 : index
    %164 = vector.load %arg3[%c232, %c0_62] : memref<752x128xf32, #tpu.memory_space<vmem>>, vector<32x32xf32>
    %165 = vector.extract_strided_slice %161 {offsets = [0, 0], sizes = [8, 8], strides = [1, 1]} : vector<8x32xf32> to vector<8x8xf32>
    %166 = vector.extract_strided_slice %162 {offsets = [0, 0], sizes = [8, 8], strides = [1, 1]} : vector<8x32xf32> to vector<8x8xf32>
    %167 = vector.extract_strided_slice %163 {offsets = [0, 0], sizes = [8, 8], strides = [1, 1]} : vector<8x32xf32> to vector<8x8xf32>
    %cst_63 = arith.constant dense<0.000000e+00> : vector<8x8xf32>
    %168 = tpu.matmul %165, %166, %cst_63 {dimension_numbers = #tpu.dot_dimension_numbers<[1], [1], [0], [0], [0, 0, 1, 0], [], []>, precision = #tpu.contract_precision<fp32>} : vector<8x8xf32>, vector<8x8xf32>, vector<8x8xf32> -> vector<8x8xf32>
    %cst_64 = arith.constant dense<0xFF800000> : vector<8xf32>
    %169 = vector.multi_reduction <maximumf>, %168, %cst_64 [1] : vector<8x8xf32> to vector<8xf32>
    %170 = vector.shape_cast %169 : vector<8xf32> to vector<8x1xf32>
    %171 = vector.broadcast %170 : vector<8x1xf32> to vector<8x8xf32>
    %172 = arith.subf %168, %171 : vector<8x8xf32>
    %173 = math.exp %172 : vector<8x8xf32>
    %cst_65 = arith.constant dense<0.000000e+00> : vector<8xf32>
    %174 = vector.multi_reduction <add>, %173, %cst_65 [1] : vector<8x8xf32> to vector<8xf32>
    %175 = vector.shape_cast %174 : vector<8xf32> to vector<8x1xf32>
    %176 = vector.broadcast %175 : vector<8x1xf32> to vector<8x8xf32>
    %177 = arith.divf %173, %176 : vector<8x8xf32>
    %cst_66 = arith.constant dense<0.000000e+00> : vector<8x8xf32>
    %178 = tpu.matmul %177, %167, %cst_66 {dimension_numbers = #tpu.dot_dimension_numbers<[1], [0], [0], [1], [0, 0, 1, 1], [], []>, precision = #tpu.contract_precision<fp32>} : vector<8x8xf32>, vector<8x8xf32>, vector<8x8xf32> -> vector<8x8xf32>
    %179 = vector.extract_strided_slice %161 {offsets = [0, 8], sizes = [8, 8], strides = [1, 1]} : vector<8x32xf32> to vector<8x8xf32>
    %180 = vector.extract_strided_slice %162 {offsets = [0, 8], sizes = [8, 8], strides = [1, 1]} : vector<8x32xf32> to vector<8x8xf32>
    %181 = vector.extract_strided_slice %163 {offsets = [0, 8], sizes = [8, 8], strides = [1, 1]} : vector<8x32xf32> to vector<8x8xf32>
    %cst_67 = arith.constant dense<0.000000e+00> : vector<8x8xf32>
    %182 = tpu.matmul %179, %180, %cst_67 {dimension_numbers = #tpu.dot_dimension_numbers<[1], [1], [0], [0], [0, 0, 1, 0], [], []>, precision = #tpu.contract_precision<fp32>} : vector<8x8xf32>, vector<8x8xf32>, vector<8x8xf32> -> vector<8x8xf32>
    %cst_68 = arith.constant dense<0xFF800000> : vector<8xf32>
    %183 = vector.multi_reduction <maximumf>, %182, %cst_68 [1] : vector<8x8xf32> to vector<8xf32>
    %184 = vector.shape_cast %183 : vector<8xf32> to vector<8x1xf32>
    %185 = vector.broadcast %184 : vector<8x1xf32> to vector<8x8xf32>
    %186 = arith.subf %182, %185 : vector<8x8xf32>
    %187 = math.exp %186 : vector<8x8xf32>
    %cst_69 = arith.constant dense<0.000000e+00> : vector<8xf32>
    %188 = vector.multi_reduction <add>, %187, %cst_69 [1] : vector<8x8xf32> to vector<8xf32>
    %189 = vector.shape_cast %188 : vector<8xf32> to vector<8x1xf32>
    %190 = vector.broadcast %189 : vector<8x1xf32> to vector<8x8xf32>
    %191 = arith.divf %187, %190 : vector<8x8xf32>
    %cst_70 = arith.constant dense<0.000000e+00> : vector<8x8xf32>
    %192 = tpu.matmul %191, %181, %cst_70 {dimension_numbers = #tpu.dot_dimension_numbers<[1], [0], [0], [1], [0, 0, 1, 1], [], []>, precision = #tpu.contract_precision<fp32>} : vector<8x8xf32>, vector<8x8xf32>, vector<8x8xf32> -> vector<8x8xf32>
    %193 = vector.extract_strided_slice %161 {offsets = [0, 16], sizes = [8, 8], strides = [1, 1]} : vector<8x32xf32> to vector<8x8xf32>
    %194 = vector.extract_strided_slice %162 {offsets = [0, 16], sizes = [8, 8], strides = [1, 1]} : vector<8x32xf32> to vector<8x8xf32>
    %195 = vector.extract_strided_slice %163 {offsets = [0, 16], sizes = [8, 8], strides = [1, 1]} : vector<8x32xf32> to vector<8x8xf32>
    %cst_71 = arith.constant dense<0.000000e+00> : vector<8x8xf32>
    %196 = tpu.matmul %193, %194, %cst_71 {dimension_numbers = #tpu.dot_dimension_numbers<[1], [1], [0], [0], [0, 0, 1, 0], [], []>, precision = #tpu.contract_precision<fp32>} : vector<8x8xf32>, vector<8x8xf32>, vector<8x8xf32> -> vector<8x8xf32>
    %cst_72 = arith.constant dense<0xFF800000> : vector<8xf32>
    %197 = vector.multi_reduction <maximumf>, %196, %cst_72 [1] : vector<8x8xf32> to vector<8xf32>
    %198 = vector.shape_cast %197 : vector<8xf32> to vector<8x1xf32>
    %199 = vector.broadcast %198 : vector<8x1xf32> to vector<8x8xf32>
    %200 = arith.subf %196, %199 : vector<8x8xf32>
    %201 = math.exp %200 : vector<8x8xf32>
    %cst_73 = arith.constant dense<0.000000e+00> : vector<8xf32>
    %202 = vector.multi_reduction <add>, %201, %cst_73 [1] : vector<8x8xf32> to vector<8xf32>
    %203 = vector.shape_cast %202 : vector<8xf32> to vector<8x1xf32>
    %204 = vector.broadcast %203 : vector<8x1xf32> to vector<8x8xf32>
    %205 = arith.divf %201, %204 : vector<8x8xf32>
    %cst_74 = arith.constant dense<0.000000e+00> : vector<8x8xf32>
    %206 = tpu.matmul %205, %195, %cst_74 {dimension_numbers = #tpu.dot_dimension_numbers<[1], [0], [0], [1], [0, 0, 1, 1], [], []>, precision = #tpu.contract_precision<fp32>} : vector<8x8xf32>, vector<8x8xf32>, vector<8x8xf32> -> vector<8x8xf32>
    %207 = vector.extract_strided_slice %161 {offsets = [0, 24], sizes = [8, 8], strides = [1, 1]} : vector<8x32xf32> to vector<8x8xf32>
    %208 = vector.extract_strided_slice %162 {offsets = [0, 24], sizes = [8, 8], strides = [1, 1]} : vector<8x32xf32> to vector<8x8xf32>
    %209 = vector.extract_strided_slice %163 {offsets = [0, 24], sizes = [8, 8], strides = [1, 1]} : vector<8x32xf32> to vector<8x8xf32>
    %cst_75 = arith.constant dense<0.000000e+00> : vector<8x8xf32>
    %210 = tpu.matmul %207, %208, %cst_75 {dimension_numbers = #tpu.dot_dimension_numbers<[1], [1], [0], [0], [0, 0, 1, 0], [], []>, precision = #tpu.contract_precision<fp32>} : vector<8x8xf32>, vector<8x8xf32>, vector<8x8xf32> -> vector<8x8xf32>
    %cst_76 = arith.constant dense<0xFF800000> : vector<8xf32>
    %211 = vector.multi_reduction <maximumf>, %210, %cst_76 [1] : vector<8x8xf32> to vector<8xf32>
    %212 = vector.shape_cast %211 : vector<8xf32> to vector<8x1xf32>
    %213 = vector.broadcast %212 : vector<8x1xf32> to vector<8x8xf32>
    %214 = arith.subf %210, %213 : vector<8x8xf32>
    %215 = math.exp %214 : vector<8x8xf32>
    %cst_77 = arith.constant dense<0.000000e+00> : vector<8xf32>
    %216 = vector.multi_reduction <add>, %215, %cst_77 [1] : vector<8x8xf32> to vector<8xf32>
    %217 = vector.shape_cast %216 : vector<8xf32> to vector<8x1xf32>
    %218 = vector.broadcast %217 : vector<8x1xf32> to vector<8x8xf32>
    %219 = arith.divf %215, %218 : vector<8x8xf32>
    %cst_78 = arith.constant dense<0.000000e+00> : vector<8x8xf32>
    %220 = tpu.matmul %219, %209, %cst_78 {dimension_numbers = #tpu.dot_dimension_numbers<[1], [0], [0], [1], [0, 0, 1, 1], [], []>, precision = #tpu.contract_precision<fp32>} : vector<8x8xf32>, vector<8x8xf32>, vector<8x8xf32> -> vector<8x8xf32>
    %221 = tpu.concatenate %178, %192, %206, %220 in 1 : vector<8x8xf32>, vector<8x8xf32>, vector<8x8xf32>, vector<8x8xf32> -> vector<8x32xf32>
    %cst_79 = arith.constant dense<0.000000e+00> : vector<8x32xf32>
    %222 = tpu.matmul %221, %164, %cst_79 {dimension_numbers = #tpu.dot_dimension_numbers<[1], [0], [0], [1], [0, 0, 1, 1], [], []>, precision = #tpu.contract_precision<fp32>} : vector<8x32xf32>, vector<32x32xf32>, vector<8x32xf32> -> vector<8x32xf32>
    %c264 = arith.constant 264 : index
    %c0_80 = arith.constant 0 : index
    %223 = vector.load %arg3[%c264, %c0_80] : memref<752x128xf32, #tpu.memory_space<vmem>>, vector<1x32xf32>
    %224 = vector.broadcast %223 : vector<1x32xf32> to vector<8x32xf32>
    %225 = arith.addf %222, %224 : vector<8x32xf32>
    %226 = arith.addf %137, %225 : vector<8x32xf32>
    %cst_81 = arith.constant dense<0.000000e+00> : vector<8xf32>
    %227 = vector.multi_reduction <add>, %226, %cst_81 [1] : vector<8x32xf32> to vector<8xf32>
    %228 = vector.shape_cast %227 : vector<8xf32> to vector<8x1xf32>
    %cst_82 = arith.constant 3.200000e+01 : f32
    %229 = vector.broadcast %cst_82 : f32 to vector<8x1xf32>
    %230 = arith.divf %228, %229 : vector<8x1xf32>
    %231 = vector.broadcast %230 : vector<8x1xf32> to vector<8x32xf32>
    %232 = arith.subf %226, %231 : vector<8x32xf32>
    %233 = arith.mulf %232, %232 : vector<8x32xf32>
    %cst_83 = arith.constant dense<0.000000e+00> : vector<8xf32>
    %234 = vector.multi_reduction <add>, %233, %cst_83 [1] : vector<8x32xf32> to vector<8xf32>
    %235 = vector.shape_cast %234 : vector<8xf32> to vector<8x1xf32>
    %cst_84 = arith.constant 3.200000e+01 : f32
    %236 = vector.broadcast %cst_84 : f32 to vector<8x1xf32>
    %237 = arith.divf %235, %236 : vector<8x1xf32>
    %238 = vector.broadcast %230 : vector<8x1xf32> to vector<8x32xf32>
    %239 = arith.subf %226, %238 : vector<8x32xf32>
    %cst_85 = arith.constant 9.99999974E-6 : f32
    %240 = vector.broadcast %cst_85 : f32 to vector<8x1xf32>
    %241 = arith.addf %237, %240 : vector<8x1xf32>
    %242 = math.rsqrt %241 : vector<8x1xf32>
    %243 = vector.broadcast %242 : vector<8x1xf32> to vector<8x32xf32>
    %244 = arith.mulf %239, %243 : vector<8x32xf32>
    %c272 = arith.constant 272 : index
    %c0_86 = arith.constant 0 : index
    %245 = vector.load %arg3[%c272, %c0_86] : memref<752x128xf32, #tpu.memory_space<vmem>>, vector<32x32xf32>
    %cst_87 = arith.constant dense<0.000000e+00> : vector<8x32xf32>
    %246 = tpu.matmul %244, %245, %cst_87 {dimension_numbers = #tpu.dot_dimension_numbers<[1], [0], [0], [1], [0, 0, 1, 1], [], []>, precision = #tpu.contract_precision<fp32>} : vector<8x32xf32>, vector<32x32xf32>, vector<8x32xf32> -> vector<8x32xf32>
    %c304 = arith.constant 304 : index
    %c0_88 = arith.constant 0 : index
    %247 = vector.load %arg3[%c304, %c0_88] : memref<752x128xf32, #tpu.memory_space<vmem>>, vector<1x32xf32>
    %248 = vector.broadcast %247 : vector<1x32xf32> to vector<8x32xf32>
    %249 = arith.addf %246, %248 : vector<8x32xf32>
    %cst_89 = arith.constant 5.000000e-01 : f32
    %250 = vector.broadcast %cst_89 : f32 to vector<8x32xf32>
    %251 = arith.mulf %250, %249 : vector<8x32xf32>
    %cst_90 = arith.constant 0.707106769 : f32
    %252 = vector.broadcast %cst_90 : f32 to vector<8x32xf32>
    %253 = arith.mulf %249, %252 : vector<8x32xf32>
    %254 = math.absf %253 : vector<8x32xf32>
    %cst_91 = arith.constant 0.327591091 : f32
    %255 = vector.broadcast %cst_91 : f32 to vector<8x32xf32>
    %256 = arith.mulf %255, %254 : vector<8x32xf32>
    %cst_92 = arith.constant 1.000000e+00 : f32
    %257 = vector.broadcast %cst_92 : f32 to vector<8x32xf32>
    %258 = arith.addf %257, %256 : vector<8x32xf32>
    %259 = tpu.reciprocal %258 {approx = true} : vector<8x32xf32> -> vector<8x32xf32>
    %cst_93 = arith.constant 1.06140542 : f32
    %260 = vector.broadcast %cst_93 : f32 to vector<8x32xf32>
    %261 = arith.mulf %260, %259 : vector<8x32xf32>
    %cst_94 = arith.constant -1.45315206 : f32
    %262 = vector.broadcast %cst_94 : f32 to vector<8x32xf32>
    %263 = arith.addf %261, %262 : vector<8x32xf32>
    %264 = arith.mulf %263, %259 : vector<8x32xf32>
    %cst_95 = arith.constant 1.42141378 : f32
    %265 = vector.broadcast %cst_95 : f32 to vector<8x32xf32>
    %266 = arith.addf %264, %265 : vector<8x32xf32>
    %267 = arith.mulf %266, %259 : vector<8x32xf32>
    %cst_96 = arith.constant -0.284496725 : f32
    %268 = vector.broadcast %cst_96 : f32 to vector<8x32xf32>
    %269 = arith.addf %267, %268 : vector<8x32xf32>
    %270 = arith.mulf %269, %259 : vector<8x32xf32>
    %cst_97 = arith.constant 0.254829586 : f32
    %271 = vector.broadcast %cst_97 : f32 to vector<8x32xf32>
    %272 = arith.addf %270, %271 : vector<8x32xf32>
    %273 = arith.mulf %272, %259 : vector<8x32xf32>
    %cst_98 = arith.constant 0.000000e+00 : f32
    %274 = vector.broadcast %cst_98 : f32 to vector<8x32xf32>
    %275 = arith.subf %274, %254 : vector<8x32xf32>
    %276 = arith.mulf %275, %254 : vector<8x32xf32>
    %277 = math.exp %276 : vector<8x32xf32>
    %278 = arith.mulf %273, %277 : vector<8x32xf32>
    %cst_99 = arith.constant 1.000000e+00 : f32
    %279 = vector.broadcast %cst_99 : f32 to vector<8x32xf32>
    %280 = arith.subf %279, %278 : vector<8x32xf32>
    %cst_100 = arith.constant 0.000000e+00 : f32
    %281 = vector.broadcast %cst_100 : f32 to vector<8x32xf32>
    %282 = arith.cmpf oge, %253, %281 : vector<8x32xf32>
    %cst_101 = arith.constant 0.000000e+00 : f32
    %283 = vector.broadcast %cst_101 : f32 to vector<8x32xf32>
    %284 = arith.subf %283, %280 : vector<8x32xf32>
    %285 = arith.select %282, %280, %284 : vector<8x32xi1>, vector<8x32xf32>
    %cst_102 = arith.constant 1.000000e+00 : f32
    %286 = vector.broadcast %cst_102 : f32 to vector<8x32xf32>
    %287 = arith.addf %286, %285 : vector<8x32xf32>
    %288 = arith.mulf %251, %287 : vector<8x32xf32>
    %c312 = arith.constant 312 : index
    %c0_103 = arith.constant 0 : index
    %289 = vector.load %arg3[%c312, %c0_103] : memref<752x128xf32, #tpu.memory_space<vmem>>, vector<32x32xf32>
    %cst_104 = arith.constant dense<0.000000e+00> : vector<8x32xf32>
    %290 = tpu.matmul %288, %289, %cst_104 {dimension_numbers = #tpu.dot_dimension_numbers<[1], [0], [0], [1], [0, 0, 1, 1], [], []>, precision = #tpu.contract_precision<fp32>} : vector<8x32xf32>, vector<32x32xf32>, vector<8x32xf32> -> vector<8x32xf32>
    %c344 = arith.constant 344 : index
    %c0_105 = arith.constant 0 : index
    %291 = vector.load %arg3[%c344, %c0_105] : memref<752x128xf32, #tpu.memory_space<vmem>>, vector<1x32xf32>
    %292 = vector.broadcast %291 : vector<1x32xf32> to vector<8x32xf32>
    %293 = arith.addf %290, %292 : vector<8x32xf32>
    %294 = arith.addf %226, %293 : vector<8x32xf32>
    %cst_106 = arith.constant dense<0.000000e+00> : vector<8xf32>
    %295 = vector.multi_reduction <add>, %294, %cst_106 [1] : vector<8x32xf32> to vector<8xf32>
    %296 = vector.shape_cast %295 : vector<8xf32> to vector<8x1xf32>
    %cst_107 = arith.constant 3.200000e+01 : f32
    %297 = vector.broadcast %cst_107 : f32 to vector<8x1xf32>
    %298 = arith.divf %296, %297 : vector<8x1xf32>
    %299 = vector.broadcast %298 : vector<8x1xf32> to vector<8x32xf32>
    %300 = arith.subf %294, %299 : vector<8x32xf32>
    %301 = arith.mulf %300, %300 : vector<8x32xf32>
    %cst_108 = arith.constant dense<0.000000e+00> : vector<8xf32>
    %302 = vector.multi_reduction <add>, %301, %cst_108 [1] : vector<8x32xf32> to vector<8xf32>
    %303 = vector.shape_cast %302 : vector<8xf32> to vector<8x1xf32>
    %cst_109 = arith.constant 3.200000e+01 : f32
    %304 = vector.broadcast %cst_109 : f32 to vector<8x1xf32>
    %305 = arith.divf %303, %304 : vector<8x1xf32>
    %306 = vector.broadcast %298 : vector<8x1xf32> to vector<8x32xf32>
    %307 = arith.subf %294, %306 : vector<8x32xf32>
    %cst_110 = arith.constant 9.99999974E-6 : f32
    %308 = vector.broadcast %cst_110 : f32 to vector<8x1xf32>
    %309 = arith.addf %305, %308 : vector<8x1xf32>
    %310 = math.rsqrt %309 : vector<8x1xf32>
    %311 = vector.broadcast %310 : vector<8x1xf32> to vector<8x32xf32>
    %312 = arith.mulf %307, %311 : vector<8x32xf32>
    %c352 = arith.constant 352 : index
    %c0_111 = arith.constant 0 : index
    %313 = vector.load %arg3[%c352, %c0_111] : memref<752x128xf32, #tpu.memory_space<vmem>>, vector<32x96xf32>
    %cst_112 = arith.constant dense<0.000000e+00> : vector<8x96xf32>
    %314 = tpu.matmul %312, %313, %cst_112 {dimension_numbers = #tpu.dot_dimension_numbers<[1], [0], [0], [1], [0, 0, 1, 1], [], []>, precision = #tpu.contract_precision<fp32>} : vector<8x32xf32>, vector<32x96xf32>, vector<8x96xf32> -> vector<8x96xf32>
    %c384 = arith.constant 384 : index
    %c0_113 = arith.constant 0 : index
    %315 = vector.load %arg3[%c384, %c0_113] : memref<752x128xf32, #tpu.memory_space<vmem>>, vector<1x96xf32>
    %316 = vector.broadcast %315 : vector<1x96xf32> to vector<8x96xf32>
    %317 = arith.addf %314, %316 : vector<8x96xf32>
    %318 = vector.extract_strided_slice %317 {offsets = [0, 0], sizes = [8, 32], strides = [1, 1]} : vector<8x96xf32> to vector<8x32xf32>
    %319 = vector.extract_strided_slice %317 {offsets = [0, 32], sizes = [8, 32], strides = [1, 1]} : vector<8x96xf32> to vector<8x32xf32>
    %320 = vector.extract_strided_slice %317 {offsets = [0, 64], sizes = [8, 32], strides = [1, 1]} : vector<8x96xf32> to vector<8x32xf32>
    %c392 = arith.constant 392 : index
    %c0_114 = arith.constant 0 : index
    %321 = vector.load %arg3[%c392, %c0_114] : memref<752x128xf32, #tpu.memory_space<vmem>>, vector<32x32xf32>
    %322 = vector.extract_strided_slice %318 {offsets = [0, 0], sizes = [8, 8], strides = [1, 1]} : vector<8x32xf32> to vector<8x8xf32>
    %323 = vector.extract_strided_slice %319 {offsets = [0, 0], sizes = [8, 8], strides = [1, 1]} : vector<8x32xf32> to vector<8x8xf32>
    %324 = vector.extract_strided_slice %320 {offsets = [0, 0], sizes = [8, 8], strides = [1, 1]} : vector<8x32xf32> to vector<8x8xf32>
    %cst_115 = arith.constant dense<0.000000e+00> : vector<8x8xf32>
    %325 = tpu.matmul %322, %323, %cst_115 {dimension_numbers = #tpu.dot_dimension_numbers<[1], [1], [0], [0], [0, 0, 1, 0], [], []>, precision = #tpu.contract_precision<fp32>} : vector<8x8xf32>, vector<8x8xf32>, vector<8x8xf32> -> vector<8x8xf32>
    %cst_116 = arith.constant dense<0xFF800000> : vector<8xf32>
    %326 = vector.multi_reduction <maximumf>, %325, %cst_116 [1] : vector<8x8xf32> to vector<8xf32>
    %327 = vector.shape_cast %326 : vector<8xf32> to vector<8x1xf32>
    %328 = vector.broadcast %327 : vector<8x1xf32> to vector<8x8xf32>
    %329 = arith.subf %325, %328 : vector<8x8xf32>
    %330 = math.exp %329 : vector<8x8xf32>
    %cst_117 = arith.constant dense<0.000000e+00> : vector<8xf32>
    %331 = vector.multi_reduction <add>, %330, %cst_117 [1] : vector<8x8xf32> to vector<8xf32>
    %332 = vector.shape_cast %331 : vector<8xf32> to vector<8x1xf32>
    %333 = vector.broadcast %332 : vector<8x1xf32> to vector<8x8xf32>
    %334 = arith.divf %330, %333 : vector<8x8xf32>
    %cst_118 = arith.constant dense<0.000000e+00> : vector<8x8xf32>
    %335 = tpu.matmul %334, %324, %cst_118 {dimension_numbers = #tpu.dot_dimension_numbers<[1], [0], [0], [1], [0, 0, 1, 1], [], []>, precision = #tpu.contract_precision<fp32>} : vector<8x8xf32>, vector<8x8xf32>, vector<8x8xf32> -> vector<8x8xf32>
    %336 = vector.extract_strided_slice %318 {offsets = [0, 8], sizes = [8, 8], strides = [1, 1]} : vector<8x32xf32> to vector<8x8xf32>
    %337 = vector.extract_strided_slice %319 {offsets = [0, 8], sizes = [8, 8], strides = [1, 1]} : vector<8x32xf32> to vector<8x8xf32>
    %338 = vector.extract_strided_slice %320 {offsets = [0, 8], sizes = [8, 8], strides = [1, 1]} : vector<8x32xf32> to vector<8x8xf32>
    %cst_119 = arith.constant dense<0.000000e+00> : vector<8x8xf32>
    %339 = tpu.matmul %336, %337, %cst_119 {dimension_numbers = #tpu.dot_dimension_numbers<[1], [1], [0], [0], [0, 0, 1, 0], [], []>, precision = #tpu.contract_precision<fp32>} : vector<8x8xf32>, vector<8x8xf32>, vector<8x8xf32> -> vector<8x8xf32>
    %cst_120 = arith.constant dense<0xFF800000> : vector<8xf32>
    %340 = vector.multi_reduction <maximumf>, %339, %cst_120 [1] : vector<8x8xf32> to vector<8xf32>
    %341 = vector.shape_cast %340 : vector<8xf32> to vector<8x1xf32>
    %342 = vector.broadcast %341 : vector<8x1xf32> to vector<8x8xf32>
    %343 = arith.subf %339, %342 : vector<8x8xf32>
    %344 = math.exp %343 : vector<8x8xf32>
    %cst_121 = arith.constant dense<0.000000e+00> : vector<8xf32>
    %345 = vector.multi_reduction <add>, %344, %cst_121 [1] : vector<8x8xf32> to vector<8xf32>
    %346 = vector.shape_cast %345 : vector<8xf32> to vector<8x1xf32>
    %347 = vector.broadcast %346 : vector<8x1xf32> to vector<8x8xf32>
    %348 = arith.divf %344, %347 : vector<8x8xf32>
    %cst_122 = arith.constant dense<0.000000e+00> : vector<8x8xf32>
    %349 = tpu.matmul %348, %338, %cst_122 {dimension_numbers = #tpu.dot_dimension_numbers<[1], [0], [0], [1], [0, 0, 1, 1], [], []>, precision = #tpu.contract_precision<fp32>} : vector<8x8xf32>, vector<8x8xf32>, vector<8x8xf32> -> vector<8x8xf32>
    %350 = vector.extract_strided_slice %318 {offsets = [0, 16], sizes = [8, 8], strides = [1, 1]} : vector<8x32xf32> to vector<8x8xf32>
    %351 = vector.extract_strided_slice %319 {offsets = [0, 16], sizes = [8, 8], strides = [1, 1]} : vector<8x32xf32> to vector<8x8xf32>
    %352 = vector.extract_strided_slice %320 {offsets = [0, 16], sizes = [8, 8], strides = [1, 1]} : vector<8x32xf32> to vector<8x8xf32>
    %cst_123 = arith.constant dense<0.000000e+00> : vector<8x8xf32>
    %353 = tpu.matmul %350, %351, %cst_123 {dimension_numbers = #tpu.dot_dimension_numbers<[1], [1], [0], [0], [0, 0, 1, 0], [], []>, precision = #tpu.contract_precision<fp32>} : vector<8x8xf32>, vector<8x8xf32>, vector<8x8xf32> -> vector<8x8xf32>
    %cst_124 = arith.constant dense<0xFF800000> : vector<8xf32>
    %354 = vector.multi_reduction <maximumf>, %353, %cst_124 [1] : vector<8x8xf32> to vector<8xf32>
    %355 = vector.shape_cast %354 : vector<8xf32> to vector<8x1xf32>
    %356 = vector.broadcast %355 : vector<8x1xf32> to vector<8x8xf32>
    %357 = arith.subf %353, %356 : vector<8x8xf32>
    %358 = math.exp %357 : vector<8x8xf32>
    %cst_125 = arith.constant dense<0.000000e+00> : vector<8xf32>
    %359 = vector.multi_reduction <add>, %358, %cst_125 [1] : vector<8x8xf32> to vector<8xf32>
    %360 = vector.shape_cast %359 : vector<8xf32> to vector<8x1xf32>
    %361 = vector.broadcast %360 : vector<8x1xf32> to vector<8x8xf32>
    %362 = arith.divf %358, %361 : vector<8x8xf32>
    %cst_126 = arith.constant dense<0.000000e+00> : vector<8x8xf32>
    %363 = tpu.matmul %362, %352, %cst_126 {dimension_numbers = #tpu.dot_dimension_numbers<[1], [0], [0], [1], [0, 0, 1, 1], [], []>, precision = #tpu.contract_precision<fp32>} : vector<8x8xf32>, vector<8x8xf32>, vector<8x8xf32> -> vector<8x8xf32>
    %364 = vector.extract_strided_slice %318 {offsets = [0, 24], sizes = [8, 8], strides = [1, 1]} : vector<8x32xf32> to vector<8x8xf32>
    %365 = vector.extract_strided_slice %319 {offsets = [0, 24], sizes = [8, 8], strides = [1, 1]} : vector<8x32xf32> to vector<8x8xf32>
    %366 = vector.extract_strided_slice %320 {offsets = [0, 24], sizes = [8, 8], strides = [1, 1]} : vector<8x32xf32> to vector<8x8xf32>
    %cst_127 = arith.constant dense<0.000000e+00> : vector<8x8xf32>
    %367 = tpu.matmul %364, %365, %cst_127 {dimension_numbers = #tpu.dot_dimension_numbers<[1], [1], [0], [0], [0, 0, 1, 0], [], []>, precision = #tpu.contract_precision<fp32>} : vector<8x8xf32>, vector<8x8xf32>, vector<8x8xf32> -> vector<8x8xf32>
    %cst_128 = arith.constant dense<0xFF800000> : vector<8xf32>
    %368 = vector.multi_reduction <maximumf>, %367, %cst_128 [1] : vector<8x8xf32> to vector<8xf32>
    %369 = vector.shape_cast %368 : vector<8xf32> to vector<8x1xf32>
    %370 = vector.broadcast %369 : vector<8x1xf32> to vector<8x8xf32>
    %371 = arith.subf %367, %370 : vector<8x8xf32>
    %372 = math.exp %371 : vector<8x8xf32>
    %cst_129 = arith.constant dense<0.000000e+00> : vector<8xf32>
    %373 = vector.multi_reduction <add>, %372, %cst_129 [1] : vector<8x8xf32> to vector<8xf32>
    %374 = vector.shape_cast %373 : vector<8xf32> to vector<8x1xf32>
    %375 = vector.broadcast %374 : vector<8x1xf32> to vector<8x8xf32>
    %376 = arith.divf %372, %375 : vector<8x8xf32>
    %cst_130 = arith.constant dense<0.000000e+00> : vector<8x8xf32>
    %377 = tpu.matmul %376, %366, %cst_130 {dimension_numbers = #tpu.dot_dimension_numbers<[1], [0], [0], [1], [0, 0, 1, 1], [], []>, precision = #tpu.contract_precision<fp32>} : vector<8x8xf32>, vector<8x8xf32>, vector<8x8xf32> -> vector<8x8xf32>
    %378 = tpu.concatenate %335, %349, %363, %377 in 1 : vector<8x8xf32>, vector<8x8xf32>, vector<8x8xf32>, vector<8x8xf32> -> vector<8x32xf32>
    %cst_131 = arith.constant dense<0.000000e+00> : vector<8x32xf32>
    %379 = tpu.matmul %378, %321, %cst_131 {dimension_numbers = #tpu.dot_dimension_numbers<[1], [0], [0], [1], [0, 0, 1, 1], [], []>, precision = #tpu.contract_precision<fp32>} : vector<8x32xf32>, vector<32x32xf32>, vector<8x32xf32> -> vector<8x32xf32>
    %c424 = arith.constant 424 : index
    %c0_132 = arith.constant 0 : index
    %380 = vector.load %arg3[%c424, %c0_132] : memref<752x128xf32, #tpu.memory_space<vmem>>, vector<1x32xf32>
    %381 = vector.broadcast %380 : vector<1x32xf32> to vector<8x32xf32>
    %382 = arith.addf %379, %381 : vector<8x32xf32>
    %383 = arith.addf %294, %382 : vector<8x32xf32>
    %cst_133 = arith.constant dense<0.000000e+00> : vector<8xf32>
    %384 = vector.multi_reduction <add>, %383, %cst_133 [1] : vector<8x32xf32> to vector<8xf32>
    %385 = vector.shape_cast %384 : vector<8xf32> to vector<8x1xf32>
    %cst_134 = arith.constant 3.200000e+01 : f32
    %386 = vector.broadcast %cst_134 : f32 to vector<8x1xf32>
    %387 = arith.divf %385, %386 : vector<8x1xf32>
    %388 = vector.broadcast %387 : vector<8x1xf32> to vector<8x32xf32>
    %389 = arith.subf %383, %388 : vector<8x32xf32>
    %390 = arith.mulf %389, %389 : vector<8x32xf32>
    %cst_135 = arith.constant dense<0.000000e+00> : vector<8xf32>
    %391 = vector.multi_reduction <add>, %390, %cst_135 [1] : vector<8x32xf32> to vector<8xf32>
    %392 = vector.shape_cast %391 : vector<8xf32> to vector<8x1xf32>
    %cst_136 = arith.constant 3.200000e+01 : f32
    %393 = vector.broadcast %cst_136 : f32 to vector<8x1xf32>
    %394 = arith.divf %392, %393 : vector<8x1xf32>
    %395 = vector.broadcast %387 : vector<8x1xf32> to vector<8x32xf32>
    %396 = arith.subf %383, %395 : vector<8x32xf32>
    %cst_137 = arith.constant 9.99999974E-6 : f32
    %397 = vector.broadcast %cst_137 : f32 to vector<8x1xf32>
    %398 = arith.addf %394, %397 : vector<8x1xf32>
    %399 = math.rsqrt %398 : vector<8x1xf32>
    %400 = vector.broadcast %399 : vector<8x1xf32> to vector<8x32xf32>
    %401 = arith.mulf %396, %400 : vector<8x32xf32>
    %c432 = arith.constant 432 : index
    %c0_138 = arith.constant 0 : index
    %402 = vector.load %arg3[%c432, %c0_138] : memref<752x128xf32, #tpu.memory_space<vmem>>, vector<32x32xf32>
    %cst_139 = arith.constant dense<0.000000e+00> : vector<8x32xf32>
    %403 = tpu.matmul %401, %402, %cst_139 {dimension_numbers = #tpu.dot_dimension_numbers<[1], [0], [0], [1], [0, 0, 1, 1], [], []>, precision = #tpu.contract_precision<fp32>} : vector<8x32xf32>, vector<32x32xf32>, vector<8x32xf32> -> vector<8x32xf32>
    %c464 = arith.constant 464 : index
    %c0_140 = arith.constant 0 : index
    %404 = vector.load %arg3[%c464, %c0_140] : memref<752x128xf32, #tpu.memory_space<vmem>>, vector<1x32xf32>
    %405 = vector.broadcast %404 : vector<1x32xf32> to vector<8x32xf32>
    %406 = arith.addf %403, %405 : vector<8x32xf32>
    %cst_141 = arith.constant 5.000000e-01 : f32
    %407 = vector.broadcast %cst_141 : f32 to vector<8x32xf32>
    %408 = arith.mulf %407, %406 : vector<8x32xf32>
    %cst_142 = arith.constant 0.707106769 : f32
    %409 = vector.broadcast %cst_142 : f32 to vector<8x32xf32>
    %410 = arith.mulf %406, %409 : vector<8x32xf32>
    %411 = math.absf %410 : vector<8x32xf32>
    %cst_143 = arith.constant 0.327591091 : f32
    %412 = vector.broadcast %cst_143 : f32 to vector<8x32xf32>
    %413 = arith.mulf %412, %411 : vector<8x32xf32>
    %cst_144 = arith.constant 1.000000e+00 : f32
    %414 = vector.broadcast %cst_144 : f32 to vector<8x32xf32>
    %415 = arith.addf %414, %413 : vector<8x32xf32>
    %416 = tpu.reciprocal %415 {approx = true} : vector<8x32xf32> -> vector<8x32xf32>
    %cst_145 = arith.constant 1.06140542 : f32
    %417 = vector.broadcast %cst_145 : f32 to vector<8x32xf32>
    %418 = arith.mulf %417, %416 : vector<8x32xf32>
    %cst_146 = arith.constant -1.45315206 : f32
    %419 = vector.broadcast %cst_146 : f32 to vector<8x32xf32>
    %420 = arith.addf %418, %419 : vector<8x32xf32>
    %421 = arith.mulf %420, %416 : vector<8x32xf32>
    %cst_147 = arith.constant 1.42141378 : f32
    %422 = vector.broadcast %cst_147 : f32 to vector<8x32xf32>
    %423 = arith.addf %421, %422 : vector<8x32xf32>
    %424 = arith.mulf %423, %416 : vector<8x32xf32>
    %cst_148 = arith.constant -0.284496725 : f32
    %425 = vector.broadcast %cst_148 : f32 to vector<8x32xf32>
    %426 = arith.addf %424, %425 : vector<8x32xf32>
    %427 = arith.mulf %426, %416 : vector<8x32xf32>
    %cst_149 = arith.constant 0.254829586 : f32
    %428 = vector.broadcast %cst_149 : f32 to vector<8x32xf32>
    %429 = arith.addf %427, %428 : vector<8x32xf32>
    %430 = arith.mulf %429, %416 : vector<8x32xf32>
    %cst_150 = arith.constant 0.000000e+00 : f32
    %431 = vector.broadcast %cst_150 : f32 to vector<8x32xf32>
    %432 = arith.subf %431, %411 : vector<8x32xf32>
    %433 = arith.mulf %432, %411 : vector<8x32xf32>
    %434 = math.exp %433 : vector<8x32xf32>
    %435 = arith.mulf %430, %434 : vector<8x32xf32>
    %cst_151 = arith.constant 1.000000e+00 : f32
    %436 = vector.broadcast %cst_151 : f32 to vector<8x32xf32>
    %437 = arith.subf %436, %435 : vector<8x32xf32>
    %cst_152 = arith.constant 0.000000e+00 : f32
    %438 = vector.broadcast %cst_152 : f32 to vector<8x32xf32>
    %439 = arith.cmpf oge, %410, %438 : vector<8x32xf32>
    %cst_153 = arith.constant 0.000000e+00 : f32
    %440 = vector.broadcast %cst_153 : f32 to vector<8x32xf32>
    %441 = arith.subf %440, %437 : vector<8x32xf32>
    %442 = arith.select %439, %437, %441 : vector<8x32xi1>, vector<8x32xf32>
    %cst_154 = arith.constant 1.000000e+00 : f32
    %443 = vector.broadcast %cst_154 : f32 to vector<8x32xf32>
    %444 = arith.addf %443, %442 : vector<8x32xf32>
    %445 = arith.mulf %408, %444 : vector<8x32xf32>
    %c472 = arith.constant 472 : index
    %c0_155 = arith.constant 0 : index
    %446 = vector.load %arg3[%c472, %c0_155] : memref<752x128xf32, #tpu.memory_space<vmem>>, vector<32x32xf32>
    %cst_156 = arith.constant dense<0.000000e+00> : vector<8x32xf32>
    %447 = tpu.matmul %445, %446, %cst_156 {dimension_numbers = #tpu.dot_dimension_numbers<[1], [0], [0], [1], [0, 0, 1, 1], [], []>, precision = #tpu.contract_precision<fp32>} : vector<8x32xf32>, vector<32x32xf32>, vector<8x32xf32> -> vector<8x32xf32>
    %c504 = arith.constant 504 : index
    %c0_157 = arith.constant 0 : index
    %448 = vector.load %arg3[%c504, %c0_157] : memref<752x128xf32, #tpu.memory_space<vmem>>, vector<1x32xf32>
    %449 = vector.broadcast %448 : vector<1x32xf32> to vector<8x32xf32>
    %450 = arith.addf %447, %449 : vector<8x32xf32>
    %451 = arith.addf %383, %450 : vector<8x32xf32>
    %cst_158 = arith.constant dense<0.000000e+00> : vector<8xf32>
    %452 = vector.multi_reduction <add>, %451, %cst_158 [1] : vector<8x32xf32> to vector<8xf32>
    %453 = vector.shape_cast %452 : vector<8xf32> to vector<8x1xf32>
    %cst_159 = arith.constant 3.200000e+01 : f32
    %454 = vector.broadcast %cst_159 : f32 to vector<8x1xf32>
    %455 = arith.divf %453, %454 : vector<8x1xf32>
    %456 = vector.broadcast %455 : vector<8x1xf32> to vector<8x32xf32>
    %457 = arith.subf %451, %456 : vector<8x32xf32>
    %458 = arith.mulf %457, %457 : vector<8x32xf32>
    %cst_160 = arith.constant dense<0.000000e+00> : vector<8xf32>
    %459 = vector.multi_reduction <add>, %458, %cst_160 [1] : vector<8x32xf32> to vector<8xf32>
    %460 = vector.shape_cast %459 : vector<8xf32> to vector<8x1xf32>
    %cst_161 = arith.constant 3.200000e+01 : f32
    %461 = vector.broadcast %cst_161 : f32 to vector<8x1xf32>
    %462 = arith.divf %460, %461 : vector<8x1xf32>
    %463 = vector.broadcast %455 : vector<8x1xf32> to vector<8x32xf32>
    %464 = arith.subf %451, %463 : vector<8x32xf32>
    %cst_162 = arith.constant 9.99999974E-6 : f32
    %465 = vector.broadcast %cst_162 : f32 to vector<8x1xf32>
    %466 = arith.addf %462, %465 : vector<8x1xf32>
    %467 = math.rsqrt %466 : vector<8x1xf32>
    %468 = vector.broadcast %467 : vector<8x1xf32> to vector<8x32xf32>
    %469 = arith.mulf %464, %468 : vector<8x32xf32>
    %c192_163 = arith.constant 192 : index
    %c0_164 = arith.constant 0 : index
    %470 = vector.load %arg3[%c192_163, %c0_164] : memref<752x128xf32, #tpu.memory_space<vmem>>, vector<32x96xf32>
    %cst_165 = arith.constant dense<0.000000e+00> : vector<8x96xf32>
    %471 = tpu.matmul %469, %470, %cst_165 {dimension_numbers = #tpu.dot_dimension_numbers<[1], [0], [0], [1], [0, 0, 1, 1], [], []>, precision = #tpu.contract_precision<fp32>} : vector<8x32xf32>, vector<32x96xf32>, vector<8x96xf32> -> vector<8x96xf32>
    %c224_166 = arith.constant 224 : index
    %c0_167 = arith.constant 0 : index
    %472 = vector.load %arg3[%c224_166, %c0_167] : memref<752x128xf32, #tpu.memory_space<vmem>>, vector<1x96xf32>
    %473 = vector.broadcast %472 : vector<1x96xf32> to vector<8x96xf32>
    %474 = arith.addf %471, %473 : vector<8x96xf32>
    %475 = vector.extract_strided_slice %474 {offsets = [0, 0], sizes = [8, 32], strides = [1, 1]} : vector<8x96xf32> to vector<8x32xf32>
    %476 = vector.extract_strided_slice %474 {offsets = [0, 32], sizes = [8, 32], strides = [1, 1]} : vector<8x96xf32> to vector<8x32xf32>
    %477 = vector.extract_strided_slice %474 {offsets = [0, 64], sizes = [8, 32], strides = [1, 1]} : vector<8x96xf32> to vector<8x32xf32>
    %c232_168 = arith.constant 232 : index
    %c0_169 = arith.constant 0 : index
    %478 = vector.load %arg3[%c232_168, %c0_169] : memref<752x128xf32, #tpu.memory_space<vmem>>, vector<32x32xf32>
    %479 = vector.extract_strided_slice %475 {offsets = [0, 0], sizes = [8, 8], strides = [1, 1]} : vector<8x32xf32> to vector<8x8xf32>
    %480 = vector.extract_strided_slice %476 {offsets = [0, 0], sizes = [8, 8], strides = [1, 1]} : vector<8x32xf32> to vector<8x8xf32>
    %481 = vector.extract_strided_slice %477 {offsets = [0, 0], sizes = [8, 8], strides = [1, 1]} : vector<8x32xf32> to vector<8x8xf32>
    %cst_170 = arith.constant dense<0.000000e+00> : vector<8x8xf32>
    %482 = tpu.matmul %479, %480, %cst_170 {dimension_numbers = #tpu.dot_dimension_numbers<[1], [1], [0], [0], [0, 0, 1, 0], [], []>, precision = #tpu.contract_precision<fp32>} : vector<8x8xf32>, vector<8x8xf32>, vector<8x8xf32> -> vector<8x8xf32>
    %cst_171 = arith.constant dense<0xFF800000> : vector<8xf32>
    %483 = vector.multi_reduction <maximumf>, %482, %cst_171 [1] : vector<8x8xf32> to vector<8xf32>
    %484 = vector.shape_cast %483 : vector<8xf32> to vector<8x1xf32>
    %485 = vector.broadcast %484 : vector<8x1xf32> to vector<8x8xf32>
    %486 = arith.subf %482, %485 : vector<8x8xf32>
    %487 = math.exp %486 : vector<8x8xf32>
    %cst_172 = arith.constant dense<0.000000e+00> : vector<8xf32>
    %488 = vector.multi_reduction <add>, %487, %cst_172 [1] : vector<8x8xf32> to vector<8xf32>
    %489 = vector.shape_cast %488 : vector<8xf32> to vector<8x1xf32>
    %490 = vector.broadcast %489 : vector<8x1xf32> to vector<8x8xf32>
    %491 = arith.divf %487, %490 : vector<8x8xf32>
    %cst_173 = arith.constant dense<0.000000e+00> : vector<8x8xf32>
    %492 = tpu.matmul %491, %481, %cst_173 {dimension_numbers = #tpu.dot_dimension_numbers<[1], [0], [0], [1], [0, 0, 1, 1], [], []>, precision = #tpu.contract_precision<fp32>} : vector<8x8xf32>, vector<8x8xf32>, vector<8x8xf32> -> vector<8x8xf32>
    %493 = vector.extract_strided_slice %475 {offsets = [0, 8], sizes = [8, 8], strides = [1, 1]} : vector<8x32xf32> to vector<8x8xf32>
    %494 = vector.extract_strided_slice %476 {offsets = [0, 8], sizes = [8, 8], strides = [1, 1]} : vector<8x32xf32> to vector<8x8xf32>
    %495 = vector.extract_strided_slice %477 {offsets = [0, 8], sizes = [8, 8], strides = [1, 1]} : vector<8x32xf32> to vector<8x8xf32>
    %cst_174 = arith.constant dense<0.000000e+00> : vector<8x8xf32>
    %496 = tpu.matmul %493, %494, %cst_174 {dimension_numbers = #tpu.dot_dimension_numbers<[1], [1], [0], [0], [0, 0, 1, 0], [], []>, precision = #tpu.contract_precision<fp32>} : vector<8x8xf32>, vector<8x8xf32>, vector<8x8xf32> -> vector<8x8xf32>
    %cst_175 = arith.constant dense<0xFF800000> : vector<8xf32>
    %497 = vector.multi_reduction <maximumf>, %496, %cst_175 [1] : vector<8x8xf32> to vector<8xf32>
    %498 = vector.shape_cast %497 : vector<8xf32> to vector<8x1xf32>
    %499 = vector.broadcast %498 : vector<8x1xf32> to vector<8x8xf32>
    %500 = arith.subf %496, %499 : vector<8x8xf32>
    %501 = math.exp %500 : vector<8x8xf32>
    %cst_176 = arith.constant dense<0.000000e+00> : vector<8xf32>
    %502 = vector.multi_reduction <add>, %501, %cst_176 [1] : vector<8x8xf32> to vector<8xf32>
    %503 = vector.shape_cast %502 : vector<8xf32> to vector<8x1xf32>
    %504 = vector.broadcast %503 : vector<8x1xf32> to vector<8x8xf32>
    %505 = arith.divf %501, %504 : vector<8x8xf32>
    %cst_177 = arith.constant dense<0.000000e+00> : vector<8x8xf32>
    %506 = tpu.matmul %505, %495, %cst_177 {dimension_numbers = #tpu.dot_dimension_numbers<[1], [0], [0], [1], [0, 0, 1, 1], [], []>, precision = #tpu.contract_precision<fp32>} : vector<8x8xf32>, vector<8x8xf32>, vector<8x8xf32> -> vector<8x8xf32>
    %507 = vector.extract_strided_slice %475 {offsets = [0, 16], sizes = [8, 8], strides = [1, 1]} : vector<8x32xf32> to vector<8x8xf32>
    %508 = vector.extract_strided_slice %476 {offsets = [0, 16], sizes = [8, 8], strides = [1, 1]} : vector<8x32xf32> to vector<8x8xf32>
    %509 = vector.extract_strided_slice %477 {offsets = [0, 16], sizes = [8, 8], strides = [1, 1]} : vector<8x32xf32> to vector<8x8xf32>
    %cst_178 = arith.constant dense<0.000000e+00> : vector<8x8xf32>
    %510 = tpu.matmul %507, %508, %cst_178 {dimension_numbers = #tpu.dot_dimension_numbers<[1], [1], [0], [0], [0, 0, 1, 0], [], []>, precision = #tpu.contract_precision<fp32>} : vector<8x8xf32>, vector<8x8xf32>, vector<8x8xf32> -> vector<8x8xf32>
    %cst_179 = arith.constant dense<0xFF800000> : vector<8xf32>
    %511 = vector.multi_reduction <maximumf>, %510, %cst_179 [1] : vector<8x8xf32> to vector<8xf32>
    %512 = vector.shape_cast %511 : vector<8xf32> to vector<8x1xf32>
    %513 = vector.broadcast %512 : vector<8x1xf32> to vector<8x8xf32>
    %514 = arith.subf %510, %513 : vector<8x8xf32>
    %515 = math.exp %514 : vector<8x8xf32>
    %cst_180 = arith.constant dense<0.000000e+00> : vector<8xf32>
    %516 = vector.multi_reduction <add>, %515, %cst_180 [1] : vector<8x8xf32> to vector<8xf32>
    %517 = vector.shape_cast %516 : vector<8xf32> to vector<8x1xf32>
    %518 = vector.broadcast %517 : vector<8x1xf32> to vector<8x8xf32>
    %519 = arith.divf %515, %518 : vector<8x8xf32>
    %cst_181 = arith.constant dense<0.000000e+00> : vector<8x8xf32>
    %520 = tpu.matmul %519, %509, %cst_181 {dimension_numbers = #tpu.dot_dimension_numbers<[1], [0], [0], [1], [0, 0, 1, 1], [], []>, precision = #tpu.contract_precision<fp32>} : vector<8x8xf32>, vector<8x8xf32>, vector<8x8xf32> -> vector<8x8xf32>
    %521 = vector.extract_strided_slice %475 {offsets = [0, 24], sizes = [8, 8], strides = [1, 1]} : vector<8x32xf32> to vector<8x8xf32>
    %522 = vector.extract_strided_slice %476 {offsets = [0, 24], sizes = [8, 8], strides = [1, 1]} : vector<8x32xf32> to vector<8x8xf32>
    %523 = vector.extract_strided_slice %477 {offsets = [0, 24], sizes = [8, 8], strides = [1, 1]} : vector<8x32xf32> to vector<8x8xf32>
    %cst_182 = arith.constant dense<0.000000e+00> : vector<8x8xf32>
    %524 = tpu.matmul %521, %522, %cst_182 {dimension_numbers = #tpu.dot_dimension_numbers<[1], [1], [0], [0], [0, 0, 1, 0], [], []>, precision = #tpu.contract_precision<fp32>} : vector<8x8xf32>, vector<8x8xf32>, vector<8x8xf32> -> vector<8x8xf32>
    %cst_183 = arith.constant dense<0xFF800000> : vector<8xf32>
    %525 = vector.multi_reduction <maximumf>, %524, %cst_183 [1] : vector<8x8xf32> to vector<8xf32>
    %526 = vector.shape_cast %525 : vector<8xf32> to vector<8x1xf32>
    %527 = vector.broadcast %526 : vector<8x1xf32> to vector<8x8xf32>
    %528 = arith.subf %524, %527 : vector<8x8xf32>
    %529 = math.exp %528 : vector<8x8xf32>
    %cst_184 = arith.constant dense<0.000000e+00> : vector<8xf32>
    %530 = vector.multi_reduction <add>, %529, %cst_184 [1] : vector<8x8xf32> to vector<8xf32>
    %531 = vector.shape_cast %530 : vector<8xf32> to vector<8x1xf32>
    %532 = vector.broadcast %531 : vector<8x1xf32> to vector<8x8xf32>
    %533 = arith.divf %529, %532 : vector<8x8xf32>
    %cst_185 = arith.constant dense<0.000000e+00> : vector<8x8xf32>
    %534 = tpu.matmul %533, %523, %cst_185 {dimension_numbers = #tpu.dot_dimension_numbers<[1], [0], [0], [1], [0, 0, 1, 1], [], []>, precision = #tpu.contract_precision<fp32>} : vector<8x8xf32>, vector<8x8xf32>, vector<8x8xf32> -> vector<8x8xf32>
    %535 = tpu.concatenate %492, %506, %520, %534 in 1 : vector<8x8xf32>, vector<8x8xf32>, vector<8x8xf32>, vector<8x8xf32> -> vector<8x32xf32>
    %cst_186 = arith.constant dense<0.000000e+00> : vector<8x32xf32>
    %536 = tpu.matmul %535, %478, %cst_186 {dimension_numbers = #tpu.dot_dimension_numbers<[1], [0], [0], [1], [0, 0, 1, 1], [], []>, precision = #tpu.contract_precision<fp32>} : vector<8x32xf32>, vector<32x32xf32>, vector<8x32xf32> -> vector<8x32xf32>
    %c264_187 = arith.constant 264 : index
    %c0_188 = arith.constant 0 : index
    %537 = vector.load %arg3[%c264_187, %c0_188] : memref<752x128xf32, #tpu.memory_space<vmem>>, vector<1x32xf32>
    %538 = vector.broadcast %537 : vector<1x32xf32> to vector<8x32xf32>
    %539 = arith.addf %536, %538 : vector<8x32xf32>
    %540 = arith.addf %451, %539 : vector<8x32xf32>
    %cst_189 = arith.constant dense<0.000000e+00> : vector<8xf32>
    %541 = vector.multi_reduction <add>, %540, %cst_189 [1] : vector<8x32xf32> to vector<8xf32>
    %542 = vector.shape_cast %541 : vector<8xf32> to vector<8x1xf32>
    %cst_190 = arith.constant 3.200000e+01 : f32
    %543 = vector.broadcast %cst_190 : f32 to vector<8x1xf32>
    %544 = arith.divf %542, %543 : vector<8x1xf32>
    %545 = vector.broadcast %544 : vector<8x1xf32> to vector<8x32xf32>
    %546 = arith.subf %540, %545 : vector<8x32xf32>
    %547 = arith.mulf %546, %546 : vector<8x32xf32>
    %cst_191 = arith.constant dense<0.000000e+00> : vector<8xf32>
    %548 = vector.multi_reduction <add>, %547, %cst_191 [1] : vector<8x32xf32> to vector<8xf32>
    %549 = vector.shape_cast %548 : vector<8xf32> to vector<8x1xf32>
    %cst_192 = arith.constant 3.200000e+01 : f32
    %550 = vector.broadcast %cst_192 : f32 to vector<8x1xf32>
    %551 = arith.divf %549, %550 : vector<8x1xf32>
    %552 = vector.broadcast %544 : vector<8x1xf32> to vector<8x32xf32>
    %553 = arith.subf %540, %552 : vector<8x32xf32>
    %cst_193 = arith.constant 9.99999974E-6 : f32
    %554 = vector.broadcast %cst_193 : f32 to vector<8x1xf32>
    %555 = arith.addf %551, %554 : vector<8x1xf32>
    %556 = math.rsqrt %555 : vector<8x1xf32>
    %557 = vector.broadcast %556 : vector<8x1xf32> to vector<8x32xf32>
    %558 = arith.mulf %553, %557 : vector<8x32xf32>
    %c272_194 = arith.constant 272 : index
    %c0_195 = arith.constant 0 : index
    %559 = vector.load %arg3[%c272_194, %c0_195] : memref<752x128xf32, #tpu.memory_space<vmem>>, vector<32x32xf32>
    %cst_196 = arith.constant dense<0.000000e+00> : vector<8x32xf32>
    %560 = tpu.matmul %558, %559, %cst_196 {dimension_numbers = #tpu.dot_dimension_numbers<[1], [0], [0], [1], [0, 0, 1, 1], [], []>, precision = #tpu.contract_precision<fp32>} : vector<8x32xf32>, vector<32x32xf32>, vector<8x32xf32> -> vector<8x32xf32>
    %c304_197 = arith.constant 304 : index
    %c0_198 = arith.constant 0 : index
    %561 = vector.load %arg3[%c304_197, %c0_198] : memref<752x128xf32, #tpu.memory_space<vmem>>, vector<1x32xf32>
    %562 = vector.broadcast %561 : vector<1x32xf32> to vector<8x32xf32>
    %563 = arith.addf %560, %562 : vector<8x32xf32>
    %cst_199 = arith.constant 5.000000e-01 : f32
    %564 = vector.broadcast %cst_199 : f32 to vector<8x32xf32>
    %565 = arith.mulf %564, %563 : vector<8x32xf32>
    %cst_200 = arith.constant 0.707106769 : f32
    %566 = vector.broadcast %cst_200 : f32 to vector<8x32xf32>
    %567 = arith.mulf %563, %566 : vector<8x32xf32>
    %568 = math.absf %567 : vector<8x32xf32>
    %cst_201 = arith.constant 0.327591091 : f32
    %569 = vector.broadcast %cst_201 : f32 to vector<8x32xf32>
    %570 = arith.mulf %569, %568 : vector<8x32xf32>
    %cst_202 = arith.constant 1.000000e+00 : f32
    %571 = vector.broadcast %cst_202 : f32 to vector<8x32xf32>
    %572 = arith.addf %571, %570 : vector<8x32xf32>
    %573 = tpu.reciprocal %572 {approx = true} : vector<8x32xf32> -> vector<8x32xf32>
    %cst_203 = arith.constant 1.06140542 : f32
    %574 = vector.broadcast %cst_203 : f32 to vector<8x32xf32>
    %575 = arith.mulf %574, %573 : vector<8x32xf32>
    %cst_204 = arith.constant -1.45315206 : f32
    %576 = vector.broadcast %cst_204 : f32 to vector<8x32xf32>
    %577 = arith.addf %575, %576 : vector<8x32xf32>
    %578 = arith.mulf %577, %573 : vector<8x32xf32>
    %cst_205 = arith.constant 1.42141378 : f32
    %579 = vector.broadcast %cst_205 : f32 to vector<8x32xf32>
    %580 = arith.addf %578, %579 : vector<8x32xf32>
    %581 = arith.mulf %580, %573 : vector<8x32xf32>
    %cst_206 = arith.constant -0.284496725 : f32
    %582 = vector.broadcast %cst_206 : f32 to vector<8x32xf32>
    %583 = arith.addf %581, %582 : vector<8x32xf32>
    %584 = arith.mulf %583, %573 : vector<8x32xf32>
    %cst_207 = arith.constant 0.254829586 : f32
    %585 = vector.broadcast %cst_207 : f32 to vector<8x32xf32>
    %586 = arith.addf %584, %585 : vector<8x32xf32>
    %587 = arith.mulf %586, %573 : vector<8x32xf32>
    %cst_208 = arith.constant 0.000000e+00 : f32
    %588 = vector.broadcast %cst_208 : f32 to vector<8x32xf32>
    %589 = arith.subf %588, %568 : vector<8x32xf32>
    %590 = arith.mulf %589, %568 : vector<8x32xf32>
    %591 = math.exp %590 : vector<8x32xf32>
    %592 = arith.mulf %587, %591 : vector<8x32xf32>
    %cst_209 = arith.constant 1.000000e+00 : f32
    %593 = vector.broadcast %cst_209 : f32 to vector<8x32xf32>
    %594 = arith.subf %593, %592 : vector<8x32xf32>
    %cst_210 = arith.constant 0.000000e+00 : f32
    %595 = vector.broadcast %cst_210 : f32 to vector<8x32xf32>
    %596 = arith.cmpf oge, %567, %595 : vector<8x32xf32>
    %cst_211 = arith.constant 0.000000e+00 : f32
    %597 = vector.broadcast %cst_211 : f32 to vector<8x32xf32>
    %598 = arith.subf %597, %594 : vector<8x32xf32>
    %599 = arith.select %596, %594, %598 : vector<8x32xi1>, vector<8x32xf32>
    %cst_212 = arith.constant 1.000000e+00 : f32
    %600 = vector.broadcast %cst_212 : f32 to vector<8x32xf32>
    %601 = arith.addf %600, %599 : vector<8x32xf32>
    %602 = arith.mulf %565, %601 : vector<8x32xf32>
    %c312_213 = arith.constant 312 : index
    %c0_214 = arith.constant 0 : index
    %603 = vector.load %arg3[%c312_213, %c0_214] : memref<752x128xf32, #tpu.memory_space<vmem>>, vector<32x32xf32>
    %cst_215 = arith.constant dense<0.000000e+00> : vector<8x32xf32>
    %604 = tpu.matmul %602, %603, %cst_215 {dimension_numbers = #tpu.dot_dimension_numbers<[1], [0], [0], [1], [0, 0, 1, 1], [], []>, precision = #tpu.contract_precision<fp32>} : vector<8x32xf32>, vector<32x32xf32>, vector<8x32xf32> -> vector<8x32xf32>
    %c344_216 = arith.constant 344 : index
    %c0_217 = arith.constant 0 : index
    %605 = vector.load %arg3[%c344_216, %c0_217] : memref<752x128xf32, #tpu.memory_space<vmem>>, vector<1x32xf32>
    %606 = vector.broadcast %605 : vector<1x32xf32> to vector<8x32xf32>
    %607 = arith.addf %604, %606 : vector<8x32xf32>
    %608 = arith.addf %540, %607 : vector<8x32xf32>
    %cst_218 = arith.constant dense<0.000000e+00> : vector<8xf32>
    %609 = vector.multi_reduction <add>, %608, %cst_218 [1] : vector<8x32xf32> to vector<8xf32>
    %610 = vector.shape_cast %609 : vector<8xf32> to vector<8x1xf32>
    %cst_219 = arith.constant 3.200000e+01 : f32
    %611 = vector.broadcast %cst_219 : f32 to vector<8x1xf32>
    %612 = arith.divf %610, %611 : vector<8x1xf32>
    %613 = vector.broadcast %612 : vector<8x1xf32> to vector<8x32xf32>
    %614 = arith.subf %608, %613 : vector<8x32xf32>
    %615 = arith.mulf %614, %614 : vector<8x32xf32>
    %cst_220 = arith.constant dense<0.000000e+00> : vector<8xf32>
    %616 = vector.multi_reduction <add>, %615, %cst_220 [1] : vector<8x32xf32> to vector<8xf32>
    %617 = vector.shape_cast %616 : vector<8xf32> to vector<8x1xf32>
    %cst_221 = arith.constant 3.200000e+01 : f32
    %618 = vector.broadcast %cst_221 : f32 to vector<8x1xf32>
    %619 = arith.divf %617, %618 : vector<8x1xf32>
    %620 = vector.broadcast %612 : vector<8x1xf32> to vector<8x32xf32>
    %621 = arith.subf %608, %620 : vector<8x32xf32>
    %cst_222 = arith.constant 9.99999974E-6 : f32
    %622 = vector.broadcast %cst_222 : f32 to vector<8x1xf32>
    %623 = arith.addf %619, %622 : vector<8x1xf32>
    %624 = math.rsqrt %623 : vector<8x1xf32>
    %625 = vector.broadcast %624 : vector<8x1xf32> to vector<8x32xf32>
    %626 = arith.mulf %621, %625 : vector<8x32xf32>
    %c352_223 = arith.constant 352 : index
    %c0_224 = arith.constant 0 : index
    %627 = vector.load %arg3[%c352_223, %c0_224] : memref<752x128xf32, #tpu.memory_space<vmem>>, vector<32x96xf32>
    %cst_225 = arith.constant dense<0.000000e+00> : vector<8x96xf32>
    %628 = tpu.matmul %626, %627, %cst_225 {dimension_numbers = #tpu.dot_dimension_numbers<[1], [0], [0], [1], [0, 0, 1, 1], [], []>, precision = #tpu.contract_precision<fp32>} : vector<8x32xf32>, vector<32x96xf32>, vector<8x96xf32> -> vector<8x96xf32>
    %c384_226 = arith.constant 384 : index
    %c0_227 = arith.constant 0 : index
    %629 = vector.load %arg3[%c384_226, %c0_227] : memref<752x128xf32, #tpu.memory_space<vmem>>, vector<1x96xf32>
    %630 = vector.broadcast %629 : vector<1x96xf32> to vector<8x96xf32>
    %631 = arith.addf %628, %630 : vector<8x96xf32>
    %632 = vector.extract_strided_slice %631 {offsets = [0, 0], sizes = [8, 32], strides = [1, 1]} : vector<8x96xf32> to vector<8x32xf32>
    %633 = vector.extract_strided_slice %631 {offsets = [0, 32], sizes = [8, 32], strides = [1, 1]} : vector<8x96xf32> to vector<8x32xf32>
    %634 = vector.extract_strided_slice %631 {offsets = [0, 64], sizes = [8, 32], strides = [1, 1]} : vector<8x96xf32> to vector<8x32xf32>
    %c392_228 = arith.constant 392 : index
    %c0_229 = arith.constant 0 : index
    %635 = vector.load %arg3[%c392_228, %c0_229] : memref<752x128xf32, #tpu.memory_space<vmem>>, vector<32x32xf32>
    %636 = vector.extract_strided_slice %632 {offsets = [0, 0], sizes = [8, 8], strides = [1, 1]} : vector<8x32xf32> to vector<8x8xf32>
    %637 = vector.extract_strided_slice %633 {offsets = [0, 0], sizes = [8, 8], strides = [1, 1]} : vector<8x32xf32> to vector<8x8xf32>
    %638 = vector.extract_strided_slice %634 {offsets = [0, 0], sizes = [8, 8], strides = [1, 1]} : vector<8x32xf32> to vector<8x8xf32>
    %cst_230 = arith.constant dense<0.000000e+00> : vector<8x8xf32>
    %639 = tpu.matmul %636, %637, %cst_230 {dimension_numbers = #tpu.dot_dimension_numbers<[1], [1], [0], [0], [0, 0, 1, 0], [], []>, precision = #tpu.contract_precision<fp32>} : vector<8x8xf32>, vector<8x8xf32>, vector<8x8xf32> -> vector<8x8xf32>
    %cst_231 = arith.constant dense<0xFF800000> : vector<8xf32>
    %640 = vector.multi_reduction <maximumf>, %639, %cst_231 [1] : vector<8x8xf32> to vector<8xf32>
    %641 = vector.shape_cast %640 : vector<8xf32> to vector<8x1xf32>
    %642 = vector.broadcast %641 : vector<8x1xf32> to vector<8x8xf32>
    %643 = arith.subf %639, %642 : vector<8x8xf32>
    %644 = math.exp %643 : vector<8x8xf32>
    %cst_232 = arith.constant dense<0.000000e+00> : vector<8xf32>
    %645 = vector.multi_reduction <add>, %644, %cst_232 [1] : vector<8x8xf32> to vector<8xf32>
    %646 = vector.shape_cast %645 : vector<8xf32> to vector<8x1xf32>
    %647 = vector.broadcast %646 : vector<8x1xf32> to vector<8x8xf32>
    %648 = arith.divf %644, %647 : vector<8x8xf32>
    %cst_233 = arith.constant dense<0.000000e+00> : vector<8x8xf32>
    %649 = tpu.matmul %648, %638, %cst_233 {dimension_numbers = #tpu.dot_dimension_numbers<[1], [0], [0], [1], [0, 0, 1, 1], [], []>, precision = #tpu.contract_precision<fp32>} : vector<8x8xf32>, vector<8x8xf32>, vector<8x8xf32> -> vector<8x8xf32>
    %650 = vector.extract_strided_slice %632 {offsets = [0, 8], sizes = [8, 8], strides = [1, 1]} : vector<8x32xf32> to vector<8x8xf32>
    %651 = vector.extract_strided_slice %633 {offsets = [0, 8], sizes = [8, 8], strides = [1, 1]} : vector<8x32xf32> to vector<8x8xf32>
    %652 = vector.extract_strided_slice %634 {offsets = [0, 8], sizes = [8, 8], strides = [1, 1]} : vector<8x32xf32> to vector<8x8xf32>
    %cst_234 = arith.constant dense<0.000000e+00> : vector<8x8xf32>
    %653 = tpu.matmul %650, %651, %cst_234 {dimension_numbers = #tpu.dot_dimension_numbers<[1], [1], [0], [0], [0, 0, 1, 0], [], []>, precision = #tpu.contract_precision<fp32>} : vector<8x8xf32>, vector<8x8xf32>, vector<8x8xf32> -> vector<8x8xf32>
    %cst_235 = arith.constant dense<0xFF800000> : vector<8xf32>
    %654 = vector.multi_reduction <maximumf>, %653, %cst_235 [1] : vector<8x8xf32> to vector<8xf32>
    %655 = vector.shape_cast %654 : vector<8xf32> to vector<8x1xf32>
    %656 = vector.broadcast %655 : vector<8x1xf32> to vector<8x8xf32>
    %657 = arith.subf %653, %656 : vector<8x8xf32>
    %658 = math.exp %657 : vector<8x8xf32>
    %cst_236 = arith.constant dense<0.000000e+00> : vector<8xf32>
    %659 = vector.multi_reduction <add>, %658, %cst_236 [1] : vector<8x8xf32> to vector<8xf32>
    %660 = vector.shape_cast %659 : vector<8xf32> to vector<8x1xf32>
    %661 = vector.broadcast %660 : vector<8x1xf32> to vector<8x8xf32>
    %662 = arith.divf %658, %661 : vector<8x8xf32>
    %cst_237 = arith.constant dense<0.000000e+00> : vector<8x8xf32>
    %663 = tpu.matmul %662, %652, %cst_237 {dimension_numbers = #tpu.dot_dimension_numbers<[1], [0], [0], [1], [0, 0, 1, 1], [], []>, precision = #tpu.contract_precision<fp32>} : vector<8x8xf32>, vector<8x8xf32>, vector<8x8xf32> -> vector<8x8xf32>
    %664 = vector.extract_strided_slice %632 {offsets = [0, 16], sizes = [8, 8], strides = [1, 1]} : vector<8x32xf32> to vector<8x8xf32>
    %665 = vector.extract_strided_slice %633 {offsets = [0, 16], sizes = [8, 8], strides = [1, 1]} : vector<8x32xf32> to vector<8x8xf32>
    %666 = vector.extract_strided_slice %634 {offsets = [0, 16], sizes = [8, 8], strides = [1, 1]} : vector<8x32xf32> to vector<8x8xf32>
    %cst_238 = arith.constant dense<0.000000e+00> : vector<8x8xf32>
    %667 = tpu.matmul %664, %665, %cst_238 {dimension_numbers = #tpu.dot_dimension_numbers<[1], [1], [0], [0], [0, 0, 1, 0], [], []>, precision = #tpu.contract_precision<fp32>} : vector<8x8xf32>, vector<8x8xf32>, vector<8x8xf32> -> vector<8x8xf32>
    %cst_239 = arith.constant dense<0xFF800000> : vector<8xf32>
    %668 = vector.multi_reduction <maximumf>, %667, %cst_239 [1] : vector<8x8xf32> to vector<8xf32>
    %669 = vector.shape_cast %668 : vector<8xf32> to vector<8x1xf32>
    %670 = vector.broadcast %669 : vector<8x1xf32> to vector<8x8xf32>
    %671 = arith.subf %667, %670 : vector<8x8xf32>
    %672 = math.exp %671 : vector<8x8xf32>
    %cst_240 = arith.constant dense<0.000000e+00> : vector<8xf32>
    %673 = vector.multi_reduction <add>, %672, %cst_240 [1] : vector<8x8xf32> to vector<8xf32>
    %674 = vector.shape_cast %673 : vector<8xf32> to vector<8x1xf32>
    %675 = vector.broadcast %674 : vector<8x1xf32> to vector<8x8xf32>
    %676 = arith.divf %672, %675 : vector<8x8xf32>
    %cst_241 = arith.constant dense<0.000000e+00> : vector<8x8xf32>
    %677 = tpu.matmul %676, %666, %cst_241 {dimension_numbers = #tpu.dot_dimension_numbers<[1], [0], [0], [1], [0, 0, 1, 1], [], []>, precision = #tpu.contract_precision<fp32>} : vector<8x8xf32>, vector<8x8xf32>, vector<8x8xf32> -> vector<8x8xf32>
    %678 = vector.extract_strided_slice %632 {offsets = [0, 24], sizes = [8, 8], strides = [1, 1]} : vector<8x32xf32> to vector<8x8xf32>
    %679 = vector.extract_strided_slice %633 {offsets = [0, 24], sizes = [8, 8], strides = [1, 1]} : vector<8x32xf32> to vector<8x8xf32>
    %680 = vector.extract_strided_slice %634 {offsets = [0, 24], sizes = [8, 8], strides = [1, 1]} : vector<8x32xf32> to vector<8x8xf32>
    %cst_242 = arith.constant dense<0.000000e+00> : vector<8x8xf32>
    %681 = tpu.matmul %678, %679, %cst_242 {dimension_numbers = #tpu.dot_dimension_numbers<[1], [1], [0], [0], [0, 0, 1, 0], [], []>, precision = #tpu.contract_precision<fp32>} : vector<8x8xf32>, vector<8x8xf32>, vector<8x8xf32> -> vector<8x8xf32>
    %cst_243 = arith.constant dense<0xFF800000> : vector<8xf32>
    %682 = vector.multi_reduction <maximumf>, %681, %cst_243 [1] : vector<8x8xf32> to vector<8xf32>
    %683 = vector.shape_cast %682 : vector<8xf32> to vector<8x1xf32>
    %684 = vector.broadcast %683 : vector<8x1xf32> to vector<8x8xf32>
    %685 = arith.subf %681, %684 : vector<8x8xf32>
    %686 = math.exp %685 : vector<8x8xf32>
    %cst_244 = arith.constant dense<0.000000e+00> : vector<8xf32>
    %687 = vector.multi_reduction <add>, %686, %cst_244 [1] : vector<8x8xf32> to vector<8xf32>
    %688 = vector.shape_cast %687 : vector<8xf32> to vector<8x1xf32>
    %689 = vector.broadcast %688 : vector<8x1xf32> to vector<8x8xf32>
    %690 = arith.divf %686, %689 : vector<8x8xf32>
    %cst_245 = arith.constant dense<0.000000e+00> : vector<8x8xf32>
    %691 = tpu.matmul %690, %680, %cst_245 {dimension_numbers = #tpu.dot_dimension_numbers<[1], [0], [0], [1], [0, 0, 1, 1], [], []>, precision = #tpu.contract_precision<fp32>} : vector<8x8xf32>, vector<8x8xf32>, vector<8x8xf32> -> vector<8x8xf32>
    %692 = tpu.concatenate %649, %663, %677, %691 in 1 : vector<8x8xf32>, vector<8x8xf32>, vector<8x8xf32>, vector<8x8xf32> -> vector<8x32xf32>
    %cst_246 = arith.constant dense<0.000000e+00> : vector<8x32xf32>
    %693 = tpu.matmul %692, %635, %cst_246 {dimension_numbers = #tpu.dot_dimension_numbers<[1], [0], [0], [1], [0, 0, 1, 1], [], []>, precision = #tpu.contract_precision<fp32>} : vector<8x32xf32>, vector<32x32xf32>, vector<8x32xf32> -> vector<8x32xf32>
    %c424_247 = arith.constant 424 : index
    %c0_248 = arith.constant 0 : index
    %694 = vector.load %arg3[%c424_247, %c0_248] : memref<752x128xf32, #tpu.memory_space<vmem>>, vector<1x32xf32>
    %695 = vector.broadcast %694 : vector<1x32xf32> to vector<8x32xf32>
    %696 = arith.addf %693, %695 : vector<8x32xf32>
    %697 = arith.addf %608, %696 : vector<8x32xf32>
    %cst_249 = arith.constant dense<0.000000e+00> : vector<8xf32>
    %698 = vector.multi_reduction <add>, %697, %cst_249 [1] : vector<8x32xf32> to vector<8xf32>
    %699 = vector.shape_cast %698 : vector<8xf32> to vector<8x1xf32>
    %cst_250 = arith.constant 3.200000e+01 : f32
    %700 = vector.broadcast %cst_250 : f32 to vector<8x1xf32>
    %701 = arith.divf %699, %700 : vector<8x1xf32>
    %702 = vector.broadcast %701 : vector<8x1xf32> to vector<8x32xf32>
    %703 = arith.subf %697, %702 : vector<8x32xf32>
    %704 = arith.mulf %703, %703 : vector<8x32xf32>
    %cst_251 = arith.constant dense<0.000000e+00> : vector<8xf32>
    %705 = vector.multi_reduction <add>, %704, %cst_251 [1] : vector<8x32xf32> to vector<8xf32>
    %706 = vector.shape_cast %705 : vector<8xf32> to vector<8x1xf32>
    %cst_252 = arith.constant 3.200000e+01 : f32
    %707 = vector.broadcast %cst_252 : f32 to vector<8x1xf32>
    %708 = arith.divf %706, %707 : vector<8x1xf32>
    %709 = vector.broadcast %701 : vector<8x1xf32> to vector<8x32xf32>
    %710 = arith.subf %697, %709 : vector<8x32xf32>
    %cst_253 = arith.constant 9.99999974E-6 : f32
    %711 = vector.broadcast %cst_253 : f32 to vector<8x1xf32>
    %712 = arith.addf %708, %711 : vector<8x1xf32>
    %713 = math.rsqrt %712 : vector<8x1xf32>
    %714 = vector.broadcast %713 : vector<8x1xf32> to vector<8x32xf32>
    %715 = arith.mulf %710, %714 : vector<8x32xf32>
    %c432_254 = arith.constant 432 : index
    %c0_255 = arith.constant 0 : index
    %716 = vector.load %arg3[%c432_254, %c0_255] : memref<752x128xf32, #tpu.memory_space<vmem>>, vector<32x32xf32>
    %cst_256 = arith.constant dense<0.000000e+00> : vector<8x32xf32>
    %717 = tpu.matmul %715, %716, %cst_256 {dimension_numbers = #tpu.dot_dimension_numbers<[1], [0], [0], [1], [0, 0, 1, 1], [], []>, precision = #tpu.contract_precision<fp32>} : vector<8x32xf32>, vector<32x32xf32>, vector<8x32xf32> -> vector<8x32xf32>
    %c464_257 = arith.constant 464 : index
    %c0_258 = arith.constant 0 : index
    %718 = vector.load %arg3[%c464_257, %c0_258] : memref<752x128xf32, #tpu.memory_space<vmem>>, vector<1x32xf32>
    %719 = vector.broadcast %718 : vector<1x32xf32> to vector<8x32xf32>
    %720 = arith.addf %717, %719 : vector<8x32xf32>
    %cst_259 = arith.constant 5.000000e-01 : f32
    %721 = vector.broadcast %cst_259 : f32 to vector<8x32xf32>
    %722 = arith.mulf %721, %720 : vector<8x32xf32>
    %cst_260 = arith.constant 0.707106769 : f32
    %723 = vector.broadcast %cst_260 : f32 to vector<8x32xf32>
    %724 = arith.mulf %720, %723 : vector<8x32xf32>
    %725 = math.absf %724 : vector<8x32xf32>
    %cst_261 = arith.constant 0.327591091 : f32
    %726 = vector.broadcast %cst_261 : f32 to vector<8x32xf32>
    %727 = arith.mulf %726, %725 : vector<8x32xf32>
    %cst_262 = arith.constant 1.000000e+00 : f32
    %728 = vector.broadcast %cst_262 : f32 to vector<8x32xf32>
    %729 = arith.addf %728, %727 : vector<8x32xf32>
    %730 = tpu.reciprocal %729 {approx = true} : vector<8x32xf32> -> vector<8x32xf32>
    %cst_263 = arith.constant 1.06140542 : f32
    %731 = vector.broadcast %cst_263 : f32 to vector<8x32xf32>
    %732 = arith.mulf %731, %730 : vector<8x32xf32>
    %cst_264 = arith.constant -1.45315206 : f32
    %733 = vector.broadcast %cst_264 : f32 to vector<8x32xf32>
    %734 = arith.addf %732, %733 : vector<8x32xf32>
    %735 = arith.mulf %734, %730 : vector<8x32xf32>
    %cst_265 = arith.constant 1.42141378 : f32
    %736 = vector.broadcast %cst_265 : f32 to vector<8x32xf32>
    %737 = arith.addf %735, %736 : vector<8x32xf32>
    %738 = arith.mulf %737, %730 : vector<8x32xf32>
    %cst_266 = arith.constant -0.284496725 : f32
    %739 = vector.broadcast %cst_266 : f32 to vector<8x32xf32>
    %740 = arith.addf %738, %739 : vector<8x32xf32>
    %741 = arith.mulf %740, %730 : vector<8x32xf32>
    %cst_267 = arith.constant 0.254829586 : f32
    %742 = vector.broadcast %cst_267 : f32 to vector<8x32xf32>
    %743 = arith.addf %741, %742 : vector<8x32xf32>
    %744 = arith.mulf %743, %730 : vector<8x32xf32>
    %cst_268 = arith.constant 0.000000e+00 : f32
    %745 = vector.broadcast %cst_268 : f32 to vector<8x32xf32>
    %746 = arith.subf %745, %725 : vector<8x32xf32>
    %747 = arith.mulf %746, %725 : vector<8x32xf32>
    %748 = math.exp %747 : vector<8x32xf32>
    %749 = arith.mulf %744, %748 : vector<8x32xf32>
    %cst_269 = arith.constant 1.000000e+00 : f32
    %750 = vector.broadcast %cst_269 : f32 to vector<8x32xf32>
    %751 = arith.subf %750, %749 : vector<8x32xf32>
    %cst_270 = arith.constant 0.000000e+00 : f32
    %752 = vector.broadcast %cst_270 : f32 to vector<8x32xf32>
    %753 = arith.cmpf oge, %724, %752 : vector<8x32xf32>
    %cst_271 = arith.constant 0.000000e+00 : f32
    %754 = vector.broadcast %cst_271 : f32 to vector<8x32xf32>
    %755 = arith.subf %754, %751 : vector<8x32xf32>
    %756 = arith.select %753, %751, %755 : vector<8x32xi1>, vector<8x32xf32>
    %cst_272 = arith.constant 1.000000e+00 : f32
    %757 = vector.broadcast %cst_272 : f32 to vector<8x32xf32>
    %758 = arith.addf %757, %756 : vector<8x32xf32>
    %759 = arith.mulf %722, %758 : vector<8x32xf32>
    %c472_273 = arith.constant 472 : index
    %c0_274 = arith.constant 0 : index
    %760 = vector.load %arg3[%c472_273, %c0_274] : memref<752x128xf32, #tpu.memory_space<vmem>>, vector<32x32xf32>
    %cst_275 = arith.constant dense<0.000000e+00> : vector<8x32xf32>
    %761 = tpu.matmul %759, %760, %cst_275 {dimension_numbers = #tpu.dot_dimension_numbers<[1], [0], [0], [1], [0, 0, 1, 1], [], []>, precision = #tpu.contract_precision<fp32>} : vector<8x32xf32>, vector<32x32xf32>, vector<8x32xf32> -> vector<8x32xf32>
    %c504_276 = arith.constant 504 : index
    %c0_277 = arith.constant 0 : index
    %762 = vector.load %arg3[%c504_276, %c0_277] : memref<752x128xf32, #tpu.memory_space<vmem>>, vector<1x32xf32>
    %763 = vector.broadcast %762 : vector<1x32xf32> to vector<8x32xf32>
    %764 = arith.addf %761, %763 : vector<8x32xf32>
    %765 = arith.addf %697, %764 : vector<8x32xf32>
    %cst_278 = arith.constant dense<0.000000e+00> : vector<8xf32>
    %766 = vector.multi_reduction <add>, %3, %cst_278 [1] : vector<8x32xf32> to vector<8xf32>
    %767 = vector.shape_cast %766 : vector<8xf32> to vector<8x1xf32>
    %cst_279 = arith.constant 3.200000e+01 : f32
    %768 = vector.broadcast %cst_279 : f32 to vector<8x1xf32>
    %769 = arith.divf %767, %768 : vector<8x1xf32>
    %770 = vector.broadcast %769 : vector<8x1xf32> to vector<8x32xf32>
    %771 = arith.subf %3, %770 : vector<8x32xf32>
    %772 = arith.mulf %771, %771 : vector<8x32xf32>
    %cst_280 = arith.constant dense<0.000000e+00> : vector<8xf32>
    %773 = vector.multi_reduction <add>, %772, %cst_280 [1] : vector<8x32xf32> to vector<8xf32>
    %774 = vector.shape_cast %773 : vector<8xf32> to vector<8x1xf32>
    %cst_281 = arith.constant 3.200000e+01 : f32
    %775 = vector.broadcast %cst_281 : f32 to vector<8x1xf32>
    %776 = arith.divf %774, %775 : vector<8x1xf32>
    %777 = vector.broadcast %769 : vector<8x1xf32> to vector<8x32xf32>
    %778 = arith.subf %3, %777 : vector<8x32xf32>
    %cst_282 = arith.constant 9.99999974E-6 : f32
    %779 = vector.broadcast %cst_282 : f32 to vector<8x1xf32>
    %780 = arith.addf %776, %779 : vector<8x1xf32>
    %781 = math.rsqrt %780 : vector<8x1xf32>
    %782 = vector.broadcast %781 : vector<8x1xf32> to vector<8x32xf32>
    %783 = arith.mulf %778, %782 : vector<8x32xf32>
    %c512 = arith.constant 512 : index
    %c0_283 = arith.constant 0 : index
    %784 = vector.load %arg3[%c512, %c0_283] : memref<752x128xf32, #tpu.memory_space<vmem>>, vector<32x32xf32>
    %cst_284 = arith.constant dense<0.000000e+00> : vector<8x32xf32>
    %785 = tpu.matmul %783, %784, %cst_284 {dimension_numbers = #tpu.dot_dimension_numbers<[1], [0], [0], [1], [0, 0, 1, 1], [], []>, precision = #tpu.contract_precision<fp32>} : vector<8x32xf32>, vector<32x32xf32>, vector<8x32xf32> -> vector<8x32xf32>
    %c544 = arith.constant 544 : index
    %c0_285 = arith.constant 0 : index
    %786 = vector.load %arg3[%c544, %c0_285] : memref<752x128xf32, #tpu.memory_space<vmem>>, vector<1x32xf32>
    %787 = vector.broadcast %786 : vector<1x32xf32> to vector<8x32xf32>
    %788 = arith.addf %785, %787 : vector<8x32xf32>
    %cst_286 = arith.constant dense<0.000000e+00> : vector<8xf32>
    %789 = vector.multi_reduction <add>, %765, %cst_286 [1] : vector<8x32xf32> to vector<8xf32>
    %790 = vector.shape_cast %789 : vector<8xf32> to vector<8x1xf32>
    %cst_287 = arith.constant 3.200000e+01 : f32
    %791 = vector.broadcast %cst_287 : f32 to vector<8x1xf32>
    %792 = arith.divf %790, %791 : vector<8x1xf32>
    %793 = vector.broadcast %792 : vector<8x1xf32> to vector<8x32xf32>
    %794 = arith.subf %765, %793 : vector<8x32xf32>
    %795 = arith.mulf %794, %794 : vector<8x32xf32>
    %cst_288 = arith.constant dense<0.000000e+00> : vector<8xf32>
    %796 = vector.multi_reduction <add>, %795, %cst_288 [1] : vector<8x32xf32> to vector<8xf32>
    %797 = vector.shape_cast %796 : vector<8xf32> to vector<8x1xf32>
    %cst_289 = arith.constant 3.200000e+01 : f32
    %798 = vector.broadcast %cst_289 : f32 to vector<8x1xf32>
    %799 = arith.divf %797, %798 : vector<8x1xf32>
    %800 = vector.broadcast %792 : vector<8x1xf32> to vector<8x32xf32>
    %801 = arith.subf %765, %800 : vector<8x32xf32>
    %cst_290 = arith.constant 9.99999974E-6 : f32
    %802 = vector.broadcast %cst_290 : f32 to vector<8x1xf32>
    %803 = arith.addf %799, %802 : vector<8x1xf32>
    %804 = math.rsqrt %803 : vector<8x1xf32>
    %805 = vector.broadcast %804 : vector<8x1xf32> to vector<8x32xf32>
    %806 = arith.mulf %801, %805 : vector<8x32xf32>
    %c552 = arith.constant 552 : index
    %c0_291 = arith.constant 0 : index
    %807 = vector.load %arg3[%c552, %c0_291] : memref<752x128xf32, #tpu.memory_space<vmem>>, vector<32x64xf32>
    %cst_292 = arith.constant dense<0.000000e+00> : vector<8x64xf32>
    %808 = tpu.matmul %806, %807, %cst_292 {dimension_numbers = #tpu.dot_dimension_numbers<[1], [0], [0], [1], [0, 0, 1, 1], [], []>, precision = #tpu.contract_precision<fp32>} : vector<8x32xf32>, vector<32x64xf32>, vector<8x64xf32> -> vector<8x64xf32>
    %c584 = arith.constant 584 : index
    %c0_293 = arith.constant 0 : index
    %809 = vector.load %arg3[%c584, %c0_293] : memref<752x128xf32, #tpu.memory_space<vmem>>, vector<1x64xf32>
    %810 = vector.broadcast %809 : vector<1x64xf32> to vector<8x64xf32>
    %811 = arith.addf %808, %810 : vector<8x64xf32>
    %812 = vector.extract_strided_slice %811 {offsets = [0, 0], sizes = [8, 32], strides = [1, 1]} : vector<8x64xf32> to vector<8x32xf32>
    %813 = vector.extract_strided_slice %811 {offsets = [0, 32], sizes = [8, 32], strides = [1, 1]} : vector<8x64xf32> to vector<8x32xf32>
    %c592 = arith.constant 592 : index
    %c0_294 = arith.constant 0 : index
    %814 = vector.load %arg3[%c592, %c0_294] : memref<752x128xf32, #tpu.memory_space<vmem>>, vector<32x32xf32>
    %cst_295 = arith.constant dense<0.000000e+00> : vector<8x8xf32>
    %815 = tpu.matmul %788, %812, %cst_295 {dimension_numbers = #tpu.dot_dimension_numbers<[1], [1], [0], [0], [0, 0, 1, 0], [], []>, precision = #tpu.contract_precision<fp32>} : vector<8x32xf32>, vector<8x32xf32>, vector<8x8xf32> -> vector<8x8xf32>
    %cst_296 = arith.constant dense<0xFF800000> : vector<8xf32>
    %816 = vector.multi_reduction <maximumf>, %815, %cst_296 [1] : vector<8x8xf32> to vector<8xf32>
    %817 = vector.shape_cast %816 : vector<8xf32> to vector<8x1xf32>
    %818 = vector.broadcast %817 : vector<8x1xf32> to vector<8x8xf32>
    %819 = arith.subf %815, %818 : vector<8x8xf32>
    %820 = math.exp %819 : vector<8x8xf32>
    %cst_297 = arith.constant dense<0.000000e+00> : vector<8xf32>
    %821 = vector.multi_reduction <add>, %820, %cst_297 [1] : vector<8x8xf32> to vector<8xf32>
    %822 = vector.shape_cast %821 : vector<8xf32> to vector<8x1xf32>
    %823 = vector.broadcast %822 : vector<8x1xf32> to vector<8x8xf32>
    %824 = arith.divf %820, %823 : vector<8x8xf32>
    %cst_298 = arith.constant dense<0.000000e+00> : vector<8x32xf32>
    %825 = tpu.matmul %824, %813, %cst_298 {dimension_numbers = #tpu.dot_dimension_numbers<[1], [0], [0], [1], [0, 0, 1, 1], [], []>, precision = #tpu.contract_precision<fp32>} : vector<8x8xf32>, vector<8x32xf32>, vector<8x32xf32> -> vector<8x32xf32>
    %cst_299 = arith.constant dense<0.000000e+00> : vector<8x32xf32>
    %826 = tpu.matmul %825, %814, %cst_299 {dimension_numbers = #tpu.dot_dimension_numbers<[1], [0], [0], [1], [0, 0, 1, 1], [], []>, precision = #tpu.contract_precision<fp32>} : vector<8x32xf32>, vector<32x32xf32>, vector<8x32xf32> -> vector<8x32xf32>
    %c624 = arith.constant 624 : index
    %c0_300 = arith.constant 0 : index
    %827 = vector.load %arg3[%c624, %c0_300] : memref<752x128xf32, #tpu.memory_space<vmem>>, vector<1x32xf32>
    %828 = vector.broadcast %827 : vector<1x32xf32> to vector<8x32xf32>
    %829 = arith.addf %826, %828 : vector<8x32xf32>
    %cst_301 = arith.constant dense<0.000000e+00> : vector<8xf32>
    %830 = vector.multi_reduction <add>, %829, %cst_301 [1] : vector<8x32xf32> to vector<8xf32>
    %831 = vector.shape_cast %830 : vector<8xf32> to vector<8x1xf32>
    %cst_302 = arith.constant 3.200000e+01 : f32
    %832 = vector.broadcast %cst_302 : f32 to vector<8x1xf32>
    %833 = arith.divf %831, %832 : vector<8x1xf32>
    %834 = vector.broadcast %833 : vector<8x1xf32> to vector<8x32xf32>
    %835 = arith.subf %829, %834 : vector<8x32xf32>
    %836 = arith.mulf %835, %835 : vector<8x32xf32>
    %cst_303 = arith.constant dense<0.000000e+00> : vector<8xf32>
    %837 = vector.multi_reduction <add>, %836, %cst_303 [1] : vector<8x32xf32> to vector<8xf32>
    %838 = vector.shape_cast %837 : vector<8xf32> to vector<8x1xf32>
    %cst_304 = arith.constant 3.200000e+01 : f32
    %839 = vector.broadcast %cst_304 : f32 to vector<8x1xf32>
    %840 = arith.divf %838, %839 : vector<8x1xf32>
    %841 = vector.broadcast %833 : vector<8x1xf32> to vector<8x32xf32>
    %842 = arith.subf %829, %841 : vector<8x32xf32>
    %cst_305 = arith.constant 9.99999974E-6 : f32
    %843 = vector.broadcast %cst_305 : f32 to vector<8x1xf32>
    %844 = arith.addf %840, %843 : vector<8x1xf32>
    %845 = math.rsqrt %844 : vector<8x1xf32>
    %846 = vector.broadcast %845 : vector<8x1xf32> to vector<8x32xf32>
    %847 = arith.mulf %842, %846 : vector<8x32xf32>
    %c632 = arith.constant 632 : index
    %c0_306 = arith.constant 0 : index
    %848 = vector.load %arg3[%c632, %c0_306] : memref<752x128xf32, #tpu.memory_space<vmem>>, vector<32x32xf32>
    %cst_307 = arith.constant dense<0.000000e+00> : vector<8x32xf32>
    %849 = tpu.matmul %847, %848, %cst_307 {dimension_numbers = #tpu.dot_dimension_numbers<[1], [0], [0], [1], [0, 0, 1, 1], [], []>, precision = #tpu.contract_precision<fp32>} : vector<8x32xf32>, vector<32x32xf32>, vector<8x32xf32> -> vector<8x32xf32>
    %c664 = arith.constant 664 : index
    %c0_308 = arith.constant 0 : index
    %850 = vector.load %arg3[%c664, %c0_308] : memref<752x128xf32, #tpu.memory_space<vmem>>, vector<1x32xf32>
    %851 = vector.broadcast %850 : vector<1x32xf32> to vector<8x32xf32>
    %852 = arith.addf %849, %851 : vector<8x32xf32>
    %cst_309 = arith.constant 5.000000e-01 : f32
    %853 = vector.broadcast %cst_309 : f32 to vector<8x32xf32>
    %854 = arith.mulf %853, %852 : vector<8x32xf32>
    %cst_310 = arith.constant 0.707106769 : f32
    %855 = vector.broadcast %cst_310 : f32 to vector<8x32xf32>
    %856 = arith.mulf %852, %855 : vector<8x32xf32>
    %857 = math.absf %856 : vector<8x32xf32>
    %cst_311 = arith.constant 0.327591091 : f32
    %858 = vector.broadcast %cst_311 : f32 to vector<8x32xf32>
    %859 = arith.mulf %858, %857 : vector<8x32xf32>
    %cst_312 = arith.constant 1.000000e+00 : f32
    %860 = vector.broadcast %cst_312 : f32 to vector<8x32xf32>
    %861 = arith.addf %860, %859 : vector<8x32xf32>
    %862 = tpu.reciprocal %861 {approx = true} : vector<8x32xf32> -> vector<8x32xf32>
    %cst_313 = arith.constant 1.06140542 : f32
    %863 = vector.broadcast %cst_313 : f32 to vector<8x32xf32>
    %864 = arith.mulf %863, %862 : vector<8x32xf32>
    %cst_314 = arith.constant -1.45315206 : f32
    %865 = vector.broadcast %cst_314 : f32 to vector<8x32xf32>
    %866 = arith.addf %864, %865 : vector<8x32xf32>
    %867 = arith.mulf %866, %862 : vector<8x32xf32>
    %cst_315 = arith.constant 1.42141378 : f32
    %868 = vector.broadcast %cst_315 : f32 to vector<8x32xf32>
    %869 = arith.addf %867, %868 : vector<8x32xf32>
    %870 = arith.mulf %869, %862 : vector<8x32xf32>
    %cst_316 = arith.constant -0.284496725 : f32
    %871 = vector.broadcast %cst_316 : f32 to vector<8x32xf32>
    %872 = arith.addf %870, %871 : vector<8x32xf32>
    %873 = arith.mulf %872, %862 : vector<8x32xf32>
    %cst_317 = arith.constant 0.254829586 : f32
    %874 = vector.broadcast %cst_317 : f32 to vector<8x32xf32>
    %875 = arith.addf %873, %874 : vector<8x32xf32>
    %876 = arith.mulf %875, %862 : vector<8x32xf32>
    %cst_318 = arith.constant 0.000000e+00 : f32
    %877 = vector.broadcast %cst_318 : f32 to vector<8x32xf32>
    %878 = arith.subf %877, %857 : vector<8x32xf32>
    %879 = arith.mulf %878, %857 : vector<8x32xf32>
    %880 = math.exp %879 : vector<8x32xf32>
    %881 = arith.mulf %876, %880 : vector<8x32xf32>
    %cst_319 = arith.constant 1.000000e+00 : f32
    %882 = vector.broadcast %cst_319 : f32 to vector<8x32xf32>
    %883 = arith.subf %882, %881 : vector<8x32xf32>
    %cst_320 = arith.constant 0.000000e+00 : f32
    %884 = vector.broadcast %cst_320 : f32 to vector<8x32xf32>
    %885 = arith.cmpf oge, %856, %884 : vector<8x32xf32>
    %cst_321 = arith.constant 0.000000e+00 : f32
    %886 = vector.broadcast %cst_321 : f32 to vector<8x32xf32>
    %887 = arith.subf %886, %883 : vector<8x32xf32>
    %888 = arith.select %885, %883, %887 : vector<8x32xi1>, vector<8x32xf32>
    %cst_322 = arith.constant 1.000000e+00 : f32
    %889 = vector.broadcast %cst_322 : f32 to vector<8x32xf32>
    %890 = arith.addf %889, %888 : vector<8x32xf32>
    %891 = arith.mulf %854, %890 : vector<8x32xf32>
    %c672 = arith.constant 672 : index
    %c0_323 = arith.constant 0 : index
    %892 = vector.load %arg3[%c672, %c0_323] : memref<752x128xf32, #tpu.memory_space<vmem>>, vector<32x32xf32>
    %cst_324 = arith.constant dense<0.000000e+00> : vector<8x32xf32>
    %893 = tpu.matmul %891, %892, %cst_324 {dimension_numbers = #tpu.dot_dimension_numbers<[1], [0], [0], [1], [0, 0, 1, 1], [], []>, precision = #tpu.contract_precision<fp32>} : vector<8x32xf32>, vector<32x32xf32>, vector<8x32xf32> -> vector<8x32xf32>
    %c704 = arith.constant 704 : index
    %c0_325 = arith.constant 0 : index
    %894 = vector.load %arg3[%c704, %c0_325] : memref<752x128xf32, #tpu.memory_space<vmem>>, vector<1x32xf32>
    %895 = vector.broadcast %894 : vector<1x32xf32> to vector<8x32xf32>
    %896 = arith.addf %893, %895 : vector<8x32xf32>
    %897 = arith.addf %829, %896 : vector<8x32xf32>
    %c712 = arith.constant 712 : index
    %c0_326 = arith.constant 0 : index
    %898 = vector.load %arg3[%c712, %c0_326] : memref<752x128xf32, #tpu.memory_space<vmem>>, vector<32x16xf32>
    %cst_327 = arith.constant dense<0.000000e+00> : vector<8x16xf32>
    %899 = tpu.matmul %897, %898, %cst_327 {dimension_numbers = #tpu.dot_dimension_numbers<[1], [0], [0], [1], [0, 0, 1, 1], [], []>, precision = #tpu.contract_precision<fp32>} : vector<8x32xf32>, vector<32x16xf32>, vector<8x16xf32> -> vector<8x16xf32>
    %c744 = arith.constant 744 : index
    %c0_328 = arith.constant 0 : index
    %900 = vector.load %arg3[%c744, %c0_328] : memref<752x128xf32, #tpu.memory_space<vmem>>, vector<1x16xf32>
    %901 = vector.broadcast %900 : vector<1x16xf32> to vector<8x16xf32>
    %902 = arith.addf %899, %901 : vector<8x16xf32>
    %c0_329 = arith.constant 0 : index
    %c0_330 = arith.constant 0 : index
    %c0_331 = arith.constant 0 : index
    %903 = vector.load %arg4[%c0_329, %c0_330, %c0_331] : memref<1x8x16xf32, #tpu.memory_space<vmem>>, vector<1x8x16xf32>
    %904 = vector.shape_cast %903 : vector<1x8x16xf32> to vector<8x16xf32>
    %905 = vector.shape_cast %902 : vector<8x16xf32> to vector<1x8x16xf32>
    tpu.vector_store %arg4[%c0_329, %c0_330, %c0_331], %905 {strides = array<i32>} : memref<1x8x16xf32, #tpu.memory_space<vmem>>, vector<1x8x16xf32>,
    return
  }
  func.func @transform_0(%arg0: i32) -> (i32, i32, i32) {
    %c0_i32 = arith.constant 0 : i32
    %c0_i32_0 = arith.constant 0 : i32
    %c0_i32_1 = arith.constant 0 : i32
    return %arg0, %c0_i32, %c0_i32_0 : i32, i32, i32
  }
  func.func @transform_1(%arg0: i32) -> (i32, i32, i32) {
    %c0_i32 = arith.constant 0 : i32
    %c0_i32_0 = arith.constant 0 : i32
    %c0_i32_1 = arith.constant 0 : i32
    return %arg0, %c0_i32, %c0_i32_0 : i32, i32, i32
  }
  func.func @transform_2(%arg0: i32) -> (i32, i32) {
    %c0_i32 = arith.constant 0 : i32
    %c0_i32_0 = arith.constant 0 : i32
    %c0_i32_1 = arith.constant 0 : i32
    return %c0_i32, %c0_i32_0 : i32, i32
  }
  func.func @transform_3(%arg0: i32) -> (i32, i32, i32) {
    %c0_i32 = arith.constant 0 : i32
    %c0_i32_0 = arith.constant 0 : i32
    %c0_i32_1 = arith.constant 0 : i32
    return %arg0, %c0_i32, %c0_i32_0 : i32, i32, i32
  }
}

</mosaic_0001>

<bundles_post_ra>
// kernel: _lambda_.1
= control target key start
LH: loop header
LB: loop body
LE: loop exit
PB: predicated region body
PF: predicated region fallthrough
CT: control target
= control target key end

     0   :  { %8 = vsyncpa [#allocation3], 0  ;;  %s39411_s0 = inlined_call_operand.vmem [shape: f32[2,32,16], index: 0, kind: input, shape index: {}]   ;;  %s39412_s1 = inlined_call_operand.vmem [shape: f32[2,8,32], index: 1, kind: input, shape index: {}]   ;;  %s39413_s2 = inlined_call_operand.hbm [shape: f32[752,128], index: 2, kind: input, shape index: {}]   ;;  %s39414_s3 = inlined_call_operand.hbm [shape: f32[2,8,16], index: 3, kind: output, shape index: {}]  }
   0x1   :  { %9 = vsyncpa [#allocation4], 0 }
   0x2   :  { %11 = vsyncpa [#allocation4 + $0x1], 0  ;;  %s36981_s12 = smov 0   ;;  %s36983_s13 = smov 0  }
   0x3   :  { %s36985_s14 = smov 0   ;;  %s36987_s15 = smov 0  }
   0x4 LB: > { %s37002_s16 = sadd.s32 4294967295, %s36938_s15   ;;  %s30810_s17 = sadd.s32 4294967294, %s36938_s15   ;;  %s36938_s15 = sphi %s36987_s15, %s39518_s15   ;;  %s36934_s14 = sphi %s36985_s14, %s39517_s14   ;;  %s36930_s13 = sphi %s36983_s13, %s39516_s13   ;;  %s36926_s12 = sphi %s36981_s12, %s39515_s12  }
   0x5   : > { %s37006_s18 = sadd.s32 1, %s36938_s15   ;;  %s97_s19 = sadd.s32 1, %s36934_s14 }
   0x6   : > { %s94_s20 = ssub.s32 %s36938_s15, %s37006_s18  ;;  %p107_p0 = scmp.ne.s32.totalorder %s36934_s14, %s36930_s13 }
   0x7   : > { %p95_p1 = scmp.eq.s32.totalorder %s94_s20, 0  ;;  %p108_p2 = scmp.eq.s32.totalorder %s37002_s16, 1 }
   0x8   : > { %p113_p3 = scmp.ne.s32.totalorder %s36930_s13, %s36926_s12  ;;  %p114_p4 = scmp.eq.s32.totalorder %s30810_s17, 1 }
   0x9   : > { %s37017_s21 = scalar_select %p95_p1, %s36934_s14, %s97_s19  }
   0xa   : > { %p37019_p5 = por %p108_p2, %p107_p0  ;;  %p37023_p6 = por %p114_p4, %p113_p3 }
   0xb   : > { %p30811_p7 = scmp.ge.s32.totalorder %s36938_s15, 1  ;;  %p121_p8 = scmp.lt.s32.totalorder %s36938_s15, 3 }
   0xc   : > { %s39452_s22 = scalar_select %p37019_p5, 1, 0 }
   0xd   : > { %s39453_s23 = scalar_select %p37023_p6, 1, 0 }
   0xe   : > { %p39415_p9 = scmp.eq.s32.totalorder %s37002_s16, 0  ;;  %p37030_p10 = pnand %p30811_p7, %p121_p8 }
   0xf   : > { %s36940_s25 = smov [#allocation2]   ;;  %s36844_s30 = scalar_lea.hbm %s39413_s2, 12032 }
  0x10   : > { %s39454_s24 = scalar_select %p37030_p10, 1, 0 }
  0x11   : > { %s133_s26 = sshll.u32 %s36940_s25, 4  ;;  %p36642_p11 = pneg %p37030_p10  ;;  %s134_s26 = int_to_ptr.vmem [resolvable:$true] %s133_s26 }
  0x12   : > { %p36845_p13 = scmp.ne.s32.totalorder %s39413_s2, %s36844_s30  ;;  %p36851_p3 = scmp.lt.u32.totalorder %s36844_s30, %s39413_s2 }
  0x13   : > { %p37038_p12 = pnand %p39415_p9, %p36642_p11 }
  0x15   : > { %p36846_p0 = pneg %p37038_p12 }
  0x17   : > { %p36847_p1 = pnand %p36846_p0, %p36845_p13 }
  0x19   : > { %p36848_p2 = pneg %p36847_p1 }
  0x1b   : > { %p36853_p4 = pnand %p36851_p3, %p36848_p2 }
  0x1d   : > { %36856 = shalt.err (!%p36853_p4)
}
  0x1e   : > { %s36857_s8 = scalar_lea.vmem %s134_s26, 12032  ;;  %p36865_p9 = scmp.lt.s32.totalorder %s134_s26, %s134_s26 }
  0x1f   : > { %p36858_p7 = scmp.ne.s32.totalorder %s134_s26, %s36857_s8  ;;  %p36866_p6 = scmp.lt.s32.totalorder %s36857_s8, %s36857_s8 }
  0x21   : > { %p36860_p8 = pnand %p36858_p7, %p36846_p0  ;;  %p36867_p5 = por %p36866_p6, %p36865_p9 }
  0x23   : > { %p36861_p11 = pneg %p36860_p8 }
  0x25   : > { %p36868_p10 = pnand %p36867_p5, %p36861_p11 }
  0x27   : > { %36871 = shalt.err (!%p36868_p10)
}
  0x28   : > { %s36941_s9 = smov 128   ;;  %s36942_s10 = smov 8  }
  0x29   : > { %36645 = dma.hbm_to_vmem [thread:$0]  (!%p37038_p12), %s39413_s2, 12032, %s134_s26, [#allocation3], %s36941_s9, %s36941_s9, %s36942_s10  }
  0x2a   : > { %p39456_p13 = scmp.ne.s32.totalorder %s39454_s24, 0 }
  0x2c   : > { %164 = sbr.rel (%p39456_p13) target bundleno = 17417 (0x4409), region = 32 }
  0x33   : > { %p39457_p1 = scmp.eq.s32.totalorder %s37002_s16, 0 }
  0x35   : > { %36917 = dma.done.wait (%p39457_p1), [#allocation3], 12032   ;;  %p39458_p0 = pmov %p39457_p1 }
  0x36   : > { %p192_p5 = scmp.lt.s32.totalorder %s37002_s16, 1  ;;  %vm207_vm0 = vcmask 261120   ;;  %vm719_vm1 = vcmask 130048   ;;  %v206_v0 = vld [vmem:[#allocation2] sm:$0xff]  ;;  %v773_v35 = vld [vmem:[#allocation2 + $0x30] sm:$0xff]  ;;  %v774_v36 = vld [vmem:[#allocation2 + $0x38] sm:$0xff] }
  0x37   : > { %36919 = vsyncadd (%p39458_p0), [#allocation3], 4294955264  ;;  %v208_v3 = vsel %vm207_vm0, %v206_v0, 0.0  ;;  %v793_v37 = vand.u32 4294901760, %v773_v35  ;;  %v796_v38 = vand.u32 4294901760, %v774_v36  ;;  %v222_v41 = vld [vmem:[#allocation2 + $0x8] sm:$0xff] }
  0x38   : > { %s37066_s19 = scalar_select %p192_p5, %s37002_s16, 1  ;;  %209 = vadd.xlane.f32.xlu0 %v208_v3  ;;  %v223_v42 = vld [vmem:[#allocation2 + $0x10] sm:$0xff]  ;;  %v39418_v44 = vmov 0.0|0.0   ;;  %v235_v45 = vand.u32 4294901760, %v222_v41  ;;  %v224_v57 = vld [vmem:[#allocation2 + $0x18] sm:$0xff]  ;;  %v225_v58 = vld [vmem:[#allocation2 + $0x20] sm:$0xff] }
  0x39   : > { %v901_v39 = vsub.f32 %v773_v35, %v793_v37  ;;  %v908_v40 = vsub.f32 %v774_v36, %v796_v38  ;;  %v37102_v43 = vpack.c.bf16 %v796_v38, %v793_v37  ;;  %35056 = vmatprep.subr.bf16.mxu0 %v39418_v44  ;;  %v238_v46 = vand.u32 4294901760, %v223_v42  ;;  %s36946_s24 = smov 96   ;;  %s36947_s28 = smov 120  }
  0x3a   : > { %s30843_s20 = sshll.u32 %s37066_s19, 5  ;;  %v37107_v50 = vsub.f32 %v222_v41, %v235_v45  ;;  %v241_v59 = vand.u32 4294901760, %v224_v57  ;;  %v244_v60 = vand.u32 4294901760, %v225_v58  ;;  %vm36944_vm2 = vmmov 0   ;;  %s36948_s29 = smov 88  }
  0x3b   : > { %s196_s26 = scalar_lea.vmem %s39411_s0, %s30843_s20  ;;  %v902_v47 = vand.u32 4294901760, %v901_v39  ;;  %v909_v48 = vand.u32 4294901760, %v908_v40  ;;  %v37105_v49 = vpack.c.bf16 %v238_v46, %v235_v45  ;;  %v37109_v51 = vsub.f32 %v223_v42, %v238_v46  ;;  %s36949_s30 = smov 80  }
  0x3c   : > { %v202_v1 = vld [vmem:[%s196_s26 + $0x8] sm:$0xff]  ;;  %v201_v2 = vld [vmem:[%s196_s26] sm:$0xff]  ;;  %v203_v5 = vld [vmem:[%s196_s26 + $0x10] sm:$0xff]  ;;  %v316_v61 = vand.u32 4294901760, %v37107_v50  ;;  %v37115_v63 = vpack.c.bf16 %v244_v60, %v241_v59  ;;  %s36950_s4 = smov 112   ;;  %s36951_s5 = smov 72  }
  0x3d   : > { %v723_v4 = vsel %vm719_vm1, %v202_v1, 0.0  ;;  %v720_v6 = vsel %vm719_vm1, %v201_v2, 0.0  ;;  %v726_v7 = vsel %vm719_vm1, %v203_v5, 0.0  ;;  %v204_v8 = vld [vmem:[%s196_s26 + $0x18] sm:$0xff]  ;;  %v903_v52 = vsub.f32 %v901_v39, %v902_v47  ;;  %35058 = vmatpush3.bf16.msra.mxu0 %v37105_v49  ;;  %s36952_s6 = smov 104   ;;  %s36953_s7 = smov 64  }
  0x3e   : > { %724 = vadd.xlane.f32.xlu1 %v723_v4  ;;  %721 = vadd.xlane.f32.xlu0 %v720_v6  ;;  %v729_v9 = vsel %vm719_vm1, %v204_v8, 0.0  ;;  %v910_v53 = vsub.f32 %v908_v40, %v909_v48  ;;  %v323_v62 = vand.u32 4294901760, %v37109_v51  ;;  %v39420_v6 = vmov 0.0   ;;  %s36954_s8 = smov 56   ;;  %s36955_s9 = smov 48  }
  0x3f   : > { %v904_v54 = vand.u32 4294901760, %v903_v52  ;;  %35059 = vmatprep.subr.bf16.mxu0 %v39418_v44  ;;  %32136 = vmatprep.mubr.msk.f32.mxu0 %vm36944_vm2, %v39420_v6  ;;  %vm4440_vm4 = vcmask 64512   ;;  %s36956_s10 = smov 40   ;;  %s36957_s11 = smov 8   ;;  %vm8119_vm5 = vcmask 195584  }
  0x40   : > { %v911_v55 = vand.u32 4294901760, %v910_v53  ;;  %v324_v3 = vsub.f32 %v37109_v51, %v323_v62  ;;  %s36958_s17 = smov 16   ;;  %s36959_s20 = smov 24  }
  0x41   : > { %35061 = vmatpush3.bf16.msra.mxu0 %v37115_v63  ;;  %s30819_s25 = sshll.u32 %s37066_s19, 3  ;;  %s189_s19 = sand.u32 1, %s36930_s13  }
  0x42   : > { %727 = vadd.xlane.f32.xlu1 %v726_v7  ;;  %730 = vadd.xlane.f32.xlu0 %v729_v9  ;;  %v35096_v56 = vpack.c.bf16 %v911_v55, %v904_v54  ;;  %v325_v7 = vand.u32 4294901760, %v324_v3  ;;  %v35100_v9 = vpack.c.bf16 %v908_v40, %v901_v39  ;;  %p39513_p9 = scmp.ne.s32.totalorder %s39452_s22, 0 }
  0x43   : > { %35062 = vmatprep.subr.bf16.mxu0 %v39418_v44 }
  0x44   : > { %35097 = vmatprep.subr.bf16.mxu1 %v35096_v56 }
  0x45   : > { %35099 = vmatpush3.bf16.msra.mxu1 %v35096_v56 }
  0x46   : > { %35101 = vmatprep.subr.bf16.mxu1 %v35100_v9 }
  0xc5   : > { %v210_v10 = vpop.xlane.xlu0 %209 }
  0xc6   : > { %v212_v12 = vmul.f32 0.03125, %v210_v10 }
  0xc8   : > { %v37077_v14 = vsub.f32 %v206_v0, %v212_v12  ;;  %v37117_v0 = vsub.f32 %v224_v57, %v241_v59 }
  0xca   : > { %v214_v19 = vmul.f32 %v37077_v14, %v37077_v14 }
  0xcb   : > { %v725_v11 = vpop.xlane.xlu1 %724  ;;  %v722_v16 = vpop.xlane.xlu0 %721 }
  0xcc   : > { %v734_v13 = vmul.f32 0.0625, %v725_v11  ;;  %v733_v18 = vmul.f32 0.0625, %v722_v16  ;;  %v215_v23 = vsel %vm207_vm0, %v214_v19, 0.0 }
  0xcd   : > { %216 = vadd.xlane.f32.xlu1 %v215_v23 }
  0xce   : > { %v37079_v15 = vsub.f32 %v202_v1, %v734_v13  ;;  %v37085_v22 = vsub.f32 %v201_v2, %v733_v18  ;;  %v37119_v1 = vsub.f32 %v225_v58, %v244_v60  ;;  %v317_v2 = vsub.f32 %v37107_v50, %v316_v61 }
  0xcf   : > { %v728_v17 = vpop.xlane.xlu1 %727  ;;  %v731_v25 = vpop.xlane.xlu0 %730  ;;  %v35069_v18 = vpack.c.bf16 %v37109_v51, %v37107_v50 }
  0xd0   : > { %v735_v20 = vmul.f32 0.0625, %v728_v17  ;;  %v742_v21 = vmul.f32 %v37079_v15, %v37079_v15  ;;  %v736_v26 = vmul.f32 0.0625, %v731_v25  ;;  %v741_v28 = vmul.f32 %v37085_v22, %v37085_v22 }
  0xd1   : > { %v318_v4 = vand.u32 4294901760, %v317_v2  ;;  %v35072_v19 = vpack.c.bf16 %v37119_v1, %v37117_v0 }
  0xd2   : > { %v37088_v24 = vsub.f32 %v203_v5, %v735_v20  ;;  %v748_v27 = vsel %vm719_vm1, %v742_v21, 0.0  ;;  %v37095_v30 = vsub.f32 %v204_v8, %v736_v26  ;;  %v745_v31 = vsel %vm719_vm1, %v741_v28, 0.0 }
  0xd3   : > { %749 = vadd.xlane.f32.xlu1 %v748_v27  ;;  %746 = vadd.xlane.f32.xlu0 %v745_v31  ;;  %v330_v5 = vand.u32 4294901760, %v37117_v0  ;;  %v337_v8 = vand.u32 4294901760, %v37119_v1  ;;  %v35063_v11 = vpack.c.bf16 %v325_v7, %v318_v4  ;;  %v37137_v20 = vpack.c.bf16 %v909_v48, %v902_v47 }
  0xd4   : > { %v743_v29 = vmul.f32 %v37088_v24, %v37088_v24  ;;  %v744_v33 = vmul.f32 %v37095_v30, %v37095_v30  ;;  %v37139_v21 = vpack.c.bf16 %v323_v62, %v316_v61 }
  0xd5   : > { %v331_v10 = vsub.f32 %v37117_v0, %v330_v5  ;;  %v338_v12 = vsub.f32 %v37119_v1, %v337_v8  ;;  %v37141_v23 = vpack.c.bf16 %v337_v8, %v330_v5 }
  0xd6   : > { %v751_v32 = vsel %vm719_vm1, %v743_v29, 0.0  ;;  %v754_v34 = vsel %vm719_vm1, %v744_v33, 0.0 }
  0xd7   : > { %752 = vadd.xlane.f32.xlu0 %v751_v32  ;;  %755 = vadd.xlane.f32.xlu1 %v754_v34  ;;  %v332_v13 = vand.u32 4294901760, %v331_v10  ;;  %v339_v16 = vand.u32 4294901760, %v338_v12 }
  0xd9   : > { %v37131_v17 = vpack.c.bf16 %v339_v16, %v332_v13 }
 0x15a   : > { %v217_v25 = vpop.xlane.xlu1 %216 }
 0x15b   : > { %v218_v26 = vmul.f32 0.03125, %v217_v25  ;;  %v30821_v25 = vld [vmem:[#allocation2 + $0x40] ss:$0 sm:$0xff] }
 0x15d   : > { %v219_v27 = vadd.f32 1e-05, %v218_v26 }
 0x15f   : > { %36705 = vrsqrt.f32 %v219_v27 }
 0x160   : > { %v750_v28 = vpop.xlane.xlu1 %749  ;;  %v747_v29 = vpop.xlane.xlu0 %746 }
 0x161   : > { %v758_v31 = vmul.f32 0.0625, %v750_v28  ;;  %v757_v32 = vmul.f32 0.0625, %v747_v29 }
 0x163   : > { %v762_v33 = vadd.f32 1e-05, %v758_v31  ;;  %v761_v34 = vadd.f32 1e-05, %v757_v32 }
 0x164   : > { %v756_v35 = vpop.xlane.xlu1 %755  ;;  %v753_v36 = vpop.xlane.xlu0 %752 }
 0x165   : > { %36707 = vrsqrt.f32 %v762_v33  ;;  %v760_v37 = vmul.f32 0.0625, %v756_v35  ;;  %v759_v38 = vmul.f32 0.0625, %v753_v36 }
 0x166   : > { %36709 = vrsqrt.f32 %v761_v34 }
 0x167   : > { %v764_v39 = vadd.f32 1e-05, %v760_v37  ;;  %v763_v40 = vadd.f32 1e-05, %v759_v38 }
 0x169   : > { %36711 = vrsqrt.f32 %v764_v39  ;;  %v36706_v41 = vpop.eup %36705 }
 0x16a   : > { %36713 = vrsqrt.f32 %v763_v40  ;;  %v221_v42 = vmul.f32 %v36706_v41, %v37077_v14 }
 0x16c   : > { %v232_v45 = vsel %vm207_vm0, %v221_v42, 0 }
 0x16d   : > { %v37145_v47 = vand.u32 4294901760, %v232_v45 }
 0x16f   : > { %v36708_v46 = vpop.eup %36707  ;;  %v37150_v54 = vsub.f32 %v232_v45, %v37145_v47 }
 0x170   : > { %v36710_v48 = vpop.eup %36709  ;;  %v770_v52 = vmul.f32 %v36708_v46, %v37079_v15 }
 0x171   : > { %v769_v53 = vmul.f32 %v36710_v48, %v37085_v22  ;;  %v305_v14 = vand.u32 4294901760, %v37150_v54 }
 0x172   : > { %v784_v55 = vsel %vm719_vm1, %v770_v52, 0 }
 0x173   : > { %v36712_v56 = vpop.eup %36711  ;;  %v781_v57 = vsel %vm719_vm1, %v769_v53, 0  ;;  %v37154_v58 = vand.u32 4294901760, %v784_v55  ;;  %v306_v15 = vsub.f32 %v37150_v54, %v305_v14 }
 0x174   : > { %v36714_v59 = vpop.eup %36713  ;;  %v859_v60 = vand.u32 4294901760, %v781_v57  ;;  %v772_v61 = vmul.f32 %v36712_v56, %v37095_v30 }
 0x175   : > { %v771_v22 = vmul.f32 %v36714_v59, %v37088_v24  ;;  %v307_v2 = vand.u32 4294901760, %v306_v15  ;;  %v870_v24 = vsub.f32 %v784_v55, %v37154_v58 }
 0x176   : > { %32208 = vmatprep.mubr.f32.mxu1 %v859_v60  ;;  %v790_v62 = vsel %vm719_vm1, %v772_v61, 0  ;;  %v860_v30 = vsub.f32 %v781_v57, %v859_v60 }
 0x177   : > { %32209 = vmatmul.mubr.f32.vlgmr.msra.gmra.mrb[0].mxu1 %v37154_v58  ;;  %v787_v3 = vsel %vm719_vm1, %v771_v22, 0  ;;  %v889_v4 = vand.u32 4294901760, %v790_v62  ;;  %32137 = vmatmul.mubr.f32.vlgmr.msra.gmra.mrb[0].mxu0 %v307_v2  ;;  %v871_v10 = vand.u32 4294901760, %v870_v24 }
 0x178   : > { %v879_v5 = vand.u32 4294901760, %v787_v3  ;;  %35103 = vmatpush3.bf16.msra.mxu1 %v35100_v9  ;;  %35064 = vmatpush3.bf16.msra.mxu0 %v35063_v11  ;;  %v861_v9 = vand.u32 4294901760, %v860_v30 }
 0x179   : > { %35105 = vmatprep.subr.bf16.mxu1 %v37102_v43  ;;  %35065 = vmatprep.subr.bf16.mxu0 %v39418_v44  ;;  %v890_v8 = vsub.f32 %v790_v62, %v889_v4  ;;  %v872_v0 = vsub.f32 %v870_v24, %v871_v10 }
 0x17a   : > { %32211 = vmatprep.mubr.f32.mxu1 %v879_v5  ;;  %32147 = vmatprep.mubr.msk.f32.mxu0 %vm36944_vm2, %v39420_v6  ;;  %v880_v7 = vsub.f32 %v787_v3, %v879_v5  ;;  %v862_v51 = vsub.f32 %v860_v30, %v861_v9 }
 0x17b   : > { %32212 = vmatmul.mubr.f32.gmra.mrb[2].mxu1 %v889_v4  ;;  %v891_v50 = vand.u32 4294901760, %v890_v8 }
 0x17c   : > { %32218 = vmatprep.mubr.f32.mxu1 %v860_v30  ;;  %35067 = vmatpush3.bf16.msra.mxu0 %v37131_v17  ;;  %v881_v11 = vand.u32 4294901760, %v880_v7  ;;  %v863_v1 = vand.u32 4294901760, %v862_v51 }
 0x17d   : > { %35068 = vmatprep.subr.bf16.mxu0 %v39418_v44  ;;  %v892_v13 = vsub.f32 %v890_v8, %v891_v50 }
 0x17e   : > { %v882_v12 = vsub.f32 %v880_v7, %v881_v11 }
 0x17f   : > { %32219 = vmatmul.mubr.f32.vlgmr.msra.gmra.mrb[0].mxu1 %v870_v24  ;;  %32148 = vmatmul.mubr.f32.vlgmr.msra.gmra.mrb[0].mxu0 %v37145_v47  ;;  %v893_v17 = vand.u32 4294901760, %v892_v13 }
 0x180   : > { %32221 = vmatprep.mubr.f32.mxu1 %v880_v7  ;;  %35107 = vmatpush3.bf16.msra.mxu1 %v37102_v43  ;;  %v883_v16 = vand.u32 4294901760, %v882_v12 }
 0x181   : > { %35109 = vmatprep.subr.bf16.mxu1 %v37137_v20  ;;  %35070 = vmatpush3.bf16.msra.mxu0 %v35069_v18 }
 0x182   : > { %32158 = vmatprep.mubr.msk.f32.mxu0 %vm36944_vm2, %v39420_v6  ;;  %35071 = vmatprep.subr.bf16.mxu0 %v39418_v44 }
 0x183   : > { %32222 = vmatmul.mubr.f32.gmra.mrb[2].mxu1 %v890_v8 }
 0x184   : > { %32228 = vmatprep.mubr.f32.mxu1 %v861_v9 }
 0x185   : > { %35073 = vmatpush3.bf16.msra.mxu0 %v35072_v19 }
 0x186   : > { %35074 = vmatprep.subr.bf16.mxu0 %v39418_v44 }
 0x187   : > { %32229 = vmatmul.mubr.f32.vlgmr.msra.gmra.mrb[0].mxu1 %v871_v10 }
 0x188   : > { %32231 = vmatprep.mubr.f32.mxu1 %v881_v11  ;;  %35111 = vmatpush3.bf16.msra.mxu1 %v37137_v20 }
 0x189   : > { %32159 = vmatmul.mubr.f32.vlgmr.msra.gmra.mrb[0].mxu0 %v37150_v54  ;;  %35113 = vmatprep.subr.bf16.mxu1 %v37102_v43 }
 0x18a   : > { %35076 = vmatpush3.bf16.msra.mxu0 %v37105_v49  ;;  %32169 = vmatprep.mubr.msk.f32.mxu0 %vm36944_vm2, %v39420_v6 }
 0x18b   : > { %32232 = vmatmul.mubr.f32.gmra.mrb[2].mxu1 %v891_v50  ;;  %35077 = vmatprep.subr.bf16.mxu0 %v39418_v44 }
 0x18c   : > { %32238 = vmatprep.mubr.f32.mxu1 %v859_v60 }
 0x18e   : > { %35079 = vmatpush3.bf16.msra.mxu0 %v37115_v63 }
 0x18f   : > { %32239 = vmatmul.mubr.f32.vlgmr.msra.gmra.mrb[0].mxu1 %v37154_v58  ;;  %35080 = vmatprep.subr.bf16.mxu0 %v39418_v44 }
 0x190   : > { %32241 = vmatprep.mubr.f32.mxu1 %v879_v5  ;;  %35115 = vmatpush3.bf16.msra.mxu1 %v37102_v43 }
 0x191   : > { %32170 = vmatmul.mubr.f32.vlgmr.msra.gmra.mrb[0].mxu0 %v305_v14  ;;  %35122 = vmatprep.subr.bf16.mxu1 %v39418_v44 }
 0x192   : > { %35082 = vmatpush3.bf16.msra.mxu0 %v37139_v21  ;;  %32180 = vmatprep.mubr.msk.f32.mxu0 %vm36944_vm2, %v39420_v6 }
 0x193   : > { %32242 = vmatmul.mubr.f32.gmra.mrb[2].mxu1 %v889_v4  ;;  %35083 = vmatprep.subr.bf16.mxu0 %v39418_v44 }
 0x194   : > { %32248 = vmatprep.mubr.f32.mxu1 %v859_v60 }
 0x196   : > { %35085 = vmatpush3.bf16.msra.mxu0 %v37141_v23 }
 0x197   : > { %32249 = vmatmul.mubr.f32.vlgmr.msra.gmra.mrb[0].mxu1 %v37154_v58  ;;  %35086 = vmatprep.subr.bf16.mxu0 %v39418_v44 }
 0x198   : > { %32251 = vmatprep.mubr.f32.mxu1 %v879_v5 }
 0x199   : > { %32181 = vmatmul.mubr.f32.vlgmr.msra.gmra.mrb[0].mxu0 %v37145_v47 }
 0x19a   : > { %35088 = vmatpush3.bf16.msra.mxu0 %v37105_v49  ;;  %32191 = vmatprep.mubr.msk.f32.mxu0 %vm36944_vm2, %v39420_v6  ;;  %v873_v49 = vand.u32 4294901760, %v872_v0 }
 0x19b   : > { %32252 = vmatmul.mubr.f32.gmra.mrb[2].mxu1 %v889_v4  ;;  %35089 = vmatprep.subr.bf16.mxu0 %v39418_v44 }
 0x19c   : > { %32273 = vmatprep.mubr.msk.f32.mxu1 %vm36944_vm2, %v39420_v6 }
 0x19e   : > { %35091 = vmatpush3.bf16.msra.mxu0 %v37115_v63 }
 0x19f   : > { %35093 = vmatprep.subr.bf16.mxu0 %v37102_v43 }
 0x1a1   : > { %32192 = vmatmul.mubr.f32.vlgmr.msra.gmra.mrb[0].mxu0 %v37145_v47 }
 0x1a2   : > { %35095 = vmatpush3.bf16.msra.mxu0 %v37102_v43  ;;  %32198 = vmatprep.mubr.f32.mxu0 %v863_v1  ;;  %v30820_v43 = vld [vmem:[#allocation2 + $0x28] ss:$0 sm:$0xff] }
 0x1a3   : > { %35116 = vmatprep.subr.bf16.mxu0 %v39418_v44 }
 0x1a5   : > { %32199 = vmatmul.mubr.f32.vlgmr.msra.gmra.mrb[2].mxu0 %v873_v49 }
 0x1a6   : > { %32201 = vmatprep.mubr.f32.mxu0 %v883_v16 }
 0x1a9   : > { %32202 = vmatmul.mubr.f32.gmra.mrb[4].mxu0 %v893_v17 }
 0x1aa   : > { %32262 = vmatprep.mubr.msk.f32.mxu0 %vm36944_vm2, %v39420_v6 }
 0x26a   : > { %v32250_v63 = vpop.f32.mrb[0].mxu1 }
 0x26b   : > { %v1358_v18 = vpop.f32.mrb[1].mxu1 }
 0x26e   : > { %v32253_v19 = vpop.f32.mrb[2].mxu1 }
 0x26f   : > { %v1370_v20 = vpop.f32.mrb[3].mxu1 }
 0x274   : > { %v715_v21 = vpop.f32.mrb[0].mxu0 }
 0x275   : > { %v32193_v23 = vpop.f32.mrb[1].mxu0  ;;  %v36088_v27 = vadd.f32 %v30820_v43, %v715_v21 }
 0x277   : > { %v1385_v35 = vsel %vm207_vm0, %v36088_v27, 0 }
 0x278   : > { %v32200_v26 = vpop.f32.mrb[2].mxu0  ;;  %v37225_v46 = vand.u32 4294901760, %v1385_v35 }
 0x279   : > { %v876_v28 = vadd.f32 %v32200_v26, %v30821_v25  ;;  %v865_v29 = vpop.f32.mrb[3].mxu0 }
 0x27a   : > { %v866_v31 = vadd.f32 %v30821_v25, %v865_v29  ;;  %v1469_v59 = vsub.f32 %v1385_v35, %v37225_v46 }
 0x27b   : > { %v36090_v32 = vadd.f32 %v32250_v63, %v876_v28 }
 0x27c   : > { %v37216_v33 = vadd.f32 %v1358_v18, %v866_v31  ;;  %v32203_v34 = vpop.f32.mrb[4].mxu0  ;;  %v1470_v5 = vand.u32 4294901760, %v1469_v59 }
 0x27d   : > { %v1391_v36 = vsel %vm207_vm0, %v36090_v32, 0  ;;  %v896_v37 = vadd.f32 %v32203_v34, %v30821_v25  ;;  %1897 = vrot.lane.b32.xlu1 %v36090_v32, %s36946_s24  ;;  %v885_v38 = vpop.f32.mrb[5].mxu0 }
 0x27e   : > { %v1403_v39 = vand.u32 4294901760, %v1391_v36  ;;  %v1388_v40 = vsel %vm207_vm0, %v37216_v33, 0  ;;  %v886_v41 = vadd.f32 %v30821_v25, %v885_v38  ;;  %v1471_v9 = vsub.f32 %v1469_v59, %v1470_v5 }
 0x27f   : > { %v1400_v42 = vand.u32 4294901760, %v1388_v40  ;;  %v37223_v45 = vadd.f32 %v32253_v19, %v896_v37 }
 0x280   : > { %v1487_v47 = vsub.f32 %v1391_v36, %v1403_v39  ;;  %v36096_v48 = vadd.f32 %v1370_v20, %v886_v41  ;;  %v1472_v50 = vand.u32 4294901760, %v1471_v9  ;;  %v1381_v9 = vld [vmem:[#allocation2 + $0x50] sm:$0xff] }
 0x281   : > { %v1480_v52 = vsub.f32 %v1388_v40, %v1400_v42  ;;  %v1397_v53 = vsel %vm207_vm0, %v37223_v45, 0  ;;  %v35117_v54 = vpack.c.bf16 %v1403_v39, %v1400_v42 }
 0x282   : > { %v1488_v55 = vand.u32 4294901760, %v1487_v47  ;;  %v1409_v56 = vand.u32 4294901760, %v1397_v53  ;;  %v1394_v57 = vsel %vm207_vm0, %v36096_v48, 0  ;;  %1899 = vrot.lane.b32.xlu1 %v36096_v48, %s36946_s24 }
 0x283   : > { %v1481_v58 = vand.u32 4294901760, %v1480_v52  ;;  %v1406_v14 = vand.u32 4294901760, %v1394_v57  ;;  %35118 = vmatpush3.bf16.xpose.msra.mxu0 %v35117_v54  ;;  %v35129_v0 = vpack.c.bf16 %v1487_v47, %v1480_v52 }
 0x284   : > { %v1501_v60 = vsub.f32 %v1397_v53, %v1409_v56  ;;  %35119 = vmatprep.subr.bf16.mxu0 %v39418_v44  ;;  %v1489_v61 = vsub.f32 %v1487_v47, %v1488_v55 }
 0x285   : > { %v1494_v15 = vsub.f32 %v1394_v57, %v1406_v14  ;;  %v1482_v22 = vsub.f32 %v1480_v52, %v1481_v58  ;;  %v35120_v30 = vpack.c.bf16 %v1409_v56, %v1406_v14  ;;  %v35141_v12 = vpack.c.bf16 %v1488_v55, %v1481_v58 }
 0x286   : > { %v1502_v62 = vand.u32 4294901760, %v1501_v60  ;;  %v1490_v2 = vand.u32 4294901760, %v1489_v61 }
 0x287   : > { %v1495_v3 = vand.u32 4294901760, %v1494_v15  ;;  %v1483_v4 = vand.u32 4294901760, %v1482_v22  ;;  %v35132_v1 = vpack.c.bf16 %v1501_v60, %v1494_v15 }
 0x288   : > { %v1503_v8 = vsub.f32 %v1501_v60, %v1502_v62 }
 0x289   : > { %v35123_v24 = vpack.c.bf16 %v1490_v2, %v1483_v4  ;;  %v1496_v7 = vsub.f32 %v1494_v15, %v1495_v3  ;;  %v35144_v49 = vpack.c.bf16 %v1502_v62, %v1495_v3 }
 0x28a   : > { %v1504_v11 = vand.u32 4294901760, %v1503_v8  ;;  %v1380_v8 = vld [vmem:[#allocation2 + $0x48] sm:$0xff] }
 0x28b   : > { %35121 = vmatpush3.bf16.xpose.msra.mxu0 %v35120_v30  ;;  %35124 = vmatpush3.bf16.xpose.msra.mxu1 %v35123_v24  ;;  %v1497_v10 = vand.u32 4294901760, %v1496_v7 }
 0x28c   : > { %35125 = vmatprep.subr.bf16.mxu1 %v39418_v44  ;;  %35152 = vmatprep.subr.bf16.mxu0 %v39418_v44 }
 0x28d   : > { %v35126_v51 = vpack.c.bf16 %v1504_v11, %v1497_v10  ;;  %v2404_v10 = vand.u32 4294901760, %v1380_v8  ;;  %v2407_v11 = vand.u32 4294901760, %v1381_v9 }
 0x292   : > { %32263 = vmatmul.mubr.f32.vlgmr.msra.gmra.mrb[6].mxu0 %v1472_v50  ;;  %v37295_v50 = vpack.c.bf16 %v2407_v11, %v2404_v10 }
 0x293   : > { %35127 = vmatpush3.bf16.xpose.msra.mxu1 %v35126_v51  ;;  %32328 = vmatprep.mubr.msk.f32.mxu0 %vm36944_vm2, %v39420_v6  ;;  %v2484_v51 = vsub.f32 %v1380_v8, %v2404_v10 }
 0x294   : > { %35128 = vmatprep.subr.bf16.mxu1 %v39418_v44 }
 0x29a   : > { %32274 = vmatmul.mubr.f32.vlgmr.msra.gmra.mrb[4].mxu1 %v37225_v46 }
 0x29b   : > { %35130 = vmatpush3.bf16.xpose.msra.mxu1 %v35129_v0  ;;  %32284 = vmatprep.mubr.msk.f32.mxu1 %vm36944_vm2, %v39420_v6  ;;  %v2491_v0 = vsub.f32 %v1381_v9, %v2407_v11 }
 0x29c   : > { %35131 = vmatprep.subr.bf16.mxu1 %v39418_v44 }
 0x2a3   : > { %35133 = vmatpush3.bf16.xpose.msra.mxu1 %v35132_v1  ;;  %v1382_v1 = vld [vmem:[#allocation2 + $0x58] sm:$0xff] }
 0x2a4   : > { %35134 = vmatprep.subr.bf16.mxu1 %v39418_v44 }
 0x2aa   : > { %32285 = vmatmul.mubr.f32.vlgmr.msra.gmra.mrb[4].mxu1 %v1469_v59 }
 0x2ab   : > { %35136 = vmatpush3.bf16.xpose.msra.mxu1 %v35117_v54  ;;  %32295 = vmatprep.mubr.msk.f32.mxu1 %vm36944_vm2, %v39420_v6 }
 0x2ac   : > { %35137 = vmatprep.subr.bf16.mxu1 %v39418_v44 }
 0x2b3   : > { %35139 = vmatpush3.bf16.xpose.msra.mxu1 %v35120_v30 }
 0x2b4   : > { %35140 = vmatprep.subr.bf16.mxu1 %v39418_v44 }
 0x2ba   : > { %32296 = vmatmul.mubr.f32.vlgmr.msra.gmra.mrb[4].mxu1 %v1470_v5 }
 0x2bb   : > { %35142 = vmatpush3.bf16.xpose.msra.mxu1 %v35141_v12  ;;  %32306 = vmatprep.mubr.msk.f32.mxu1 %vm36944_vm2, %v39420_v6  ;;  %v1383_v12 = vld [vmem:[#allocation2 + $0x60] sm:$0xff] }
 0x2bc   : > { %35143 = vmatprep.subr.bf16.mxu1 %v39418_v44 }
 0x2c3   : > { %35145 = vmatpush3.bf16.xpose.msra.mxu1 %v35144_v49  ;;  %v2410_v49 = vand.u32 4294901760, %v1382_v1 }
 0x2c4   : > { %35146 = vmatprep.subr.bf16.mxu1 %v39418_v44 }
 0x2ca   : > { %32307 = vmatmul.mubr.f32.vlgmr.msra.gmra.mrb[4].mxu1 %v37225_v46 }
 0x2cb   : > { %35148 = vmatpush3.bf16.xpose.msra.mxu1 %v35117_v54  ;;  %32317 = vmatprep.mubr.msk.f32.mxu1 %vm36944_vm2, %v39420_v6 }
 0x2cc   : > { %35149 = vmatprep.subr.bf16.mxu1 %v39418_v44 }
 0x2d3   : > { %35151 = vmatpush3.bf16.xpose.msra.mxu1 %v35120_v30 }
 0x2d4   : > { %35224 = vmatprep.subr.bf16.mxu1 %v39418_v44 }
 0x2da   : > { %32318 = vmatmul.mubr.f32.vlgmr.msra.gmra.mrb[4].mxu1 %v37225_v46 }
 0x2db   : > { %32460 = vmatprep.mubr.msk.f32.mxu1 %vm36944_vm2, %v39420_v6 }
 0x2ef   : > { %v1898_v23 = vpop.permute.xlu1 %1897 }
 0x2f0   : > { %v1914_v26 = vand.u32 4294901760, %v1898_v23 }
 0x2f2   : > { %v1998_v39 = vsub.f32 %v1898_v23, %v1914_v26 }
 0x2f4   : > { %v1900_v32 = vpop.permute.xlu1 %1899  ;;  %v1999_v47 = vand.u32 4294901760, %v1998_v39 }
 0x2f5   : > { %v1917_v35 = vand.u32 4294901760, %v1900_v32 }
 0x2f6   : > { %v2000_v56 = vsub.f32 %v1998_v39, %v1999_v47 }
 0x2f7   : > { %v2005_v48 = vsub.f32 %v1900_v32, %v1917_v35 }
 0x2f8   : > { %v2001_v61 = vand.u32 4294901760, %v2000_v56 }
 0x2f9   : > { %v2006_v57 = vand.u32 4294901760, %v2005_v48 }
 0x2fb   : > { %v2007_v15 = vsub.f32 %v2005_v48, %v2006_v57 }
 0x2fd   : > { %v2008_v3 = vand.u32 4294901760, %v2007_v15 }
 0x365   : > { %v1474_v13 = vpop.f32.mrb[6].mxu0 }
 0x366   : > { %v32264_v16 = vpop.f32.mrb[7].mxu0 }
 0x367   : > { %v2485_v16 = vand.u32 4294901760, %v2484_v51 }
 0x3ad   : > { %v1880_v17 = vpop.f32.mrb[4].mxu1 }
 0x3ae   : > { %v36097_v63 = vadd.f32 %v1880_v17, %v1474_v13  ;;  %v32319_v18 = vpop.f32.mrb[5].mxu1  ;;  %v2413_v13 = vand.u32 4294901760, %v1383_v12  ;;  %v2492_v17 = vand.u32 4294901760, %v2491_v0 }
 0x3af   : > { %v2498_v18 = vsub.f32 %v1382_v1, %v2410_v49  ;;  %v2904_v1 = vld [vmem:[#allocation2 + $0x80] sm:$0xff] }
 0x3b0   : > { %v1884_v19 = vsel %vm207_vm0, %v36097_v63, -inf }
 0x3b1   : > { %1885 = vmax.xlane.f32.xlu0 %v1884_v19  ;;  %v2505_v19 = vsub.f32 %v1383_v12, %v2413_v13 }
 0x3c7   : > { %1895 = vrot.lane.b32.xlu0 %v37216_v33, %s36946_s24 }
 0x43e   : > { %v1886_v20 = vpop.xlane.xlu0 %1885 }
 0x43f   : > { %v1887_v21 = vsub.f32 %v36097_v63, %v1886_v20  ;;  %v35192_v63 = vpack.c.bf16 %v2413_v13, %v2410_v49  ;;  %v2486_v20 = vsub.f32 %v2484_v51, %v2485_v16  ;;  %v2905_v13 = vld [vmem:[#allocation2 + $0x88] sm:$0xff] }
 0x441   : > { %v1888_v43 = vmul.f32 1.442695, %v1887_v21  ;;  %v2493_v21 = vsub.f32 %v2491_v0, %v2492_v17  ;;  %v2487_v23 = vand.u32 4294901760, %v2486_v20 }
 0x442   : > { %v1896_v25 = vpop.permute.xlu0 %1895 }
 0x443   : > { %36715 = vpow2.f32 %v1888_v43  ;;  %v1911_v27 = vand.u32 4294901760, %v1896_v25  ;;  %v2499_v43 = vand.u32 4294901760, %v2498_v18 }
 0x445   : > { %v37262_v28 = vpack.c.bf16 %v1914_v26, %v1911_v27  ;;  %v1991_v38 = vsub.f32 %v1896_v25, %v1911_v27  ;;  %v2506_v25 = vand.u32 4294901760, %v2505_v19  ;;  %v2494_v26 = vand.u32 4294901760, %v2493_v21 }
 0x446   : > { %v2500_v27 = vsub.f32 %v2498_v18, %v2499_v43 }
 0x447   : > { %35154 = vmatpush3.bf16.msra.mxu0 %v37262_v28  ;;  %v1992_v41 = vand.u32 4294901760, %v1991_v38  ;;  %v35165_v5 = vpack.c.bf16 %v1998_v39, %v1991_v38 }
 0x448   : > { %35155 = vmatprep.subr.bf16.mxu0 %v39418_v44 }
 0x449   : > { %v1993_v53 = vsub.f32 %v1991_v38, %v1992_v41  ;;  %v35177_v24 = vpack.c.bf16 %v1999_v47, %v1992_v41 }
 0x44b   : > { %v1994_v14 = vand.u32 4294901760, %v1993_v53  ;;  %v30822_v53 = vld [vmem:[#allocation2 + $0x68] ss:$0 sm:$0xff] }
 0x44d   : > { %v36716_v29 = vpop.eup %36715  ;;  %v35159_v2 = vpack.c.bf16 %v2001_v61, %v1994_v14 }
 0x44e   : > { %v1890_v31 = vsel %vm207_vm0, %v36716_v29, 0.0 }
 0x44f   : > { %1891 = vadd.xlane.f32.xlu1 %v1890_v31  ;;  %v2501_v31 = vand.u32 4294901760, %v2500_v27 }
 0x460   : > { %1901 = vrot.lane.b32.xlu1 %v37223_v45, %s36946_s24 }
 0x4dc   : > { %v1892_v33 = vpop.xlane.xlu1 %1891 }
 0x4dd   : > { %36717 = vrcp.f32 %v1892_v33 }
 0x4e0   : > { %v1902_v34 = vpop.permute.xlu1 %1901 }
 0x4e1   : > { %v1920_v36 = vand.u32 4294901760, %v1902_v34 }
 0x4e3   : > { %v35156_v37 = vpack.c.bf16 %v1920_v36, %v1917_v35  ;;  %v2012_v46 = vsub.f32 %v1902_v34, %v1920_v36  ;;  %v35201_v34 = vpack.c.bf16 %v2491_v0, %v2484_v51  ;;  %v35204_v35 = vpack.c.bf16 %v2505_v19, %v2498_v18  ;;  %v2902_v51 = vld [vmem:[#allocation2 + $0x70] sm:$0xff]  ;;  %v2903_v0 = vld [vmem:[#allocation2 + $0x78] sm:$0xff] }
 0x4e4   : > { %v35213_v36 = vpack.c.bf16 %v2492_v17, %v2485_v16  ;;  %v2915_v12 = vand.u32 4294901760, %v2902_v51  ;;  %v2918_v49 = vand.u32 4294901760, %v2903_v0  ;;  %v2921_v16 = vand.u32 4294901760, %v2904_v1 }
 0x4e5   : > { %35157 = vmatpush3.bf16.msra.mxu0 %v35156_v37  ;;  %v2013_v54 = vand.u32 4294901760, %v2012_v46  ;;  %v35168_v30 = vpack.c.bf16 %v2012_v46, %v2005_v48  ;;  %v2924_v17 = vand.u32 4294901760, %v2905_v13 }
 0x4e6   : > { %35158 = vmatprep.subr.bf16.mxu0 %v39418_v44  ;;  %v2995_v18 = vsub.f32 %v2902_v51, %v2915_v12  ;;  %v3009_v20 = vsub.f32 %v2904_v1, %v2921_v16 }
 0x4e7   : > { %v36718_v40 = vpop.eup %36717  ;;  %v2014_v59 = vsub.f32 %v2012_v46, %v2013_v54  ;;  %v35180_v7 = vpack.c.bf16 %v2013_v54, %v2006_v57  ;;  %v3016_v21 = vsub.f32 %v2905_v13, %v2924_v17 }
 0x4e8   : > { %v1894_v42 = vmul.f32 %v36718_v40, %v36716_v29  ;;  %v35195_v29 = vpack.c.bf16 %v2494_v26, %v2487_v23  ;;  %v35228_v23 = vpack.c.bf16 %v2924_v17, %v2921_v16 }
 0x4e9   : > { %v2015_v62 = vand.u32 4294901760, %v2014_v59 }
 0x4ea   : > { %v1908_v45 = vsel %vm207_vm0, %v1894_v42, 0 }
 0x4eb   : > { %v1979_v52 = vand.u32 4294901760, %v1908_v45  ;;  %v35162_v4 = vpack.c.bf16 %v2015_v62, %v2008_v3 }
 0x4ed   : > { %v1980_v55 = vsub.f32 %v1908_v45, %v1979_v52 }
 0x4ef   : > { %v1981_v58 = vand.u32 4294901760, %v1980_v55 }
 0x4f1   : > { %v1982_v60 = vsub.f32 %v1980_v55, %v1981_v58 }
 0x4f3   : > { %v1983_v22 = vand.u32 4294901760, %v1982_v60 }
 0x4f5   : > { %32329 = vmatmul.mubr.f32.vlgmr.msra.gmra.mrb[8].mxu0 %v1983_v22 }
 0x4f6   : > { %35160 = vmatpush3.bf16.msra.mxu0 %v35159_v2  ;;  %32339 = vmatprep.mubr.msk.f32.mxu0 %vm36944_vm2, %v39420_v6 }
 0x4f7   : > { %35161 = vmatprep.subr.bf16.mxu0 %v39418_v44 }
 0x4fa   : > { %35163 = vmatpush3.bf16.msra.mxu0 %v35162_v4 }
 0x4fb   : > { %35164 = vmatprep.subr.bf16.mxu0 %v39418_v44 }
 0x4fd   : > { %32340 = vmatmul.mubr.f32.vlgmr.msra.gmra.mrb[8].mxu0 %v1979_v52 }
 0x4fe   : > { %35166 = vmatpush3.bf16.msra.mxu0 %v35165_v5  ;;  %32350 = vmatprep.mubr.msk.f32.mxu0 %vm36944_vm2, %v39420_v6 }
 0x4ff   : > { %35167 = vmatprep.subr.bf16.mxu0 %v39418_v44 }
 0x502   : > { %35169 = vmatpush3.bf16.msra.mxu0 %v35168_v30  ;;  %v36835_v30 = vld [vmem:[#allocation2] sm:$0xff] }
 0x503   : > { %35170 = vmatprep.subr.bf16.mxu0 %v39418_v44 }
 0x505   : > { %32351 = vmatmul.mubr.f32.vlgmr.msra.gmra.mrb[8].mxu0 %v1980_v55 }
 0x506   : > { %35172 = vmatpush3.bf16.msra.mxu0 %v37262_v28  ;;  %32361 = vmatprep.mubr.msk.f32.mxu0 %vm36944_vm2, %v39420_v6 }
 0x507   : > { %35173 = vmatprep.subr.bf16.mxu0 %v39418_v44 }
 0x50a   : > { %35175 = vmatpush3.bf16.msra.mxu0 %v35156_v37 }
 0x50b   : > { %35176 = vmatprep.subr.bf16.mxu0 %v39418_v44 }
 0x50d   : > { %32362 = vmatmul.mubr.f32.vlgmr.msra.gmra.mrb[8].mxu0 %v1981_v58 }
 0x50e   : > { %35178 = vmatpush3.bf16.msra.mxu0 %v35177_v24  ;;  %32372 = vmatprep.mubr.msk.f32.mxu0 %vm36944_vm2, %v39420_v6 }
 0x50f   : > { %35179 = vmatprep.subr.bf16.mxu0 %v39418_v44 }
 0x512   : > { %35181 = vmatpush3.bf16.msra.mxu0 %v35180_v7 }
 0x513   : > { %35182 = vmatprep.subr.bf16.mxu0 %v39418_v44 }
 0x515   : > { %32373 = vmatmul.mubr.f32.vlgmr.msra.gmra.mrb[8].mxu0 %v1979_v52 }
 0x516   : > { %35184 = vmatpush3.bf16.msra.mxu0 %v37262_v28  ;;  %32383 = vmatprep.mubr.msk.f32.mxu0 %vm36944_vm2, %v39420_v6  ;;  %v2507_v28 = vsub.f32 %v2505_v19, %v2506_v25  ;;  %v3002_v19 = vsub.f32 %v2903_v0, %v2918_v49 }
 0x517   : > { %35185 = vmatprep.subr.bf16.mxu0 %v39418_v44 }
 0x518   : > { %v2508_v32 = vand.u32 4294901760, %v2507_v28 }
 0x51a   : > { %35187 = vmatpush3.bf16.msra.mxu0 %v35156_v37  ;;  %v35198_v33 = vpack.c.bf16 %v2508_v32, %v2501_v31  ;;  %v35216_v37 = vpack.c.bf16 %v2506_v25, %v2499_v43  ;;  %v2996_v43 = vand.u32 4294901760, %v2995_v18  ;;  %v3003_v25 = vand.u32 4294901760, %v3002_v19 }
 0x51b   : > { %35188 = vmatprep.subr.bf16.mxu0 %v39418_v44  ;;  %v3010_v31 = vand.u32 4294901760, %v3009_v20  ;;  %v3017_v32 = vand.u32 4294901760, %v3016_v21 }
 0x51c   : > { %v2997_v26 = vsub.f32 %v2995_v18, %v2996_v43  ;;  %v3004_v27 = vsub.f32 %v3002_v19, %v3003_v25 }
 0x51d   : > { %32384 = vmatmul.mubr.f32.vlgmr.msra.gmra.mrb[8].mxu0 %v1979_v52 }
 0x51e   : > { %32394 = vmatprep.mubr.msk.f32.mxu0 %vm36944_vm2, %v39420_v6  ;;  %35190 = vmatpush3.bf16.msra.mxu0 %v37295_v50  ;;  %v2998_v28 = vand.u32 4294901760, %v2997_v26 }
 0x51f   : > { %35191 = vmatprep.subr.bf16.mxu0 %v39418_v44 }
 0x522   : > { %35193 = vmatpush3.bf16.msra.mxu0 %v35192_v63 }
 0x523   : > { %35194 = vmatprep.subr.bf16.mxu0 %v39418_v44 }
 0x5f0   : > { %v2391_v38 = vpop.f32.mrb[8].mxu0 }
 0x5f1   : > { %v2401_v39 = vsel %vm207_vm0, %v2391_v38, 0  ;;  %v32385_v40 = vpop.f32.mrb[9].mxu0 }
 0x5f2   : > { %v2472_v41 = vand.u32 4294901760, %v2401_v39  ;;  %v35240_v40 = vpack.c.bf16 %v3016_v21, %v3009_v20 }
 0x5f4   : > { %v2473_v42 = vsub.f32 %v2401_v39, %v2472_v41  ;;  %v35237_v39 = vpack.c.bf16 %v3002_v19, %v2995_v18 }
 0x5f6   : > { %v2474_v46 = vand.u32 4294901760, %v2473_v42 }
 0x5f8   : > { %v2475_v47 = vsub.f32 %v2473_v42, %v2474_v46 }
 0x5fa   : > { %v2476_v48 = vand.u32 4294901760, %v2475_v47 }
 0x5fc   : > { %32395 = vmatmul.mubr.f32.vlgmr.msra.gmra.mrb[10].mxu0 %v2476_v48 }
 0x5fd   : > { %35196 = vmatpush3.bf16.msra.mxu0 %v35195_v29  ;;  %32405 = vmatprep.mubr.msk.f32.mxu0 %vm36944_vm2, %v39420_v6  ;;  %v3005_v29 = vand.u32 4294901760, %v3004_v27 }
 0x5fe   : > { %35197 = vmatprep.subr.bf16.mxu0 %v39418_v44 }
 0x601   : > { %35199 = vmatpush3.bf16.msra.mxu0 %v35198_v33  ;;  %v35231_v33 = vpack.c.bf16 %v3005_v29, %v2998_v28 }
 0x602   : > { %35200 = vmatprep.subr.bf16.mxu0 %v39418_v44 }
 0x604   : > { %32406 = vmatmul.mubr.f32.vlgmr.msra.gmra.mrb[12].mxu0 %v2472_v41 }
 0x605   : > { %35202 = vmatpush3.bf16.msra.mxu0 %v35201_v34  ;;  %32416 = vmatprep.mubr.msk.f32.mxu0 %vm36944_vm2, %v39420_v6  ;;  %v3011_v34 = vsub.f32 %v3009_v20, %v3010_v31 }
 0x606   : > { %35203 = vmatprep.subr.bf16.mxu0 %v39418_v44 }
 0x609   : > { %35205 = vmatpush3.bf16.msra.mxu0 %v35204_v35  ;;  %v3018_v35 = vsub.f32 %v3016_v21, %v3017_v32 }
 0x60a   : > { %35206 = vmatprep.subr.bf16.mxu0 %v39418_v44 }
 0x60c   : > { %32417 = vmatmul.mubr.f32.vlgmr.msra.gmra.mrb[14].mxu0 %v2473_v42  ;;  %v35252_v42 = vpack.c.bf16 %v3017_v32, %v3010_v31 }
 0x60d   : > { %35208 = vmatpush3.bf16.msra.mxu0 %v37295_v50  ;;  %32427 = vmatprep.mubr.msk.f32.mxu0 %vm36944_vm2, %v39420_v6 }
 0x60e   : > { %35209 = vmatprep.subr.bf16.mxu0 %v39418_v44 }
 0x611   : > { %35211 = vmatpush3.bf16.msra.mxu0 %v35192_v63 }
 0x612   : > { %35212 = vmatprep.subr.bf16.mxu0 %v39418_v44 }
 0x614   : > { %32428 = vmatmul.mubr.f32.vlgmr.msra.gmra.mrb[16].mxu0 %v2474_v46 }
 0x615   : > { %35214 = vmatpush3.bf16.msra.mxu0 %v35213_v36  ;;  %32438 = vmatprep.mubr.msk.f32.mxu0 %vm36944_vm2, %v39420_v6  ;;  %v3012_v36 = vand.u32 4294901760, %v3011_v34 }
 0x616   : > { %35215 = vmatprep.subr.bf16.mxu0 %v39418_v44 }
 0x619   : > { %35217 = vmatpush3.bf16.msra.mxu0 %v35216_v37  ;;  %v3019_v37 = vand.u32 4294901760, %v3018_v35 }
 0x61a   : > { %35218 = vmatprep.subr.bf16.mxu0 %v39418_v44 }
 0x61b   : > { %v35234_v38 = vpack.c.bf16 %v3019_v37, %v3012_v36 }
 0x61c   : > { %32439 = vmatmul.mubr.f32.vlgmr.msra.gmra.mrb[18].mxu0 %v2472_v41 }
 0x61d   : > { %35220 = vmatpush3.bf16.msra.mxu0 %v37295_v50  ;;  %32449 = vmatprep.mubr.msk.f32.mxu0 %vm36944_vm2, %v39420_v6 }
 0x61e   : > { %35221 = vmatprep.subr.bf16.mxu0 %v39418_v44 }
 0x621   : > { %35223 = vmatpush3.bf16.msra.mxu0 %v35192_v63  ;;  %v37331_v63 = vpack.c.bf16 %v2918_v49, %v2915_v12 }
 0x622   : > { %35260 = vmatprep.subr.bf16.mxu0 %v39418_v44 }
 0x623   : > { %35226 = vmatpush3.bf16.msra.mxu1 %v37331_v63 }
 0x624   : > { %32450 = vmatmul.mubr.f32.vlgmr.msra.gmra.mrb[20].mxu0 %v2472_v41  ;;  %35227 = vmatprep.subr.bf16.mxu1 %v39418_v44  ;;  %v35249_v41 = vpack.c.bf16 %v3003_v25, %v2996_v43  ;;  %v30823_v43 = vld [vmem:[#allocation2 + $0x90] ss:$0 sm:$0xff] }
 0x625   : > { %32526 = vmatprep.mubr.msk.f32.mxu0 %vm36944_vm2, %v39420_v6 }
 0x627   : > { %35229 = vmatpush3.bf16.msra.mxu1 %v35228_v23 }
 0x628   : > { %35230 = vmatprep.subr.bf16.mxu1 %v39418_v44 }
 0x6cf   : > { %v2478_v45 = vpop.f32.mrb[10].mxu0 }
 0x6d0   : > { %v32396_v52 = vpop.f32.mrb[11].mxu0  ;;  %v2479_v54 = vadd.f32 %v30822_v53, %v2478_v45 }
 0x6d7   : > { %v2569_v55 = vpop.f32.mrb[12].mxu0 }
 0x6d8   : > { %v2570_v56 = vadd.f32 %v2569_v55, %v2479_v54  ;;  %v32407_v57 = vpop.f32.mrb[13].mxu0 }
 0x6df   : > { %v2649_v58 = vpop.f32.mrb[14].mxu0 }
 0x6e0   : > { %v2650_v14 = vadd.f32 %v2649_v58, %v2570_v56  ;;  %v32418_v59 = vpop.f32.mrb[15].mxu0 }
 0x6e1   : > { %v3426_v59 = vld [vmem:[#allocation2 + $0xa0] sm:$0xff] }
 0x6e7   : > { %v2726_v60 = vpop.f32.mrb[16].mxu0 }
 0x6e8   : > { %v2727_v61 = vadd.f32 %v2726_v60, %v2650_v14  ;;  %v32429_v15 = vpop.f32.mrb[17].mxu0  ;;  %v3425_v14 = vld [vmem:[#allocation2 + $0x98] sm:$0xff] }
 0x6e9   : > { %v3438_v60 = vand.u32 4294901760, %v3425_v14 }
 0x6ef   : > { %v2809_v22 = vpop.f32.mrb[18].mxu0 }
 0x6f0   : > { %v2810_v62 = vadd.f32 %v2809_v22, %v2727_v61  ;;  %v32440_v2 = vpop.f32.mrb[19].mxu0  ;;  %v3441_v61 = vand.u32 4294901760, %v3426_v59  ;;  %v37363_v22 = vsub.f32 %v3425_v14, %v3438_v60 }
 0x6f1   : > { %v3427_v2 = vld [vmem:[#allocation2 + $0xa8] sm:$0xff] }
 0x6f2   : > { %v37361_v15 = vpack.c.bf16 %v3441_v61, %v3438_v60 }
 0x6f4   : > { %35262 = vmatpush3.bf16.msra.mxu0 %v37361_v15 }
 0x6f5   : > { %35263 = vmatprep.subr.bf16.mxu0 %v39418_v44 }
 0x6f7   : > { %v2884_v3 = vpop.f32.mrb[20].mxu0 }
 0x6f8   : > { %v2885_v4 = vadd.f32 %v2884_v3, %v2810_v62  ;;  %v32451_v5 = vpop.f32.mrb[21].mxu0  ;;  %v37365_v62 = vsub.f32 %v3426_v59, %v3441_v61  ;;  %v3428_v3 = vld [vmem:[#allocation2 + $0xb0] sm:$0xff] }
 0x6f9   : > { %v3447_v5 = vand.u32 4294901760, %v3428_v3 }
 0x6fa   : > { %v37325_v24 = vadd.f32 %v36835_v30, %v2885_v4  ;;  %v3444_v4 = vand.u32 4294901760, %v3427_v2  ;;  %v3519_v30 = vand.u32 4294901760, %v37363_v22  ;;  %v35273_v19 = vpack.c.bf16 %v37365_v62, %v37363_v22 }
 0x6fc   : > { %v2889_v7 = vsel %vm207_vm0, %v37325_v24, 0.0 }
 0x6fd   : > { %2890 = vadd.xlane.f32.xlu0 %v2889_v7  ;;  %v3526_v7 = vand.u32 4294901760, %v37365_v62 }
 0x6ff   : > { %v35285_v21 = vpack.c.bf16 %v3526_v7, %v3519_v30 }
 0x78a   : > { %v2891_v8 = vpop.xlane.xlu0 %2890 }
 0x78b   : > { %v2892_v9 = vmul.f32 0.03125, %v2891_v8  ;;  %v37371_v8 = vpack.c.bf16 %v3447_v5, %v3444_v4 }
 0x78d   : > { %v2893_v10 = vsub.f32 %v37325_v24, %v2892_v9  ;;  %v37373_v9 = vsub.f32 %v3427_v2, %v3444_v4  ;;  %35265 = vmatpush3.bf16.msra.mxu0 %v37371_v8  ;;  %v30824_v4 = vld [vmem:[#allocation2 + $0xb8] ss:$0 sm:$0xff] }
 0x78e   : > { %35266 = vmatprep.subr.bf16.mxu0 %v39418_v44 }
 0x78f   : > { %v2894_v11 = vmul.f32 %v2893_v10, %v2893_v10  ;;  %v3533_v1 = vand.u32 4294901760, %v37373_v9 }
 0x791   : > { %v2895_v50 = vsel %vm207_vm0, %v2894_v11, 0.0  ;;  %v3520_v11 = vsub.f32 %v37363_v22, %v3519_v30  ;;  %v3534_v13 = vsub.f32 %v37373_v9, %v3533_v1 }
 0x792   : > { %2896 = vadd.xlane.f32.xlu1 %v2895_v50  ;;  %v3527_v50 = vsub.f32 %v37365_v62, %v3526_v7 }
 0x793   : > { %v3521_v51 = vand.u32 4294901760, %v3520_v11  ;;  %v3535_v17 = vand.u32 4294901760, %v3534_v13 }
 0x794   : > { %v3528_v0 = vand.u32 4294901760, %v3527_v50 }
 0x796   : > { %v35267_v49 = vpack.c.bf16 %v3528_v0, %v3521_v51 }
 0x81f   : > { %v2897_v46 = vpop.xlane.xlu1 %2896 }
 0x820   : > { %v2898_v47 = vmul.f32 0.03125, %v2897_v46 }
 0x822   : > { %v2899_v48 = vadd.f32 1e-05, %v2898_v47 }
 0x824   : > { %36719 = vrsqrt.f32 %v2899_v48 }
 0x82e   : > { %v36720_v45 = vpop.eup %36719 }
 0x82f   : > { %v2901_v52 = vmul.f32 %v36720_v45, %v2893_v10  ;;  %v37375_v10 = vsub.f32 %v3428_v3, %v3447_v5 }
 0x831   : > { %v2912_v53 = vsel %vm207_vm0, %v2901_v52, 0  ;;  %v3540_v12 = vand.u32 4294901760, %v37375_v10  ;;  %v35276_v20 = vpack.c.bf16 %v37375_v10, %v37373_v9 }
 0x832   : > { %v2983_v54 = vand.u32 4294901760, %v2912_v53 }
 0x833   : > { %v3541_v16 = vsub.f32 %v37375_v10, %v3540_v12 }
 0x834   : > { %v2984_v55 = vsub.f32 %v2912_v53, %v2983_v54 }
 0x836   : > { %v2985_v56 = vand.u32 4294901760, %v2984_v55 }
 0x838   : > { %v2986_v57 = vsub.f32 %v2984_v55, %v2985_v56 }
 0x83a   : > { %v2987_v58 = vand.u32 4294901760, %v2986_v57 }
 0x83c   : > { %32461 = vmatmul.mubr.f32.vlgmr.msra.gmra.mrb[6].mxu1 %v2987_v58 }
 0x83d   : > { %35232 = vmatpush3.bf16.msra.mxu1 %v35231_v33  ;;  %32471 = vmatprep.mubr.msk.f32.mxu1 %vm36944_vm2, %v39420_v6 }
 0x83e   : > { %35233 = vmatprep.subr.bf16.mxu1 %v39418_v44 }
 0x841   : > { %35235 = vmatpush3.bf16.msra.mxu1 %v35234_v38 }
 0x842   : > { %35236 = vmatprep.subr.bf16.mxu1 %v39418_v44 }
 0x844   : > { %32472 = vmatmul.mubr.f32.vlgmr.msra.gmra.mrb[6].mxu1 %v2983_v54 }
 0x845   : > { %35238 = vmatpush3.bf16.msra.mxu1 %v35237_v39  ;;  %32482 = vmatprep.mubr.msk.f32.mxu1 %vm36944_vm2, %v39420_v6 }
 0x846   : > { %35239 = vmatprep.subr.bf16.mxu1 %v39418_v44 }
 0x849   : > { %35241 = vmatpush3.bf16.msra.mxu1 %v35240_v40 }
 0x84a   : > { %35242 = vmatprep.subr.bf16.mxu1 %v39418_v44 }
 0x84c   : > { %32483 = vmatmul.mubr.f32.vlgmr.msra.gmra.mrb[6].mxu1 %v2984_v55 }
 0x84d   : > { %35244 = vmatpush3.bf16.msra.mxu1 %v37331_v63  ;;  %32493 = vmatprep.mubr.msk.f32.mxu1 %vm36944_vm2, %v39420_v6 }
 0x84e   : > { %35245 = vmatprep.subr.bf16.mxu1 %v39418_v44 }
 0x851   : > { %35247 = vmatpush3.bf16.msra.mxu1 %v35228_v23 }
 0x852   : > { %35248 = vmatprep.subr.bf16.mxu1 %v39418_v44 }
 0x854   : > { %32494 = vmatmul.mubr.f32.vlgmr.msra.gmra.mrb[6].mxu1 %v2985_v56 }
 0x855   : > { %35250 = vmatpush3.bf16.msra.mxu1 %v35249_v41  ;;  %32504 = vmatprep.mubr.msk.f32.mxu1 %vm36944_vm2, %v39420_v6 }
 0x856   : > { %35251 = vmatprep.subr.bf16.mxu1 %v39418_v44 }
 0x859   : > { %35253 = vmatpush3.bf16.msra.mxu1 %v35252_v42 }
 0x85a   : > { %35254 = vmatprep.subr.bf16.mxu1 %v39418_v44 }
 0x85c   : > { %32505 = vmatmul.mubr.f32.vlgmr.msra.gmra.mrb[6].mxu1 %v2983_v54 }
 0x85d   : > { %35256 = vmatpush3.bf16.msra.mxu1 %v37331_v63  ;;  %32515 = vmatprep.mubr.msk.f32.mxu1 %vm36944_vm2, %v39420_v6  ;;  %v3542_v63 = vand.u32 4294901760, %v3541_v16 }
 0x85e   : > { %35257 = vmatprep.subr.bf16.mxu1 %v39418_v44 }
 0x85f   : > { %v35270_v18 = vpack.c.bf16 %v3542_v63, %v3535_v17 }
 0x861   : > { %35259 = vmatpush3.bf16.msra.mxu1 %v35228_v23  ;;  %v35288_v23 = vpack.c.bf16 %v3540_v12, %v3533_v1 }
 0x862   : > { %35296 = vmatprep.subr.bf16.mxu1 %v39418_v44 }
 0x864   : > { %32516 = vmatmul.mubr.f32.vlgmr.msra.gmra.mrb[6].mxu1 %v2983_v54 }
 0x865   : > { %32592 = vmatprep.mubr.msk.f32.mxu1 %vm36944_vm2, %v39420_v6 }
 0x937   : > { %v3395_v25 = vpop.f32.mrb[6].mxu1 }
 0x938   : > { %v36098_v26 = vadd.f32 %v30823_v43, %v3395_v25  ;;  %v32517_v27 = vpop.f32.mrb[7].mxu1  ;;  %v3936_v43 = vld [vmem:[#allocation2 + $0xc0] sm:$0xff]  ;;  %v3937_v25 = vld [vmem:[#allocation2 + $0xc8] sm:$0xff] }
 0x939   : > { %v3949_v27 = vand.u32 4294901760, %v3936_v43 }
 0x93a   : > { %v3400_v28 = vmul.f32 0.70710677, %v36098_v26  ;;  %v3399_v56 = vmul.f32 0.5, %v36098_v26  ;;  %v3938_v26 = vld [vmem:[#allocation2 + $0xd0] sm:$0xff] }
 0x93c   : > { %v3401_v29 = vand.u32 2147483647, %v3400_v28  ;;  %vm3420_vm3 = vcmp.ge.f32.partialorder %v3400_v28, 0.0  ;;  %v3952_v28 = vand.u32 4294901760, %v3937_v25 }
 0x93e   : > { %v3402_v31 = vmul.f32 0.3275911, %v3401_v29  ;;  %v3414_v33 = vsub.f32 0.0, %v3401_v29 }
 0x940   : > { %v3403_v32 = vadd.f32 1.0, %v3402_v31  ;;  %v3415_v35 = vmul.f32 %v3414_v33, %v3401_v29  ;;  %v3939_v29 = vld [vmem:[#allocation2 + $0xd8] sm:$0xff]  ;;  %v4029_v33 = vsub.f32 %v3936_v43, %v3949_v27 }
 0x941   : > { %v3958_v31 = vand.u32 4294901760, %v3939_v29 }
 0x942   : > { %36721 = vrcp.f32 %v3403_v32  ;;  %v3416_v38 = vmul.f32 1.442695, %v3415_v35  ;;  %v37423_v32 = vpack.c.bf16 %v3952_v28, %v3949_v27 }
 0x944   : > { %36723 = vpow2.f32 %v3416_v38  ;;  %35298 = vmatpush3.bf16.msra.mxu1 %v37423_v32 }
 0x945   : > { %35299 = vmatprep.subr.bf16.mxu1 %v39418_v44 }
 0x94c   : > { %v36722_v34 = vpop.eup %36721 }
 0x94d   : > { %v3405_v36 = vmul.f32 1.0614054, %v36722_v34 }
 0x94e   : > { %v36724_v45 = vpop.eup %36723 }
 0x94f   : > { %v3406_v37 = vadd.f32 -1.4531521, %v3405_v36  ;;  %v4030_v36 = vand.u32 4294901760, %v4029_v33 }
 0x951   : > { %v3407_v39 = vmul.f32 %v36722_v34, %v3406_v37  ;;  %v4031_v38 = vsub.f32 %v4029_v33, %v4030_v36 }
 0x953   : > { %v3408_v40 = vadd.f32 1.4214138, %v3407_v39 }
 0x955   : > { %v3409_v41 = vmul.f32 %v36722_v34, %v3408_v40 }
 0x957   : > { %v3410_v42 = vadd.f32 -0.28449672, %v3409_v41  ;;  %v4050_v41 = vsub.f32 %v3939_v29, %v3958_v31 }
 0x959   : > { %v3411_v46 = vmul.f32 %v36722_v34, %v3410_v42  ;;  %v4032_v42 = vand.u32 4294901760, %v4031_v38 }
 0x95b   : > { %v3412_v47 = vadd.f32 0.2548296, %v3411_v46 }
 0x95d   : > { %v3413_v48 = vmul.f32 %v36722_v34, %v3412_v47  ;;  %v4036_v34 = vsub.f32 %v3937_v25, %v3952_v28 }
 0x95f   : > { %v3418_v52 = vmul.f32 %v36724_v45, %v3413_v48  ;;  %v4037_v37 = vand.u32 4294901760, %v4036_v34  ;;  %v4051_v48 = vand.u32 4294901760, %v4050_v41 }
 0x961   : > { %v3419_v53 = vsub.f32 1.0, %v3418_v52  ;;  %v4038_v39 = vsub.f32 %v4036_v34, %v4037_v37 }
 0x963   : > { %v3421_v54 = vsub.f32 0.0, %v3419_v53  ;;  %v4039_v46 = vand.u32 4294901760, %v4038_v39 }
 0x965   : > { %v3422_v55 = vsel %vm3420_vm3, %v3419_v53, %v3421_v54  ;;  %v37431_v45 = vpack.c.bf16 %v4039_v46, %v4032_v42  ;;  %v4052_v53 = vsub.f32 %v4050_v41, %v4051_v48 }
 0x966   : > { %v3423_v57 = vadd.f32 1.0, %v3422_v55 }
 0x967   : > { %v4053_v55 = vand.u32 4294901760, %v4052_v53 }
 0x968   : > { %v3424_v58 = vmul.f32 %v3423_v57, %v3399_v56  ;;  %v37435_v57 = vpack.c.bf16 %v4036_v34, %v4029_v33 }
 0x96a   : > { %v3435_v14 = vsel %vm207_vm0, %v3424_v58, 0 }
 0x96b   : > { %v3506_v59 = vand.u32 4294901760, %v3435_v14 }
 0x96d   : > { %v3507_v60 = vsub.f32 %v3435_v14, %v3506_v59  ;;  %v37439_v14 = vpack.c.bf16 %v4037_v37, %v4030_v36 }
 0x96f   : > { %v3508_v61 = vand.u32 4294901760, %v3507_v60 }
 0x971   : > { %v3509_v22 = vsub.f32 %v3507_v60, %v3508_v61 }
 0x973   : > { %v3510_v62 = vand.u32 4294901760, %v3509_v22 }
 0x975   : > { %32527 = vmatmul.mubr.f32.vlgmr.msra.gmra.mrb[22].mxu0 %v3510_v62 }
 0x976   : > { %35268 = vmatpush3.bf16.msra.mxu0 %v35267_v49  ;;  %32537 = vmatprep.mubr.msk.f32.mxu0 %vm36944_vm2, %v39420_v6 }
 0x977   : > { %35269 = vmatprep.subr.bf16.mxu0 %v39418_v44 }
 0x97a   : > { %35271 = vmatpush3.bf16.msra.mxu0 %v35270_v18 }
 0x97b   : > { %35272 = vmatprep.subr.bf16.mxu0 %v39418_v44 }
 0x97d   : > { %32538 = vmatmul.mubr.f32.vlgmr.msra.gmra.mrb[24].mxu0 %v3506_v59 }
 0x97e   : > { %35274 = vmatpush3.bf16.msra.mxu0 %v35273_v19  ;;  %32548 = vmatprep.mubr.msk.f32.mxu0 %vm36944_vm2, %v39420_v6 }
 0x97f   : > { %35275 = vmatprep.subr.bf16.mxu0 %v39418_v44 }
 0x982   : > { %35277 = vmatpush3.bf16.msra.mxu0 %v35276_v20 }
 0x983   : > { %35278 = vmatprep.subr.bf16.mxu0 %v39418_v44 }
 0x985   : > { %32549 = vmatmul.mubr.f32.vlgmr.msra.gmra.mrb[26].mxu0 %v3507_v60 }
 0x986   : > { %35280 = vmatpush3.bf16.msra.mxu0 %v37361_v15  ;;  %32559 = vmatprep.mubr.msk.f32.mxu0 %vm36944_vm2, %v39420_v6 }
 0x987   : > { %35281 = vmatprep.subr.bf16.mxu0 %v39418_v44 }
 0x98a   : > { %35283 = vmatpush3.bf16.msra.mxu0 %v37371_v8 }
 0x98b   : > { %35284 = vmatprep.subr.bf16.mxu0 %v39418_v44 }
 0x98d   : > { %32560 = vmatmul.mubr.f32.vlgmr.msra.gmra.mrb[28].mxu0 %v3508_v61 }
 0x98e   : > { %35286 = vmatpush3.bf16.msra.mxu0 %v35285_v21  ;;  %32570 = vmatprep.mubr.msk.f32.mxu0 %vm36944_vm2, %v39420_v6 }
 0x98f   : > { %35287 = vmatprep.subr.bf16.mxu0 %v39418_v44 }
 0x992   : > { %35289 = vmatpush3.bf16.msra.mxu0 %v35288_v23 }
 0x993   : > { %35290 = vmatprep.subr.bf16.mxu0 %v39418_v44 }
 0x995   : > { %32571 = vmatmul.mubr.f32.vlgmr.msra.gmra.mrb[30].mxu0 %v3506_v59 }
 0x996   : > { %35292 = vmatpush3.bf16.msra.mxu0 %v37361_v15  ;;  %32581 = vmatprep.mubr.msk.f32.mxu0 %vm36944_vm2, %v39420_v6 }
 0x997   : > { %35293 = vmatprep.subr.bf16.mxu0 %v39418_v44 }
 0x99a   : > { %35295 = vmatpush3.bf16.msra.mxu0 %v37371_v8 }
 0x99b   : > { %32650 = vmatprep.subr.mxu0 %v39420_v6 }
 0x99d   : > { %32582 = vmatmul.mubr.f32.vlgmr.msra.gmra.mrb[32].mxu0 %v3506_v59 }
 0x99e   : > { %32652 = vmatprep.mubr.msk.f32.mxu0 %vm36944_vm2, %v39420_v6 }
 0xa48   : > { %v3512_v2 = vpop.f32.mrb[22].mxu0 }
 0xa49   : > { %v32528_v3 = vpop.f32.mrb[23].mxu0  ;;  %v3513_v5 = vadd.f32 %v30824_v4, %v3512_v2 }
 0xa50   : > { %v3603_v30 = vpop.f32.mrb[24].mxu0 }
 0xa51   : > { %v3604_v7 = vadd.f32 %v3603_v30, %v3513_v5  ;;  %v32539_v15 = vpop.f32.mrb[25].mxu0 }
 0xa58   : > { %v3683_v9 = vpop.f32.mrb[26].mxu0 }
 0xa59   : > { %v3684_v10 = vadd.f32 %v3683_v9, %v3604_v7  ;;  %v32550_v11 = vpop.f32.mrb[27].mxu0  ;;  %v30825_v9 = vld [vmem:[#allocation2 + $0xe0] ss:$0 sm:$0xff] }
 0xa60   : > { %v3760_v50 = vpop.f32.mrb[28].mxu0 }
 0xa61   : > { %v3761_v51 = vadd.f32 %v3760_v50, %v3684_v10  ;;  %v32561_v0 = vpop.f32.mrb[29].mxu0 }
 0xa68   : > { %v3843_v8 = vpop.f32.mrb[30].mxu0 }
 0xa69   : > { %v3844_v1 = vadd.f32 %v3843_v8, %v3761_v51  ;;  %v32572_v12 = vpop.f32.mrb[31].mxu0 }
 0xa70   : > { %v3918_v49 = vpop.f32.mrb[32].mxu0 }
 0xa71   : > { %v3919_v13 = vadd.f32 %v3918_v49, %v3844_v1  ;;  %v32583_v16 = vpop.f32.mrb[33].mxu0 }
 0xa73   : > { %v37417_v17 = vadd.f32 %v3919_v13, %v37325_v24  ;;  %v3955_v24 = vand.u32 4294901760, %v3938_v26 }
 0xa75   : > { %v3923_v63 = vsel %vm207_vm0, %v37417_v17, 0.0  ;;  %v37426_v35 = vpack.c.bf16 %v3958_v31, %v3955_v24  ;;  %v4043_v40 = vsub.f32 %v3938_v26, %v3955_v24 }
 0xa76   : > { %3924 = vadd.xlane.f32.xlu0 %v3923_v63 }
 0xa77   : > { %35301 = vmatpush3.bf16.msra.mxu1 %v37426_v35  ;;  %v4044_v47 = vand.u32 4294901760, %v4043_v40  ;;  %v37437_v58 = vpack.c.bf16 %v4050_v41, %v4043_v40 }
 0xa78   : > { %35302 = vmatprep.subr.bf16.mxu1 %v39418_v44 }
 0xa79   : > { %v4045_v52 = vsub.f32 %v4043_v40, %v4044_v47  ;;  %v37441_v59 = vpack.c.bf16 %v4051_v48, %v4044_v47 }
 0xa7b   : > { %v4046_v54 = vand.u32 4294901760, %v4045_v52 }
 0xa7d   : > { %v37433_v56 = vpack.c.bf16 %v4053_v55, %v4046_v54 }
 0xb03   : > { %v3925_v18 = vpop.xlane.xlu0 %3924 }
 0xb04   : > { %v3926_v19 = vmul.f32 0.03125, %v3925_v18 }
 0xb06   : > { %v3927_v20 = vsub.f32 %v37417_v17, %v3926_v19 }
 0xb08   : > { %v3928_v21 = vmul.f32 %v3927_v20, %v3927_v20 }
 0xb0a   : > { %v3929_v23 = vsel %vm207_vm0, %v3928_v21, 0.0 }
 0xb0b   : > { %3930 = vadd.xlane.f32.xlu0 %v3929_v23 }
 0xb98   : > { %v3931_v60 = vpop.xlane.xlu0 %3930 }
 0xb99   : > { %v3932_v61 = vmul.f32 0.03125, %v3931_v60 }
 0xb9b   : > { %v3933_v22 = vadd.f32 1e-05, %v3932_v61 }
 0xb9d   : > { %36725 = vrsqrt.f32 %v3933_v22 }
 0xba7   : > { %v36726_v62 = vpop.eup %36725 }
 0xba8   : > { %v3935_v2 = vmul.f32 %v36726_v62, %v3927_v20 }
 0xbaa   : > { %v3946_v3 = vsel %vm207_vm0, %v3935_v2, 0 }
 0xbab   : > { %v4017_v4 = vand.u32 4294901760, %v3946_v3 }
 0xbad   : > { %v4018_v5 = vsub.f32 %v3946_v3, %v4017_v4 }
 0xbaf   : > { %v4019_v30 = vand.u32 4294901760, %v4018_v5 }
 0xbb1   : > { %v4020_v7 = vsub.f32 %v4018_v5, %v4019_v30 }
 0xbb3   : > { %v4021_v15 = vand.u32 4294901760, %v4020_v7 }
 0xbb5   : > { %32593 = vmatmul.mubr.f32.vlgmr.msra.gmra.mrb[8].mxu1 %v4021_v15 }
 0xbb6   : > { %35304 = vmatpush3.bf16.msra.mxu1 %v37431_v45  ;;  %32603 = vmatprep.mubr.msk.f32.mxu1 %vm36944_vm2, %v39420_v6 }
 0xbb7   : > { %35305 = vmatprep.subr.bf16.mxu1 %v39418_v44 }
 0xbba   : > { %35307 = vmatpush3.bf16.msra.mxu1 %v37433_v56 }
 0xbbb   : > { %35308 = vmatprep.subr.bf16.mxu1 %v39418_v44 }
 0xbbd   : > { %32604 = vmatmul.mubr.f32.vlgmr.msra.gmra.mrb[8].mxu1 %v4017_v4 }
 0xbbe   : > { %35310 = vmatpush3.bf16.msra.mxu1 %v37435_v57  ;;  %32614 = vmatprep.mubr.msk.f32.mxu1 %vm36944_vm2, %v39420_v6 }
 0xbbf   : > { %35311 = vmatprep.subr.bf16.mxu1 %v39418_v44 }
 0xbc2   : > { %35313 = vmatpush3.bf16.msra.mxu1 %v37437_v58 }
 0xbc3   : > { %35314 = vmatprep.subr.bf16.mxu1 %v39418_v44 }
 0xbc5   : > { %32615 = vmatmul.mubr.f32.vlgmr.msra.gmra.mrb[8].mxu1 %v4018_v5 }
 0xbc6   : > { %35316 = vmatpush3.bf16.msra.mxu1 %v37423_v32  ;;  %32625 = vmatprep.mubr.msk.f32.mxu1 %vm36944_vm2, %v39420_v6 }
 0xbc7   : > { %35317 = vmatprep.subr.bf16.mxu1 %v39418_v44 }
 0xbca   : > { %35319 = vmatpush3.bf16.msra.mxu1 %v37426_v35 }
 0xbcb   : > { %35320 = vmatprep.subr.bf16.mxu1 %v39418_v44 }
 0xbcd   : > { %32626 = vmatmul.mubr.f32.vlgmr.msra.gmra.mrb[8].mxu1 %v4019_v30 }
 0xbce   : > { %35322 = vmatpush3.bf16.msra.mxu1 %v37439_v14  ;;  %32636 = vmatprep.mubr.msk.f32.mxu1 %vm36944_vm2, %v39420_v6 }
 0xbcf   : > { %35323 = vmatprep.subr.bf16.mxu1 %v39418_v44 }
 0xbd2   : > { %35325 = vmatpush3.bf16.msra.mxu1 %v37441_v59 }
 0xbd3   : > { %35326 = vmatprep.subr.bf16.mxu1 %v39418_v44 }
 0xbd5   : > { %32637 = vmatmul.mubr.f32.vlgmr.msra.gmra.mrb[8].mxu1 %v4017_v4 }
 0xbd6   : > { %35328 = vmatpush3.bf16.msra.mxu1 %v37423_v32  ;;  %32647 = vmatprep.mubr.msk.f32.mxu1 %vm36944_vm2, %v39420_v6 }
 0xbd7   : > { %35329 = vmatprep.subr.bf16.mxu1 %v39418_v44 }
 0xbda   : > { %35331 = vmatpush3.bf16.msra.mxu1 %v37426_v35 }
 0xbdb   : > { %32710 = vmatprep.subr.mxu1 %v39420_v6 }
 0xbdd   : > { %32648 = vmatmul.mubr.f32.vlgmr.msra.gmra.mrb[8].mxu1 %v4017_v4 }
 0xbde   : > { %32712 = vmatprep.mubr.msk.f32.mxu1 %vm36944_vm2, %v39420_v6 }
 0xcb0   : > { %v4429_v10 = vpop.f32.mrb[8].mxu1 }
 0xcb1   : > { %v37476_v11 = vadd.f32 %v30825_v9, %v4429_v10  ;;  %v32649_v50 = vpop.f32.mrb[9].mxu1 }
 0xcb3   : > { %5354 = vrot.lane.b32.xlu1 %v37476_v11, %s36947_s28  ;;  %4438 = vrot.lane.b32.xlu0 %v37476_v11, %s36946_s24  ;;  %v4441_v51 = vsel %vm4440_vm4, %v37476_v11, 0 }
 0xcb4   : > { %v37494_v0 = vand.u32 4294901760, %v4441_v51 }
 0xcb6   : > { %v4512_v8 = vsub.f32 %v4441_v51, %v37494_v0 }
 0xcb7   : > { %5356 = vrot.lane.b32.xlu1 %v37476_v11, %s36948_s29  ;;  %6273 = vrot.lane.b32.xlu0 %v37476_v11, %s36949_s30 }
 0xcb8   : > { %v4513_v1 = vand.u32 4294901760, %v4512_v8 }
 0xcba   : > { %v4514_v63 = vsub.f32 %v4512_v8, %v4513_v1 }
 0xcbb   : > { %6271 = vrot.lane.b32.xlu1 %v37476_v11, %s36950_s4  ;;  %7190 = vrot.lane.b32.xlu0 %v37476_v11, %s36951_s5 }
 0xcbc   : > { %v4515_v25 = vand.u32 4294901760, %v4514_v63 }
 0xcbf   : > { %7188 = vrot.lane.b32.xlu1 %v37476_v11, %s36952_s6 }
 0xd25   : > { %v5355_v12 = vpop.permute.xlu1 %5354  ;;  %v4439_v49 = vpop.permute.xlu0 %4438 }
 0xd26   : > { %v5358_v13 = vsel %vm4440_vm4, %v5355_v12, 0  ;;  %v4443_v16 = vsel %vm4440_vm4, %v4439_v49, 0 }
 0xd27   : > { %v37499_v18 = vand.u32 4294901760, %v5358_v13  ;;  %v4446_v19 = vand.u32 4294901760, %v4443_v16 }
 0xd29   : > { %v5429_v20 = vsub.f32 %v5358_v13, %v37499_v18  ;;  %v4523_v21 = vsub.f32 %v4443_v16, %v4446_v19  ;;  %v5357_v23 = vpop.permute.xlu1 %5356  ;;  %32651 = vmatpush3.xpose.msra.mxu0 %v4446_v19  ;;  %v6274_v40 = vpop.permute.xlu0 %6273 }
 0xd2a   : > { %v5360_v43 = vsel %vm4440_vm4, %v5357_v23, 0  ;;  %32655 = vmatprep.subr.mxu0 %v39420_v6  ;;  %v6277_v42 = vsel %vm4440_vm4, %v6274_v40, 0 }
 0xd2b   : > { %v5430_v26 = vand.u32 4294901760, %v5429_v20  ;;  %v4524_v27 = vand.u32 4294901760, %v4523_v21  ;;  %v5363_v28 = vand.u32 4294901760, %v5360_v43  ;;  %v6280_v47 = vand.u32 4294901760, %v6277_v42 }
 0xd2c   : > { %32653 = vmatmul.mubr.f32.vlgmr.msra.gmra.mrb[34].mxu0 %v4515_v25 }
 0xd2d   : > { %v5431_v29 = vsub.f32 %v5429_v20, %v5430_v26  ;;  %v4525_v24 = vsub.f32 %v4523_v21, %v4524_v27  ;;  %v5440_v31 = vsub.f32 %v5360_v43, %v5363_v28  ;;  %32711 = vmatpush3.xpose.msra.mxu1 %v5363_v28  ;;  %32657 = vmatprep.mubr.msk.f32.mxu0 %vm36944_vm2, %v39420_v6  ;;  %v6272_v39 = vpop.permute.xlu1 %6271  ;;  %v7191_v2 = vpop.permute.xlu0 %7190 }
 0xd2e   : > { %32715 = vmatprep.subr.mxu1 %v39420_v6  ;;  %v6275_v41 = vsel %vm4440_vm4, %v6272_v39, 0  ;;  %v6357_v52 = vsub.f32 %v6277_v42, %v6280_v47  ;;  %v7194_v4 = vsel %vm4440_vm4, %v7191_v2, 0 }
 0xd2f   : > { %v5441_v33 = vand.u32 4294901760, %v5440_v31  ;;  %v5432_v34 = vand.u32 4294901760, %v5431_v29  ;;  %v4526_v36 = vand.u32 4294901760, %v4525_v24  ;;  %v6345_v46 = vand.u32 4294901760, %v6275_v41 }
 0xd30   : > { %v6358_v54 = vand.u32 4294901760, %v6357_v52  ;;  %v7197_v30 = vand.u32 4294901760, %v7194_v4 }
 0xd31   : > { %v5442_v37 = vsub.f32 %v5440_v31, %v5441_v33  ;;  %32713 = vmatmul.mubr.f32.vlgmr.msra.gmra.mrb[10].mxu1 %v5432_v34  ;;  %32656 = vmatpush3.xpose.msra.mxu0 %v4526_v36  ;;  %v6346_v48 = vsub.f32 %v6275_v41, %v6345_v46  ;;  %v7189_v62 = vpop.permute.xlu1 %7188 }
 0xd32   : > { %32660 = vmatprep.subr.mxu0 %v39420_v6  ;;  %32717 = vmatprep.mubr.msk.f32.mxu1 %vm36944_vm2, %v39420_v6  ;;  %v6359_v60 = vsub.f32 %v6357_v52, %v6358_v54  ;;  %v7192_v3 = vsel %vm4440_vm4, %v7189_v62, 0  ;;  %v7274_v15 = vsub.f32 %v7194_v4, %v7197_v30 }
 0xd33   : > { %v5443_v38 = vand.u32 4294901760, %v5442_v37  ;;  %v6347_v53 = vand.u32 4294901760, %v6346_v48  ;;  %v7262_v5 = vand.u32 4294901760, %v7192_v3 }
 0xd34   : > { %32658 = vmatmul.mubr.f32.vlgmr.msra.gmra.mrb[34].mxu0 %v37494_v0  ;;  %v6360_v22 = vand.u32 4294901760, %v6359_v60  ;;  %v7275_v10 = vand.u32 4294901760, %v7274_v15 }
 0xd35   : > { %32716 = vmatpush3.xpose.msra.mxu1 %v5443_v38  ;;  %32661 = vmatpush3.xpose.msra.mxu0 %v4523_v21  ;;  %v6348_v55 = vsub.f32 %v6346_v48, %v6347_v53  ;;  %v7263_v7 = vsub.f32 %v7192_v3, %v7262_v5 }
 0xd36   : > { %32720 = vmatprep.subr.mxu1 %v39420_v6  ;;  %32662 = vmatprep.mubr.msk.f32.mxu0 %vm36944_vm2, %v39420_v6  ;;  %v7276_v51 = vsub.f32 %v7274_v15, %v7275_v10 }
 0xd37   : > { %32665 = vmatprep.subr.mxu0 %v39420_v6  ;;  %v6349_v61 = vand.u32 4294901760, %v6348_v55  ;;  %v7264_v9 = vand.u32 4294901760, %v7263_v7 }
 0xd39   : > { %32718 = vmatmul.mubr.f32.vlgmr.msra.gmra.mrb[10].mxu1 %v37499_v18  ;;  %v7265_v50 = vsub.f32 %v7263_v7, %v7264_v9 }
 0xd3a   : > { %32721 = vmatpush3.xpose.msra.mxu1 %v5440_v31  ;;  %32722 = vmatprep.mubr.msk.f32.mxu1 %vm36944_vm2, %v39420_v6 }
 0xd3b   : > { %32725 = vmatprep.subr.mxu1 %v39420_v6 }
 0xd3c   : > { %32663 = vmatmul.mubr.f32.vlgmr.msra.gmra.mrb[34].mxu0 %v4512_v8  ;;  %v7277_v8 = vand.u32 4294901760, %v7276_v51 }
 0xd3d   : > { %32666 = vmatpush3.xpose.msra.mxu0 %v4446_v19  ;;  %32667 = vmatprep.mubr.msk.f32.mxu0 %vm36944_vm2, %v39420_v6 }
 0xd3e   : > { %32670 = vmatprep.subr.mxu0 %v39420_v6 }
 0xd41   : > { %32723 = vmatmul.mubr.f32.vlgmr.msra.gmra.mrb[10].mxu1 %v5429_v20 }
 0xd42   : > { %32726 = vmatpush3.xpose.msra.mxu1 %v5363_v28  ;;  %32727 = vmatprep.mubr.msk.f32.mxu1 %vm36944_vm2, %v39420_v6 }
 0xd43   : > { %32730 = vmatprep.subr.mxu1 %v39420_v6 }
 0xd44   : > { %32668 = vmatmul.mubr.f32.vlgmr.msra.gmra.mrb[34].mxu0 %v4513_v1 }
 0xd45   : > { %32671 = vmatpush3.xpose.msra.mxu0 %v4524_v27  ;;  %32672 = vmatprep.mubr.msk.f32.mxu0 %vm36944_vm2, %v39420_v6 }
 0xd46   : > { %32675 = vmatprep.subr.mxu0 %v39420_v6 }
 0xd49   : > { %32728 = vmatmul.mubr.f32.vlgmr.msra.gmra.mrb[10].mxu1 %v5430_v26 }
 0xd4a   : > { %32731 = vmatpush3.xpose.msra.mxu1 %v5441_v33  ;;  %32732 = vmatprep.mubr.msk.f32.mxu1 %vm36944_vm2, %v39420_v6 }
 0xd4b   : > { %32735 = vmatprep.subr.mxu1 %v39420_v6 }
 0xd4c   : > { %32673 = vmatmul.mubr.f32.vlgmr.msra.gmra.mrb[34].mxu0 %v37494_v0 }
 0xd4d   : > { %32676 = vmatpush3.xpose.msra.mxu0 %v4446_v19  ;;  %32677 = vmatprep.mubr.msk.f32.mxu0 %vm36944_vm2, %v39420_v6 }
 0xd4e   : > { %32680 = vmatprep.subr.mxu0 %v39420_v6 }
 0xd51   : > { %32733 = vmatmul.mubr.f32.vlgmr.msra.gmra.mrb[10].mxu1 %v37499_v18 }
 0xd52   : > { %32736 = vmatpush3.xpose.msra.mxu1 %v5363_v28  ;;  %32737 = vmatprep.mubr.msk.f32.mxu1 %vm36944_vm2, %v39420_v6 }
 0xd53   : > { %32770 = vmatprep.subr.mxu1 %v39420_v6 }
 0xd54   : > { %32678 = vmatmul.mubr.f32.vlgmr.msra.gmra.mrb[34].mxu0 %v37494_v0  ;;  %v7266_v0 = vand.u32 4294901760, %v7265_v50 }
 0xd55   : > { %32682 = vmatprep.mubr.msk.f32.mxu0 %vm36944_vm2, %v39420_v6 }
 0xd59   : > { %32738 = vmatmul.mubr.f32.vlgmr.msra.gmra.mrb[10].mxu1 %v37499_v18 }
 0xd5a   : > { %32771 = vmatpush3.xpose.msra.mxu1 %v6280_v47  ;;  %32772 = vmatprep.mubr.msk.f32.mxu1 %vm36944_vm2, %v39420_v6 }
 0xd5b   : > { %32775 = vmatprep.subr.mxu1 %v39420_v6 }
 0xd5d   : > { %32773 = vmatmul.mubr.f32.vlgmr.msra.gmra.mrb[12].mxu1 %v6349_v61 }
 0xd5e   : > { %32776 = vmatpush3.xpose.msra.mxu1 %v6360_v22  ;;  %32777 = vmatprep.mubr.msk.f32.mxu1 %vm36944_vm2, %v39420_v6 }
 0xd5f   : > { %32780 = vmatprep.subr.mxu1 %v39420_v6 }
 0xd65   : > { %32778 = vmatmul.mubr.f32.vlgmr.msra.gmra.mrb[12].mxu1 %v6345_v46 }
 0xd66   : > { %32781 = vmatpush3.xpose.msra.mxu1 %v6357_v52  ;;  %32782 = vmatprep.mubr.msk.f32.mxu1 %vm36944_vm2, %v39420_v6 }
 0xd67   : > { %32785 = vmatprep.subr.mxu1 %v39420_v6 }
 0xd6d   : > { %32783 = vmatmul.mubr.f32.vlgmr.msra.gmra.mrb[12].mxu1 %v6346_v48 }
 0xd6e   : > { %32786 = vmatpush3.xpose.msra.mxu1 %v6280_v47  ;;  %32787 = vmatprep.mubr.msk.f32.mxu1 %vm36944_vm2, %v39420_v6 }
 0xd6f   : > { %32790 = vmatprep.subr.mxu1 %v39420_v6 }
 0xd75   : > { %32788 = vmatmul.mubr.f32.vlgmr.msra.gmra.mrb[12].mxu1 %v6347_v53 }
 0xd76   : > { %32791 = vmatpush3.xpose.msra.mxu1 %v6358_v54  ;;  %32792 = vmatprep.mubr.msk.f32.mxu1 %vm36944_vm2, %v39420_v6 }
 0xd77   : > { %32795 = vmatprep.subr.mxu1 %v39420_v6 }
 0xd7d   : > { %32793 = vmatmul.mubr.f32.vlgmr.msra.gmra.mrb[12].mxu1 %v6345_v46 }
 0xd7e   : > { %32796 = vmatpush3.xpose.msra.mxu1 %v6280_v47  ;;  %32797 = vmatprep.mubr.msk.f32.mxu1 %vm36944_vm2, %v39420_v6 }
 0xd7f   : > { %32830 = vmatprep.subr.mxu1 %v39420_v6 }
 0xd85   : > { %32798 = vmatmul.mubr.f32.vlgmr.msra.gmra.mrb[12].mxu1 %v6345_v46 }
 0xd86   : > { %32831 = vmatpush3.xpose.msra.mxu1 %v7197_v30  ;;  %32832 = vmatprep.mubr.msk.f32.mxu1 %vm36944_vm2, %v39420_v6 }
 0xd87   : > { %32835 = vmatprep.subr.mxu1 %v39420_v6 }
 0xd89   : > { %32833 = vmatmul.mubr.f32.vlgmr.msra.gmra.mrb[14].mxu1 %v7266_v0 }
 0xd8a   : > { %32836 = vmatpush3.xpose.msra.mxu1 %v7277_v8  ;;  %32837 = vmatprep.mubr.msk.f32.mxu1 %vm36944_vm2, %v39420_v6 }
 0xd8b   : > { %32840 = vmatprep.subr.mxu1 %v39420_v6 }
 0xd91   : > { %32838 = vmatmul.mubr.f32.vlgmr.msra.gmra.mrb[14].mxu1 %v7262_v5 }
 0xd92   : > { %32841 = vmatpush3.xpose.msra.mxu1 %v7274_v15  ;;  %32842 = vmatprep.mubr.msk.f32.mxu1 %vm36944_vm2, %v39420_v6 }
 0xd93   : > { %32845 = vmatprep.subr.mxu1 %v39420_v6 }
 0xd99   : > { %32843 = vmatmul.mubr.f32.vlgmr.msra.gmra.mrb[14].mxu1 %v7263_v7 }
 0xd9a   : > { %32846 = vmatpush3.xpose.msra.mxu1 %v7197_v30  ;;  %32847 = vmatprep.mubr.msk.f32.mxu1 %vm36944_vm2, %v39420_v6 }
 0xd9b   : > { %32850 = vmatprep.subr.mxu1 %v39420_v6 }
 0xda1   : > { %32848 = vmatmul.mubr.f32.vlgmr.msra.gmra.mrb[14].mxu1 %v7264_v9 }
 0xda2   : > { %32851 = vmatpush3.xpose.msra.mxu1 %v7275_v10  ;;  %32852 = vmatprep.mubr.msk.f32.mxu1 %vm36944_vm2, %v39420_v6 }
 0xda3   : > { %32855 = vmatprep.subr.mxu1 %v39420_v6 }
 0xda9   : > { %32853 = vmatmul.mubr.f32.vlgmr.msra.gmra.mrb[14].mxu1 %v7262_v5 }
 0xdaa   : > { %32856 = vmatpush3.xpose.msra.mxu1 %v7197_v30  ;;  %32857 = vmatprep.mubr.msk.f32.mxu1 %vm36944_vm2, %v39420_v6 }
 0xdab   : > { %35332 = vmatprep.subr.bf16.mxu1 %v39418_v44 }
 0xdb1   : > { %32858 = vmatmul.mubr.f32.vlgmr.msra.gmra.mrb[14].mxu1 %v7262_v5 }
 0xdb2   : > { %32898 = vmatprep.mubr.msk.f32.mxu1 %vm36944_vm2, %v39420_v6 }
 0xe27   : > { %v4887_v1 = vpop.f32.mrb[34].mxu0 }
 0xe28   : > { %v32679_v12 = vpop.f32.mrb[35].mxu0  ;;  %v4891_v49 = vsel %vm4440_vm4, %v4887_v1, -inf }
 0xe29   : > { %4892 = vmax.xlane.f32.xlu1 %v4891_v49 }
 0xe2c   : > { %v5804_v13 = vpop.f32.mrb[10].mxu1 }
 0xe2d   : > { %v32739_v16 = vpop.f32.mrb[11].mxu1  ;;  %v5808_v63 = vsel %vm4440_vm4, %v5804_v13, -inf }
 0xe2e   : > { %5809 = vmax.xlane.f32.xlu0 %v5808_v63 }
 0xe3a   : > { %4902 = vrot.lane.b32.xlu1 %v37476_v11, %s36953_s7 }
 0xe58   : > { %v6721_v18 = vpop.f32.mrb[12].mxu1 }
 0xe59   : > { %v32799_v19 = vpop.f32.mrb[13].mxu1  ;;  %v6725_v34 = vsel %vm4440_vm4, %v6721_v18, -inf }
 0xe84   : > { %v7638_v20 = vpop.f32.mrb[14].mxu1 }
 0xe85   : > { %v32859_v21 = vpop.f32.mrb[15].mxu1  ;;  %v7642_v38 = vsel %vm4440_vm4, %v7638_v20, -inf }
 0xeb6   : > { %v4893_v23 = vpop.xlane.xlu1 %4892 }
 0xeb7   : > { %v4894_v43 = vsub.f32 %v4887_v1, %v4893_v23 }
 0xeb9   : > { %v4895_v25 = vmul.f32 1.442695, %v4894_v43 }
 0xeba   : > { %v4903_v26 = vpop.permute.xlu1 %4902 }
 0xebb   : > { %36727 = vpow2.f32 %v4895_v25  ;;  %v37589_v27 = vand.u32 4294901760, %v4903_v26  ;;  %v5810_v28 = vpop.xlane.xlu0 %5809 }
 0xebc   : > { %v5811_v29 = vsub.f32 %v5804_v13, %v5810_v28 }
 0xebd   : > { %32681 = vmatpush3.msra.mxu0 %v37589_v27  ;;  %v4986_v48 = vsub.f32 %v4903_v26, %v37589_v27 }
 0xebe   : > { %v5812_v24 = vmul.f32 1.442695, %v5811_v29  ;;  %32685 = vmatprep.subr.mxu0 %v39420_v6 }
 0xebf   : > { %v4987_v22 = vand.u32 4294901760, %v4986_v48 }
 0xec0   : > { %36729 = vpow2.f32 %v5812_v24 }
 0xec1   : > { %v4988_v5 = vsub.f32 %v4986_v48, %v4987_v22 }
 0xec3   : > { %v4989_v15 = vand.u32 4294901760, %v4988_v5 }
 0xec5   : > { %v36728_v31 = vpop.eup %36727 }
 0xec6   : > { %v4897_v33 = vsel %vm4440_vm4, %v36728_v31, 0.0 }
 0xec7   : > { %4898 = vadd.xlane.f32.xlu0 %v4897_v33 }
 0xeca   : > { %v36730_v36 = vpop.eup %36729 }
 0xecb   : > { %6726 = vmax.xlane.f32.xlu0 %v6725_v34  ;;  %v5814_v37 = vsel %vm4440_vm4, %v36730_v36, 0.0 }
 0xecf   : > { %5815 = vadd.xlane.f32.xlu0 %v5814_v37 }
 0xed3   : > { %7643 = vmax.xlane.f32.xlu0 %v7642_v38 }
 0xee9   : > { %5819 = vrot.lane.b32.xlu0 %v37476_v11, %s36954_s8 }
 0xeed   : > { %6736 = vrot.lane.b32.xlu0 %v37476_v11, %s36955_s9 }
 0xf54   : > { %v4899_v39 = vpop.xlane.xlu0 %4898 }
 0xf55   : > { %36731 = vrcp.f32 %v4899_v39 }
 0xf58   : > { %v6727_v40 = vpop.xlane.xlu0 %6726 }
 0xf59   : > { %v6728_v41 = vsub.f32 %v6721_v18, %v6727_v40 }
 0xf5b   : > { %v6729_v42 = vmul.f32 1.442695, %v6728_v41 }
 0xf5c   : > { %v5816_v46 = vpop.xlane.xlu0 %5815 }
 0xf5d   : > { %36733 = vpow2.f32 %v6729_v42 }
 0xf5f   : > { %v36732_v47 = vpop.eup %36731 }
 0xf60   : > { %v4901_v52 = vmul.f32 %v36732_v47, %v36728_v31  ;;  %v7644_v53 = vpop.xlane.xlu0 %7643 }
 0xf61   : > { %v7645_v54 = vsub.f32 %v7638_v20, %v7644_v53 }
 0xf62   : > { %v4906_v55 = vsel %vm4440_vm4, %v4901_v52, 0 }
 0xf63   : > { %v7646_v60 = vmul.f32 1.442695, %v7645_v54  ;;  %v4974_v61 = vand.u32 4294901760, %v4906_v55 }
 0xf64   : > { %v5820_v8 = vpop.permute.xlu0 %5819 }
 0xf65   : > { %36735 = vpow2.f32 %v7646_v60  ;;  %v4975_v62 = vsub.f32 %v4906_v55, %v4974_v61  ;;  %v5826_v1 = vand.u32 4294901760, %v5820_v8 }
 0xf66   : > { %36737 = vrcp.f32 %v5816_v46 }
 0xf67   : > { %v37603_v2 = vpop.eup %36733  ;;  %v4976_v3 = vand.u32 4294901760, %v4975_v62  ;;  %v5903_v49 = vsub.f32 %v5820_v8, %v5826_v1 }
 0xf68   : > { %v6731_v4 = vsel %vm4440_vm4, %v37603_v2, 0.0  ;;  %v6737_v21 = vpop.permute.xlu0 %6736 }
 0xf69   : > { %6732 = vadd.xlane.f32.xlu1 %v6731_v4  ;;  %v4977_v30 = vsub.f32 %v4975_v62, %v4976_v3  ;;  %v5904_v16 = vand.u32 4294901760, %v5903_v49  ;;  %v6743_v23 = vand.u32 4294901760, %v6737_v21 }
 0xf6b   : > { %v4978_v7 = vand.u32 4294901760, %v4977_v30  ;;  %v5905_v18 = vsub.f32 %v5903_v49, %v5904_v16  ;;  %v6820_v26 = vsub.f32 %v6737_v21, %v6743_v23  ;;  %v4433_v30 = vld [vmem:[#allocation2 + $0xe8] sm:$0xff] }
 0xf6d   : > { %32683 = vmatmul.mubr.f32.vlgmr.msra.gmra.mrb[36].mxu0 %v4978_v7  ;;  %v5906_v20 = vand.u32 4294901760, %v5905_v18  ;;  %v6821_v24 = vand.u32 4294901760, %v6820_v26  ;;  %v4434_v7 = vld [vmem:[#allocation2 + $0xf0] sm:$0xff]  ;;  %v4436_v18 = vld [vmem:[#allocation2 + $0x100] sm:$0xff] }
 0xf6e   : > { %32686 = vmatpush3.msra.mxu0 %v4989_v15  ;;  %32687 = vmatprep.mubr.msk.f32.mxu0 %vm36944_vm2, %v39420_v6  ;;  %v8130_v15 = vand.u32 4294901760, %v4433_v30 }
 0xf6f   : > { %v37609_v9 = vpop.eup %36735  ;;  %32690 = vmatprep.subr.mxu0 %v39420_v6  ;;  %v6822_v34 = vsub.f32 %v6820_v26, %v6821_v24 }
 0xf70   : > { %v7648_v10 = vsel %vm4440_vm4, %v37609_v9, 0.0  ;;  %v36738_v50 = vpop.eup %36737 }
 0xf71   : > { %7649 = vadd.xlane.f32.xlu0 %v7648_v10  ;;  %v5818_v51 = vmul.f32 %v36738_v50, %v36730_v36  ;;  %v6823_v38 = vand.u32 4294901760, %v6822_v34  ;;  %v8210_v10 = vsub.f32 %v4433_v30, %v8130_v15 }
 0xf73   : > { %v5823_v0 = vsel %vm4440_vm4, %v5818_v51, 0  ;;  %v8211_v51 = vand.u32 4294901760, %v8210_v10 }
 0xf75   : > { %32688 = vmatmul.mubr.f32.vlgmr.msra.gmra.mrb[36].mxu0 %v4974_v61  ;;  %v8212_v8 = vsub.f32 %v8210_v10, %v8211_v51 }
 0xf76   : > { %32691 = vmatpush3.msra.mxu0 %v4986_v48  ;;  %32692 = vmatprep.mubr.msk.f32.mxu0 %vm36944_vm2, %v39420_v6 }
 0xf77   : > { %32695 = vmatprep.subr.mxu0 %v39420_v6 }
 0xf7a   : > { %7653 = vrot.lane.b32.xlu1 %v37476_v11, %s36956_s10  ;;  %v5891_v11 = vand.u32 4294901760, %v5823_v0 }
 0xf7c   : > { %v5892_v12 = vsub.f32 %v5823_v0, %v5891_v11 }
 0xf7d   : > { %32693 = vmatmul.mubr.f32.vlgmr.msra.gmra.mrb[36].mxu0 %v4975_v62 }
 0xf7e   : > { %32696 = vmatpush3.msra.mxu0 %v37589_v27  ;;  %32697 = vmatprep.mubr.msk.f32.mxu0 %vm36944_vm2, %v39420_v6  ;;  %v5893_v13 = vand.u32 4294901760, %v5892_v12 }
 0xf7f   : > { %32700 = vmatprep.subr.mxu0 %v39420_v6 }
 0xf80   : > { %v5894_v63 = vsub.f32 %v5892_v12, %v5893_v13 }
 0xf82   : > { %v5895_v19 = vand.u32 4294901760, %v5894_v63  ;;  %v4435_v63 = vld [vmem:[#allocation2 + $0xf8] sm:$0xff] }
 0xf85   : > { %32698 = vmatmul.mubr.f32.vlgmr.msra.gmra.mrb[36].mxu0 %v4976_v3 }
 0xf86   : > { %32701 = vmatpush3.msra.mxu0 %v4987_v22  ;;  %32702 = vmatprep.mubr.msk.f32.mxu0 %vm36944_vm2, %v39420_v6 }
 0xf87   : > { %32705 = vmatprep.subr.mxu0 %v39420_v6 }
 0xf8d   : > { %32703 = vmatmul.mubr.f32.vlgmr.msra.gmra.mrb[36].mxu0 %v4974_v61 }
 0xf8e   : > { %32706 = vmatpush3.msra.mxu0 %v37589_v27  ;;  %32707 = vmatprep.mubr.msk.f32.mxu0 %vm36944_vm2, %v39420_v6 }
 0xf8f   : > { %32740 = vmatprep.subr.mxu0 %v39420_v6 }
 0xf95   : > { %32708 = vmatmul.mubr.f32.vlgmr.msra.gmra.mrb[36].mxu0 %v4974_v61 }
 0xf96   : > { %32741 = vmatpush3.msra.mxu0 %v5826_v1  ;;  %32742 = vmatprep.mubr.msk.f32.mxu0 %vm36944_vm2, %v39420_v6 }
 0xf97   : > { %32745 = vmatprep.subr.mxu0 %v39420_v6 }
 0xf99   : > { %32743 = vmatmul.mubr.f32.vlgmr.msra.gmra.mrb[38].mxu0 %v5895_v19  ;;  %v8136_v19 = vand.u32 4294901760, %v4435_v63 }
 0xf9a   : > { %32746 = vmatpush3.msra.mxu0 %v5906_v20  ;;  %32747 = vmatprep.mubr.msk.f32.mxu0 %vm36944_vm2, %v39420_v6  ;;  %v8139_v20 = vand.u32 4294901760, %v4436_v18 }
 0xf9b   : > { %32750 = vmatprep.subr.mxu0 %v39420_v6  ;;  %v8224_v21 = vsub.f32 %v4435_v63, %v8136_v19 }
 0xfa1   : > { %32748 = vmatmul.mubr.f32.vlgmr.msra.gmra.mrb[38].mxu0 %v5891_v11 }
 0xfa2   : > { %32751 = vmatpush3.msra.mxu0 %v5903_v49  ;;  %32752 = vmatprep.mubr.msk.f32.mxu0 %vm36944_vm2, %v39420_v6 }
 0xfa3   : > { %32755 = vmatprep.subr.mxu0 %v39420_v6 }
 0xfa9   : > { %32753 = vmatmul.mubr.f32.vlgmr.msra.gmra.mrb[38].mxu0 %v5892_v12 }
 0xfaa   : > { %32756 = vmatpush3.msra.mxu0 %v5826_v1  ;;  %32757 = vmatprep.mubr.msk.f32.mxu0 %vm36944_vm2, %v39420_v6 }
 0xfab   : > { %32760 = vmatprep.subr.mxu0 %v39420_v6 }
 0xfb1   : > { %32758 = vmatmul.mubr.f32.vlgmr.msra.gmra.mrb[38].mxu0 %v5893_v13 }
 0xfb2   : > { %32761 = vmatpush3.msra.mxu0 %v5904_v16  ;;  %32762 = vmatprep.mubr.msk.f32.mxu0 %vm36944_vm2, %v39420_v6 }
 0xfb3   : > { %32765 = vmatprep.subr.mxu0 %v39420_v6 }
 0xfb9   : > { %32763 = vmatmul.mubr.f32.vlgmr.msra.gmra.mrb[38].mxu0 %v5891_v11 }
 0xfba   : > { %32766 = vmatpush3.msra.mxu0 %v5826_v1  ;;  %32767 = vmatprep.mubr.msk.f32.mxu0 %vm36944_vm2, %v39420_v6  ;;  %v8213_v1 = vand.u32 4294901760, %v8212_v8 }
 0xfbb   : > { %32800 = vmatprep.subr.mxu0 %v39420_v6 }
 0xfc1   : > { %32768 = vmatmul.mubr.f32.vlgmr.msra.gmra.mrb[38].mxu0 %v5891_v11 }
 0xfc2   : > { %32801 = vmatpush3.msra.mxu0 %v6743_v23  ;;  %32802 = vmatprep.mubr.msk.f32.mxu0 %vm36944_vm2, %v39420_v6 }
 0xfc3   : > { %32805 = vmatprep.subr.mxu0 %v39420_v6 }
 0xff6   : > { %v6733_v43 = vpop.xlane.xlu1 %6732 }
 0xff7   : > { %36739 = vrcp.f32 %v6733_v43  ;;  %v8225_v43 = vand.u32 4294901760, %v8224_v21 }
 0xffa   : > { %v7654_v46 = vpop.permute.xlu1 %7653 }
 0xffb   : > { %v7660_v48 = vand.u32 4294901760, %v7654_v46 }
 0xffd   : > { %v7737_v53 = vsub.f32 %v7654_v46, %v7660_v48 }
 0xffe   : > { %v7650_v39 = vpop.xlane.xlu0 %7649 }
 0xfff   : > { %36741 = vrcp.f32 %v7650_v39  ;;  %v7738_v55 = vand.u32 4294901760, %v7737_v53 }
0x1001   : > { %v36740_v25 = vpop.eup %36739  ;;  %v7739_v61 = vsub.f32 %v7737_v53, %v7738_v55 }
0x1002   : > { %v6735_v27 = vmul.f32 %v36740_v25, %v37603_v2 }
0x1003   : > { %v7740_v62 = vand.u32 4294901760, %v7739_v61 }
0x1004   : > { %v6740_v28 = vsel %vm4440_vm4, %v6735_v27, 0 }
0x1005   : > { %v6808_v29 = vand.u32 4294901760, %v6740_v28 }
0x1007   : > { %v6809_v31 = vsub.f32 %v6740_v28, %v6808_v29 }
0x1009   : > { %v6810_v33 = vand.u32 4294901760, %v6809_v31  ;;  %v36742_v40 = vpop.eup %36741 }
0x100a   : > { %v7652_v41 = vmul.f32 %v36742_v40, %v37609_v9  ;;  %v8133_v9 = vand.u32 4294901760, %v4434_v7 }
0x100b   : > { %v6811_v36 = vsub.f32 %v6809_v31, %v6810_v33 }
0x100c   : > { %v7657_v42 = vsel %vm4440_vm4, %v7652_v41, 0  ;;  %v8217_v50 = vsub.f32 %v4434_v7, %v8133_v9 }
0x100d   : > { %v6812_v37 = vand.u32 4294901760, %v6811_v36  ;;  %v7725_v47 = vand.u32 4294901760, %v7657_v42 }
0x100e   : > { %v8218_v0 = vand.u32 4294901760, %v8217_v50  ;;  %v37709_v34 = vpack.c.bf16 %v8217_v50, %v8210_v10 }
0x100f   : > { %32803 = vmatmul.mubr.f32.vlgmr.msra.gmra.mrb[40].mxu0 %v6812_v37  ;;  %v7726_v52 = vsub.f32 %v7657_v42, %v7725_v47 }
0x1010   : > { %32806 = vmatpush3.msra.mxu0 %v6823_v38  ;;  %32807 = vmatprep.mubr.msk.f32.mxu0 %vm36944_vm2, %v39420_v6  ;;  %v8219_v11 = vsub.f32 %v8217_v50, %v8218_v0  ;;  %v37714_v39 = vpack.c.bf16 %v8218_v0, %v8211_v51 }
0x1011   : > { %32810 = vmatprep.subr.mxu0 %v39420_v6  ;;  %v7727_v54 = vand.u32 4294901760, %v7726_v52 }
0x1012   : > { %v8220_v12 = vand.u32 4294901760, %v8219_v11 }
0x1013   : > { %v7728_v60 = vsub.f32 %v7726_v52, %v7727_v54 }
0x1014   : > { %v37692_v49 = vpack.c.bf16 %v8220_v12, %v8213_v1 }
0x1015   : > { %v7729_v22 = vand.u32 4294901760, %v7728_v60 }
0x1017   : > { %32808 = vmatmul.mubr.f32.vlgmr.msra.gmra.mrb[40].mxu0 %v6808_v29 }
0x1018   : > { %32811 = vmatpush3.msra.mxu0 %v6820_v26  ;;  %32812 = vmatprep.mubr.msk.f32.mxu0 %vm36944_vm2, %v39420_v6  ;;  %v8226_v26 = vsub.f32 %v8224_v21, %v8225_v43 }
0x1019   : > { %32815 = vmatprep.subr.mxu0 %v39420_v6 }
0x101a   : > { %v8227_v28 = vand.u32 4294901760, %v8226_v26  ;;  %v8629_v26 = vld [vmem:[#allocation2 + $0x118] sm:$0xff] }
0x101f   : > { %32813 = vmatmul.mubr.f32.vlgmr.msra.gmra.mrb[40].mxu0 %v6809_v31  ;;  %v37701_v31 = vpack.c.bf16 %v8133_v9, %v8130_v15 }
0x1020   : > { %32816 = vmatpush3.msra.mxu0 %v6743_v23  ;;  %32817 = vmatprep.mubr.msk.f32.mxu0 %vm36944_vm2, %v39420_v6 }
0x1021   : > { %32820 = vmatprep.subr.mxu0 %v39420_v6  ;;  %35334 = vmatpush3.bf16.msra.mxu1 %v37701_v31 }
0x1022   : > { %35335 = vmatprep.subr.bf16.mxu1 %v39418_v44 }
0x1027   : > { %32818 = vmatmul.mubr.f32.vlgmr.msra.gmra.mrb[40].mxu0 %v6810_v33  ;;  %v37705_v33 = vpack.c.bf16 %v8139_v20, %v8136_v19 }
0x1028   : > { %32821 = vmatpush3.msra.mxu0 %v6821_v24  ;;  %32822 = vmatprep.mubr.msk.f32.mxu0 %vm36944_vm2, %v39420_v6 }
0x1029   : > { %32825 = vmatprep.subr.mxu0 %v39420_v6  ;;  %35337 = vmatpush3.bf16.msra.mxu1 %v37705_v33 }
0x102a   : > { %35344 = vmatprep.subr.bf16.mxu1 %v39418_v44 }
0x102f   : > { %32823 = vmatmul.mubr.f32.vlgmr.msra.gmra.mrb[40].mxu0 %v6808_v29 }
0x1030   : > { %32826 = vmatpush3.msra.mxu0 %v6743_v23  ;;  %32827 = vmatprep.mubr.msk.f32.mxu0 %vm36944_vm2, %v39420_v6  ;;  %v8231_v23 = vsub.f32 %v4436_v18, %v8139_v20 }
0x1031   : > { %32860 = vmatprep.subr.mxu0 %v39420_v6 }
0x1032   : > { %v8232_v25 = vand.u32 4294901760, %v8231_v23  ;;  %v37712_v38 = vpack.c.bf16 %v8231_v23, %v8224_v21 }
0x1034   : > { %v8233_v27 = vsub.f32 %v8231_v23, %v8232_v25  ;;  %v37716_v40 = vpack.c.bf16 %v8232_v25, %v8225_v43  ;;  %v8628_v25 = vld [vmem:[#allocation2 + $0x110] sm:$0xff] }
0x1037   : > { %32828 = vmatmul.mubr.f32.vlgmr.msra.gmra.mrb[40].mxu0 %v6808_v29  ;;  %v8234_v29 = vand.u32 4294901760, %v8233_v27  ;;  %v8630_v27 = vld [vmem:[#allocation2 + $0x120] sm:$0xff] }
0x1038   : > { %32861 = vmatpush3.msra.mxu0 %v7660_v48  ;;  %32862 = vmatprep.mubr.msk.f32.mxu0 %vm36944_vm2, %v39420_v6 }
0x1039   : > { %32865 = vmatprep.subr.mxu0 %v39420_v6  ;;  %v37697_v24 = vpack.c.bf16 %v8234_v29, %v8227_v28  ;;  %v8641_v28 = vand.u32 4294901760, %v8628_v25  ;;  %v8644_v29 = vand.u32 4294901760, %v8629_v26 }
0x103b   : > { %32863 = vmatmul.mubr.f32.vlgmr.msra.gmra.mrb[42].mxu0 %v7729_v22 }
0x103c   : > { %32866 = vmatpush3.msra.mxu0 %v7740_v62  ;;  %32867 = vmatprep.mubr.msk.f32.mxu0 %vm36944_vm2, %v39420_v6 }
0x103d   : > { %32870 = vmatprep.subr.mxu0 %v39420_v6 }
0x1043   : > { %32868 = vmatmul.mubr.f32.vlgmr.msra.gmra.mrb[42].mxu0 %v7725_v47 }
0x1044   : > { %32871 = vmatpush3.msra.mxu0 %v7737_v53  ;;  %32872 = vmatprep.mubr.msk.f32.mxu0 %vm36944_vm2, %v39420_v6 }
0x1045   : > { %32875 = vmatprep.subr.mxu0 %v39420_v6 }
0x104b   : > { %32873 = vmatmul.mubr.f32.vlgmr.msra.gmra.mrb[42].mxu0 %v7726_v52 }
0x104c   : > { %32876 = vmatpush3.msra.mxu0 %v7660_v48  ;;  %32877 = vmatprep.mubr.msk.f32.mxu0 %vm36944_vm2, %v39420_v6 }
0x104d   : > { %32880 = vmatprep.subr.mxu0 %v39420_v6 }
0x1053   : > { %32878 = vmatmul.mubr.f32.vlgmr.msra.gmra.mrb[42].mxu0 %v7727_v54 }
0x1054   : > { %32881 = vmatpush3.msra.mxu0 %v7738_v55  ;;  %32882 = vmatprep.mubr.msk.f32.mxu0 %vm36944_vm2, %v39420_v6 }
0x1055   : > { %32885 = vmatprep.subr.mxu0 %v39420_v6 }
0x105b   : > { %32883 = vmatmul.mubr.f32.vlgmr.msra.gmra.mrb[42].mxu0 %v7725_v47 }
0x105c   : > { %32886 = vmatpush3.msra.mxu0 %v7660_v48  ;;  %32887 = vmatprep.mubr.msk.f32.mxu0 %vm36944_vm2, %v39420_v6 }
0x105d   : > { %35338 = vmatprep.subr.bf16.mxu0 %v39418_v44 }
0x1063   : > { %32888 = vmatmul.mubr.f32.vlgmr.msra.gmra.mrb[42].mxu0 %v7725_v47 }
0x1064   : > { %32909 = vmatprep.mubr.msk.f32.mxu0 %vm36944_vm2, %v39420_v6  ;;  %35340 = vmatpush3.bf16.msra.mxu0 %v37692_v49 }
0x1065   : > { %35341 = vmatprep.subr.bf16.mxu0 %v39418_v44 }
0x1068   : > { %v5350_v2 = vpop.f32.mrb[36].mxu0  ;;  %35343 = vmatpush3.bf16.msra.mxu0 %v37697_v24 }
0x1069   : > { %v32709_v3 = vpop.f32.mrb[37].mxu0  ;;  %35350 = vmatprep.subr.bf16.mxu0 %v39418_v44 }
0x106a   : > { %v30826_v3 = vld [vmem:[#allocation2 + $0x108] ss:$0 sm:$0xff] }
0x1094   : > { %v6267_v4 = vpop.f32.mrb[38].mxu0 }
0x1095   : > { %8106 = vrot.lane.b32.xlu0 %v6267_v4, %s36957_s11  ;;  %v32769_v5 = vpop.f32.mrb[39].mxu0 }
0x1107   : > { %v8107_v41 = vpop.permute.xlu0 %8106 }
0x1108   : > { %v8117_v46 = vsel %vm4440_vm4, %v5350_v2, %v8107_v41  ;;  %v37757_v41 = vpack.c.bf16 %v8644_v29, %v8641_v28 }
0x110a   : > { %v7184_v13 = vpop.f32.mrb[40].mxu0 }
0x110b   : > { %8110 = vrot.lane.b32.xlu1 %v7184_v13, %s36958_s17  ;;  %v32829_v16 = vpop.f32.mrb[41].mxu0 }
0x1136   : > { %v8101_v36 = vpop.f32.mrb[42].mxu0 }
0x1137   : > { %8114 = vrot.lane.b32.xlu1 %v8101_v36, %s36959_s20  ;;  %v32889_v37 = vpop.f32.mrb[43].mxu0  ;;  %v8631_v36 = vld [vmem:[#allocation2 + $0x128] sm:$0xff] }
0x1138   : > { %v8650_v37 = vand.u32 4294901760, %v8631_v36 }
0x117d   : > { %v8111_v42 = vpop.permute.xlu1 %8110 }
0x117e   : > { %v8118_v47 = vsel %vm719_vm1, %v8117_v46, %v8111_v42  ;;  %v8721_v42 = vsub.f32 %v8628_v25, %v8641_v28  ;;  %v8728_v46 = vsub.f32 %v8629_v26, %v8644_v29 }
0x11a9   : > { %v8115_v48 = vpop.permute.xlu1 %8114 }
0x11aa   : > { %v8120_v52 = vsel %vm8119_vm5, %v8118_v47, %v8115_v48  ;;  %v8722_v48 = vand.u32 4294901760, %v8721_v42 }
0x11ab   : > { %v8127_v53 = vsel %vm207_vm0, %v8120_v52, 0  ;;  %v8729_v52 = vand.u32 4294901760, %v8728_v46 }
0x11ac   : > { %v8198_v54 = vand.u32 4294901760, %v8127_v53 }
0x11ae   : > { %v8199_v55 = vsub.f32 %v8127_v53, %v8198_v54  ;;  %32910 = vmatmul.mubr.f32.vlgmr.msra.gmra.mrb[44].mxu0 %v8198_v54  ;;  %v8723_v53 = vsub.f32 %v8721_v42, %v8722_v48 }
0x11af   : > { %35352 = vmatpush3.bf16.msra.mxu0 %v37701_v31  ;;  %32931 = vmatprep.mubr.msk.f32.mxu0 %vm36944_vm2, %v39420_v6 }
0x11b0   : > { %35353 = vmatprep.subr.bf16.mxu0 %v39418_v44  ;;  %v8200_v60 = vand.u32 4294901760, %v8199_v55 }
0x11b2   : > { %v8201_v61 = vsub.f32 %v8199_v55, %v8200_v60 }
0x11b3   : > { %35355 = vmatpush3.bf16.msra.mxu0 %v37705_v33 }
0x11b4   : > { %35362 = vmatprep.subr.bf16.mxu0 %v39418_v44  ;;  %v8202_v22 = vand.u32 4294901760, %v8201_v61  ;;  %v8724_v61 = vand.u32 4294901760, %v8723_v53 }
0x11b6   : > { %32932 = vmatmul.mubr.f32.vlgmr.msra.gmra.mrb[46].mxu0 %v8200_v60  ;;  %32899 = vmatmul.mubr.f32.vlgmr.msra.gmra.mrb[16].mxu1 %v8202_v22  ;;  %v8742_v60 = vsub.f32 %v8631_v36, %v8650_v37  ;;  %v9153_v36 = vld [vmem:[#allocation2 + $0x148] sm:$0xff] }
0x11b7   : > { %35346 = vmatpush3.bf16.msra.mxu1 %v37709_v34  ;;  %35364 = vmatpush3.bf16.msra.mxu0 %v37701_v31 }
0x11b8   : > { %35347 = vmatprep.subr.bf16.mxu1 %v39418_v44  ;;  %35365 = vmatprep.subr.bf16.mxu0 %v39418_v44 }
0x11b9   : > { %32920 = vmatprep.mubr.msk.f32.mxu1 %vm36944_vm2, %v39420_v6  ;;  %32953 = vmatprep.mubr.msk.f32.mxu0 %vm36944_vm2, %v39420_v6 }
0x11bb   : > { %35349 = vmatpush3.bf16.msra.mxu1 %v37712_v38  ;;  %35367 = vmatpush3.bf16.msra.mxu0 %v37705_v33 }
0x11bc   : > { %35356 = vmatprep.subr.bf16.mxu1 %v39418_v44  ;;  %35404 = vmatprep.subr.bf16.mxu0 %v39418_v44 }
0x11be   : > { %32921 = vmatmul.mubr.f32.vlgmr.msra.gmra.mrb[18].mxu1 %v8199_v55  ;;  %32954 = vmatmul.mubr.f32.vlgmr.msra.gmra.mrb[48].mxu0 %v8198_v54 }
0x11bf   : > { %35358 = vmatpush3.bf16.msra.mxu1 %v37714_v39  ;;  %32942 = vmatprep.mubr.msk.f32.mxu1 %vm36944_vm2, %v39420_v6 }
0x11c0   : > { %35359 = vmatprep.subr.bf16.mxu1 %v39418_v44  ;;  %33030 = vmatprep.mubr.msk.f32.mxu0 %vm36944_vm2, %v39420_v6 }
0x11c3   : > { %35361 = vmatpush3.bf16.msra.mxu1 %v37716_v40 }
0x11c4   : > { %35368 = vmatprep.subr.bf16.mxu1 %v39418_v44 }
0x11c6   : > { %32943 = vmatmul.mubr.f32.vlgmr.msra.gmra.mrb[20].mxu1 %v8198_v54  ;;  %v8730_v54 = vsub.f32 %v8728_v46, %v8729_v52 }
0x11c7   : > { %32964 = vmatprep.mubr.msk.f32.mxu1 %vm36944_vm2, %v39420_v6  ;;  %35370 = vmatpush3.bf16.msra.mxu1 %v37757_v41 }
0x11c8   : > { %35371 = vmatprep.subr.bf16.mxu1 %v39418_v44  ;;  %v8731_v22 = vand.u32 4294901760, %v8730_v54 }
0x1281   : > { %v8295_v62 = vpop.f32.mrb[44].mxu0 }
0x1282   : > { %v32911_v2 = vpop.f32.mrb[45].mxu0 }
0x1283   : > { %v8743_v2 = vand.u32 4294901760, %v8742_v60 }
0x1289   : > { %v8452_v4 = vpop.f32.mrb[46].mxu0  ;;  %v8204_v5 = vpop.f32.mrb[16].mxu1 }
0x128a   : > { %v8205_v30 = vadd.f32 %v30826_v3, %v8204_v5  ;;  %v32933_v7 = vpop.f32.mrb[47].mxu0  ;;  %v32900_v15 = vpop.f32.mrb[17].mxu1  ;;  %v37765_v3 = vpack.c.bf16 %v8731_v22, %v8724_v61  ;;  %v8744_v5 = vsub.f32 %v8742_v60, %v8743_v2 }
0x128c   : > { %v8296_v9 = vadd.f32 %v8295_v62, %v8205_v30  ;;  %v8745_v7 = vand.u32 4294901760, %v8744_v5 }
0x1291   : > { %v8375_v10 = vpop.f32.mrb[18].mxu1  ;;  %v8610_v50 = vpop.f32.mrb[48].mxu0 }
0x1292   : > { %v8376_v51 = vadd.f32 %v8375_v10, %v8296_v9  ;;  %v32922_v0 = vpop.f32.mrb[19].mxu1  ;;  %v32955_v8 = vpop.f32.mrb[49].mxu0  ;;  %v37769_v9 = vpack.c.bf16 %v8728_v46, %v8721_v42 }
0x1294   : > { %v8453_v11 = vadd.f32 %v8452_v4, %v8376_v51 }
0x1299   : > { %v8535_v1 = vpop.f32.mrb[20].mxu1 }
0x129a   : > { %v8536_v12 = vadd.f32 %v8535_v1, %v8453_v11  ;;  %v32944_v13 = vpop.f32.mrb[21].mxu1 }
0x129c   : > { %v8611_v16 = vadd.f32 %v8610_v50, %v8536_v12  ;;  %v37773_v50 = vpack.c.bf16 %v8729_v52, %v8722_v48 }
0x129e   : > { %v37751_v63 = vadd.f32 %v8611_v16, %v37417_v17  ;;  %v8647_v17 = vand.u32 4294901760, %v8630_v27 }
0x12a0   : > { %v8615_v18 = vsel %vm207_vm0, %v37751_v63, 0.0  ;;  %v37760_v47 = vpack.c.bf16 %v8650_v37, %v8647_v17  ;;  %v8735_v55 = vsub.f32 %v8630_v27, %v8647_v17  ;;  %v9154_v17 = vld [vmem:[#allocation2 + $0x150] sm:$0xff]  ;;  %v9170_v37 = vand.u32 4294901760, %v9153_v36 }
0x12a1   : > { %8616 = vadd.xlane.f32.xlu1 %v8615_v18  ;;  %v9173_v42 = vand.u32 4294901760, %v9154_v17 }
0x12a2   : > { %35373 = vmatpush3.bf16.msra.mxu1 %v37760_v47  ;;  %v8736_v62 = vand.u32 4294901760, %v8735_v55  ;;  %v37771_v10 = vpack.c.bf16 %v8742_v60, %v8735_v55 }
0x12a3   : > { %35374 = vmatprep.subr.bf16.mxu1 %v39418_v44  ;;  %v37814_v52 = vpack.c.bf16 %v9173_v42, %v9170_v37  ;;  %v9265_v60 = vsub.f32 %v9154_v17, %v9173_v42 }
0x12a4   : > { %v8737_v4 = vsub.f32 %v8735_v55, %v8736_v62  ;;  %v37775_v51 = vpack.c.bf16 %v8743_v2, %v8736_v62  ;;  %v9258_v55 = vsub.f32 %v9153_v36, %v9170_v37 }
0x12a5   : > { %v9266_v2 = vand.u32 4294901760, %v9265_v60 }
0x12a6   : > { %v8738_v30 = vand.u32 4294901760, %v8737_v4  ;;  %v9259_v62 = vand.u32 4294901760, %v9258_v55 }
0x12a8   : > { %v37767_v15 = vpack.c.bf16 %v8745_v7, %v8738_v30  ;;  %v9260_v5 = vsub.f32 %v9258_v55, %v9259_v62  ;;  %v9267_v30 = vsub.f32 %v9265_v60, %v9266_v2 }
0x12aa   : > { %v9261_v7 = vand.u32 4294901760, %v9260_v5 }
0x132e   : > { %v8617_v19 = vpop.xlane.xlu1 %8616 }
0x132f   : > { %v8618_v20 = vmul.f32 0.03125, %v8617_v19 }
0x1331   : > { %v8619_v21 = vsub.f32 %v37751_v63, %v8618_v20 }
0x1333   : > { %v8620_v23 = vmul.f32 %v8619_v21, %v8619_v21 }
0x1335   : > { %v8621_v43 = vsel %vm207_vm0, %v8620_v23, 0.0 }
0x1336   : > { %8622 = vadd.xlane.f32.xlu0 %v8621_v43  ;;  %v9152_v43 = vld [vmem:[#allocation2 + $0x140] sm:$0xff] }
0x1337   : > { %v9167_v26 = vand.u32 4294901760, %v9152_v43 }
0x1339   : > { %v9251_v29 = vsub.f32 %v9152_v43, %v9167_v26 }
0x133b   : > { %v9252_v48 = vand.u32 4294901760, %v9251_v29 }
0x133d   : > { %v9253_v54 = vsub.f32 %v9251_v29, %v9252_v48 }
0x133f   : > { %v9254_v22 = vand.u32 4294901760, %v9253_v54 }
0x13c3   : > { %v8623_v0 = vpop.xlane.xlu0 %8622 }
0x13c4   : > { %v8624_v8 = vmul.f32 0.03125, %v8623_v0  ;;  %v9268_v0 = vand.u32 4294901760, %v9267_v30 }
0x13c6   : > { %v8625_v11 = vadd.f32 1e-05, %v8624_v8  ;;  %v37820_v8 = vpack.c.bf16 %v9268_v0, %v9261_v7 }
0x13c8   : > { %36743 = vrsqrt.f32 %v8625_v11 }
0x13d2   : > { %v36744_v1 = vpop.eup %36743 }
0x13d3   : > { %v8627_v12 = vmul.f32 %v36744_v1, %v8619_v21  ;;  %v9151_v21 = vld [vmem:[#allocation2 + $0x138] sm:$0xff]  ;;  %v37824_v1 = vpack.c.bf16 %v9265_v60, %v9258_v55 }
0x13d4   : > { %v9164_v25 = vand.u32 4294901760, %v9151_v21 }
0x13d5   : > { %v8638_v13 = vsel %vm207_vm0, %v8627_v12, 0  ;;  %39460 = vst [vmem:[#allocation9_spill] sm:$0xff] %v37824_v1 }
0x13d6   : > { %v8709_v16 = vand.u32 4294901760, %v8638_v13  ;;  %v37810_v27 = vpack.c.bf16 %v9167_v26, %v9164_v25  ;;  %v9244_v28 = vsub.f32 %v9151_v21, %v9164_v25 }
0x13d8   : > { %v8710_v18 = vsub.f32 %v8638_v13, %v8709_v16  ;;  %35406 = vmatpush3.bf16.msra.mxu0 %v37810_v27  ;;  %v9245_v46 = vand.u32 4294901760, %v9244_v28  ;;  %v37822_v11 = vpack.c.bf16 %v9251_v29, %v9244_v28  ;;  %v37828_v13 = vpack.c.bf16 %v9266_v2, %v9259_v62 }
0x13d9   : > { %35407 = vmatprep.subr.bf16.mxu0 %v39418_v44 }
0x13da   : > { %v8711_v19 = vand.u32 4294901760, %v8710_v18  ;;  %v9246_v53 = vsub.f32 %v9244_v28, %v9245_v46  ;;  %39459 = vst [vmem:[#allocation8_spill] sm:$0xff] %v37822_v11  ;;  %v37826_v12 = vpack.c.bf16 %v9252_v48, %v9245_v46  ;;  %39462 = vst [vmem:[#allocation11_spill] sm:$0xff] %v37828_v13 }
0x13dc   : > { %v8712_v20 = vsub.f32 %v8710_v18, %v8711_v19  ;;  %35409 = vmatpush3.bf16.msra.mxu0 %v37814_v52  ;;  %v9247_v61 = vand.u32 4294901760, %v9246_v53  ;;  %39461 = vst [vmem:[#allocation10_spill] sm:$0xff] %v37826_v12 }
0x13dd   : > { %35410 = vmatprep.subr.bf16.mxu0 %v39418_v44 }
0x13de   : > { %v8713_v23 = vand.u32 4294901760, %v8712_v20  ;;  %v37818_v4 = vpack.c.bf16 %v9254_v22, %v9247_v61 }
0x13e0   : > { %32965 = vmatmul.mubr.f32.vlgmr.msra.gmra.mrb[22].mxu1 %v8713_v23 }
0x13e1   : > { %35376 = vmatpush3.bf16.msra.mxu1 %v37765_v3  ;;  %32975 = vmatprep.mubr.msk.f32.mxu1 %vm36944_vm2, %v39420_v6 }
0x13e2   : > { %35377 = vmatprep.subr.bf16.mxu1 %v39418_v44 }
0x13e5   : > { %35379 = vmatpush3.bf16.msra.mxu1 %v37767_v15 }
0x13e6   : > { %35380 = vmatprep.subr.bf16.mxu1 %v39418_v44 }
0x13e8   : > { %32976 = vmatmul.mubr.f32.vlgmr.msra.gmra.mrb[22].mxu1 %v8709_v16 }
0x13e9   : > { %35382 = vmatpush3.bf16.msra.mxu1 %v37769_v9  ;;  %32986 = vmatprep.mubr.msk.f32.mxu1 %vm36944_vm2, %v39420_v6 }
0x13ea   : > { %35383 = vmatprep.subr.bf16.mxu1 %v39418_v44 }
0x13ed   : > { %35385 = vmatpush3.bf16.msra.mxu1 %v37771_v10 }
0x13ee   : > { %35386 = vmatprep.subr.bf16.mxu1 %v39418_v44 }
0x13f0   : > { %32987 = vmatmul.mubr.f32.vlgmr.msra.gmra.mrb[22].mxu1 %v8710_v18 }
0x13f1   : > { %35388 = vmatpush3.bf16.msra.mxu1 %v37757_v41  ;;  %32997 = vmatprep.mubr.msk.f32.mxu1 %vm36944_vm2, %v39420_v6 }
0x13f2   : > { %35389 = vmatprep.subr.bf16.mxu1 %v39418_v44 }
0x13f5   : > { %35391 = vmatpush3.bf16.msra.mxu1 %v37760_v47 }
0x13f6   : > { %35392 = vmatprep.subr.bf16.mxu1 %v39418_v44 }
0x13f8   : > { %32998 = vmatmul.mubr.f32.vlgmr.msra.gmra.mrb[22].mxu1 %v8711_v19 }
0x13f9   : > { %35394 = vmatpush3.bf16.msra.mxu1 %v37773_v50  ;;  %33008 = vmatprep.mubr.msk.f32.mxu1 %vm36944_vm2, %v39420_v6 }
0x13fa   : > { %35395 = vmatprep.subr.bf16.mxu1 %v39418_v44 }
0x13fd   : > { %35397 = vmatpush3.bf16.msra.mxu1 %v37775_v51 }
0x13fe   : > { %35398 = vmatprep.subr.bf16.mxu1 %v39418_v44 }
0x1400   : > { %33009 = vmatmul.mubr.f32.vlgmr.msra.gmra.mrb[22].mxu1 %v8709_v16 }
0x1401   : > { %35400 = vmatpush3.bf16.msra.mxu1 %v37757_v41  ;;  %33019 = vmatprep.mubr.msk.f32.mxu1 %vm36944_vm2, %v39420_v6 }
0x1402   : > { %35401 = vmatprep.subr.bf16.mxu1 %v39418_v44 }
0x1405   : > { %35403 = vmatpush3.bf16.msra.mxu1 %v37760_v47 }
0x1406   : > { %35440 = vmatprep.subr.bf16.mxu1 %v39418_v44 }
0x1408   : > { %33020 = vmatmul.mubr.f32.vlgmr.msra.gmra.mrb[22].mxu1 %v8709_v16  ;;  %v30827_v16 = vld [vmem:[#allocation2 + $0x130] ss:$0 sm:$0xff] }
0x1409   : > { %33096 = vmatprep.mubr.msk.f32.mxu1 %vm36944_vm2, %v39420_v6 }
0x14db   : > { %v9121_v18 = vpop.f32.mrb[22].mxu1 }
0x14dc   : > { %v36100_v19 = vadd.f32 %v30827_v16, %v9121_v18  ;;  %v33021_v20 = vpop.f32.mrb[23].mxu1 }
0x14de   : > { %v9126_v23 = vmul.f32 0.70710677, %v36100_v19  ;;  %v9125_v30 = vmul.f32 0.5, %v36100_v19 }
0x14e0   : > { %v9127_v21 = vand.u32 2147483647, %v9126_v23  ;;  %vm9146_vm6 = vcmp.ge.f32.partialorder %v9126_v23, 0.0 }
0x14e2   : > { %v9128_v43 = vmul.f32 0.3275911, %v9127_v21  ;;  %v9140_v26 = vsub.f32 0.0, %v9127_v21 }
0x14e4   : > { %v9129_v25 = vadd.f32 1.0, %v9128_v43  ;;  %v9141_v17 = vmul.f32 %v9140_v26, %v9127_v21  ;;  %v30828_v26 = vld [vmem:[#allocation2 + $0x158] ss:$0 sm:$0xff] }
0x14e6   : > { %36745 = vrcp.f32 %v9129_v25  ;;  %v9142_v37 = vmul.f32 1.442695, %v9141_v17 }
0x14e8   : > { %36747 = vpow2.f32 %v9142_v37 }
0x14f0   : > { %v36746_v36 = vpop.eup %36745 }
0x14f1   : > { %v9131_v28 = vmul.f32 1.0614054, %v36746_v36 }
0x14f2   : > { %v36748_v61 = vpop.eup %36747 }
0x14f3   : > { %v9132_v29 = vadd.f32 -1.4531521, %v9131_v28 }
0x14f5   : > { %v9133_v42 = vmul.f32 %v36746_v36, %v9132_v29 }
0x14f7   : > { %v9134_v46 = vadd.f32 1.4214138, %v9133_v42 }
0x14f9   : > { %v9135_v48 = vmul.f32 %v36746_v36, %v9134_v46 }
0x14fb   : > { %v9136_v53 = vadd.f32 -0.28449672, %v9135_v48 }
0x14fd   : > { %v9137_v54 = vmul.f32 %v36746_v36, %v9136_v53 }
0x14ff   : > { %v9138_v55 = vadd.f32 0.2548296, %v9137_v54 }
0x1501   : > { %v9139_v60 = vmul.f32 %v36746_v36, %v9138_v55 }
0x1503   : > { %v9144_v22 = vmul.f32 %v36748_v61, %v9139_v60 }
0x1505   : > { %v9145_v62 = vsub.f32 1.0, %v9144_v22 }
0x1507   : > { %v9147_v2 = vsub.f32 0.0, %v9145_v62 }
0x1509   : > { %v9148_v5 = vsel %vm9146_vm6, %v9145_v62, %v9147_v2 }
0x150a   : > { %v9149_v7 = vadd.f32 1.0, %v9148_v5 }
0x150c   : > { %v9150_v0 = vmul.f32 %v9149_v7, %v9125_v30 }
0x150e   : > { %v9161_v16 = vsel %vm207_vm0, %v9150_v0, 0 }
0x150f   : > { %v9232_v18 = vand.u32 4294901760, %v9161_v16 }
0x1511   : > { %v9233_v20 = vsub.f32 %v9161_v16, %v9232_v18 }
0x1513   : > { %v9234_v21 = vand.u32 4294901760, %v9233_v20 }
0x1515   : > { %v9235_v43 = vsub.f32 %v9233_v20, %v9234_v21 }
0x1517   : > { %v9236_v25 = vand.u32 4294901760, %v9235_v43  ;;  %v9663_v43 = vld [vmem:[#allocation2 + $0x168] sm:$0xff] }
0x1519   : > { %33031 = vmatmul.mubr.f32.vlgmr.msra.gmra.mrb[50].mxu0 %v9236_v25  ;;  %v9664_v25 = vld [vmem:[#allocation2 + $0x170] sm:$0xff] }
0x151a   : > { %35412 = vmatpush3.bf16.msra.mxu0 %v37818_v4  ;;  %33041 = vmatprep.mubr.msk.f32.mxu0 %vm36944_vm2, %v39420_v6 }
0x151b   : > { %35413 = vmatprep.subr.bf16.mxu0 %v39418_v44 }
0x151e   : > { %35415 = vmatpush3.bf16.msra.mxu0 %v37820_v8 }
0x151f   : > { %35416 = vmatprep.subr.bf16.mxu0 %v39418_v44 }
0x1521   : > { %33042 = vmatmul.mubr.f32.vlgmr.msra.gmra.mrb[52].mxu0 %v9232_v18 }
0x1522   : > { %35418 = vmatpush3.bf16.msra.mxu0 %v37822_v11  ;;  %33052 = vmatprep.mubr.msk.f32.mxu0 %vm36944_vm2, %v39420_v6 }
0x1523   : > { %35419 = vmatprep.subr.bf16.mxu0 %v39418_v44 }
0x1526   : > { %35421 = vmatpush3.bf16.msra.mxu0 %v37824_v1 }
0x1527   : > { %35422 = vmatprep.subr.bf16.mxu0 %v39418_v44 }
0x1529   : > { %33053 = vmatmul.mubr.f32.vlgmr.msra.gmra.mrb[54].mxu0 %v9233_v20 }
0x152a   : > { %35424 = vmatpush3.bf16.msra.mxu0 %v37810_v27  ;;  %33063 = vmatprep.mubr.msk.f32.mxu0 %vm36944_vm2, %v39420_v6 }
0x152b   : > { %35425 = vmatprep.subr.bf16.mxu0 %v39418_v44 }
0x152e   : > { %35427 = vmatpush3.bf16.msra.mxu0 %v37814_v52 }
0x152f   : > { %35428 = vmatprep.subr.bf16.mxu0 %v39418_v44 }
0x1531   : > { %33064 = vmatmul.mubr.f32.vlgmr.msra.gmra.mrb[56].mxu0 %v9234_v21  ;;  %v9662_v21 = vld [vmem:[#allocation2 + $0x160] sm:$0xff] }
0x1532   : > { %35430 = vmatpush3.bf16.msra.mxu0 %v37826_v12  ;;  %33074 = vmatprep.mubr.msk.f32.mxu0 %vm36944_vm2, %v39420_v6 }
0x1533   : > { %35431 = vmatprep.subr.bf16.mxu0 %v39418_v44 }
0x1536   : > { %35433 = vmatpush3.bf16.msra.mxu0 %v37828_v13 }
0x1537   : > { %35434 = vmatprep.subr.bf16.mxu0 %v39418_v44 }
0x1539   : > { %33075 = vmatmul.mubr.f32.vlgmr.msra.gmra.mrb[58].mxu0 %v9232_v18 }
0x153a   : > { %35436 = vmatpush3.bf16.msra.mxu0 %v37810_v27  ;;  %33085 = vmatprep.mubr.msk.f32.mxu0 %vm36944_vm2, %v39420_v6 }
0x153b   : > { %35437 = vmatprep.subr.bf16.mxu0 %v39418_v44 }
0x153e   : > { %35439 = vmatpush3.bf16.msra.mxu0 %v37814_v52 }
0x153f   : > { %33154 = vmatprep.subr.mxu0 %v39420_v6 }
0x1541   : > { %33086 = vmatmul.mubr.f32.vlgmr.msra.gmra.mrb[60].mxu0 %v9232_v18 }
0x1542   : > { %33156 = vmatprep.mubr.msk.f32.mxu0 %vm36944_vm2, %v39420_v6 }
0x15ec   : > { %v9238_v19 = vpop.f32.mrb[50].mxu0 }
0x15ed   : > { %v33032_v23 = vpop.f32.mrb[51].mxu0  ;;  %v9239_v36 = vadd.f32 %v30828_v26, %v9238_v19  ;;  %v9675_v19 = vand.u32 4294901760, %v9662_v21  ;;  %v9665_v26 = vld [vmem:[#allocation2 + $0x178] sm:$0xff] }
0x15ee   : > { %v9678_v23 = vand.u32 4294901760, %v9663_v43 }
0x15f4   : > { %v9329_v17 = vpop.f32.mrb[52].mxu0 }
0x15f5   : > { %v9330_v28 = vadd.f32 %v9329_v17, %v9239_v36  ;;  %v33043_v29 = vpop.f32.mrb[53].mxu0  ;;  %v9684_v36 = vand.u32 4294901760, %v9665_v26  ;;  %v37870_v17 = vpack.c.bf16 %v9678_v23, %v9675_v19 }
0x15f6   : > { %v9762_v29 = vsub.f32 %v9663_v43, %v9678_v23 }
0x15f7   : > { %35442 = vmatpush3.bf16.msra.mxu1 %v37870_v17 }
0x15f8   : > { %35443 = vmatprep.subr.bf16.mxu1 %v39418_v44 }
0x15fc   : > { %v9409_v37 = vpop.f32.mrb[54].mxu0 }
0x15fd   : > { %v9410_v42 = vadd.f32 %v9409_v37, %v9330_v28  ;;  %v33054_v46 = vpop.f32.mrb[55].mxu0  ;;  %v9755_v28 = vsub.f32 %v9662_v21, %v9675_v19 }
0x15fe   : > { %v9763_v46 = vand.u32 4294901760, %v9762_v29 }
0x15ff   : > { %v37882_v21 = vpack.c.bf16 %v9762_v29, %v9755_v28 }
0x1601   : > { %39465 = vst [vmem:[#allocation14_spill] sm:$0xff] %v37882_v21 }
0x1604   : > { %v9486_v48 = vpop.f32.mrb[56].mxu0 }
0x1605   : > { %v9487_v53 = vadd.f32 %v9486_v48, %v9410_v42  ;;  %v33065_v54 = vpop.f32.mrb[57].mxu0  ;;  %v9756_v42 = vand.u32 4294901760, %v9755_v28 }
0x1607   : > { %v9757_v48 = vsub.f32 %v9755_v28, %v9756_v42 }
0x160c   : > { %v9569_v55 = vpop.f32.mrb[58].mxu0 }
0x160d   : > { %v9570_v60 = vadd.f32 %v9569_v55, %v9487_v53  ;;  %v33076_v61 = vpop.f32.mrb[59].mxu0  ;;  %v9764_v53 = vsub.f32 %v9762_v29, %v9763_v46  ;;  %v9776_v55 = vsub.f32 %v9665_v26, %v9684_v36 }
0x160f   : > { %v9765_v61 = vand.u32 4294901760, %v9764_v53 }
0x1614   : > { %v9644_v22 = vpop.f32.mrb[60].mxu0 }
0x1615   : > { %v9645_v62 = vadd.f32 %v9644_v22, %v9570_v60  ;;  %v33087_v2 = vpop.f32.mrb[61].mxu0  ;;  %v9758_v60 = vand.u32 4294901760, %v9757_v48 }
0x1617   : > { %v37864_v5 = vadd.f32 %v9645_v62, %v37751_v63  ;;  %v9681_v63 = vand.u32 4294901760, %v9664_v25  ;;  %v9777_v62 = vand.u32 4294901760, %v9776_v55  ;;  %v37878_v2 = vpack.c.bf16 %v9765_v61, %v9758_v60 }
0x1619   : > { %v9649_v30 = vsel %vm207_vm0, %v37864_v5, 0.0  ;;  %v37873_v37 = vpack.c.bf16 %v9684_v36, %v9681_v63  ;;  %v9769_v54 = vsub.f32 %v9664_v25, %v9681_v63  ;;  %39463 = vst [vmem:[#allocation12_spill] sm:$0xff] %v37878_v2  ;;  %v37886_v25 = vpack.c.bf16 %v9763_v46, %v9756_v42 }
0x161a   : > { %9650 = vadd.xlane.f32.xlu1 %v9649_v30 }
0x161b   : > { %35445 = vmatpush3.bf16.msra.mxu1 %v37873_v37  ;;  %v9770_v22 = vand.u32 4294901760, %v9769_v54  ;;  %v37884_v43 = vpack.c.bf16 %v9776_v55, %v9769_v54  ;;  %39467 = vst [vmem:[#allocation16_spill] sm:$0xff] %v37886_v25 }
0x161c   : > { %35446 = vmatprep.subr.bf16.mxu1 %v39418_v44 }
0x161d   : > { %v9771_v30 = vsub.f32 %v9769_v54, %v9770_v22  ;;  %39466 = vst [vmem:[#allocation15_spill] sm:$0xff] %v37884_v43  ;;  %v37888_v19 = vpack.c.bf16 %v9777_v62, %v9770_v22 }
0x161f   : > { %39468 = vst [vmem:[#allocation17_spill] sm:$0xff] %v37888_v19 }
0x16a7   : > { %v9651_v7 = vpop.xlane.xlu1 %9650 }
0x16a8   : > { %v9652_v0 = vmul.f32 0.03125, %v9651_v7  ;;  %v9778_v7 = vsub.f32 %v9776_v55, %v9777_v62 }
0x16aa   : > { %v9653_v16 = vsub.f32 %v37864_v5, %v9652_v0  ;;  %v9772_v0 = vand.u32 4294901760, %v9771_v30 }
0x16ac   : > { %v9654_v18 = vmul.f32 %v9653_v16, %v9653_v16 }
0x16ae   : > { %v9655_v20 = vsel %vm207_vm0, %v9654_v18, 0.0  ;;  %v9779_v18 = vand.u32 4294901760, %v9778_v7 }
0x16af   : > { %9656 = vadd.xlane.f32.xlu1 %v9655_v20 }
0x16b0   : > { %v37880_v20 = vpack.c.bf16 %v9779_v18, %v9772_v0 }
0x16b2   : > { %39464 = vst [vmem:[#allocation13_spill] sm:$0xff] %v37880_v20 }
0x173c   : > { %v9657_v23 = vpop.xlane.xlu1 %9656 }
0x173d   : > { %v9658_v26 = vmul.f32 0.03125, %v9657_v23 }
0x173f   : > { %v9659_v63 = vadd.f32 1e-05, %v9658_v26 }
0x1741   : > { %36749 = vrsqrt.f32 %v9659_v63 }
0x174b   : > { %v36750_v36 = vpop.eup %36749 }
0x174c   : > { %v9661_v48 = vmul.f32 %v36750_v36, %v9653_v16  ;;  %v30829_v16 = vld [vmem:[#allocation2 + $0x180] ss:$0 sm:$0xff] }
0x174e   : > { %v9672_v53 = vsel %vm207_vm0, %v9661_v48, 0 }
0x174f   : > { %v9743_v60 = vand.u32 4294901760, %v9672_v53 }
0x1751   : > { %v9744_v61 = vsub.f32 %v9672_v53, %v9743_v60 }
0x1753   : > { %v9745_v30 = vand.u32 4294901760, %v9744_v61 }
0x1755   : > { %v9746_v7 = vsub.f32 %v9744_v61, %v9745_v30 }
0x1757   : > { %v9747_v28 = vand.u32 4294901760, %v9746_v7 }
0x1759   : > { %33097 = vmatmul.mubr.f32.vlgmr.msra.gmra.mrb[24].mxu1 %v9747_v28 }
0x175a   : > { %35448 = vmatpush3.bf16.msra.mxu1 %v37878_v2  ;;  %33107 = vmatprep.mubr.msk.f32.mxu1 %vm36944_vm2, %v39420_v6 }
0x175b   : > { %35449 = vmatprep.subr.bf16.mxu1 %v39418_v44 }
0x175e   : > { %35451 = vmatpush3.bf16.msra.mxu1 %v37880_v20 }
0x175f   : > { %35452 = vmatprep.subr.bf16.mxu1 %v39418_v44 }
0x1761   : > { %33108 = vmatmul.mubr.f32.vlgmr.msra.gmra.mrb[24].mxu1 %v9743_v60 }
0x1762   : > { %35454 = vmatpush3.bf16.msra.mxu1 %v37882_v21  ;;  %33118 = vmatprep.mubr.msk.f32.mxu1 %vm36944_vm2, %v39420_v6 }
0x1763   : > { %35455 = vmatprep.subr.bf16.mxu1 %v39418_v44 }
0x1766   : > { %35457 = vmatpush3.bf16.msra.mxu1 %v37884_v43 }
0x1767   : > { %35458 = vmatprep.subr.bf16.mxu1 %v39418_v44 }
0x1769   : > { %33119 = vmatmul.mubr.f32.vlgmr.msra.gmra.mrb[24].mxu1 %v9744_v61 }
0x176a   : > { %35460 = vmatpush3.bf16.msra.mxu1 %v37870_v17  ;;  %33129 = vmatprep.mubr.msk.f32.mxu1 %vm36944_vm2, %v39420_v6 }
0x176b   : > { %35461 = vmatprep.subr.bf16.mxu1 %v39418_v44 }
0x176e   : > { %35463 = vmatpush3.bf16.msra.mxu1 %v37873_v37 }
0x176f   : > { %35464 = vmatprep.subr.bf16.mxu1 %v39418_v44 }
0x1771   : > { %33130 = vmatmul.mubr.f32.vlgmr.msra.gmra.mrb[24].mxu1 %v9745_v30 }
0x1772   : > { %35466 = vmatpush3.bf16.msra.mxu1 %v37886_v25  ;;  %33140 = vmatprep.mubr.msk.f32.mxu1 %vm36944_vm2, %v39420_v6 }
0x1773   : > { %35467 = vmatprep.subr.bf16.mxu1 %v39418_v44 }
0x1776   : > { %35469 = vmatpush3.bf16.msra.mxu1 %v37888_v19 }
0x1777   : > { %35470 = vmatprep.subr.bf16.mxu1 %v39418_v44 }
0x1779   : > { %33141 = vmatmul.mubr.f32.vlgmr.msra.gmra.mrb[24].mxu1 %v9743_v60 }
0x177a   : > { %35472 = vmatpush3.bf16.msra.mxu1 %v37870_v17  ;;  %33151 = vmatprep.mubr.msk.f32.mxu1 %vm36944_vm2, %v39420_v6 }
0x177b   : > { %35473 = vmatprep.subr.bf16.mxu1 %v39418_v44 }
0x177e   : > { %35475 = vmatpush3.bf16.msra.mxu1 %v37873_v37 }
0x177f   : > { %33214 = vmatprep.subr.mxu1 %v39420_v6 }
0x1781   : > { %33152 = vmatmul.mubr.f32.vlgmr.msra.gmra.mrb[24].mxu1 %v9743_v60 }
0x1782   : > { %33216 = vmatprep.mubr.msk.f32.mxu1 %vm36944_vm2, %v39420_v6 }
0x1854   : > { %v10155_v29 = vpop.f32.mrb[24].mxu1 }
0x1855   : > { %v37923_v42 = vadd.f32 %v30829_v16, %v10155_v29  ;;  %v33153_v46 = vpop.f32.mrb[25].mxu1 }
0x1857   : > { %11079 = vrot.lane.b32.xlu1 %v37923_v42, %s36947_s28  ;;  %10164 = vrot.lane.b32.xlu0 %v37923_v42, %s36946_s24  ;;  %v10166_v54 = vsel %vm4440_vm4, %v37923_v42, 0 }
0x1858   : > { %v37941_v55 = vand.u32 4294901760, %v10166_v54 }
0x185a   : > { %v10237_v22 = vsub.f32 %v10166_v54, %v37941_v55 }
0x185b   : > { %11081 = vrot.lane.b32.xlu1 %v37923_v42, %s36948_s29  ;;  %11998 = vrot.lane.b32.xlu0 %v37923_v42, %s36949_s30 }
0x185c   : > { %v10238_v62 = vand.u32 4294901760, %v10237_v22 }
0x185e   : > { %v10239_v63 = vsub.f32 %v10237_v22, %v10238_v62 }
0x185f   : > { %11996 = vrot.lane.b32.xlu1 %v37923_v42, %s36950_s4  ;;  %12915 = vrot.lane.b32.xlu0 %v37923_v42, %s36951_s5 }
0x1860   : > { %v10240_v7 = vand.u32 4294901760, %v10239_v63 }
0x1863   : > { %12913 = vrot.lane.b32.xlu1 %v37923_v42, %s36952_s6 }
0x18c9   : > { %v11080_v0 = vpop.permute.xlu1 %11079  ;;  %v10165_v18 = vpop.permute.xlu0 %10164 }
0x18ca   : > { %v11083_v23 = vsel %vm4440_vm4, %v11080_v0, 0  ;;  %v10168_v26 = vsel %vm4440_vm4, %v10165_v18, 0 }
0x18cb   : > { %v37946_v36 = vand.u32 4294901760, %v11083_v23  ;;  %v10171_v48 = vand.u32 4294901760, %v10168_v26 }
0x18cd   : > { %v11154_v53 = vsub.f32 %v11083_v23, %v37946_v36  ;;  %v10248_v60 = vsub.f32 %v10168_v26, %v10171_v48  ;;  %v11082_v61 = vpop.permute.xlu1 %11081  ;;  %33155 = vmatpush3.xpose.msra.mxu0 %v10171_v48 }
0x18ce   : > { %v11085_v30 = vsel %vm4440_vm4, %v11082_v61, 0  ;;  %33159 = vmatprep.subr.mxu0 %v39420_v6 }
0x18cf   : > { %v11155_v28 = vand.u32 4294901760, %v11154_v53  ;;  %v10249_v16 = vand.u32 4294901760, %v10248_v60  ;;  %v11088_v29 = vand.u32 4294901760, %v11085_v30 }
0x18d0   : > { %33157 = vmatmul.mubr.f32.vlgmr.msra.gmra.mrb[62].mxu0 %v10240_v7 }
0x18d1   : > { %v11156_v46 = vsub.f32 %v11154_v53, %v11155_v28  ;;  %v10250_v54 = vsub.f32 %v10248_v60, %v10249_v16  ;;  %v11165_v0 = vsub.f32 %v11085_v30, %v11088_v29  ;;  %33215 = vmatpush3.xpose.msra.mxu1 %v11088_v29  ;;  %33161 = vmatprep.mubr.msk.f32.mxu0 %vm36944_vm2, %v39420_v6 }
0x18d2   : > { %33219 = vmatprep.subr.mxu1 %v39420_v6 }
0x18d3   : > { %v11157_v18 = vand.u32 4294901760, %v11156_v46  ;;  %v10251_v23 = vand.u32 4294901760, %v10250_v54  ;;  %v11166_v26 = vand.u32 4294901760, %v11165_v0 }
0x18d5   : > { %v11167_v61 = vsub.f32 %v11165_v0, %v11166_v26  ;;  %33217 = vmatmul.mubr.f32.vlgmr.msra.gmra.mrb[26].mxu1 %v11157_v18  ;;  %33160 = vmatpush3.xpose.msra.mxu0 %v10251_v23 }
0x18d6   : > { %33164 = vmatprep.subr.mxu0 %v39420_v6  ;;  %33221 = vmatprep.mubr.msk.f32.mxu1 %vm36944_vm2, %v39420_v6 }
0x18d7   : > { %v11168_v63 = vand.u32 4294901760, %v11167_v61 }
0x18d8   : > { %33162 = vmatmul.mubr.f32.vlgmr.msra.gmra.mrb[62].mxu0 %v37941_v55 }
0x18d9   : > { %33165 = vmatpush3.xpose.msra.mxu0 %v10248_v60  ;;  %33220 = vmatpush3.xpose.msra.mxu1 %v11168_v63  ;;  %v11997_v60 = vpop.permute.xlu1 %11996 }
0x18da   : > { %33224 = vmatprep.subr.mxu1 %v39420_v6  ;;  %33166 = vmatprep.mubr.msk.f32.mxu0 %vm36944_vm2, %v39420_v6  ;;  %v12000_v30 = vsel %vm4440_vm4, %v11997_v60, 0 }
0x18db   : > { %33169 = vmatprep.subr.mxu0 %v39420_v6 }
0x18dd   : > { %33222 = vmatmul.mubr.f32.vlgmr.msra.gmra.mrb[26].mxu1 %v37946_v36 }
0x18de   : > { %33225 = vmatpush3.xpose.msra.mxu1 %v11165_v0  ;;  %33226 = vmatprep.mubr.msk.f32.mxu1 %vm36944_vm2, %v39420_v6 }
0x18df   : > { %33229 = vmatprep.subr.mxu1 %v39420_v6 }
0x18e0   : > { %33167 = vmatmul.mubr.f32.vlgmr.msra.gmra.mrb[62].mxu0 %v10237_v22  ;;  %v11999_v22 = vpop.permute.xlu0 %11998 }
0x18e1   : > { %33170 = vmatpush3.xpose.msra.mxu0 %v10171_v48  ;;  %33171 = vmatprep.mubr.msk.f32.mxu0 %vm36944_vm2, %v39420_v6  ;;  %v12002_v7 = vsel %vm4440_vm4, %v11999_v22, 0 }
0x18e2   : > { %33174 = vmatprep.subr.mxu0 %v39420_v6 }
0x18e5   : > { %33227 = vmatmul.mubr.f32.vlgmr.msra.gmra.mrb[26].mxu1 %v11154_v53  ;;  %v12070_v53 = vand.u32 4294901760, %v12000_v30 }
0x18e6   : > { %33230 = vmatpush3.xpose.msra.mxu1 %v11088_v29  ;;  %33231 = vmatprep.mubr.msk.f32.mxu1 %vm36944_vm2, %v39420_v6 }
0x18e7   : > { %33234 = vmatprep.subr.mxu1 %v39420_v6 }
0x18e8   : > { %33172 = vmatmul.mubr.f32.vlgmr.msra.gmra.mrb[62].mxu0 %v10238_v62  ;;  %v12005_v62 = vand.u32 4294901760, %v12002_v7 }
0x18e9   : > { %33175 = vmatpush3.xpose.msra.mxu0 %v10249_v16  ;;  %33176 = vmatprep.mubr.msk.f32.mxu0 %vm36944_vm2, %v39420_v6  ;;  %v12071_v16 = vsub.f32 %v12000_v30, %v12070_v53 }
0x18ea   : > { %33179 = vmatprep.subr.mxu0 %v39420_v6  ;;  %v12082_v46 = vsub.f32 %v12002_v7, %v12005_v62 }
0x18ec   : > { %v12083_v54 = vand.u32 4294901760, %v12082_v46 }
0x18ed   : > { %33232 = vmatmul.mubr.f32.vlgmr.msra.gmra.mrb[26].mxu1 %v11155_v28  ;;  %v12072_v28 = vand.u32 4294901760, %v12071_v16 }
0x18ee   : > { %33235 = vmatpush3.xpose.msra.mxu1 %v11166_v26  ;;  %33236 = vmatprep.mubr.msk.f32.mxu1 %vm36944_vm2, %v39420_v6  ;;  %v12084_v0 = vsub.f32 %v12082_v46, %v12083_v54 }
0x18ef   : > { %33239 = vmatprep.subr.mxu1 %v39420_v6 }
0x18f0   : > { %33177 = vmatmul.mubr.f32.vlgmr.msra.gmra.mrb[62].mxu0 %v37941_v55  ;;  %v12085_v18 = vand.u32 4294901760, %v12084_v0 }
0x18f1   : > { %33180 = vmatpush3.xpose.msra.mxu0 %v10171_v48  ;;  %33181 = vmatprep.mubr.msk.f32.mxu0 %vm36944_vm2, %v39420_v6  ;;  %v12073_v48 = vsub.f32 %v12071_v16, %v12072_v28 }
0x18f2   : > { %33184 = vmatprep.subr.mxu0 %v39420_v6 }
0x18f5   : > { %33237 = vmatmul.mubr.f32.vlgmr.msra.gmra.mrb[26].mxu1 %v37946_v36 }
0x18f6   : > { %33240 = vmatpush3.xpose.msra.mxu1 %v11088_v29  ;;  %33241 = vmatprep.mubr.msk.f32.mxu1 %vm36944_vm2, %v39420_v6  ;;  %v12074_v29 = vand.u32 4294901760, %v12073_v48 }
0x18f7   : > { %33274 = vmatprep.subr.mxu1 %v39420_v6 }
0x18f8   : > { %33182 = vmatmul.mubr.f32.vlgmr.msra.gmra.mrb[62].mxu0 %v37941_v55  ;;  %v12914_v55 = vpop.permute.xlu1 %12913 }
0x18f9   : > { %33186 = vmatprep.mubr.msk.f32.mxu0 %vm36944_vm2, %v39420_v6  ;;  %v12917_v23 = vsel %vm4440_vm4, %v12914_v55, 0 }
0x18fa   : > { %v12987_v61 = vand.u32 4294901760, %v12917_v23 }
0x18fc   : > { %v12988_v60 = vsub.f32 %v12917_v23, %v12987_v61 }
0x18fd   : > { %33242 = vmatmul.mubr.f32.vlgmr.msra.gmra.mrb[26].mxu1 %v37946_v36  ;;  %v12916_v36 = vpop.permute.xlu0 %12915 }
0x18fe   : > { %33275 = vmatpush3.xpose.msra.mxu1 %v12005_v62  ;;  %33276 = vmatprep.mubr.msk.f32.mxu1 %vm36944_vm2, %v39420_v6  ;;  %v12919_v26 = vsel %vm4440_vm4, %v12916_v36, 0  ;;  %v12989_v30 = vand.u32 4294901760, %v12988_v60 }
0x18ff   : > { %33279 = vmatprep.subr.mxu1 %v39420_v6  ;;  %v12922_v63 = vand.u32 4294901760, %v12919_v26 }
0x1901   : > { %33277 = vmatmul.mubr.f32.vlgmr.msra.gmra.mrb[28].mxu1 %v12074_v29  ;;  %v12999_v22 = vsub.f32 %v12919_v26, %v12922_v63 }
0x1902   : > { %33280 = vmatpush3.xpose.msra.mxu1 %v12085_v18  ;;  %33281 = vmatprep.mubr.msk.f32.mxu1 %vm36944_vm2, %v39420_v6 }
0x1903   : > { %33284 = vmatprep.subr.mxu1 %v39420_v6  ;;  %v13000_v7 = vand.u32 4294901760, %v12999_v22 }
0x1909   : > { %33282 = vmatmul.mubr.f32.vlgmr.msra.gmra.mrb[28].mxu1 %v12070_v53 }
0x190a   : > { %33285 = vmatpush3.xpose.msra.mxu1 %v12082_v46  ;;  %33286 = vmatprep.mubr.msk.f32.mxu1 %vm36944_vm2, %v39420_v6  ;;  %v13001_v46 = vsub.f32 %v12999_v22, %v13000_v7 }
0x190b   : > { %33289 = vmatprep.subr.mxu1 %v39420_v6 }
0x1911   : > { %33287 = vmatmul.mubr.f32.vlgmr.msra.gmra.mrb[28].mxu1 %v12071_v16  ;;  %v12990_v16 = vsub.f32 %v12988_v60, %v12989_v30 }
0x1912   : > { %33290 = vmatpush3.xpose.msra.mxu1 %v12005_v62  ;;  %33291 = vmatprep.mubr.msk.f32.mxu1 %vm36944_vm2, %v39420_v6 }
0x1913   : > { %33294 = vmatprep.subr.mxu1 %v39420_v6 }
0x1919   : > { %33292 = vmatmul.mubr.f32.vlgmr.msra.gmra.mrb[28].mxu1 %v12072_v28  ;;  %v12991_v28 = vand.u32 4294901760, %v12990_v16 }
0x191a   : > { %33295 = vmatpush3.xpose.msra.mxu1 %v12083_v54  ;;  %33296 = vmatprep.mubr.msk.f32.mxu1 %vm36944_vm2, %v39420_v6  ;;  %v13002_v54 = vand.u32 4294901760, %v13001_v46 }
0x191b   : > { %33299 = vmatprep.subr.mxu1 %v39420_v6 }
0x1921   : > { %33297 = vmatmul.mubr.f32.vlgmr.msra.gmra.mrb[28].mxu1 %v12070_v53 }
0x1922   : > { %33300 = vmatpush3.xpose.msra.mxu1 %v12005_v62  ;;  %33301 = vmatprep.mubr.msk.f32.mxu1 %vm36944_vm2, %v39420_v6 }
0x1923   : > { %33334 = vmatprep.subr.mxu1 %v39420_v6 }
0x1929   : > { %33302 = vmatmul.mubr.f32.vlgmr.msra.gmra.mrb[28].mxu1 %v12070_v53 }
0x192a   : > { %33335 = vmatpush3.xpose.msra.mxu1 %v12922_v63  ;;  %33336 = vmatprep.mubr.msk.f32.mxu1 %vm36944_vm2, %v39420_v6 }
0x192b   : > { %33339 = vmatprep.subr.mxu1 %v39420_v6 }
0x192d   : > { %33337 = vmatmul.mubr.f32.vlgmr.msra.gmra.mrb[30].mxu1 %v12991_v28 }
0x192e   : > { %33340 = vmatpush3.xpose.msra.mxu1 %v13002_v54  ;;  %33341 = vmatprep.mubr.msk.f32.mxu1 %vm36944_vm2, %v39420_v6 }
0x192f   : > { %33344 = vmatprep.subr.mxu1 %v39420_v6 }
0x1935   : > { %33342 = vmatmul.mubr.f32.vlgmr.msra.gmra.mrb[30].mxu1 %v12987_v61 }
0x1936   : > { %33345 = vmatpush3.xpose.msra.mxu1 %v12999_v22  ;;  %33346 = vmatprep.mubr.msk.f32.mxu1 %vm36944_vm2, %v39420_v6 }
0x1937   : > { %33349 = vmatprep.subr.mxu1 %v39420_v6 }
0x193d   : > { %33347 = vmatmul.mubr.f32.vlgmr.msra.gmra.mrb[30].mxu1 %v12988_v60 }
0x193e   : > { %33350 = vmatpush3.xpose.msra.mxu1 %v12922_v63  ;;  %33351 = vmatprep.mubr.msk.f32.mxu1 %vm36944_vm2, %v39420_v6 }
0x193f   : > { %33354 = vmatprep.subr.mxu1 %v39420_v6 }
0x1945   : > { %33352 = vmatmul.mubr.f32.vlgmr.msra.gmra.mrb[30].mxu1 %v12989_v30 }
0x1946   : > { %33355 = vmatpush3.xpose.msra.mxu1 %v13000_v7  ;;  %33356 = vmatprep.mubr.msk.f32.mxu1 %vm36944_vm2, %v39420_v6 }
0x1947   : > { %33359 = vmatprep.subr.mxu1 %v39420_v6 }
0x194d   : > { %33357 = vmatmul.mubr.f32.vlgmr.msra.gmra.mrb[30].mxu1 %v12987_v61 }
0x194e   : > { %33360 = vmatpush3.xpose.msra.mxu1 %v12922_v63  ;;  %33361 = vmatprep.mubr.msk.f32.mxu1 %vm36944_vm2, %v39420_v6 }
0x194f   : > { %35476 = vmatprep.subr.bf16.mxu1 %v39418_v44 }
0x1955   : > { %33362 = vmatmul.mubr.f32.vlgmr.msra.gmra.mrb[30].mxu1 %v12987_v61 }
0x1956   : > { %33402 = vmatprep.mubr.msk.f32.mxu1 %vm36944_vm2, %v39420_v6 }
0x19cb   : > { %v10612_v53 = vpop.f32.mrb[62].mxu0 }
0x19cc   : > { %v33183_v62 = vpop.f32.mrb[63].mxu0  ;;  %v10616_v48 = vsel %vm4440_vm4, %v10612_v53, -inf }
0x19cd   : > { %10617 = vmax.xlane.f32.xlu1 %v10616_v48 }
0x19d0   : > { %v11529_v0 = vpop.f32.mrb[26].mxu1 }
0x19d1   : > { %v33243_v29 = vpop.f32.mrb[27].mxu1  ;;  %v11533_v18 = vsel %vm4440_vm4, %v11529_v0, -inf }
0x19d2   : > { %11534 = vmax.xlane.f32.xlu0 %v11533_v18 }
0x19de   : > { %10627 = vrot.lane.b32.xlu1 %v37923_v42, %s36953_s7 }
0x19fc   : > { %v12446_v55 = vpop.f32.mrb[28].mxu1 }
0x19fd   : > { %v33303_v36 = vpop.f32.mrb[29].mxu1  ;;  %v12450_v62 = vsel %vm4440_vm4, %v12446_v55, -inf }
0x1a28   : > { %v13363_v23 = vpop.f32.mrb[30].mxu1 }
0x1a29   : > { %v33363_v26 = vpop.f32.mrb[31].mxu1  ;;  %v13367_v29 = vsel %vm4440_vm4, %v13363_v23, -inf }
0x1a5a   : > { %v10618_v61 = vpop.xlane.xlu1 %10617 }
0x1a5b   : > { %v10619_v63 = vsub.f32 %v10612_v53, %v10618_v61 }
0x1a5d   : > { %v10620_v60 = vmul.f32 1.442695, %v10619_v63 }
0x1a5e   : > { %v10628_v22 = vpop.permute.xlu1 %10627 }
0x1a5f   : > { %36751 = vpow2.f32 %v10620_v60  ;;  %v38036_v30 = vand.u32 4294901760, %v10628_v22  ;;  %v11535_v7 = vpop.xlane.xlu0 %11534 }
0x1a60   : > { %v11536_v16 = vsub.f32 %v11529_v0, %v11535_v7 }
0x1a61   : > { %33185 = vmatpush3.msra.mxu0 %v38036_v30  ;;  %v10711_v60 = vsub.f32 %v10628_v22, %v38036_v30 }
0x1a62   : > { %v11537_v46 = vmul.f32 1.442695, %v11536_v16  ;;  %33189 = vmatprep.subr.mxu0 %v39420_v6 }
0x1a64   : > { %36753 = vpow2.f32 %v11537_v46 }
0x1a69   : > { %v36752_v28 = vpop.eup %36751 }
0x1a6a   : > { %v10622_v54 = vsel %vm4440_vm4, %v36752_v28, 0.0 }
0x1a6b   : > { %10623 = vadd.xlane.f32.xlu0 %v10622_v54 }
0x1a6e   : > { %v36754_v53 = vpop.eup %36753 }
0x1a6f   : > { %12451 = vmax.xlane.f32.xlu0 %v12450_v62  ;;  %v11539_v48 = vsel %vm4440_vm4, %v36754_v53, 0.0 }
0x1a73   : > { %11540 = vadd.xlane.f32.xlu0 %v11539_v48 }
0x1a77   : > { %13368 = vmax.xlane.f32.xlu0 %v13367_v29  ;;  %v10712_v29 = vand.u32 4294901760, %v10711_v60 }
0x1a8d   : > { %11544 = vrot.lane.b32.xlu0 %v37923_v42, %s36954_s8 }
0x1a91   : > { %12461 = vrot.lane.b32.xlu0 %v37923_v42, %s36955_s9 }
0x1af8   : > { %v10624_v0 = vpop.xlane.xlu0 %10623 }
0x1af9   : > { %36755 = vrcp.f32 %v10624_v0 }
0x1afc   : > { %v12452_v18 = vpop.xlane.xlu0 %12451 }
0x1afd   : > { %v12453_v36 = vsub.f32 %v12446_v55, %v12452_v18  ;;  %v10713_v55 = vsub.f32 %v10711_v60, %v10712_v29 }
0x1aff   : > { %v12454_v26 = vmul.f32 1.442695, %v12453_v36 }
0x1b00   : > { %v11541_v61 = vpop.xlane.xlu0 %11540 }
0x1b01   : > { %36757 = vpow2.f32 %v12454_v26 }
0x1b03   : > { %v36756_v63 = vpop.eup %36755 }
0x1b04   : > { %v10626_v7 = vmul.f32 %v36756_v63, %v36752_v28  ;;  %v13369_v16 = vpop.xlane.xlu0 %13368  ;;  %v10714_v28 = vand.u32 4294901760, %v10713_v55 }
0x1b05   : > { %v13370_v46 = vsub.f32 %v13363_v23, %v13369_v16  ;;  %v39469_v23 = vmov 0.0  }
0x1b06   : > { %v10631_v54 = vsel %vm4440_vm4, %v10626_v7, 0 }
0x1b07   : > { %v13371_v62 = vmul.f32 1.442695, %v13370_v46  ;;  %v10699_v48 = vand.u32 4294901760, %v10631_v54 }
0x1b08   : > { %v11545_v16 = vpop.permute.xlu0 %11544 }
0x1b09   : > { %36759 = vpow2.f32 %v13371_v62  ;;  %v10700_v44 = vsub.f32 %v10631_v54, %v10699_v48 }
0x1b0a   : > { %36761 = vrcp.f32 %v11541_v61 }
0x1b0b   : > { %v38050_v6 = vpop.eup %36757  ;;  %v10701_v0 = vand.u32 4294901760, %v10700_v44 }
0x1b0c   : > { %v12456_v18 = vsel %vm4440_vm4, %v38050_v6, 0.0 }
0x1b0d   : > { %12457 = vadd.xlane.f32.xlu1 %v12456_v18  ;;  %v10702_v36 = vsub.f32 %v10700_v44, %v10701_v0 }
0x1b0f   : > { %v10703_v22 = vand.u32 4294901760, %v10702_v36 }
0x1b11   : > { %33187 = vmatmul.mubr.f32.vlgmr.msra.gmra.mrb[64].mxu0 %v10703_v22 }
0x1b12   : > { %33190 = vmatpush3.msra.mxu0 %v10714_v28  ;;  %33191 = vmatprep.mubr.msk.f32.mxu0 %vm36944_vm2, %v39469_v23 }
0x1b13   : > { %v38056_v26 = vpop.eup %36759  ;;  %33194 = vmatprep.subr.mxu0 %v39469_v23 }
0x1b14   : > { %v13373_v63 = vsel %vm4440_vm4, %v38056_v26, 0.0  ;;  %v36762_v7 = vpop.eup %36761 }
0x1b15   : > { %13374 = vadd.xlane.f32.xlu0 %v13373_v63  ;;  %v11543_v61 = vmul.f32 %v36762_v7, %v36754_v53 }
0x1b19   : > { %33192 = vmatmul.mubr.f32.vlgmr.msra.gmra.mrb[64].mxu0 %v10699_v48 }
0x1b1a   : > { %33195 = vmatpush3.msra.mxu0 %v10711_v60  ;;  %33196 = vmatprep.mubr.msk.f32.mxu0 %vm36944_vm2, %v39469_v23  ;;  %v11548_v60 = vsel %vm4440_vm4, %v11543_v61, 0 }
0x1b1b   : > { %33199 = vmatprep.subr.mxu0 %v39469_v23 }
0x1b1e   : > { %13378 = vrot.lane.b32.xlu1 %v37923_v42, %s36956_s10  ;;  %v11616_v42 = vand.u32 4294901760, %v11548_v60 }
0x1b20   : > { %v11617_v46 = vsub.f32 %v11548_v60, %v11616_v42 }
0x1b21   : > { %33197 = vmatmul.mubr.f32.vlgmr.msra.gmra.mrb[64].mxu0 %v10700_v44  ;;  %v11551_v44 = vand.u32 4294901760, %v11545_v16 }
0x1b22   : > { %33200 = vmatpush3.msra.mxu0 %v38036_v30  ;;  %33201 = vmatprep.mubr.msk.f32.mxu0 %vm36944_vm2, %v39469_v23  ;;  %v11618_v53 = vand.u32 4294901760, %v11617_v46 }
0x1b23   : > { %33204 = vmatprep.subr.mxu0 %v39469_v23  ;;  %v11628_v54 = vsub.f32 %v11545_v16, %v11551_v44 }
0x1b25   : > { %v11629_v62 = vand.u32 4294901760, %v11628_v54 }
0x1b29   : > { %33202 = vmatmul.mubr.f32.vlgmr.msra.gmra.mrb[64].mxu0 %v10701_v0  ;;  %v11630_v0 = vsub.f32 %v11628_v54, %v11629_v62 }
0x1b2a   : > { %33205 = vmatpush3.msra.mxu0 %v10712_v29  ;;  %33206 = vmatprep.mubr.msk.f32.mxu0 %vm36944_vm2, %v39469_v23  ;;  %v11619_v29 = vsub.f32 %v11617_v46, %v11618_v53 }
0x1b2b   : > { %33209 = vmatprep.subr.mxu0 %v39469_v23  ;;  %v11631_v18 = vand.u32 4294901760, %v11630_v0 }
0x1b2c   : > { %v11620_v55 = vand.u32 4294901760, %v11619_v29 }
0x1b31   : > { %33207 = vmatmul.mubr.f32.vlgmr.msra.gmra.mrb[64].mxu0 %v10699_v48 }
0x1b32   : > { %33210 = vmatpush3.msra.mxu0 %v38036_v30  ;;  %33211 = vmatprep.mubr.msk.f32.mxu0 %vm36944_vm2, %v39469_v23  ;;  %v12462_v30 = vpop.permute.xlu0 %12461 }
0x1b33   : > { %33244 = vmatprep.subr.mxu0 %v39469_v23 }
0x1b39   : > { %33212 = vmatmul.mubr.f32.vlgmr.msra.gmra.mrb[64].mxu0 %v10699_v48  ;;  %v12468_v48 = vand.u32 4294901760, %v12462_v30 }
0x1b3a   : > { %33245 = vmatpush3.msra.mxu0 %v11551_v44  ;;  %33246 = vmatprep.mubr.msk.f32.mxu0 %vm36944_vm2, %v39469_v23 }
0x1b3b   : > { %33249 = vmatprep.subr.mxu0 %v39469_v23  ;;  %v12545_v28 = vsub.f32 %v12462_v30, %v12468_v48 }
0x1b3d   : > { %33247 = vmatmul.mubr.f32.vlgmr.msra.gmra.mrb[66].mxu0 %v11620_v55  ;;  %v12546_v60 = vand.u32 4294901760, %v12545_v28 }
0x1b3e   : > { %33250 = vmatpush3.msra.mxu0 %v11631_v18  ;;  %33251 = vmatprep.mubr.msk.f32.mxu0 %vm36944_vm2, %v39469_v23 }
0x1b3f   : > { %33254 = vmatprep.subr.mxu0 %v39469_v23 }
0x1b45   : > { %33252 = vmatmul.mubr.f32.vlgmr.msra.gmra.mrb[66].mxu0 %v11616_v42 }
0x1b46   : > { %33255 = vmatpush3.msra.mxu0 %v11628_v54  ;;  %33256 = vmatprep.mubr.msk.f32.mxu0 %vm36944_vm2, %v39469_v23 }
0x1b47   : > { %33259 = vmatprep.subr.mxu0 %v39469_v23 }
0x1b4d   : > { %33257 = vmatmul.mubr.f32.vlgmr.msra.gmra.mrb[66].mxu0 %v11617_v46  ;;  %v12547_v46 = vsub.f32 %v12545_v28, %v12546_v60 }
0x1b4e   : > { %33260 = vmatpush3.msra.mxu0 %v11551_v44  ;;  %33261 = vmatprep.mubr.msk.f32.mxu0 %vm36944_vm2, %v39469_v23 }
0x1b4f   : > { %33264 = vmatprep.subr.mxu0 %v39469_v23 }
0x1b55   : > { %33262 = vmatmul.mubr.f32.vlgmr.msra.gmra.mrb[66].mxu0 %v11618_v53  ;;  %v12548_v53 = vand.u32 4294901760, %v12547_v46 }
0x1b56   : > { %33265 = vmatpush3.msra.mxu0 %v11629_v62  ;;  %33266 = vmatprep.mubr.msk.f32.mxu0 %vm36944_vm2, %v39469_v23 }
0x1b57   : > { %33269 = vmatprep.subr.mxu0 %v39469_v23 }
0x1b5d   : > { %33267 = vmatmul.mubr.f32.vlgmr.msra.gmra.mrb[66].mxu0 %v11616_v42 }
0x1b5e   : > { %33270 = vmatpush3.msra.mxu0 %v11551_v44  ;;  %33271 = vmatprep.mubr.msk.f32.mxu0 %vm36944_vm2, %v39469_v23 }
0x1b5f   : > { %33304 = vmatprep.subr.mxu0 %v39469_v23 }
0x1b65   : > { %33272 = vmatmul.mubr.f32.vlgmr.msra.gmra.mrb[66].mxu0 %v11616_v42 }
0x1b66   : > { %33305 = vmatpush3.msra.mxu0 %v12468_v48  ;;  %33306 = vmatprep.mubr.msk.f32.mxu0 %vm36944_vm2, %v39469_v23 }
0x1b67   : > { %33309 = vmatprep.subr.mxu0 %v39469_v23 }
0x1b9a   : > { %v12458_v36 = vpop.xlane.xlu1 %12457 }
0x1b9b   : > { %36763 = vrcp.f32 %v12458_v36 }
0x1b9e   : > { %v13379_v55 = vpop.permute.xlu1 %13378 }
0x1b9f   : > { %v13385_v30 = vand.u32 4294901760, %v13379_v55 }
0x1ba2   : > { %v13375_v62 = vpop.xlane.xlu0 %13374 }
0x1ba3   : > { %36765 = vrcp.f32 %v13375_v62 }
0x1ba5   : > { %v36764_v22 = vpop.eup %36763 }
0x1ba6   : > { %v12460_v63 = vmul.f32 %v36764_v22, %v38050_v6  ;;  %v13462_v22 = vsub.f32 %v13379_v55, %v13385_v30 }
0x1ba8   : > { %v12465_v7 = vsel %vm4440_vm4, %v12460_v63, 0 }
0x1ba9   : > { %v12533_v61 = vand.u32 4294901760, %v12465_v7 }
0x1bab   : > { %v12534_v16 = vsub.f32 %v12465_v7, %v12533_v61 }
0x1bad   : > { %v12535_v44 = vand.u32 4294901760, %v12534_v16  ;;  %v36766_v6 = vpop.eup %36765 }
0x1bae   : > { %v13377_v29 = vmul.f32 %v36766_v6, %v38056_v26 }
0x1baf   : > { %v12536_v42 = vsub.f32 %v12534_v16, %v12535_v44 }
0x1bb0   : > { %v13382_v0 = vsel %vm4440_vm4, %v13377_v29, 0 }
0x1bb1   : > { %v12537_v54 = vand.u32 4294901760, %v12536_v42  ;;  %v13450_v18 = vand.u32 4294901760, %v13382_v0 }
0x1bb3   : > { %33307 = vmatmul.mubr.f32.vlgmr.msra.gmra.mrb[68].mxu0 %v12537_v54  ;;  %v13451_v36 = vsub.f32 %v13382_v0, %v13450_v18  ;;  %v10159_v54 = vld [vmem:[#allocation2 + $0x188] sm:$0xff] }
0x1bb4   : > { %33310 = vmatpush3.msra.mxu0 %v12548_v53  ;;  %33311 = vmatprep.mubr.msk.f32.mxu0 %vm36944_vm2, %v39469_v23  ;;  %v10160_v53 = vld [vmem:[#allocation2 + $0x190] sm:$0xff]  ;;  %v13854_v62 = vand.u32 4294901760, %v10159_v54 }
0x1bb5   : > { %33314 = vmatprep.subr.mxu0 %v39469_v23  ;;  %v13452_v26 = vand.u32 4294901760, %v13451_v36  ;;  %v13857_v6 = vand.u32 4294901760, %v10160_v53 }
0x1bb6   : > { %v13934_v29 = vsub.f32 %v10159_v54, %v13854_v62 }
0x1bb7   : > { %v13453_v63 = vsub.f32 %v13451_v36, %v13452_v26  ;;  %v13941_v0 = vsub.f32 %v10160_v53, %v13857_v6 }
0x1bb8   : > { %v13935_v55 = vand.u32 4294901760, %v13934_v29 }
0x1bbb   : > { %33312 = vmatmul.mubr.f32.vlgmr.msra.gmra.mrb[68].mxu0 %v12533_v61 }
0x1bbc   : > { %33315 = vmatpush3.msra.mxu0 %v12545_v28  ;;  %33316 = vmatprep.mubr.msk.f32.mxu0 %vm36944_vm2, %v39469_v23  ;;  %v13463_v28 = vand.u32 4294901760, %v13462_v22 }
0x1bbd   : > { %33319 = vmatprep.subr.mxu0 %v39469_v23 }
0x1bbe   : > { %v13464_v7 = vsub.f32 %v13462_v22, %v13463_v28 }
0x1bc3   : > { %33317 = vmatmul.mubr.f32.vlgmr.msra.gmra.mrb[68].mxu0 %v12534_v16  ;;  %v13465_v16 = vand.u32 4294901760, %v13464_v7 }
0x1bc4   : > { %33320 = vmatpush3.msra.mxu0 %v12468_v48  ;;  %33321 = vmatprep.mubr.msk.f32.mxu0 %vm36944_vm2, %v39469_v23 }
0x1bc5   : > { %33324 = vmatprep.subr.mxu0 %v39469_v23 }
0x1bcb   : > { %33322 = vmatmul.mubr.f32.vlgmr.msra.gmra.mrb[68].mxu0 %v12535_v44 }
0x1bcc   : > { %33325 = vmatpush3.msra.mxu0 %v12546_v60  ;;  %33326 = vmatprep.mubr.msk.f32.mxu0 %vm36944_vm2, %v39469_v23  ;;  %v13454_v60 = vand.u32 4294901760, %v13453_v63 }
0x1bcd   : > { %33329 = vmatprep.subr.mxu0 %v39469_v23 }
0x1bd3   : > { %33327 = vmatmul.mubr.f32.vlgmr.msra.gmra.mrb[68].mxu0 %v12533_v61 }
0x1bd4   : > { %33330 = vmatpush3.msra.mxu0 %v12468_v48  ;;  %33331 = vmatprep.mubr.msk.f32.mxu0 %vm36944_vm2, %v39469_v23  ;;  %v39470_v48 = vmov 0.0|0.0  }
0x1bd5   : > { %33364 = vmatprep.subr.mxu0 %v39469_v23 }
0x1bdb   : > { %33332 = vmatmul.mubr.f32.vlgmr.msra.gmra.mrb[68].mxu0 %v12533_v61 }
0x1bdc   : > { %33365 = vmatpush3.msra.mxu0 %v13385_v30  ;;  %33366 = vmatprep.mubr.msk.f32.mxu0 %vm36944_vm2, %v39469_v23 }
0x1bdd   : > { %33369 = vmatprep.subr.mxu0 %v39469_v23 }
0x1bdf   : > { %33367 = vmatmul.mubr.f32.vlgmr.msra.gmra.mrb[70].mxu0 %v13454_v60  ;;  %v10161_v60 = vld [vmem:[#allocation2 + $0x198] sm:$0xff] }
0x1be0   : > { %33370 = vmatpush3.msra.mxu0 %v13465_v16  ;;  %33371 = vmatprep.mubr.msk.f32.mxu0 %vm36944_vm2, %v39469_v23  ;;  %v10162_v16 = vld [vmem:[#allocation2 + $0x1a0] sm:$0xff] }
0x1be1   : > { %33374 = vmatprep.subr.mxu0 %v39469_v23 }
0x1be7   : > { %33372 = vmatmul.mubr.f32.vlgmr.msra.gmra.mrb[70].mxu0 %v13450_v18 }
0x1be8   : > { %33375 = vmatpush3.msra.mxu0 %v13462_v22  ;;  %33376 = vmatprep.mubr.msk.f32.mxu0 %vm36944_vm2, %v39469_v23 }
0x1be9   : > { %33379 = vmatprep.subr.mxu0 %v39469_v23 }
0x1bef   : > { %33377 = vmatmul.mubr.f32.vlgmr.msra.gmra.mrb[70].mxu0 %v13451_v36  ;;  %v13936_v36 = vsub.f32 %v13934_v29, %v13935_v55 }
0x1bf0   : > { %33380 = vmatpush3.msra.mxu0 %v13385_v30  ;;  %33381 = vmatprep.mubr.msk.f32.mxu0 %vm36944_vm2, %v39469_v23 }
0x1bf1   : > { %33384 = vmatprep.subr.mxu0 %v39469_v23 }
0x1bf7   : > { %33382 = vmatmul.mubr.f32.vlgmr.msra.gmra.mrb[70].mxu0 %v13452_v26 }
0x1bf8   : > { %33385 = vmatpush3.msra.mxu0 %v13463_v28  ;;  %33386 = vmatprep.mubr.msk.f32.mxu0 %vm36944_vm2, %v39469_v23 }
0x1bf9   : > { %33389 = vmatprep.subr.mxu0 %v39469_v23 }
0x1bff   : > { %33387 = vmatmul.mubr.f32.vlgmr.msra.gmra.mrb[70].mxu0 %v13450_v18 }
0x1c00   : > { %33390 = vmatpush3.msra.mxu0 %v13385_v30  ;;  %33391 = vmatprep.mubr.msk.f32.mxu0 %vm36944_vm2, %v39469_v23  ;;  %v13942_v30 = vand.u32 4294901760, %v13941_v0 }
0x1c01   : > { %35482 = vmatprep.subr.bf16.mxu0 %v39470_v48 }
0x1c02   : > { %v13943_v22 = vsub.f32 %v13941_v0, %v13942_v30 }
0x1c04   : > { %v13944_v26 = vand.u32 4294901760, %v13943_v22 }
0x1c07   : > { %33392 = vmatmul.mubr.f32.vlgmr.msra.gmra.mrb[70].mxu0 %v13450_v18  ;;  %v13937_v18 = vand.u32 4294901760, %v13936_v36 }
0x1c08   : > { %33413 = vmatprep.mubr.msk.f32.mxu0 %vm36944_vm2, %v39469_v23 }
0x1c09   : > { %v38139_v28 = vpack.c.bf16 %v13944_v26, %v13937_v18 }
0x1c0b   : > { %39471 = vst [vmem:[#allocation18_spill] sm:$0xff] %v38139_v28  ;;  %35484 = vmatpush3.bf16.msra.mxu0 %v38139_v28 }
0x1c0c   : > { %v11075_v61 = vpop.f32.mrb[64].mxu0  ;;  %35485 = vmatprep.subr.bf16.mxu0 %v39470_v48 }
0x1c0d   : > { %v33213_v44 = vpop.f32.mrb[65].mxu0 }
0x1c0e   : > { %v13860_v44 = vand.u32 4294901760, %v10161_v60 }
0x1c38   : > { %v11992_v46 = vpop.f32.mrb[66].mxu0 }
0x1c39   : > { %13831 = vrot.lane.b32.xlu0 %v11992_v46, %s36957_s11  ;;  %v33273_v42 = vpop.f32.mrb[67].mxu0  ;;  %v13863_v46 = vand.u32 4294901760, %v10162_v16 }
0x1c3a   : > { %v13948_v42 = vsub.f32 %v10161_v60, %v13860_v44  ;;  %v38156_v60 = vpack.c.bf16 %v13941_v0, %v13934_v29 }
0x1c3b   : > { %v13955_v54 = vsub.f32 %v10162_v16, %v13863_v46 }
0x1c3c   : > { %v13949_v53 = vand.u32 4294901760, %v13948_v42  ;;  %39475 = vst [vmem:[#allocation22_spill] sm:$0xff] %v38156_v60 }
0x1c3d   : > { %v13956_v19 = vand.u32 4294901760, %v13955_v54 }
0x1c3e   : > { %v13950_v36 = vsub.f32 %v13948_v42, %v13949_v53 }
0x1c3f   : > { %v13957_v22 = vsub.f32 %v13955_v54, %v13956_v19 }
0x1c40   : > { %v13951_v18 = vand.u32 4294901760, %v13950_v36 }
0x1c41   : > { %v13958_v26 = vand.u32 4294901760, %v13957_v22  ;;  %v38159_v22 = vpack.c.bf16 %v13955_v54, %v13948_v42  ;;  %v30830_v42 = vld [vmem:[#allocation2 + $0x1a8] ss:$0 sm:$0xff] }
0x1c43   : > { %v38144_v25 = vpack.c.bf16 %v13958_v26, %v13951_v18  ;;  %39476 = vst [vmem:[#allocation23_spill] sm:$0xff] %v38159_v22 }
0x1c45   : > { %39472 = vst [vmem:[#allocation19_spill] sm:$0xff] %v38144_v25  ;;  %35487 = vmatpush3.bf16.msra.mxu0 %v38144_v25 }
0x1c46   : > { %35494 = vmatprep.subr.bf16.mxu0 %v39470_v48 }
0x1cab   : > { %v13832_v18 = vpop.permute.xlu0 %13831 }
0x1cae   : > { %v12909_v63 = vpop.f32.mrb[68].mxu0 }
0x1caf   : > { %13835 = vrot.lane.b32.xlu1 %v12909_v63, %s36958_s17  ;;  %v33333_v7 = vpop.f32.mrb[69].mxu0  ;;  %v38148_v63 = vpack.c.bf16 %v13857_v6, %v13854_v62  ;;  %v38161_v62 = vpack.c.bf16 %v13942_v30, %v13935_v55  ;;  %v38163_v6 = vpack.c.bf16 %v13956_v19, %v13949_v53 }
0x1cb0   : > { %v38152_v7 = vpack.c.bf16 %v13863_v46, %v13860_v44  ;;  %v13842_v44 = vsel %vm4440_vm4, %v11075_v61, %v13832_v18 }
0x1cb1   : > { %39473 = vst [vmem:[#allocation20_spill] sm:$0xff] %v38148_v63  ;;  %35478 = vmatpush3.bf16.msra.mxu1 %v38148_v63  ;;  %39477 = vst [vmem:[#allocation24_spill] sm:$0xff] %v38161_v62 }
0x1cb2   : > { %35479 = vmatprep.subr.bf16.mxu1 %v39470_v48  ;;  %39474 = vst [vmem:[#allocation21_spill] sm:$0xff] %v38152_v7  ;;  %39478 = vst [vmem:[#allocation25_spill] sm:$0xff] %v38163_v6 }
0x1cb5   : > { %35481 = vmatpush3.bf16.msra.mxu1 %v38152_v7 }
0x1cb6   : > { %35488 = vmatprep.subr.bf16.mxu1 %v39470_v48 }
0x1cda   : > { %v13826_v16 = vpop.f32.mrb[70].mxu0 }
0x1cdb   : > { %13839 = vrot.lane.b32.xlu1 %v13826_v16, %s36959_s20  ;;  %v33393_v36 = vpop.f32.mrb[71].mxu0 }
0x1d21   : > { %v13836_v26 = vpop.permute.xlu1 %13835 }
0x1d22   : > { %v13843_v46 = vsel %vm719_vm1, %v13842_v44, %v13836_v26 }
0x1d4d   : > { %v13840_v25 = vpop.permute.xlu1 %13839 }
0x1d4e   : > { %v13844_v29 = vsel %vm8119_vm5, %v13843_v46, %v13840_v25 }
0x1d4f   : > { %v13851_v0 = vsel %vm207_vm0, %v13844_v29, 0 }
0x1d50   : > { %v13922_v28 = vand.u32 4294901760, %v13851_v0 }
0x1d52   : > { %v13923_v16 = vsub.f32 %v13851_v0, %v13922_v28  ;;  %33414 = vmatmul.mubr.f32.vlgmr.msra.gmra.mrb[72].mxu0 %v13922_v28 }
0x1d53   : > { %35496 = vmatpush3.bf16.msra.mxu0 %v38148_v63  ;;  %33435 = vmatprep.mubr.msk.f32.mxu0 %vm36944_vm2, %v39469_v23 }
0x1d54   : > { %35497 = vmatprep.subr.bf16.mxu0 %v39470_v48  ;;  %v13924_v19 = vand.u32 4294901760, %v13923_v16 }
0x1d56   : > { %v13925_v55 = vsub.f32 %v13923_v16, %v13924_v19 }
0x1d57   : > { %35499 = vmatpush3.bf16.msra.mxu0 %v38152_v7 }
0x1d58   : > { %35506 = vmatprep.subr.bf16.mxu0 %v39470_v48  ;;  %v13926_v61 = vand.u32 4294901760, %v13925_v55 }
0x1d5a   : > { %33436 = vmatmul.mubr.f32.vlgmr.msra.gmra.mrb[74].mxu0 %v13924_v19  ;;  %33403 = vmatmul.mubr.f32.vlgmr.msra.gmra.mrb[32].mxu1 %v13926_v61 }
0x1d5b   : > { %35490 = vmatpush3.bf16.msra.mxu1 %v38156_v60  ;;  %35508 = vmatpush3.bf16.msra.mxu0 %v38148_v63 }
0x1d5c   : > { %35491 = vmatprep.subr.bf16.mxu1 %v39470_v48  ;;  %35509 = vmatprep.subr.bf16.mxu0 %v39470_v48 }
0x1d5d   : > { %33424 = vmatprep.mubr.msk.f32.mxu1 %vm36944_vm2, %v39469_v23  ;;  %33457 = vmatprep.mubr.msk.f32.mxu0 %vm36944_vm2, %v39469_v23 }
0x1d5f   : > { %35493 = vmatpush3.bf16.msra.mxu1 %v38159_v22  ;;  %35511 = vmatpush3.bf16.msra.mxu0 %v38152_v7 }
0x1d60   : > { %35500 = vmatprep.subr.bf16.mxu1 %v39470_v48  ;;  %35548 = vmatprep.subr.bf16.mxu0 %v39470_v48 }
0x1d62   : > { %33425 = vmatmul.mubr.f32.vlgmr.msra.gmra.mrb[34].mxu1 %v13923_v16  ;;  %33458 = vmatmul.mubr.f32.vlgmr.msra.gmra.mrb[76].mxu0 %v13922_v28 }
0x1d63   : > { %35502 = vmatpush3.bf16.msra.mxu1 %v38161_v62  ;;  %33446 = vmatprep.mubr.msk.f32.mxu1 %vm36944_vm2, %v39469_v23 }
0x1d64   : > { %35503 = vmatprep.subr.bf16.mxu1 %v39470_v48  ;;  %33534 = vmatprep.mubr.msk.f32.mxu0 %vm36944_vm2, %v39469_v23 }
0x1d67   : > { %35505 = vmatpush3.bf16.msra.mxu1 %v38163_v6 }
0x1d68   : > { %35512 = vmatprep.subr.bf16.mxu1 %v39470_v48 }
0x1d6a   : > { %33447 = vmatmul.mubr.f32.vlgmr.msra.gmra.mrb[36].mxu1 %v13922_v28 }
0x1d6b   : > { %33468 = vmatprep.mubr.msk.f32.mxu1 %vm36944_vm2, %v39469_v23 }
0x1e25   : > { %v14019_v25 = vpop.f32.mrb[72].mxu0 }
0x1e26   : > { %v33415_v30 = vpop.f32.mrb[73].mxu0 }
0x1e2d   : > { %v14176_v54 = vpop.f32.mrb[74].mxu0  ;;  %v13928_v53 = vpop.f32.mrb[32].mxu1 }
0x1e2e   : > { %v13929_v36 = vadd.f32 %v30830_v42, %v13928_v53  ;;  %v33437_v18 = vpop.f32.mrb[75].mxu0  ;;  %v33404_v26 = vpop.f32.mrb[33].mxu1 }
0x1e2f   : > { %v14353_v26 = vld [vmem:[#allocation2 + $0x1b8] sm:$0xff] }
0x1e30   : > { %v14020_v44 = vadd.f32 %v14019_v25, %v13929_v36 }
0x1e35   : > { %v14099_v46 = vpop.f32.mrb[34].mxu1  ;;  %v14334_v29 = vpop.f32.mrb[76].mxu0 }
0x1e36   : > { %v14100_v0 = vadd.f32 %v14099_v46, %v14020_v44  ;;  %v33426_v16 = vpop.f32.mrb[35].mxu1  ;;  %v33459_v19 = vpop.f32.mrb[77].mxu0  ;;  %v14354_v44 = vld [vmem:[#allocation2 + $0x1c0] sm:$0xff]  ;;  %v14368_v46 = vand.u32 4294901760, %v14353_v26 }
0x1e38   : > { %v14177_v55 = vadd.f32 %v14176_v54, %v14100_v0  ;;  %v14352_v54 = vld [vmem:[#allocation2 + $0x1b0] sm:$0xff]  ;;  %v14452_v19 = vsub.f32 %v14353_v26, %v14368_v46 }
0x1e3d   : > { %v14259_v61 = vpop.f32.mrb[36].mxu1 }
0x1e3e   : > { %v14260_v28 = vadd.f32 %v14259_v61, %v14177_v55  ;;  %v33448_v6 = vpop.f32.mrb[37].mxu1 }
0x1e3f   : > { %v14365_v6 = vand.u32 4294901760, %v14352_v54 }
0x1e40   : > { %v14335_v62 = vadd.f32 %v14334_v29, %v14260_v28  ;;  %v14355_v29 = vld [vmem:[#allocation2 + $0x1c8] sm:$0xff]  ;;  %v14453_v28 = vand.u32 4294901760, %v14452_v19 }
0x1e41   : > { %v38204_v0 = vpack.c.bf16 %v14368_v46, %v14365_v6  ;;  %v14445_v16 = vsub.f32 %v14352_v54, %v14365_v6 }
0x1e42   : > { %v38198_v22 = vadd.f32 %v14335_v62, %v37864_v5  ;;  %v14371_v5 = vand.u32 4294901760, %v14354_v44  ;;  %v14374_v62 = vand.u32 4294901760, %v14355_v29 }
0x1e43   : > { %39479 = vst [vmem:[#allocation26_spill] sm:$0xff] %v38204_v0  ;;  %35514 = vmatpush3.bf16.msra.mxu1 %v38204_v0  ;;  %v14446_v61 = vand.u32 4294901760, %v14445_v16  ;;  %v38216_v20 = vpack.c.bf16 %v14452_v19, %v14445_v16 }
0x1e44   : > { %v14339_v30 = vsel %vm207_vm0, %v38198_v22, 0.0  ;;  %v38207_v55 = vpack.c.bf16 %v14374_v62, %v14371_v5  ;;  %35515 = vmatprep.subr.bf16.mxu1 %v39470_v48 }
0x1e45   : > { %14340 = vadd.xlane.f32.xlu1 %v14339_v30  ;;  %v14447_v30 = vsub.f32 %v14445_v16, %v14446_v61  ;;  %39483 = vst [vmem:[#allocation30_spill] sm:$0xff] %v38216_v20 }
0x1e46   : > { %39480 = vst [vmem:[#allocation27_spill] sm:$0xff] %v38207_v55 }
0x1e47   : > { %35517 = vmatpush3.bf16.msra.mxu1 %v38207_v55 }
0x1e48   : > { %35518 = vmatprep.subr.bf16.mxu1 %v39470_v48 }
0x1ed2   : > { %v14341_v42 = vpop.xlane.xlu1 %14340 }
0x1ed3   : > { %v14342_v53 = vmul.f32 0.03125, %v14341_v42  ;;  %v14454_v42 = vsub.f32 %v14452_v19, %v14453_v28 }
0x1ed5   : > { %v14343_v25 = vsub.f32 %v38198_v22, %v14342_v53  ;;  %v14459_v53 = vsub.f32 %v14354_v44, %v14371_v5  ;;  %v14455_v60 = vand.u32 4294901760, %v14454_v42 }
0x1ed7   : > { %v14344_v36 = vmul.f32 %v14343_v25, %v14343_v25  ;;  %v14460_v54 = vand.u32 4294901760, %v14459_v53 }
0x1ed9   : > { %v14345_v18 = vsel %vm207_vm0, %v14344_v36, 0.0  ;;  %v14466_v36 = vsub.f32 %v14355_v29, %v14374_v62  ;;  %v14461_v46 = vsub.f32 %v14459_v53, %v14460_v54  ;;  %v38220_v29 = vpack.c.bf16 %v14453_v28, %v14446_v61 }
0x1eda   : > { %14346 = vadd.xlane.f32.xlu0 %v14345_v18  ;;  %v14448_v18 = vand.u32 4294901760, %v14447_v30 }
0x1edb   : > { %v14467_v26 = vand.u32 4294901760, %v14466_v36  ;;  %v14462_v63 = vand.u32 4294901760, %v14461_v46  ;;  %v38218_v44 = vpack.c.bf16 %v14466_v36, %v14459_v53  ;;  %39485 = vst [vmem:[#allocation32_spill] sm:$0xff] %v38220_v29 }
0x1edc   : > { %v38212_v6 = vpack.c.bf16 %v14455_v60, %v14448_v18 }
0x1edd   : > { %v14468_v7 = vsub.f32 %v14466_v36, %v14467_v26  ;;  %39484 = vst [vmem:[#allocation31_spill] sm:$0xff] %v38218_v44  ;;  %v38222_v5 = vpack.c.bf16 %v14467_v26, %v14460_v54  ;;  %v14877_v54 = vld [vmem:[#allocation2 + $0x1e8] sm:$0xff]  ;;  %v14878_v26 = vld [vmem:[#allocation2 + $0x1f0] sm:$0xff] }
0x1ede   : > { %39481 = vst [vmem:[#allocation28_spill] sm:$0xff] %v38212_v6 }
0x1edf   : > { %v14469_v43 = vand.u32 4294901760, %v14468_v7  ;;  %39486 = vst [vmem:[#allocation33_spill] sm:$0xff] %v38222_v5 }
0x1ee1   : > { %v38214_v21 = vpack.c.bf16 %v14469_v43, %v14462_v63 }
0x1ee3   : > { %39482 = vst [vmem:[#allocation29_spill] sm:$0xff] %v38214_v21 }
0x1f67   : > { %v14347_v62 = vpop.xlane.xlu0 %14346 }
0x1f68   : > { %v14348_v30 = vmul.f32 0.03125, %v14347_v62  ;;  %v14894_v62 = vand.u32 4294901760, %v14877_v54 }
0x1f6a   : > { %v14349_v42 = vadd.f32 1e-05, %v14348_v30  ;;  %v14897_v30 = vand.u32 4294901760, %v14878_v26 }
0x1f6c   : > { %36767 = vrsqrt.f32 %v14349_v42 }
0x1f76   : > { %v36768_v60 = vpop.eup %36767 }
0x1f77   : > { %v14351_v18 = vmul.f32 %v36768_v60, %v14343_v25  ;;  %v14876_v25 = vld [vmem:[#allocation2 + $0x1e0] sm:$0xff] }
0x1f78   : > { %v14891_v61 = vand.u32 4294901760, %v14876_v25 }
0x1f79   : > { %v14362_v2 = vsel %vm207_vm0, %v14351_v18, 0  ;;  %v38265_v18 = vpack.c.bf16 %v14897_v30, %v14894_v62 }
0x1f7a   : > { %v14433_v46 = vand.u32 4294901760, %v14362_v2  ;;  %v14975_v36 = vsub.f32 %v14876_v25, %v14891_v61 }
0x1f7c   : > { %v14434_v7 = vsub.f32 %v14362_v2, %v14433_v46  ;;  %v14875_v2 = vld [vmem:[#allocation2 + $0x1d8] sm:$0xff]  ;;  %v14976_v60 = vand.u32 4294901760, %v14975_v36 }
0x1f7d   : > { %v14888_v19 = vand.u32 4294901760, %v14875_v2 }
0x1f7e   : > { %v14435_v43 = vand.u32 4294901760, %v14434_v7 }
0x1f7f   : > { %v38261_v28 = vpack.c.bf16 %v14891_v61, %v14888_v19  ;;  %v14968_v53 = vsub.f32 %v14875_v2, %v14888_v19 }
0x1f80   : > { %v14436_v63 = vsub.f32 %v14434_v7, %v14435_v43 }
0x1f81   : > { %35550 = vmatpush3.bf16.msra.mxu0 %v38261_v28  ;;  %v14969_v42 = vand.u32 4294901760, %v14968_v53 }
0x1f82   : > { %v14437_v16 = vand.u32 4294901760, %v14436_v63  ;;  %35551 = vmatprep.subr.bf16.mxu0 %v39470_v48  ;;  %v14989_v63 = vsub.f32 %v14878_v26, %v14897_v30  ;;  %v30831_v30 = vld [vmem:[#allocation2 + $0x1d0] ss:$0 sm:$0xff] }
0x1f83   : > { %v38277_v26 = vpack.c.bf16 %v14976_v60, %v14969_v42 }
0x1f84   : > { %33469 = vmatmul.mubr.f32.vlgmr.msra.gmra.mrb[38].mxu1 %v14437_v16  ;;  %v14990_v19 = vand.u32 4294901760, %v14989_v63 }
0x1f85   : > { %35520 = vmatpush3.bf16.msra.mxu1 %v38212_v6  ;;  %33479 = vmatprep.mubr.msk.f32.mxu1 %vm36944_vm2, %v39469_v23  ;;  %v38273_v6 = vpack.c.bf16 %v14975_v36, %v14968_v53 }
0x1f86   : > { %35521 = vmatprep.subr.bf16.mxu1 %v39470_v48  ;;  %35553 = vmatpush3.bf16.msra.mxu0 %v38265_v18 }
0x1f87   : > { %35554 = vmatprep.subr.bf16.mxu0 %v39470_v48 }
0x1f89   : > { %35523 = vmatpush3.bf16.msra.mxu1 %v38214_v21 }
0x1f8a   : > { %35524 = vmatprep.subr.bf16.mxu1 %v39470_v48 }
0x1f8c   : > { %33480 = vmatmul.mubr.f32.vlgmr.msra.gmra.mrb[38].mxu1 %v14433_v46 }
0x1f8d   : > { %35526 = vmatpush3.bf16.msra.mxu1 %v38216_v20  ;;  %33490 = vmatprep.mubr.msk.f32.mxu1 %vm36944_vm2, %v39469_v23 }
0x1f8e   : > { %35527 = vmatprep.subr.bf16.mxu1 %v39470_v48 }
0x1f91   : > { %35529 = vmatpush3.bf16.msra.mxu1 %v38218_v44 }
0x1f92   : > { %35530 = vmatprep.subr.bf16.mxu1 %v39470_v48 }
0x1f94   : > { %33491 = vmatmul.mubr.f32.vlgmr.msra.gmra.mrb[38].mxu1 %v14434_v7  ;;  %v14977_v7 = vsub.f32 %v14975_v36, %v14976_v60 }
0x1f95   : > { %35532 = vmatpush3.bf16.msra.mxu1 %v38204_v0  ;;  %33501 = vmatprep.mubr.msk.f32.mxu1 %vm36944_vm2, %v39469_v23 }
0x1f96   : > { %35533 = vmatprep.subr.bf16.mxu1 %v39470_v48  ;;  %v14978_v2 = vand.u32 4294901760, %v14977_v7 }
0x1f99   : > { %35535 = vmatpush3.bf16.msra.mxu1 %v38207_v55 }
0x1f9a   : > { %35536 = vmatprep.subr.bf16.mxu1 %v39470_v48 }
0x1f9c   : > { %33502 = vmatmul.mubr.f32.vlgmr.msra.gmra.mrb[38].mxu1 %v14435_v43  ;;  %v14982_v43 = vsub.f32 %v14877_v54, %v14894_v62 }
0x1f9d   : > { %35538 = vmatpush3.bf16.msra.mxu1 %v38220_v29  ;;  %33512 = vmatprep.mubr.msk.f32.mxu1 %vm36944_vm2, %v39469_v23  ;;  %v14991_v29 = vsub.f32 %v14989_v63, %v14990_v19 }
0x1f9e   : > { %35539 = vmatprep.subr.bf16.mxu1 %v39470_v48  ;;  %v14983_v25 = vand.u32 4294901760, %v14982_v43  ;;  %v38275_v54 = vpack.c.bf16 %v14989_v63, %v14982_v43 }
0x1f9f   : > { %v14992_v20 = vand.u32 4294901760, %v14991_v29 }
0x1fa0   : > { %v38279_v62 = vpack.c.bf16 %v14990_v19, %v14983_v25 }
0x1fa1   : > { %35541 = vmatpush3.bf16.msra.mxu1 %v38222_v5  ;;  %v14984_v5 = vsub.f32 %v14982_v43, %v14983_v25 }
0x1fa2   : > { %35542 = vmatprep.subr.bf16.mxu1 %v39470_v48 }
0x1fa3   : > { %v14985_v44 = vand.u32 4294901760, %v14984_v5 }
0x1fa4   : > { %33513 = vmatmul.mubr.f32.vlgmr.msra.gmra.mrb[38].mxu1 %v14433_v46 }
0x1fa5   : > { %35544 = vmatpush3.bf16.msra.mxu1 %v38204_v0  ;;  %33523 = vmatprep.mubr.msk.f32.mxu1 %vm36944_vm2, %v39469_v23  ;;  %v38271_v21 = vpack.c.bf16 %v14992_v20, %v14985_v44 }
0x1fa6   : > { %35545 = vmatprep.subr.bf16.mxu1 %v39470_v48 }
0x1fa9   : > { %35547 = vmatpush3.bf16.msra.mxu1 %v38207_v55 }
0x1faa   : > { %35584 = vmatprep.subr.bf16.mxu1 %v39470_v48 }
0x1fac   : > { %33524 = vmatmul.mubr.f32.vlgmr.msra.gmra.mrb[38].mxu1 %v14433_v46  ;;  %v14970_v46 = vsub.f32 %v14968_v53, %v14969_v42 }
0x1fad   : > { %35586 = vmatpush3.bf16.msra.mxu1 %v37423_v32  ;;  %33600 = vmatprep.mubr.msk.f32.mxu1 %vm36944_vm2, %v39469_v23 }
0x1fae   : > { %35587 = vmatprep.subr.bf16.mxu1 %v39470_v48  ;;  %v14971_v16 = vand.u32 4294901760, %v14970_v46 }
0x1fb0   : > { %v38269_v61 = vpack.c.bf16 %v14978_v2, %v14971_v16 }
0x1fb1   : > { %35589 = vmatpush3.bf16.msra.mxu1 %v37426_v35 }
0x1fb2   : > { %35590 = vmatprep.subr.bf16.mxu1 %v39470_v48 }
0x207f   : > { %v14845_v46 = vpop.f32.mrb[38].mxu1 }
0x2080   : > { %v36102_v7 = vadd.f32 %v30831_v30, %v14845_v46  ;;  %v33525_v55 = vpop.f32.mrb[39].mxu1 }
0x2082   : > { %v14850_v16 = vmul.f32 0.70710677, %v36102_v7 }
0x2084   : > { %v14851_v2 = vand.u32 2147483647, %v14850_v16  ;;  %vm14870_vm7 = vcmp.ge.f32.partialorder %v14850_v16, 0.0 }
0x2086   : > { %v14852_v0 = vmul.f32 0.3275911, %v14851_v2  ;;  %v14864_v29 = vsub.f32 0.0, %v14851_v2 }
0x2088   : > { %v14853_v13 = vadd.f32 1.0, %v14852_v0  ;;  %v14865_v44 = vmul.f32 %v14864_v29, %v14851_v2  ;;  %v14849_v0 = vmul.f32 0.5, %v36102_v7 }
0x208a   : > { %36769 = vrcp.f32 %v14853_v13  ;;  %v14866_v36 = vmul.f32 1.442695, %v14865_v44 }
0x208c   : > { %36771 = vpow2.f32 %v14866_v36 }
0x2094   : > { %v36770_v20 = vpop.eup %36769 }
0x2095   : > { %v14855_v5 = vmul.f32 1.0614054, %v36770_v20 }
0x2096   : > { %v36772_v55 = vpop.eup %36771 }
0x2097   : > { %v14856_v53 = vadd.f32 -1.4531521, %v14855_v5 }
0x2099   : > { %v14857_v43 = vmul.f32 %v36770_v20, %v14856_v53 }
0x209b   : > { %v14858_v42 = vadd.f32 1.4214138, %v14857_v43 }
0x209d   : > { %v14859_v60 = vmul.f32 %v36770_v20, %v14858_v42 }
0x209f   : > { %v14860_v63 = vadd.f32 -0.28449672, %v14859_v60 }
0x20a1   : > { %v14861_v25 = vmul.f32 %v36770_v20, %v14860_v63 }
0x20a3   : > { %v14862_v19 = vadd.f32 0.2548296, %v14861_v25 }
0x20a5   : > { %v14863_v30 = vmul.f32 %v36770_v20, %v14862_v19 }
0x20a7   : > { %v14868_v46 = vmul.f32 %v36772_v55, %v14863_v30 }
0x20a9   : > { %v14869_v12 = vsub.f32 1.0, %v14868_v46 }
0x20ab   : > { %v14871_v1 = vsub.f32 0.0, %v14869_v12 }
0x20ad   : > { %v14872_v13 = vsel %vm14870_vm7, %v14869_v12, %v14871_v1  ;;  %v30832_v12 = vld [vmem:[#allocation2 + $0x1f8] ss:$0 sm:$0xff] }
0x20ae   : > { %v14873_v11 = vadd.f32 1.0, %v14872_v13 }
0x20b0   : > { %v14874_v2 = vmul.f32 %v14873_v11, %v14849_v0 }
0x20b2   : > { %v14885_v29 = vsel %vm207_vm0, %v14874_v2, 0 }
0x20b3   : > { %v14956_v44 = vand.u32 4294901760, %v14885_v29 }
0x20b5   : > { %v14957_v5 = vsub.f32 %v14885_v29, %v14956_v44 }
0x20b7   : > { %v14958_v53 = vand.u32 4294901760, %v14957_v5 }
0x20b9   : > { %v14959_v36 = vsub.f32 %v14957_v5, %v14958_v53 }
0x20bb   : > { %v14960_v43 = vand.u32 4294901760, %v14959_v36 }
0x20bd   : > { %33535 = vmatmul.mubr.f32.vlgmr.msra.gmra.mrb[78].mxu0 %v14960_v43 }
0x20be   : > { %35556 = vmatpush3.bf16.msra.mxu0 %v38269_v61  ;;  %33545 = vmatprep.mubr.msk.f32.mxu0 %vm36944_vm2, %v39469_v23 }
0x20bf   : > { %35557 = vmatprep.subr.bf16.mxu0 %v39470_v48 }
0x20c2   : > { %35559 = vmatpush3.bf16.msra.mxu0 %v38271_v21 }
0x20c3   : > { %35560 = vmatprep.subr.bf16.mxu0 %v39470_v48 }
0x20c5   : > { %33546 = vmatmul.mubr.f32.vlgmr.msra.gmra.mrb[80].mxu0 %v14956_v44 }
0x20c6   : > { %35562 = vmatpush3.bf16.msra.mxu0 %v38273_v6  ;;  %33556 = vmatprep.mubr.msk.f32.mxu0 %vm36944_vm2, %v39469_v23 }
0x20c7   : > { %35563 = vmatprep.subr.bf16.mxu0 %v39470_v48 }
0x20ca   : > { %35565 = vmatpush3.bf16.msra.mxu0 %v38275_v54 }
0x20cb   : > { %35566 = vmatprep.subr.bf16.mxu0 %v39470_v48 }
0x20cd   : > { %33557 = vmatmul.mubr.f32.vlgmr.msra.gmra.mrb[82].mxu0 %v14957_v5 }
0x20ce   : > { %35568 = vmatpush3.bf16.msra.mxu0 %v38261_v28  ;;  %33567 = vmatprep.mubr.msk.f32.mxu0 %vm36944_vm2, %v39469_v23 }
0x20cf   : > { %35569 = vmatprep.subr.bf16.mxu0 %v39470_v48 }
0x20d2   : > { %35571 = vmatpush3.bf16.msra.mxu0 %v38265_v18 }
0x20d3   : > { %35572 = vmatprep.subr.bf16.mxu0 %v39470_v48 }
0x20d5   : > { %33568 = vmatmul.mubr.f32.vlgmr.msra.gmra.mrb[84].mxu0 %v14958_v53 }
0x20d6   : > { %35574 = vmatpush3.bf16.msra.mxu0 %v38277_v26  ;;  %33578 = vmatprep.mubr.msk.f32.mxu0 %vm36944_vm2, %v39469_v23 }
0x20d7   : > { %35575 = vmatprep.subr.bf16.mxu0 %v39470_v48 }
0x20da   : > { %35577 = vmatpush3.bf16.msra.mxu0 %v38279_v62 }
0x20db   : > { %35578 = vmatprep.subr.bf16.mxu0 %v39470_v48 }
0x20dd   : > { %33579 = vmatmul.mubr.f32.vlgmr.msra.gmra.mrb[86].mxu0 %v14956_v44 }
0x20de   : > { %35580 = vmatpush3.bf16.msra.mxu0 %v38261_v28  ;;  %33589 = vmatprep.mubr.msk.f32.mxu0 %vm36944_vm2, %v39469_v23 }
0x20df   : > { %35581 = vmatprep.subr.bf16.mxu0 %v39470_v48 }
0x20e2   : > { %35583 = vmatpush3.bf16.msra.mxu0 %v38265_v18 }
0x20e3   : > { %33658 = vmatprep.subr.mxu0 %v39469_v23 }
0x20e5   : > { %33590 = vmatmul.mubr.f32.vlgmr.msra.gmra.mrb[88].mxu0 %v14956_v44 }
0x20e6   : > { %33660 = vmatprep.mubr.msk.f32.mxu0 %vm36944_vm2, %v39469_v23 }
0x2190   : > { %v14962_v11 = vpop.f32.mrb[78].mxu0 }
0x2191   : > { %v33536_v1 = vpop.f32.mrb[79].mxu0  ;;  %v14963_v7 = vadd.f32 %v30832_v12, %v14962_v11 }
0x2198   : > { %v15053_v16 = vpop.f32.mrb[80].mxu0 }
0x2199   : > { %v15054_v20 = vadd.f32 %v15053_v16, %v14963_v7  ;;  %v33547_v42 = vpop.f32.mrb[81].mxu0 }
0x21a0   : > { %v15133_v60 = vpop.f32.mrb[82].mxu0 }
0x21a1   : > { %v15134_v63 = vadd.f32 %v15133_v60, %v15054_v20  ;;  %v33558_v25 = vpop.f32.mrb[83].mxu0 }
0x21a8   : > { %v15210_v19 = vpop.f32.mrb[84].mxu0 }
0x21a9   : > { %v15211_v30 = vadd.f32 %v15210_v19, %v15134_v63  ;;  %v33569_v55 = vpop.f32.mrb[85].mxu0 }
0x21b0   : > { %v15293_v46 = vpop.f32.mrb[86].mxu0 }
0x21b1   : > { %v15294_v13 = vadd.f32 %v15293_v46, %v15211_v30  ;;  %v33580_v0 = vpop.f32.mrb[87].mxu0 }
0x21b8   : > { %v15368_v2 = vpop.f32.mrb[88].mxu0 }
0x21b9   : > { %v15369_v29 = vadd.f32 %v15368_v2, %v15294_v13  ;;  %v33591_v44 = vpop.f32.mrb[89].mxu0 }
0x21bb   : > { %v38315_v5 = vadd.f32 %v15369_v29, %v38198_v22 }
0x21bd   : > { %v15373_v53 = vsel %vm207_vm0, %v38315_v5, 0.0 }
0x21be   : > { %15374 = vadd.xlane.f32.xlu1 %v15373_v53 }
0x224b   : > { %v15375_v36 = vpop.xlane.xlu1 %15374 }
0x224c   : > { %v15376_v43 = vmul.f32 0.03125, %v15375_v36 }
0x224e   : > { %v15377_v11 = vsub.f32 %v38315_v5, %v15376_v43 }
0x2250   : > { %v15378_v1 = vmul.f32 %v15377_v11, %v15377_v11 }
0x2252   : > { %v15379_v12 = vsel %vm207_vm0, %v15378_v1, 0.0 }
0x2253   : > { %15380 = vadd.xlane.f32.xlu1 %v15379_v12 }
0x22e0   : > { %v15381_v7 = vpop.xlane.xlu1 %15380 }
0x22e1   : > { %v15382_v16 = vmul.f32 0.03125, %v15381_v7 }
0x22e3   : > { %v15383_v20 = vadd.f32 1e-05, %v15382_v16 }
0x22e5   : > { %36773 = vrsqrt.f32 %v15383_v20 }
0x22ef   : > { %v36774_v42 = vpop.eup %36773 }
0x22f0   : > { %v15385_v60 = vmul.f32 %v36774_v42, %v15377_v11 }
0x22f2   : > { %v15387_v22 = vsel %vm207_vm0, %v15385_v60, 0 }
0x22f3   : > { %v15458_v63 = vand.u32 4294901760, %v15387_v22 }
0x22f5   : > { %v15459_v25 = vsub.f32 %v15387_v22, %v15458_v63 }
0x22f7   : > { %v15460_v19 = vand.u32 4294901760, %v15459_v25 }
0x22f9   : > { %v15461_v30 = vsub.f32 %v15459_v25, %v15460_v19 }
0x22fb   : > { %v15462_v55 = vand.u32 4294901760, %v15461_v30 }
0x22fd   : > { %33601 = vmatmul.mubr.f32.vlgmr.msra.gmra.mrb[40].mxu1 %v15462_v55 }
0x22fe   : > { %35592 = vmatpush3.bf16.msra.mxu1 %v37431_v45  ;;  %33611 = vmatprep.mubr.msk.f32.mxu1 %vm36944_vm2, %v39469_v23 }
0x22ff   : > { %35593 = vmatprep.subr.bf16.mxu1 %v39470_v48 }
0x2302   : > { %35595 = vmatpush3.bf16.msra.mxu1 %v37433_v56  ;;  %v36836_v56 = vld [vmem:[#allocation2 + $0xe0] ss:$0 sm:$0xff] }
0x2303   : > { %35596 = vmatprep.subr.bf16.mxu1 %v39470_v48 }
0x2305   : > { %33612 = vmatmul.mubr.f32.vlgmr.msra.gmra.mrb[40].mxu1 %v15458_v63 }
0x2306   : > { %35598 = vmatpush3.bf16.msra.mxu1 %v37435_v57  ;;  %33622 = vmatprep.mubr.msk.f32.mxu1 %vm36944_vm2, %v39469_v23 }
0x2307   : > { %35599 = vmatprep.subr.bf16.mxu1 %v39470_v48 }
0x230a   : > { %35601 = vmatpush3.bf16.msra.mxu1 %v37437_v58 }
0x230b   : > { %35602 = vmatprep.subr.bf16.mxu1 %v39470_v48 }
0x230d   : > { %33623 = vmatmul.mubr.f32.vlgmr.msra.gmra.mrb[40].mxu1 %v15459_v25 }
0x230e   : > { %35604 = vmatpush3.bf16.msra.mxu1 %v37423_v32  ;;  %33633 = vmatprep.mubr.msk.f32.mxu1 %vm36944_vm2, %v39469_v23 }
0x230f   : > { %35605 = vmatprep.subr.bf16.mxu1 %v39470_v48 }
0x2312   : > { %35607 = vmatpush3.bf16.msra.mxu1 %v37426_v35 }
0x2313   : > { %35608 = vmatprep.subr.bf16.mxu1 %v39470_v48 }
0x2315   : > { %33634 = vmatmul.mubr.f32.vlgmr.msra.gmra.mrb[40].mxu1 %v15460_v19 }
0x2316   : > { %35610 = vmatpush3.bf16.msra.mxu1 %v37439_v14  ;;  %33644 = vmatprep.mubr.msk.f32.mxu1 %vm36944_vm2, %v39469_v23 }
0x2317   : > { %35611 = vmatprep.subr.bf16.mxu1 %v39470_v48 }
0x231a   : > { %35613 = vmatpush3.bf16.msra.mxu1 %v37441_v59 }
0x231b   : > { %35614 = vmatprep.subr.bf16.mxu1 %v39470_v48 }
0x231d   : > { %33645 = vmatmul.mubr.f32.vlgmr.msra.gmra.mrb[40].mxu1 %v15458_v63 }
0x231e   : > { %35616 = vmatpush3.bf16.msra.mxu1 %v37423_v32  ;;  %33655 = vmatprep.mubr.msk.f32.mxu1 %vm36944_vm2, %v39469_v23 }
0x231f   : > { %35617 = vmatprep.subr.bf16.mxu1 %v39470_v48 }
0x2322   : > { %35619 = vmatpush3.bf16.msra.mxu1 %v37426_v35 }
0x2323   : > { %33718 = vmatprep.subr.mxu1 %v39469_v23 }
0x2325   : > { %33656 = vmatmul.mubr.f32.vlgmr.msra.gmra.mrb[40].mxu1 %v15458_v63 }
0x2326   : > { %33720 = vmatprep.mubr.msk.f32.mxu1 %vm36944_vm2, %v39469_v23 }
0x23f8   : > { %v15870_v45 = vpop.f32.mrb[40].mxu1 }
0x23f9   : > { %v38354_v57 = vadd.f32 %v36836_v56, %v15870_v45  ;;  %v33657_v58 = vpop.f32.mrb[41].mxu1 }
0x23fb   : > { %16790 = vrot.lane.b32.xlu1 %v38354_v57, %s36947_s28  ;;  %15875 = vrot.lane.b32.xlu0 %v38354_v57, %s36946_s24  ;;  %v15877_v32 = vsel %vm4440_vm4, %v38354_v57, 0 }
0x23fc   : > { %v38372_v35 = vand.u32 4294901760, %v15877_v32 }
0x23fe   : > { %v15948_v14 = vsub.f32 %v15877_v32, %v38372_v35 }
0x23ff   : > { %16792 = vrot.lane.b32.xlu1 %v38354_v57, %s36948_s29  ;;  %17709 = vrot.lane.b32.xlu0 %v38354_v57, %s36949_s30 }
0x2400   : > { %v15949_v59 = vand.u32 4294901760, %v15948_v14 }
0x2402   : > { %v15950_v29 = vsub.f32 %v15948_v14, %v15949_v59 }
0x2403   : > { %17707 = vrot.lane.b32.xlu1 %v38354_v57, %s36950_s4  ;;  %18626 = vrot.lane.b32.xlu0 %v38354_v57, %s36951_s5 }
0x2404   : > { %v15951_v12 = vand.u32 4294901760, %v15950_v29 }
0x2407   : > { %18624 = vrot.lane.b32.xlu1 %v38354_v57, %s36952_s6 }
0x246d   : > { %v16791_v46 = vpop.permute.xlu1 %16790  ;;  %v15876_v13 = vpop.permute.xlu0 %15875 }
0x246e   : > { %v16794_v0 = vsel %vm4440_vm4, %v16791_v46, 0  ;;  %v15879_v2 = vsel %vm4440_vm4, %v15876_v13, 0 }
0x246f   : > { %v38377_v44 = vand.u32 4294901760, %v16794_v0  ;;  %v15882_v53 = vand.u32 4294901760, %v15879_v2 }
0x2471   : > { %v16865_v36 = vsub.f32 %v16794_v0, %v38377_v44  ;;  %v15959_v43 = vsub.f32 %v15879_v2, %v15882_v53  ;;  %v16793_v11 = vpop.permute.xlu1 %16792  ;;  %33659 = vmatpush3.xpose.msra.mxu0 %v15882_v53  ;;  %v17710_v56 = vpop.permute.xlu0 %17709 }
0x2472   : > { %v16796_v1 = vsel %vm4440_vm4, %v16793_v11, 0  ;;  %33663 = vmatprep.subr.mxu0 %v39469_v23  ;;  %v17713_v32 = vsel %vm4440_vm4, %v17710_v56, 0 }
0x2473   : > { %v16866_v7 = vand.u32 4294901760, %v16865_v36  ;;  %v15960_v16 = vand.u32 4294901760, %v15959_v43  ;;  %v16799_v20 = vand.u32 4294901760, %v16796_v1 }
0x2474   : > { %33661 = vmatmul.mubr.f32.vlgmr.msra.gmra.mrb[90].mxu0 %v15951_v12 }
0x2475   : > { %v16867_v42 = vsub.f32 %v16865_v36, %v16866_v7  ;;  %v15961_v60 = vsub.f32 %v15959_v43, %v15960_v16  ;;  %v16876_v22 = vsub.f32 %v16796_v1, %v16799_v20  ;;  %33719 = vmatpush3.xpose.msra.mxu1 %v16799_v20  ;;  %33665 = vmatprep.mubr.msk.f32.mxu0 %vm36944_vm2, %v39469_v23  ;;  %v17708_v45 = vpop.permute.xlu1 %17707 }
0x2476   : > { %33723 = vmatprep.subr.mxu1 %v39469_v23  ;;  %v17711_v58 = vsel %vm4440_vm4, %v17708_v45, 0 }
0x2477   : > { %v16868_v63 = vand.u32 4294901760, %v16867_v42  ;;  %v15962_v25 = vand.u32 4294901760, %v15961_v60  ;;  %v16877_v19 = vand.u32 4294901760, %v16876_v22 }
0x2479   : > { %v16878_v30 = vsub.f32 %v16876_v22, %v16877_v19  ;;  %33721 = vmatmul.mubr.f32.vlgmr.msra.gmra.mrb[42].mxu1 %v16868_v63  ;;  %33664 = vmatpush3.xpose.msra.mxu0 %v15962_v25 }
0x247a   : > { %33668 = vmatprep.subr.mxu0 %v39469_v23  ;;  %33725 = vmatprep.mubr.msk.f32.mxu1 %vm36944_vm2, %v39469_v23 }
0x247b   : > { %v16879_v55 = vand.u32 4294901760, %v16878_v30 }
0x247c   : > { %33666 = vmatmul.mubr.f32.vlgmr.msra.gmra.mrb[90].mxu0 %v38372_v35 }
0x247d   : > { %33669 = vmatpush3.xpose.msra.mxu0 %v15959_v43  ;;  %33724 = vmatpush3.xpose.msra.mxu1 %v16879_v55 }
0x247e   : > { %33728 = vmatprep.subr.mxu1 %v39469_v23  ;;  %33670 = vmatprep.mubr.msk.f32.mxu0 %vm36944_vm2, %v39469_v23 }
0x247f   : > { %33673 = vmatprep.subr.mxu0 %v39469_v23 }
0x2481   : > { %33726 = vmatmul.mubr.f32.vlgmr.msra.gmra.mrb[42].mxu1 %v38377_v44 }
0x2482   : > { %33729 = vmatpush3.xpose.msra.mxu1 %v16876_v22  ;;  %33730 = vmatprep.mubr.msk.f32.mxu1 %vm36944_vm2, %v39469_v23 }
0x2483   : > { %33733 = vmatprep.subr.mxu1 %v39469_v23 }
0x2484   : > { %33671 = vmatmul.mubr.f32.vlgmr.msra.gmra.mrb[90].mxu0 %v15948_v14  ;;  %v17781_v14 = vand.u32 4294901760, %v17711_v58 }
0x2485   : > { %33674 = vmatpush3.xpose.msra.mxu0 %v15882_v53  ;;  %33675 = vmatprep.mubr.msk.f32.mxu0 %vm36944_vm2, %v39469_v23 }
0x2486   : > { %33678 = vmatprep.subr.mxu0 %v39469_v23  ;;  %v17782_v46 = vsub.f32 %v17711_v58, %v17781_v14 }
0x2488   : > { %v17783_v0 = vand.u32 4294901760, %v17782_v46 }
0x2489   : > { %33731 = vmatmul.mubr.f32.vlgmr.msra.gmra.mrb[42].mxu1 %v16865_v36 }
0x248a   : > { %33734 = vmatpush3.xpose.msra.mxu1 %v16799_v20  ;;  %33735 = vmatprep.mubr.msk.f32.mxu1 %vm36944_vm2, %v39469_v23  ;;  %v17784_v29 = vsub.f32 %v17782_v46, %v17783_v0 }
0x248b   : > { %33738 = vmatprep.subr.mxu1 %v39469_v23 }
0x248c   : > { %33676 = vmatmul.mubr.f32.vlgmr.msra.gmra.mrb[90].mxu0 %v15949_v59  ;;  %v17716_v59 = vand.u32 4294901760, %v17713_v32  ;;  %v17785_v36 = vand.u32 4294901760, %v17784_v29 }
0x248d   : > { %33679 = vmatpush3.xpose.msra.mxu0 %v15960_v16  ;;  %33680 = vmatprep.mubr.msk.f32.mxu0 %vm36944_vm2, %v39469_v23 }
0x248e   : > { %33683 = vmatprep.subr.mxu0 %v39469_v23  ;;  %v17793_v13 = vsub.f32 %v17713_v32, %v17716_v59 }
0x2490   : > { %v17794_v2 = vand.u32 4294901760, %v17793_v13 }
0x2491   : > { %33736 = vmatmul.mubr.f32.vlgmr.msra.gmra.mrb[42].mxu1 %v16866_v7 }
0x2492   : > { %33739 = vmatpush3.xpose.msra.mxu1 %v16877_v19  ;;  %33740 = vmatprep.mubr.msk.f32.mxu1 %vm36944_vm2, %v39469_v23 }
0x2493   : > { %33743 = vmatprep.subr.mxu1 %v39469_v23 }
0x2494   : > { %33681 = vmatmul.mubr.f32.vlgmr.msra.gmra.mrb[90].mxu0 %v38372_v35 }
0x2495   : > { %33684 = vmatpush3.xpose.msra.mxu0 %v15882_v53  ;;  %33685 = vmatprep.mubr.msk.f32.mxu0 %vm36944_vm2, %v39469_v23  ;;  %v17795_v53 = vsub.f32 %v17793_v13, %v17794_v2 }
0x2496   : > { %33688 = vmatprep.subr.mxu0 %v39469_v23 }
0x2497   : > { %v17796_v43 = vand.u32 4294901760, %v17795_v53 }
0x2499   : > { %33741 = vmatmul.mubr.f32.vlgmr.msra.gmra.mrb[42].mxu1 %v38377_v44 }
0x249a   : > { %33744 = vmatpush3.xpose.msra.mxu1 %v16799_v20  ;;  %33745 = vmatprep.mubr.msk.f32.mxu1 %vm36944_vm2, %v39469_v23 }
0x249b   : > { %33778 = vmatprep.subr.mxu1 %v39469_v23 }
0x249c   : > { %33686 = vmatmul.mubr.f32.vlgmr.msra.gmra.mrb[90].mxu0 %v38372_v35  ;;  %v18625_v35 = vpop.permute.xlu1 %18624 }
0x249d   : > { %33690 = vmatprep.mubr.msk.f32.mxu0 %vm36944_vm2, %v39469_v23  ;;  %v18628_v11 = vsel %vm4440_vm4, %v18625_v35, 0 }
0x249e   : > { %v18698_v12 = vand.u32 4294901760, %v18628_v11 }
0x24a0   : > { %v18699_v16 = vsub.f32 %v18628_v11, %v18698_v12 }
0x24a1   : > { %33746 = vmatmul.mubr.f32.vlgmr.msra.gmra.mrb[42].mxu1 %v38377_v44  ;;  %v18627_v44 = vpop.permute.xlu0 %18626 }
0x24a2   : > { %33779 = vmatpush3.xpose.msra.mxu1 %v17716_v59  ;;  %33780 = vmatprep.mubr.msk.f32.mxu1 %vm36944_vm2, %v39469_v23  ;;  %v18630_v1 = vsel %vm4440_vm4, %v18627_v44, 0  ;;  %v18700_v42 = vand.u32 4294901760, %v18699_v16 }
0x24a3   : > { %33783 = vmatprep.subr.mxu1 %v39469_v23  ;;  %v18633_v7 = vand.u32 4294901760, %v18630_v1 }
0x24a4   : > { %v18701_v22 = vsub.f32 %v18699_v16, %v18700_v42 }
0x24a5   : > { %33781 = vmatmul.mubr.f32.vlgmr.msra.gmra.mrb[44].mxu1 %v17785_v36  ;;  %v18710_v20 = vsub.f32 %v18630_v1, %v18633_v7 }
0x24a6   : > { %33784 = vmatpush3.xpose.msra.mxu1 %v17796_v43  ;;  %33785 = vmatprep.mubr.msk.f32.mxu1 %vm36944_vm2, %v39469_v23  ;;  %v18702_v25 = vand.u32 4294901760, %v18701_v22 }
0x24a7   : > { %33788 = vmatprep.subr.mxu1 %v39469_v23  ;;  %v18711_v60 = vand.u32 4294901760, %v18710_v20 }
0x24a9   : > { %v18712_v63 = vsub.f32 %v18710_v20, %v18711_v60 }
0x24ab   : > { %v18713_v19 = vand.u32 4294901760, %v18712_v63 }
0x24ad   : > { %33786 = vmatmul.mubr.f32.vlgmr.msra.gmra.mrb[44].mxu1 %v17781_v14 }
0x24ae   : > { %33789 = vmatpush3.xpose.msra.mxu1 %v17793_v13  ;;  %33790 = vmatprep.mubr.msk.f32.mxu1 %vm36944_vm2, %v39469_v23 }
0x24af   : > { %33793 = vmatprep.subr.mxu1 %v39469_v23 }
0x24b5   : > { %33791 = vmatmul.mubr.f32.vlgmr.msra.gmra.mrb[44].mxu1 %v17782_v46 }
0x24b6   : > { %33794 = vmatpush3.xpose.msra.mxu1 %v17716_v59  ;;  %33795 = vmatprep.mubr.msk.f32.mxu1 %vm36944_vm2, %v39469_v23 }
0x24b7   : > { %33798 = vmatprep.subr.mxu1 %v39469_v23 }
0x24bd   : > { %33796 = vmatmul.mubr.f32.vlgmr.msra.gmra.mrb[44].mxu1 %v17783_v0 }
0x24be   : > { %33799 = vmatpush3.xpose.msra.mxu1 %v17794_v2  ;;  %33800 = vmatprep.mubr.msk.f32.mxu1 %vm36944_vm2, %v39469_v23 }
0x24bf   : > { %33803 = vmatprep.subr.mxu1 %v39469_v23 }
0x24c5   : > { %33801 = vmatmul.mubr.f32.vlgmr.msra.gmra.mrb[44].mxu1 %v17781_v14 }
0x24c6   : > { %33804 = vmatpush3.xpose.msra.mxu1 %v17716_v59  ;;  %33805 = vmatprep.mubr.msk.f32.mxu1 %vm36944_vm2, %v39469_v23 }
0x24c7   : > { %33838 = vmatprep.subr.mxu1 %v39469_v23 }
0x24cd   : > { %33806 = vmatmul.mubr.f32.vlgmr.msra.gmra.mrb[44].mxu1 %v17781_v14 }
0x24ce   : > { %33839 = vmatpush3.xpose.msra.mxu1 %v18633_v7  ;;  %33840 = vmatprep.mubr.msk.f32.mxu1 %vm36944_vm2, %v39469_v23 }
0x24cf   : > { %33843 = vmatprep.subr.mxu1 %v39469_v23 }
0x24d1   : > { %33841 = vmatmul.mubr.f32.vlgmr.msra.gmra.mrb[46].mxu1 %v18702_v25 }
0x24d2   : > { %33844 = vmatpush3.xpose.msra.mxu1 %v18713_v19  ;;  %33845 = vmatprep.mubr.msk.f32.mxu1 %vm36944_vm2, %v39469_v23 }
0x24d3   : > { %33848 = vmatprep.subr.mxu1 %v39469_v23 }
0x24d9   : > { %33846 = vmatmul.mubr.f32.vlgmr.msra.gmra.mrb[46].mxu1 %v18698_v12 }
0x24da   : > { %33849 = vmatpush3.xpose.msra.mxu1 %v18710_v20  ;;  %33850 = vmatprep.mubr.msk.f32.mxu1 %vm36944_vm2, %v39469_v23 }
0x24db   : > { %33853 = vmatprep.subr.mxu1 %v39469_v23 }
0x24e1   : > { %33851 = vmatmul.mubr.f32.vlgmr.msra.gmra.mrb[46].mxu1 %v18699_v16 }
0x24e2   : > { %33854 = vmatpush3.xpose.msra.mxu1 %v18633_v7  ;;  %33855 = vmatprep.mubr.msk.f32.mxu1 %vm36944_vm2, %v39469_v23 }
0x24e3   : > { %33858 = vmatprep.subr.mxu1 %v39469_v23 }
0x24e9   : > { %33856 = vmatmul.mubr.f32.vlgmr.msra.gmra.mrb[46].mxu1 %v18700_v42 }
0x24ea   : > { %33859 = vmatpush3.xpose.msra.mxu1 %v18711_v60  ;;  %33860 = vmatprep.mubr.msk.f32.mxu1 %vm36944_vm2, %v39469_v23 }
0x24eb   : > { %33863 = vmatprep.subr.mxu1 %v39469_v23 }
0x24f1   : > { %33861 = vmatmul.mubr.f32.vlgmr.msra.gmra.mrb[46].mxu1 %v18698_v12 }
0x24f2   : > { %33864 = vmatpush3.xpose.msra.mxu1 %v18633_v7  ;;  %33865 = vmatprep.mubr.msk.f32.mxu1 %vm36944_vm2, %v39469_v23 }
0x24f3   : > { %35620 = vmatprep.subr.bf16.mxu1 %v39470_v48 }
0x24f9   : > { %33866 = vmatmul.mubr.f32.vlgmr.msra.gmra.mrb[46].mxu1 %v18698_v12 }
0x24fa   : > { %35622 = vmatpush3.bf16.msra.mxu1 %v37701_v31  ;;  %33906 = vmatprep.mubr.msk.f32.mxu1 %vm36944_vm2, %v39469_v23 }
0x24fb   : > { %35623 = vmatprep.subr.bf16.mxu1 %v39470_v48 }
0x24fe   : > { %35625 = vmatpush3.bf16.msra.mxu1 %v37705_v33 }
0x24ff   : > { %35632 = vmatprep.subr.bf16.mxu1 %v39470_v48 }
0x256f   : > { %v16323_v30 = vpop.f32.mrb[90].mxu0 }
0x2570   : > { %v33687_v55 = vpop.f32.mrb[91].mxu0  ;;  %v16327_v45 = vsel %vm4440_vm4, %v16323_v30, -inf }
0x2571   : > { %16328 = vmax.xlane.f32.xlu1 %v16327_v45 }
0x2574   : > { %v17240_v56 = vpop.f32.mrb[42].mxu1 }
0x2575   : > { %v33747_v58 = vpop.f32.mrb[43].mxu1  ;;  %v17244_v32 = vsel %vm4440_vm4, %v17240_v56, -inf }
0x2576   : > { %17245 = vmax.xlane.f32.xlu0 %v17244_v32 }
0x2582   : > { %16338 = vrot.lane.b32.xlu1 %v38354_v57, %s36953_s7 }
0x25a0   : > { %v18157_v14 = vpop.f32.mrb[44].mxu1 }
0x25a1   : > { %v33807_v59 = vpop.f32.mrb[45].mxu1  ;;  %v18161_v12 = vsel %vm4440_vm4, %v18157_v14, -inf }
0x25cc   : > { %v19074_v46 = vpop.f32.mrb[46].mxu1 }
0x25cd   : > { %v33867_v13 = vpop.f32.mrb[47].mxu1  ;;  %v19078_v20 = vsel %vm4440_vm4, %v19074_v46, -inf }
0x25fe   : > { %v16329_v0 = vpop.xlane.xlu1 %16328 }
0x25ff   : > { %v16330_v2 = vsub.f32 %v16323_v30, %v16329_v0 }
0x2601   : > { %v16331_v29 = vmul.f32 1.442695, %v16330_v2 }
0x2602   : > { %v16339_v53 = vpop.permute.xlu1 %16338 }
0x2603   : > { %36775 = vpow2.f32 %v16331_v29  ;;  %v38471_v36 = vand.u32 4294901760, %v16339_v53  ;;  %v17246_v43 = vpop.xlane.xlu0 %17245 }
0x2604   : > { %v17247_v35 = vsub.f32 %v17240_v56, %v17246_v43 }
0x2605   : > { %33689 = vmatpush3.msra.mxu0 %v38471_v36  ;;  %v16422_v30 = vsub.f32 %v16339_v53, %v38471_v36 }
0x2606   : > { %v17248_v44 = vmul.f32 1.442695, %v17247_v35  ;;  %33693 = vmatprep.subr.mxu0 %v39469_v23 }
0x2607   : > { %v16423_v13 = vand.u32 4294901760, %v16422_v30 }
0x2608   : > { %36777 = vpow2.f32 %v17248_v44 }
0x260d   : > { %v36776_v11 = vpop.eup %36775 }
0x260e   : > { %v16333_v1 = vsel %vm4440_vm4, %v36776_v11, 0.0 }
0x260f   : > { %16334 = vadd.xlane.f32.xlu0 %v16333_v1 }
0x2612   : > { %v36778_v7 = vpop.eup %36777 }
0x2613   : > { %18162 = vmax.xlane.f32.xlu0 %v18161_v12  ;;  %v17250_v16 = vsel %vm4440_vm4, %v36778_v7, 0.0 }
0x2617   : > { %17251 = vadd.xlane.f32.xlu0 %v17250_v16 }
0x261b   : > { %19079 = vmax.xlane.f32.xlu0 %v19078_v20 }
0x2631   : > { %17255 = vrot.lane.b32.xlu0 %v38354_v57, %s36954_s8 }
0x2635   : > { %18172 = vrot.lane.b32.xlu0 %v38354_v57, %s36955_s9 }
0x269c   : > { %v16335_v42 = vpop.xlane.xlu0 %16334 }
0x269d   : > { %36779 = vrcp.f32 %v16335_v42 }
0x26a0   : > { %v18163_v60 = vpop.xlane.xlu0 %18162 }
0x26a1   : > { %v18164_v22 = vsub.f32 %v18157_v14, %v18163_v60  ;;  %v16424_v14 = vsub.f32 %v16422_v30, %v16423_v13 }
0x26a3   : > { %v18165_v63 = vmul.f32 1.442695, %v18164_v22  ;;  %v16425_v44 = vand.u32 4294901760, %v16424_v14 }
0x26a4   : > { %v17252_v25 = vpop.xlane.xlu0 %17251 }
0x26a5   : > { %36781 = vpow2.f32 %v18165_v63 }
0x26a7   : > { %v36780_v19 = vpop.eup %36779 }
0x26a8   : > { %v16337_v55 = vmul.f32 %v36780_v19, %v36776_v11  ;;  %v19080_v45 = vpop.xlane.xlu0 %19079 }
0x26a9   : > { %v19081_v56 = vsub.f32 %v19074_v46, %v19080_v45 }
0x26aa   : > { %v16342_v58 = vsel %vm4440_vm4, %v16337_v55, 0 }
0x26ab   : > { %v19082_v32 = vmul.f32 1.442695, %v19081_v56  ;;  %v16410_v59 = vand.u32 4294901760, %v16342_v58 }
0x26ac   : > { %v17256_v20 = vpop.permute.xlu0 %17255 }
0x26ad   : > { %36783 = vpow2.f32 %v19082_v32  ;;  %v16411_v0 = vsub.f32 %v16342_v58, %v16410_v59  ;;  %v17262_v42 = vand.u32 4294901760, %v17256_v20 }
0x26ae   : > { %36785 = vrcp.f32 %v17252_v25 }
0x26af   : > { %v38485_v2 = vpop.eup %36781  ;;  %v16412_v29 = vand.u32 4294901760, %v16411_v0  ;;  %v17339_v22 = vsub.f32 %v17256_v20, %v17262_v42 }
0x26b0   : > { %v18167_v43 = vsel %vm4440_vm4, %v38485_v2, 0.0 }
0x26b1   : > { %18168 = vadd.xlane.f32.xlu1 %v18167_v43  ;;  %v16413_v35 = vsub.f32 %v16411_v0, %v16412_v29  ;;  %v17340_v63 = vand.u32 4294901760, %v17339_v22 }
0x26b3   : > { %v16414_v53 = vand.u32 4294901760, %v16413_v35  ;;  %v17341_v19 = vsub.f32 %v17339_v22, %v17340_v63 }
0x26b5   : > { %33691 = vmatmul.mubr.f32.vlgmr.msra.gmra.mrb[92].mxu0 %v16414_v53  ;;  %v17342_v55 = vand.u32 4294901760, %v17341_v19 }
0x26b6   : > { %33694 = vmatpush3.msra.mxu0 %v16425_v44  ;;  %33695 = vmatprep.mubr.msk.f32.mxu0 %vm36944_vm2, %v39469_v23 }
0x26b7   : > { %v38491_v46 = vpop.eup %36783  ;;  %33698 = vmatprep.subr.mxu0 %v39469_v23 }
0x26b8   : > { %v19084_v11 = vsel %vm4440_vm4, %v38491_v46, 0.0  ;;  %v36786_v1 = vpop.eup %36785 }
0x26b9   : > { %19085 = vadd.xlane.f32.xlu0 %v19084_v11  ;;  %v17254_v12 = vmul.f32 %v36786_v1, %v36778_v7 }
0x26bb   : > { %v17259_v16 = vsel %vm4440_vm4, %v17254_v12, 0 }
0x26bd   : > { %33696 = vmatmul.mubr.f32.vlgmr.msra.gmra.mrb[92].mxu0 %v16410_v59 }
0x26be   : > { %33699 = vmatpush3.msra.mxu0 %v16422_v30  ;;  %33700 = vmatprep.mubr.msk.f32.mxu0 %vm36944_vm2, %v39469_v23 }
0x26bf   : > { %33703 = vmatprep.subr.mxu0 %v39469_v23 }
0x26c2   : > { %19089 = vrot.lane.b32.xlu1 %v38354_v57, %s36956_s10  ;;  %v17327_v57 = vand.u32 4294901760, %v17259_v16 }
0x26c4   : > { %v17328_v60 = vsub.f32 %v17259_v16, %v17327_v57 }
0x26c5   : > { %33701 = vmatmul.mubr.f32.vlgmr.msra.gmra.mrb[92].mxu0 %v16411_v0 }
0x26c6   : > { %33704 = vmatpush3.msra.mxu0 %v38471_v36  ;;  %33705 = vmatprep.mubr.msk.f32.mxu0 %vm36944_vm2, %v39469_v23  ;;  %v17329_v7 = vand.u32 4294901760, %v17328_v60 }
0x26c7   : > { %33708 = vmatprep.subr.mxu0 %v39469_v23 }
0x26c8   : > { %v17330_v25 = vsub.f32 %v17328_v60, %v17329_v7 }
0x26ca   : > { %v17331_v30 = vand.u32 4294901760, %v17330_v25 }
0x26cd   : > { %33706 = vmatmul.mubr.f32.vlgmr.msra.gmra.mrb[92].mxu0 %v16412_v29 }
0x26ce   : > { %33709 = vmatpush3.msra.mxu0 %v16423_v13  ;;  %33710 = vmatprep.mubr.msk.f32.mxu0 %vm36944_vm2, %v39469_v23 }
0x26cf   : > { %33713 = vmatprep.subr.mxu0 %v39469_v23 }
0x26d5   : > { %33711 = vmatmul.mubr.f32.vlgmr.msra.gmra.mrb[92].mxu0 %v16410_v59 }
0x26d6   : > { %33714 = vmatpush3.msra.mxu0 %v38471_v36  ;;  %33715 = vmatprep.mubr.msk.f32.mxu0 %vm36944_vm2, %v39469_v23  ;;  %v18173_v36 = vpop.permute.xlu0 %18172 }
0x26d7   : > { %33748 = vmatprep.subr.mxu0 %v39469_v23  ;;  %v18179_v45 = vand.u32 4294901760, %v18173_v36 }
0x26d9   : > { %v18256_v32 = vsub.f32 %v18173_v36, %v18179_v45 }
0x26db   : > { %v18257_v29 = vand.u32 4294901760, %v18256_v32 }
0x26dd   : > { %33716 = vmatmul.mubr.f32.vlgmr.msra.gmra.mrb[92].mxu0 %v16410_v59  ;;  %v18258_v35 = vsub.f32 %v18256_v32, %v18257_v29 }
0x26de   : > { %33749 = vmatpush3.msra.mxu0 %v17262_v42  ;;  %33750 = vmatprep.mubr.msk.f32.mxu0 %vm36944_vm2, %v39469_v23 }
0x26df   : > { %33753 = vmatprep.subr.mxu0 %v39469_v23  ;;  %v18259_v11 = vand.u32 4294901760, %v18258_v35 }
0x26e1   : > { %33751 = vmatmul.mubr.f32.vlgmr.msra.gmra.mrb[94].mxu0 %v17331_v30 }
0x26e2   : > { %33754 = vmatpush3.msra.mxu0 %v17342_v55  ;;  %33755 = vmatprep.mubr.msk.f32.mxu0 %vm36944_vm2, %v39469_v23 }
0x26e3   : > { %33758 = vmatprep.subr.mxu0 %v39469_v23 }
0x26e9   : > { %33756 = vmatmul.mubr.f32.vlgmr.msra.gmra.mrb[94].mxu0 %v17327_v57 }
0x26ea   : > { %33759 = vmatpush3.msra.mxu0 %v17339_v22  ;;  %33760 = vmatprep.mubr.msk.f32.mxu0 %vm36944_vm2, %v39469_v23 }
0x26eb   : > { %33763 = vmatprep.subr.mxu0 %v39469_v23 }
0x26f1   : > { %33761 = vmatmul.mubr.f32.vlgmr.msra.gmra.mrb[94].mxu0 %v17328_v60 }
0x26f2   : > { %33764 = vmatpush3.msra.mxu0 %v17262_v42  ;;  %33765 = vmatprep.mubr.msk.f32.mxu0 %vm36944_vm2, %v39469_v23 }
0x26f3   : > { %33768 = vmatprep.subr.mxu0 %v39469_v23 }
0x26f9   : > { %33766 = vmatmul.mubr.f32.vlgmr.msra.gmra.mrb[94].mxu0 %v17329_v7 }
0x26fa   : > { %33769 = vmatpush3.msra.mxu0 %v17340_v63  ;;  %33770 = vmatprep.mubr.msk.f32.mxu0 %vm36944_vm2, %v39469_v23 }
0x26fb   : > { %33773 = vmatprep.subr.mxu0 %v39469_v23 }
0x2701   : > { %33771 = vmatmul.mubr.f32.vlgmr.msra.gmra.mrb[94].mxu0 %v17327_v57 }
0x2702   : > { %33774 = vmatpush3.msra.mxu0 %v17262_v42  ;;  %33775 = vmatprep.mubr.msk.f32.mxu0 %vm36944_vm2, %v39469_v23 }
0x2703   : > { %33808 = vmatprep.subr.mxu0 %v39469_v23 }
0x2709   : > { %33776 = vmatmul.mubr.f32.vlgmr.msra.gmra.mrb[94].mxu0 %v17327_v57 }
0x270a   : > { %33809 = vmatpush3.msra.mxu0 %v18179_v45  ;;  %33810 = vmatprep.mubr.msk.f32.mxu0 %vm36944_vm2, %v39469_v23 }
0x270b   : > { %33813 = vmatprep.subr.mxu0 %v39469_v23 }
0x273e   : > { %v18169_v56 = vpop.xlane.xlu1 %18168 }
0x273f   : > { %36787 = vrcp.f32 %v18169_v56 }
0x2742   : > { %v19090_v20 = vpop.permute.xlu1 %19089 }
0x2743   : > { %v19096_v42 = vand.u32 4294901760, %v19090_v20 }
0x2745   : > { %v19173_v22 = vsub.f32 %v19090_v20, %v19096_v42 }
0x2746   : > { %v19086_v1 = vpop.xlane.xlu0 %19085 }
0x2747   : > { %36789 = vrcp.f32 %v19086_v1  ;;  %v19174_v7 = vand.u32 4294901760, %v19173_v22 }
0x2749   : > { %v36788_v58 = vpop.eup %36787  ;;  %v19175_v25 = vsub.f32 %v19173_v22, %v19174_v7 }
0x274a   : > { %v18171_v59 = vmul.f32 %v36788_v58, %v38485_v2 }
0x274b   : > { %v19176_v30 = vand.u32 4294901760, %v19175_v25 }
0x274c   : > { %v18176_v13 = vsel %vm4440_vm4, %v18171_v59, 0 }
0x274d   : > { %v18244_v0 = vand.u32 4294901760, %v18176_v13 }
0x274f   : > { %v18245_v14 = vsub.f32 %v18176_v13, %v18244_v0 }
0x2751   : > { %v18246_v43 = vand.u32 4294901760, %v18245_v14  ;;  %v36790_v2 = vpop.eup %36789 }
0x2752   : > { %v19088_v12 = vmul.f32 %v36790_v2, %v38491_v46 }
0x2753   : > { %v18247_v53 = vsub.f32 %v18245_v14, %v18246_v43 }
0x2754   : > { %v19093_v16 = vsel %vm4440_vm4, %v19088_v12, 0 }
0x2755   : > { %v18248_v44 = vand.u32 4294901760, %v18247_v53  ;;  %v19161_v57 = vand.u32 4294901760, %v19093_v16 }
0x2757   : > { %33811 = vmatmul.mubr.f32.vlgmr.msra.gmra.mrb[96].mxu0 %v18248_v44  ;;  %v19162_v60 = vsub.f32 %v19093_v16, %v19161_v57 }
0x2758   : > { %33814 = vmatpush3.msra.mxu0 %v18259_v11  ;;  %33815 = vmatprep.mubr.msk.f32.mxu0 %vm36944_vm2, %v39469_v23 }
0x2759   : > { %33818 = vmatprep.subr.mxu0 %v39469_v23  ;;  %v19163_v46 = vand.u32 4294901760, %v19162_v60 }
0x275b   : > { %v19164_v63 = vsub.f32 %v19162_v60, %v19163_v46 }
0x275d   : > { %v19165_v19 = vand.u32 4294901760, %v19164_v63 }
0x275f   : > { %33816 = vmatmul.mubr.f32.vlgmr.msra.gmra.mrb[96].mxu0 %v18244_v0 }
0x2760   : > { %33819 = vmatpush3.msra.mxu0 %v18256_v32  ;;  %33820 = vmatprep.mubr.msk.f32.mxu0 %vm36944_vm2, %v39469_v23 }
0x2761   : > { %33823 = vmatprep.subr.mxu0 %v39469_v23 }
0x2767   : > { %33821 = vmatmul.mubr.f32.vlgmr.msra.gmra.mrb[96].mxu0 %v18245_v14 }
0x2768   : > { %33824 = vmatpush3.msra.mxu0 %v18179_v45  ;;  %33825 = vmatprep.mubr.msk.f32.mxu0 %vm36944_vm2, %v39469_v23 }
0x2769   : > { %33828 = vmatprep.subr.mxu0 %v39469_v23 }
0x276f   : > { %33826 = vmatmul.mubr.f32.vlgmr.msra.gmra.mrb[96].mxu0 %v18246_v43 }
0x2770   : > { %33829 = vmatpush3.msra.mxu0 %v18257_v29  ;;  %33830 = vmatprep.mubr.msk.f32.mxu0 %vm36944_vm2, %v39469_v23 }
0x2771   : > { %33833 = vmatprep.subr.mxu0 %v39469_v23 }
0x2777   : > { %33831 = vmatmul.mubr.f32.vlgmr.msra.gmra.mrb[96].mxu0 %v18244_v0 }
0x2778   : > { %33834 = vmatpush3.msra.mxu0 %v18179_v45  ;;  %33835 = vmatprep.mubr.msk.f32.mxu0 %vm36944_vm2, %v39469_v23 }
0x2779   : > { %33868 = vmatprep.subr.mxu0 %v39469_v23 }
0x277f   : > { %33836 = vmatmul.mubr.f32.vlgmr.msra.gmra.mrb[96].mxu0 %v18244_v0 }
0x2780   : > { %33869 = vmatpush3.msra.mxu0 %v19096_v42  ;;  %33870 = vmatprep.mubr.msk.f32.mxu0 %vm36944_vm2, %v39469_v23 }
0x2781   : > { %33873 = vmatprep.subr.mxu0 %v39469_v23 }
0x2783   : > { %33871 = vmatmul.mubr.f32.vlgmr.msra.gmra.mrb[98].mxu0 %v19165_v19 }
0x2784   : > { %33874 = vmatpush3.msra.mxu0 %v19176_v30  ;;  %33875 = vmatprep.mubr.msk.f32.mxu0 %vm36944_vm2, %v39469_v23 }
0x2785   : > { %33878 = vmatprep.subr.mxu0 %v39469_v23 }
0x278b   : > { %33876 = vmatmul.mubr.f32.vlgmr.msra.gmra.mrb[98].mxu0 %v19161_v57 }
0x278c   : > { %33879 = vmatpush3.msra.mxu0 %v19173_v22  ;;  %33880 = vmatprep.mubr.msk.f32.mxu0 %vm36944_vm2, %v39469_v23 }
0x278d   : > { %33883 = vmatprep.subr.mxu0 %v39469_v23 }
0x2793   : > { %33881 = vmatmul.mubr.f32.vlgmr.msra.gmra.mrb[98].mxu0 %v19162_v60 }
0x2794   : > { %33884 = vmatpush3.msra.mxu0 %v19096_v42  ;;  %33885 = vmatprep.mubr.msk.f32.mxu0 %vm36944_vm2, %v39469_v23 }
0x2795   : > { %33888 = vmatprep.subr.mxu0 %v39469_v23 }
0x279b   : > { %33886 = vmatmul.mubr.f32.vlgmr.msra.gmra.mrb[98].mxu0 %v19163_v46 }
0x279c   : > { %33889 = vmatpush3.msra.mxu0 %v19174_v7  ;;  %33890 = vmatprep.mubr.msk.f32.mxu0 %vm36944_vm2, %v39469_v23 }
0x279d   : > { %33893 = vmatprep.subr.mxu0 %v39469_v23 }
0x27a3   : > { %33891 = vmatmul.mubr.f32.vlgmr.msra.gmra.mrb[98].mxu0 %v19161_v57 }
0x27a4   : > { %33894 = vmatpush3.msra.mxu0 %v19096_v42  ;;  %33895 = vmatprep.mubr.msk.f32.mxu0 %vm36944_vm2, %v39469_v23 }
0x27a5   : > { %35626 = vmatprep.subr.bf16.mxu0 %v39470_v48 }
0x27ab   : > { %33896 = vmatmul.mubr.f32.vlgmr.msra.gmra.mrb[98].mxu0 %v19161_v57 }
0x27ac   : > { %35628 = vmatpush3.bf16.msra.mxu0 %v37692_v49  ;;  %33917 = vmatprep.mubr.msk.f32.mxu0 %vm36944_vm2, %v39469_v23 }
0x27ad   : > { %35629 = vmatprep.subr.bf16.mxu0 %v39470_v48 }
0x27b0   : > { %v16786_v55 = vpop.f32.mrb[92].mxu0  ;;  %35631 = vmatpush3.bf16.msra.mxu0 %v37697_v24 }
0x27b1   : > { %v33717_v36 = vpop.f32.mrb[93].mxu0  ;;  %35638 = vmatprep.subr.bf16.mxu0 %v39470_v48 }
0x27dc   : > { %v17703_v45 = vpop.f32.mrb[94].mxu0 }
0x27dd   : > { %19542 = vrot.lane.b32.xlu0 %v17703_v45, %s36957_s11  ;;  %v33777_v56 = vpop.f32.mrb[95].mxu0 }
0x284f   : > { %v19543_v13 = vpop.permute.xlu0 %19542 }
0x2850   : > { %v19553_v29 = vsel %vm4440_vm4, %v16786_v55, %v19543_v13 }
0x2852   : > { %v18620_v58 = vpop.f32.mrb[96].mxu0 }
0x2853   : > { %19546 = vrot.lane.b32.xlu1 %v18620_v58, %s36958_s17  ;;  %v33837_v32 = vpop.f32.mrb[97].mxu0 }
0x287e   : > { %v19537_v49 = vpop.f32.mrb[98].mxu0 }
0x287f   : > { %19550 = vrot.lane.b32.xlu1 %v19537_v49, %s36959_s20  ;;  %v33897_v59 = vpop.f32.mrb[99].mxu0 }
0x28c5   : > { %v19547_v0 = vpop.permute.xlu1 %19546 }
0x28c6   : > { %v19554_v24 = vsel %vm719_vm1, %v19553_v29, %v19547_v0 }
0x28f1   : > { %v19551_v14 = vpop.permute.xlu1 %19550 }
0x28f2   : > { %v19555_v43 = vsel %vm8119_vm5, %v19554_v24, %v19551_v14 }
0x28f3   : > { %v19557_v35 = vsel %vm207_vm0, %v19555_v43, 0 }
0x28f4   : > { %v19628_v53 = vand.u32 4294901760, %v19557_v35 }
0x28f6   : > { %v19629_v44 = vsub.f32 %v19557_v35, %v19628_v53  ;;  %33918 = vmatmul.mubr.f32.vlgmr.msra.gmra.mrb[100].mxu0 %v19628_v53 }
0x28f7   : > { %35640 = vmatpush3.bf16.msra.mxu0 %v37701_v31  ;;  %33939 = vmatprep.mubr.msk.f32.mxu0 %vm36944_vm2, %v39469_v23 }
0x28f8   : > { %35641 = vmatprep.subr.bf16.mxu0 %v39470_v48  ;;  %v19630_v11 = vand.u32 4294901760, %v19629_v44 }
0x28fa   : > { %v19631_v1 = vsub.f32 %v19629_v44, %v19630_v11 }
0x28fb   : > { %35643 = vmatpush3.bf16.msra.mxu0 %v37705_v33 }
0x28fc   : > { %35650 = vmatprep.subr.bf16.mxu0 %v39470_v48  ;;  %v19632_v2 = vand.u32 4294901760, %v19631_v1 }
0x28fe   : > { %33940 = vmatmul.mubr.f32.vlgmr.msra.gmra.mrb[102].mxu0 %v19630_v11  ;;  %33907 = vmatmul.mubr.f32.vlgmr.msra.gmra.mrb[48].mxu1 %v19632_v2 }
0x28ff   : > { %35634 = vmatpush3.bf16.msra.mxu1 %v37709_v34  ;;  %35652 = vmatpush3.bf16.msra.mxu0 %v37701_v31 }
0x2900   : > { %35635 = vmatprep.subr.bf16.mxu1 %v39470_v48  ;;  %35653 = vmatprep.subr.bf16.mxu0 %v39470_v48 }
0x2901   : > { %33928 = vmatprep.mubr.msk.f32.mxu1 %vm36944_vm2, %v39469_v23  ;;  %33961 = vmatprep.mubr.msk.f32.mxu0 %vm36944_vm2, %v39469_v23 }
0x2903   : > { %35637 = vmatpush3.bf16.msra.mxu1 %v37712_v38  ;;  %35655 = vmatpush3.bf16.msra.mxu0 %v37705_v33 }
0x2904   : > { %35644 = vmatprep.subr.bf16.mxu1 %v39470_v48  ;;  %35692 = vmatprep.subr.bf16.mxu0 %v39470_v48 }
0x2906   : > { %33929 = vmatmul.mubr.f32.vlgmr.msra.gmra.mrb[50].mxu1 %v19629_v44  ;;  %33962 = vmatmul.mubr.f32.vlgmr.msra.gmra.mrb[104].mxu0 %v19628_v53 }
0x2907   : > { %35646 = vmatpush3.bf16.msra.mxu1 %v37714_v39  ;;  %33950 = vmatprep.mubr.msk.f32.mxu1 %vm36944_vm2, %v39469_v23  ;;  %v36837_v39 = vld [vmem:[#allocation2 + $0x108] ss:$0 sm:$0xff] }
0x2908   : > { %35647 = vmatprep.subr.bf16.mxu1 %v39470_v48  ;;  %35694 = vmatpush3.bf16.msra.mxu0 %v37810_v27 }
0x2909   : > { %35695 = vmatprep.subr.bf16.mxu0 %v39470_v48  ;;  %34038 = vmatprep.mubr.msk.f32.mxu0 %vm36944_vm2, %v39469_v23 }
0x290b   : > { %35649 = vmatpush3.bf16.msra.mxu1 %v37716_v40 }
0x290c   : > { %35656 = vmatprep.subr.bf16.mxu1 %v39470_v48  ;;  %35697 = vmatpush3.bf16.msra.mxu0 %v37814_v52 }
0x290d   : > { %35698 = vmatprep.subr.bf16.mxu0 %v39470_v48 }
0x290e   : > { %33951 = vmatmul.mubr.f32.vlgmr.msra.gmra.mrb[52].mxu1 %v19628_v53 }
0x290f   : > { %35658 = vmatpush3.bf16.msra.mxu1 %v37757_v41  ;;  %33972 = vmatprep.mubr.msk.f32.mxu1 %vm36944_vm2, %v39469_v23 }
0x2910   : > { %35659 = vmatprep.subr.bf16.mxu1 %v39470_v48 }
0x2913   : > { %35661 = vmatpush3.bf16.msra.mxu1 %v37760_v47 }
0x2914   : > { %35662 = vmatprep.subr.bf16.mxu1 %v39470_v48 }
0x29c9   : > { %v19725_v31 = vpop.f32.mrb[100].mxu0 }
0x29ca   : > { %v33919_v33 = vpop.f32.mrb[101].mxu0 }
0x29d1   : > { %v19882_v34 = vpop.f32.mrb[102].mxu0  ;;  %v19634_v38 = vpop.f32.mrb[48].mxu1 }
0x29d2   : > { %v19635_v40 = vadd.f32 %v36837_v39, %v19634_v38  ;;  %v33941_v12 = vpop.f32.mrb[103].mxu0  ;;  %v33908_v16 = vpop.f32.mrb[49].mxu1 }
0x29d4   : > { %v19726_v20 = vadd.f32 %v19725_v31, %v19635_v40 }
0x29d9   : > { %v19805_v57 = vpop.f32.mrb[50].mxu1  ;;  %v20040_v42 = vpop.f32.mrb[104].mxu0 }
0x29da   : > { %v19806_v60 = vadd.f32 %v19805_v57, %v19726_v20  ;;  %v33930_v22 = vpop.f32.mrb[51].mxu1  ;;  %v33963_v46 = vpop.f32.mrb[105].mxu0 }
0x29dc   : > { %v19883_v7 = vadd.f32 %v19882_v34, %v19806_v60 }
0x29e1   : > { %v19965_v63 = vpop.f32.mrb[52].mxu1 }
0x29e2   : > { %v19966_v25 = vadd.f32 %v19965_v63, %v19883_v7  ;;  %v33952_v19 = vpop.f32.mrb[53].mxu1 }
0x29e4   : > { %v20041_v30 = vadd.f32 %v20040_v42, %v19966_v25 }
0x29e6   : > { %v38621_v55 = vadd.f32 %v20041_v30, %v38315_v5 }
0x29e8   : > { %v20045_v36 = vsel %vm207_vm0, %v38621_v55, 0.0 }
0x29e9   : > { %20046 = vadd.xlane.f32.xlu1 %v20045_v36 }
0x2a76   : > { %v20047_v45 = vpop.xlane.xlu1 %20046 }
0x2a77   : > { %v20048_v56 = vmul.f32 0.03125, %v20047_v45 }
0x2a79   : > { %v20049_v58 = vsub.f32 %v38621_v55, %v20048_v56 }
0x2a7b   : > { %v20050_v32 = vmul.f32 %v20049_v58, %v20049_v58 }
0x2a7d   : > { %v20051_v49 = vsel %vm207_vm0, %v20050_v32, 0.0 }
0x2a7e   : > { %20052 = vadd.xlane.f32.xlu0 %v20051_v49  ;;  %v39487_v49 = vld [vmem:[#allocation8_spill] sm:$0xff] }
0x2b0b   : > { %v20053_v59 = vpop.xlane.xlu0 %20052 }
0x2b0c   : > { %v20054_v13 = vmul.f32 0.03125, %v20053_v59  ;;  %v39488_v59 = vld [vmem:[#allocation9_spill] sm:$0xff] }
0x2b0e   : > { %v20055_v0 = vadd.f32 1e-05, %v20054_v13 }
0x2b10   : > { %36791 = vrsqrt.f32 %v20055_v0 }
0x2b1a   : > { %v36792_v29 = vpop.eup %36791 }
0x2b1b   : > { %v20057_v24 = vmul.f32 %v36792_v29, %v20049_v58  ;;  %v36839_v29 = vld [vmem:[#allocation2 + $0x158] ss:$0 sm:$0xff] }
0x2b1d   : > { %v20059_v5 = vsel %vm207_vm0, %v20057_v24, 0 }
0x2b1e   : > { %v20130_v14 = vand.u32 4294901760, %v20059_v5 }
0x2b20   : > { %v20131_v43 = vsub.f32 %v20059_v5, %v20130_v14 }
0x2b22   : > { %v20132_v35 = vand.u32 4294901760, %v20131_v43 }
0x2b24   : > { %v20133_v53 = vsub.f32 %v20131_v43, %v20132_v35 }
0x2b26   : > { %v20134_v44 = vand.u32 4294901760, %v20133_v53 }
0x2b28   : > { %33973 = vmatmul.mubr.f32.vlgmr.msra.gmra.mrb[54].mxu1 %v20134_v44 }
0x2b29   : > { %35664 = vmatpush3.bf16.msra.mxu1 %v37765_v3  ;;  %33983 = vmatprep.mubr.msk.f32.mxu1 %vm36944_vm2, %v39469_v23  ;;  %v36838_v3 = vld [vmem:[#allocation2 + $0x130] ss:$0 sm:$0xff] }
0x2b2a   : > { %35665 = vmatprep.subr.bf16.mxu1 %v39470_v48 }
0x2b2d   : > { %35667 = vmatpush3.bf16.msra.mxu1 %v37767_v15 }
0x2b2e   : > { %35668 = vmatprep.subr.bf16.mxu1 %v39470_v48 }
0x2b30   : > { %33984 = vmatmul.mubr.f32.vlgmr.msra.gmra.mrb[54].mxu1 %v20130_v14 }
0x2b31   : > { %35670 = vmatpush3.bf16.msra.mxu1 %v37769_v9  ;;  %33994 = vmatprep.mubr.msk.f32.mxu1 %vm36944_vm2, %v39469_v23 }
0x2b32   : > { %35671 = vmatprep.subr.bf16.mxu1 %v39470_v48 }
0x2b35   : > { %35673 = vmatpush3.bf16.msra.mxu1 %v37771_v10 }
0x2b36   : > { %35674 = vmatprep.subr.bf16.mxu1 %v39470_v48 }
0x2b38   : > { %33995 = vmatmul.mubr.f32.vlgmr.msra.gmra.mrb[54].mxu1 %v20131_v43 }
0x2b39   : > { %35676 = vmatpush3.bf16.msra.mxu1 %v37757_v41  ;;  %34005 = vmatprep.mubr.msk.f32.mxu1 %vm36944_vm2, %v39469_v23 }
0x2b3a   : > { %35677 = vmatprep.subr.bf16.mxu1 %v39470_v48 }
0x2b3d   : > { %35679 = vmatpush3.bf16.msra.mxu1 %v37760_v47 }
0x2b3e   : > { %35680 = vmatprep.subr.bf16.mxu1 %v39470_v48 }
0x2b40   : > { %34006 = vmatmul.mubr.f32.vlgmr.msra.gmra.mrb[54].mxu1 %v20132_v35 }
0x2b41   : > { %35682 = vmatpush3.bf16.msra.mxu1 %v37773_v50  ;;  %34016 = vmatprep.mubr.msk.f32.mxu1 %vm36944_vm2, %v39469_v23 }
0x2b42   : > { %35683 = vmatprep.subr.bf16.mxu1 %v39470_v48 }
0x2b45   : > { %35685 = vmatpush3.bf16.msra.mxu1 %v37775_v51 }
0x2b46   : > { %35686 = vmatprep.subr.bf16.mxu1 %v39470_v48 }
0x2b48   : > { %34017 = vmatmul.mubr.f32.vlgmr.msra.gmra.mrb[54].mxu1 %v20130_v14 }
0x2b49   : > { %35688 = vmatpush3.bf16.msra.mxu1 %v37757_v41  ;;  %34027 = vmatprep.mubr.msk.f32.mxu1 %vm36944_vm2, %v39469_v23 }
0x2b4a   : > { %35689 = vmatprep.subr.bf16.mxu1 %v39470_v48 }
0x2b4d   : > { %35691 = vmatpush3.bf16.msra.mxu1 %v37760_v47 }
0x2b4e   : > { %35728 = vmatprep.subr.bf16.mxu1 %v39470_v48 }
0x2b50   : > { %34028 = vmatmul.mubr.f32.vlgmr.msra.gmra.mrb[54].mxu1 %v20130_v14 }
0x2b51   : > { %35730 = vmatpush3.bf16.msra.mxu1 %v37870_v17  ;;  %34104 = vmatprep.mubr.msk.f32.mxu1 %vm36944_vm2, %v39469_v23 }
0x2b52   : > { %35731 = vmatprep.subr.bf16.mxu1 %v39470_v48 }
0x2b55   : > { %35733 = vmatpush3.bf16.msra.mxu1 %v37873_v37 }
0x2b56   : > { %35734 = vmatprep.subr.bf16.mxu1 %v39470_v48 }
0x2c23   : > { %v20542_v41 = vpop.f32.mrb[54].mxu1 }
0x2c24   : > { %v36104_v15 = vadd.f32 %v36838_v3, %v20542_v41  ;;  %v34029_v9 = vpop.f32.mrb[55].mxu1 }
0x2c26   : > { %v20547_v10 = vmul.f32 0.70710677, %v36104_v15  ;;  %v20546_v63 = vmul.f32 0.5, %v36104_v15 }
0x2c28   : > { %v20548_v47 = vand.u32 2147483647, %v20547_v10  ;;  %vm20567_vm8 = vcmp.ge.f32.partialorder %v20547_v10, 0.0 }
0x2c2a   : > { %v20549_v50 = vmul.f32 0.3275911, %v20548_v47  ;;  %v20561_v11 = vsub.f32 0.0, %v20548_v47 }
0x2c2c   : > { %v20550_v51 = vadd.f32 1.0, %v20549_v50  ;;  %v20562_v2 = vmul.f32 %v20561_v11, %v20548_v47 }
0x2c2e   : > { %36793 = vrcp.f32 %v20550_v51  ;;  %v20563_v34 = vmul.f32 1.442695, %v20562_v2 }
0x2c30   : > { %36795 = vpow2.f32 %v20563_v34 }
0x2c38   : > { %v36794_v1 = vpop.eup %36793 }
0x2c39   : > { %v20552_v31 = vmul.f32 1.0614054, %v36794_v1 }
0x2c3a   : > { %v36796_v42 = vpop.eup %36795 }
0x2c3b   : > { %v20553_v33 = vadd.f32 -1.4531521, %v20552_v31 }
0x2c3d   : > { %v20554_v38 = vmul.f32 %v36794_v1, %v20553_v33 }
0x2c3f   : > { %v20555_v39 = vadd.f32 1.4214138, %v20554_v38 }
0x2c41   : > { %v20556_v40 = vmul.f32 %v36794_v1, %v20555_v39 }
0x2c43   : > { %v20557_v12 = vadd.f32 -0.28449672, %v20556_v40 }
0x2c45   : > { %v20558_v16 = vmul.f32 %v36794_v1, %v20557_v12 }
0x2c47   : > { %v20559_v20 = vadd.f32 0.2548296, %v20558_v16 }
0x2c49   : > { %v20560_v57 = vmul.f32 %v36794_v1, %v20559_v20 }
0x2c4b   : > { %v20565_v60 = vmul.f32 %v36796_v42, %v20560_v57 }
0x2c4d   : > { %v20566_v22 = vsub.f32 1.0, %v20565_v60 }
0x2c4f   : > { %v20568_v46 = vsub.f32 0.0, %v20566_v22 }
0x2c51   : > { %v20569_v7 = vsel %vm20567_vm8, %v20566_v22, %v20568_v46  ;;  %v39491_v46 = vld [vmem:[#allocation12_spill] sm:$0xff] }
0x2c52   : > { %v20570_v25 = vadd.f32 1.0, %v20569_v7  ;;  %v39492_v7 = vld [vmem:[#allocation13_spill] sm:$0xff] }
0x2c54   : > { %v20571_v19 = vmul.f32 %v20570_v25, %v20546_v63  ;;  %v39493_v63 = vld [vmem:[#allocation14_spill] sm:$0xff]  ;;  %v39494_v25 = vld [vmem:[#allocation15_spill] sm:$0xff] }
0x2c56   : > { %v20573_v30 = vsel %vm207_vm0, %v20571_v19, 0  ;;  %v39495_v19 = vld [vmem:[#allocation16_spill] sm:$0xff] }
0x2c57   : > { %v20644_v36 = vand.u32 4294901760, %v20573_v30 }
0x2c59   : > { %v20645_v45 = vsub.f32 %v20573_v30, %v20644_v36  ;;  %v39496_v30 = vld [vmem:[#allocation17_spill] sm:$0xff] }
0x2c5b   : > { %v20646_v56 = vand.u32 4294901760, %v20645_v45 }
0x2c5d   : > { %v20647_v58 = vsub.f32 %v20645_v45, %v20646_v56 }
0x2c5f   : > { %v20648_v32 = vand.u32 4294901760, %v20647_v58 }
0x2c61   : > { %34039 = vmatmul.mubr.f32.vlgmr.msra.gmra.mrb[106].mxu0 %v20648_v32 }
0x2c62   : > { %35700 = vmatpush3.bf16.msra.mxu0 %v37818_v4  ;;  %34049 = vmatprep.mubr.msk.f32.mxu0 %vm36944_vm2, %v39469_v23  ;;  %v39489_v4 = vld [vmem:[#allocation10_spill] sm:$0xff] }
0x2c63   : > { %35701 = vmatprep.subr.bf16.mxu0 %v39470_v48 }
0x2c66   : > { %35703 = vmatpush3.bf16.msra.mxu0 %v37820_v8  ;;  %v39490_v8 = vld [vmem:[#allocation11_spill] sm:$0xff] }
0x2c67   : > { %35704 = vmatprep.subr.bf16.mxu0 %v39470_v48 }
0x2c69   : > { %34050 = vmatmul.mubr.f32.vlgmr.msra.gmra.mrb[108].mxu0 %v20644_v36 }
0x2c6a   : > { %35706 = vmatpush3.bf16.msra.mxu0 %v39487_v49  ;;  %34060 = vmatprep.mubr.msk.f32.mxu0 %vm36944_vm2, %v39469_v23 }
0x2c6b   : > { %35707 = vmatprep.subr.bf16.mxu0 %v39470_v48 }
0x2c6e   : > { %35709 = vmatpush3.bf16.msra.mxu0 %v39488_v59 }
0x2c6f   : > { %35710 = vmatprep.subr.bf16.mxu0 %v39470_v48 }
0x2c71   : > { %34061 = vmatmul.mubr.f32.vlgmr.msra.gmra.mrb[110].mxu0 %v20645_v45  ;;  %v36840_v45 = vld [vmem:[#allocation2 + $0x180] ss:$0 sm:$0xff] }
0x2c72   : > { %35712 = vmatpush3.bf16.msra.mxu0 %v37810_v27  ;;  %34071 = vmatprep.mubr.msk.f32.mxu0 %vm36944_vm2, %v39469_v23 }
0x2c73   : > { %35713 = vmatprep.subr.bf16.mxu0 %v39470_v48 }
0x2c76   : > { %35715 = vmatpush3.bf16.msra.mxu0 %v37814_v52 }
0x2c77   : > { %35716 = vmatprep.subr.bf16.mxu0 %v39470_v48 }
0x2c79   : > { %34072 = vmatmul.mubr.f32.vlgmr.msra.gmra.mrb[112].mxu0 %v20646_v56 }
0x2c7a   : > { %35718 = vmatpush3.bf16.msra.mxu0 %v39489_v4  ;;  %34082 = vmatprep.mubr.msk.f32.mxu0 %vm36944_vm2, %v39469_v23 }
0x2c7b   : > { %35719 = vmatprep.subr.bf16.mxu0 %v39470_v48 }
0x2c7e   : > { %35721 = vmatpush3.bf16.msra.mxu0 %v39490_v8 }
0x2c7f   : > { %35722 = vmatprep.subr.bf16.mxu0 %v39470_v48 }
0x2c81   : > { %34083 = vmatmul.mubr.f32.vlgmr.msra.gmra.mrb[114].mxu0 %v20644_v36 }
0x2c82   : > { %35724 = vmatpush3.bf16.msra.mxu0 %v37810_v27  ;;  %34093 = vmatprep.mubr.msk.f32.mxu0 %vm36944_vm2, %v39469_v23 }
0x2c83   : > { %35725 = vmatprep.subr.bf16.mxu0 %v39470_v48 }
0x2c86   : > { %35727 = vmatpush3.bf16.msra.mxu0 %v37814_v52 }
0x2c87   : > { %34162 = vmatprep.subr.mxu0 %v39469_v23 }
0x2c89   : > { %34094 = vmatmul.mubr.f32.vlgmr.msra.gmra.mrb[116].mxu0 %v20644_v36 }
0x2c8a   : > { %34164 = vmatprep.mubr.msk.f32.mxu0 %vm36944_vm2, %v39469_v23 }
0x2d34   : > { %v20650_v13 = vpop.f32.mrb[106].mxu0 }
0x2d35   : > { %v34040_v0 = vpop.f32.mrb[107].mxu0  ;;  %v20651_v24 = vadd.f32 %v36839_v29, %v20650_v13 }
0x2d3c   : > { %v20741_v5 = vpop.f32.mrb[108].mxu0 }
0x2d3d   : > { %v20742_v14 = vadd.f32 %v20741_v5, %v20651_v24  ;;  %v34051_v27 = vpop.f32.mrb[109].mxu0 }
0x2d44   : > { %v20821_v43 = vpop.f32.mrb[110].mxu0 }
0x2d45   : > { %v20822_v35 = vadd.f32 %v20821_v43, %v20742_v14  ;;  %v34062_v53 = vpop.f32.mrb[111].mxu0 }
0x2d4c   : > { %v20898_v44 = vpop.f32.mrb[112].mxu0 }
0x2d4d   : > { %v20899_v41 = vadd.f32 %v20898_v44, %v20822_v35  ;;  %v34073_v3 = vpop.f32.mrb[113].mxu0 }
0x2d54   : > { %v20981_v52 = vpop.f32.mrb[114].mxu0 }
0x2d55   : > { %v20982_v15 = vadd.f32 %v20981_v52, %v20899_v41  ;;  %v34084_v9 = vpop.f32.mrb[115].mxu0 }
0x2d5c   : > { %v21056_v10 = vpop.f32.mrb[116].mxu0 }
0x2d5d   : > { %v21057_v47 = vadd.f32 %v21056_v10, %v20982_v15  ;;  %v34095_v50 = vpop.f32.mrb[117].mxu0 }
0x2d5f   : > { %v38698_v51 = vadd.f32 %v21057_v47, %v38621_v55 }
0x2d61   : > { %v21061_v11 = vsel %vm207_vm0, %v38698_v51, 0.0 }
0x2d62   : > { %21062 = vadd.xlane.f32.xlu1 %v21061_v11 }
0x2def   : > { %v21063_v1 = vpop.xlane.xlu1 %21062 }
0x2df0   : > { %v21064_v2 = vmul.f32 0.03125, %v21063_v1 }
0x2df2   : > { %v21065_v31 = vsub.f32 %v38698_v51, %v21064_v2 }
0x2df4   : > { %v21066_v33 = vmul.f32 %v21065_v31, %v21065_v31 }
0x2df6   : > { %v21067_v34 = vsel %vm207_vm0, %v21066_v33, 0.0 }
0x2df7   : > { %21068 = vadd.xlane.f32.xlu1 %v21067_v34 }
0x2e84   : > { %v21069_v38 = vpop.xlane.xlu1 %21068 }
0x2e85   : > { %v21070_v39 = vmul.f32 0.03125, %v21069_v38 }
0x2e87   : > { %v21071_v40 = vadd.f32 1e-05, %v21070_v39 }
0x2e89   : > { %36797 = vrsqrt.f32 %v21071_v40 }
0x2e93   : > { %v36798_v12 = vpop.eup %36797 }
0x2e94   : > { %v21073_v16 = vmul.f32 %v36798_v12, %v21065_v31 }
0x2e96   : > { %v21075_v55 = vsel %vm207_vm0, %v21073_v16, 0 }
0x2e97   : > { %v21146_v20 = vand.u32 4294901760, %v21075_v55 }
0x2e99   : > { %v21147_v57 = vsub.f32 %v21075_v55, %v21146_v20 }
0x2e9b   : > { %v21148_v42 = vand.u32 4294901760, %v21147_v57 }
0x2e9d   : > { %v21149_v60 = vsub.f32 %v21147_v57, %v21148_v42 }
0x2e9f   : > { %v21150_v22 = vand.u32 4294901760, %v21149_v60 }
0x2ea1   : > { %34105 = vmatmul.mubr.f32.vlgmr.msra.gmra.mrb[56].mxu1 %v21150_v22 }
0x2ea2   : > { %35736 = vmatpush3.bf16.msra.mxu1 %v39491_v46  ;;  %34115 = vmatprep.mubr.msk.f32.mxu1 %vm36944_vm2, %v39469_v23 }
0x2ea3   : > { %35737 = vmatprep.subr.bf16.mxu1 %v39470_v48 }
0x2ea6   : > { %35739 = vmatpush3.bf16.msra.mxu1 %v39492_v7 }
0x2ea7   : > { %35740 = vmatprep.subr.bf16.mxu1 %v39470_v48 }
0x2ea9   : > { %34116 = vmatmul.mubr.f32.vlgmr.msra.gmra.mrb[56].mxu1 %v21146_v20 }
0x2eaa   : > { %35742 = vmatpush3.bf16.msra.mxu1 %v39493_v63  ;;  %34126 = vmatprep.mubr.msk.f32.mxu1 %vm36944_vm2, %v39469_v23 }
0x2eab   : > { %35743 = vmatprep.subr.bf16.mxu1 %v39470_v48 }
0x2eae   : > { %35745 = vmatpush3.bf16.msra.mxu1 %v39494_v25 }
0x2eaf   : > { %35746 = vmatprep.subr.bf16.mxu1 %v39470_v48 }
0x2eb1   : > { %34127 = vmatmul.mubr.f32.vlgmr.msra.gmra.mrb[56].mxu1 %v21147_v57 }
0x2eb2   : > { %35748 = vmatpush3.bf16.msra.mxu1 %v37870_v17  ;;  %34137 = vmatprep.mubr.msk.f32.mxu1 %vm36944_vm2, %v39469_v23 }
0x2eb3   : > { %35749 = vmatprep.subr.bf16.mxu1 %v39470_v48 }
0x2eb6   : > { %35751 = vmatpush3.bf16.msra.mxu1 %v37873_v37 }
0x2eb7   : > { %35752 = vmatprep.subr.bf16.mxu1 %v39470_v48 }
0x2eb9   : > { %34138 = vmatmul.mubr.f32.vlgmr.msra.gmra.mrb[56].mxu1 %v21148_v42 }
0x2eba   : > { %35754 = vmatpush3.bf16.msra.mxu1 %v39495_v19  ;;  %34148 = vmatprep.mubr.msk.f32.mxu1 %vm36944_vm2, %v39469_v23 }
0x2ebb   : > { %35755 = vmatprep.subr.bf16.mxu1 %v39470_v48 }
0x2ebe   : > { %35757 = vmatpush3.bf16.msra.mxu1 %v39496_v30 }
0x2ebf   : > { %35758 = vmatprep.subr.bf16.mxu1 %v39470_v48 }
0x2ec1   : > { %34149 = vmatmul.mubr.f32.vlgmr.msra.gmra.mrb[56].mxu1 %v21146_v20 }
0x2ec2   : > { %35760 = vmatpush3.bf16.msra.mxu1 %v37870_v17  ;;  %34159 = vmatprep.mubr.msk.f32.mxu1 %vm36944_vm2, %v39469_v23 }
0x2ec3   : > { %35761 = vmatprep.subr.bf16.mxu1 %v39470_v48 }
0x2ec6   : > { %35763 = vmatpush3.bf16.msra.mxu1 %v37873_v37 }
0x2ec7   : > { %34222 = vmatprep.subr.mxu1 %v39469_v23 }
0x2ec9   : > { %34160 = vmatmul.mubr.f32.vlgmr.msra.gmra.mrb[56].mxu1 %v21146_v20 }
0x2eca   : > { %34224 = vmatprep.mubr.msk.f32.mxu1 %vm36944_vm2, %v39469_v23 }
0x2f9c   : > { %v21558_v36 = vpop.f32.mrb[56].mxu1 }
0x2f9d   : > { %v38737_v56 = vadd.f32 %v36840_v45, %v21558_v36  ;;  %v34161_v58 = vpop.f32.mrb[57].mxu1 }
0x2f9f   : > { %22478 = vrot.lane.b32.xlu1 %v38737_v56, %s36947_s28  ;;  %21563 = vrot.lane.b32.xlu0 %v38737_v56, %s36946_s24  ;;  %v21565_v17 = vsel %vm4440_vm4, %v38737_v56, 0  ;;  %s200_s28 = scalar_lea.vmem %s39412_s1, %s30819_s25 }
0x2fa0   : > { %v38755_v37 = vand.u32 4294901760, %v21565_v17 }
0x2fa2   : > { %v21636_v32 = vsub.f32 %v21565_v17, %v38755_v37 }
0x2fa3   : > { %22480 = vrot.lane.b32.xlu1 %v38737_v56, %s36948_s29  ;;  %23397 = vrot.lane.b32.xlu0 %v38737_v56, %s36949_s30  ;;  %s30840_s29 = sshll.u32 %s37002_s16, 7  ;;  %s36960_s16 = smov [#allocation5]  }
0x2fa4   : > { %v21637_v49 = vand.u32 4294901760, %v21636_v32 }
0x2fa6   : > { %v21638_v0 = vsub.f32 %v21636_v32, %v21637_v49 }
0x2fa7   : > { %23395 = vrot.lane.b32.xlu1 %v38737_v56, %s36950_s4  ;;  %24314 = vrot.lane.b32.xlu0 %v38737_v56, %s36951_s5 }
0x2fa8   : > { %v21639_v35 = vand.u32 4294901760, %v21638_v0 }
0x2fab   : > { %24312 = vrot.lane.b32.xlu1 %v38737_v56, %s36952_s6 }
0x3011   : > { %v22479_v59 = vpop.permute.xlu1 %22478  ;;  %v21564_v4 = vpop.permute.xlu0 %21563 }
0x3012   : > { %v22482_v8 = vsel %vm4440_vm4, %v22479_v59, 0  ;;  %v21567_v13 = vsel %vm4440_vm4, %v21564_v4, 0  ;;  %v39498_v59 = vld [vmem:[#allocation21_spill] sm:$0xff] }
0x3013   : > { %v38760_v29 = vand.u32 4294901760, %v22482_v8  ;;  %v21570_v24 = vand.u32 4294901760, %v21567_v13 }
0x3015   : > { %v22553_v5 = vsub.f32 %v22482_v8, %v38760_v29  ;;  %v21647_v14 = vsub.f32 %v21567_v13, %v21570_v24  ;;  %v22481_v27 = vpop.permute.xlu1 %22480  ;;  %34163 = vmatpush3.xpose.msra.mxu0 %v21570_v24  ;;  %v23398_v2 = vpop.permute.xlu0 %23397 }
0x3016   : > { %v22484_v43 = vsel %vm4440_vm4, %v22481_v27, 0  ;;  %34167 = vmatprep.subr.mxu0 %v39469_v23  ;;  %v23401_v33 = vsel %vm4440_vm4, %v23398_v2, 0 }
0x3017   : > { %v22554_v53 = vand.u32 4294901760, %v22553_v5  ;;  %v21648_v44 = vand.u32 4294901760, %v21647_v14  ;;  %v22487_v41 = vand.u32 4294901760, %v22484_v43  ;;  %v23404_v38 = vand.u32 4294901760, %v23401_v33 }
0x3018   : > { %34165 = vmatmul.mubr.f32.vlgmr.msra.gmra.mrb[118].mxu0 %v21639_v35 }
0x3019   : > { %v22555_v3 = vsub.f32 %v22553_v5, %v22554_v53  ;;  %v21649_v52 = vsub.f32 %v21647_v14, %v21648_v44  ;;  %v22564_v15 = vsub.f32 %v22484_v43, %v22487_v41  ;;  %34223 = vmatpush3.xpose.msra.mxu1 %v22487_v41  ;;  %34169 = vmatprep.mubr.msk.f32.mxu0 %vm36944_vm2, %v39469_v23  ;;  %v23396_v1 = vpop.permute.xlu1 %23395  ;;  %v24315_v22 = vpop.permute.xlu0 %24314 }
0x301a   : > { %34227 = vmatprep.subr.mxu1 %v39469_v23  ;;  %v23399_v31 = vsel %vm4440_vm4, %v23396_v1, 0  ;;  %v23481_v40 = vsub.f32 %v23401_v33, %v23404_v38  ;;  %v24318_v7 = vsel %vm4440_vm4, %v24315_v22, 0 }
0x301b   : > { %v22556_v9 = vand.u32 4294901760, %v22555_v3  ;;  %v21650_v10 = vand.u32 4294901760, %v21649_v52  ;;  %v22565_v47 = vand.u32 4294901760, %v22564_v15  ;;  %v23469_v34 = vand.u32 4294901760, %v23399_v31 }
0x301c   : > { %v23482_v16 = vand.u32 4294901760, %v23481_v40  ;;  %v24321_v25 = vand.u32 4294901760, %v24318_v7 }
0x301d   : > { %v22566_v50 = vsub.f32 %v22564_v15, %v22565_v47  ;;  %34225 = vmatmul.mubr.f32.vlgmr.msra.gmra.mrb[58].mxu1 %v22556_v9  ;;  %34168 = vmatpush3.xpose.msra.mxu0 %v21650_v10  ;;  %v23470_v39 = vsub.f32 %v23399_v31, %v23469_v34  ;;  %v24313_v60 = vpop.permute.xlu1 %24312 }
0x301e   : > { %34172 = vmatprep.subr.mxu0 %v39469_v23  ;;  %34229 = vmatprep.mubr.msk.f32.mxu1 %vm36944_vm2, %v39469_v23  ;;  %v23483_v20 = vsub.f32 %v23481_v40, %v23482_v16  ;;  %v24316_v46 = vsel %vm4440_vm4, %v24313_v60, 0  ;;  %v24398_v30 = vsub.f32 %v24318_v7, %v24321_v25 }
0x301f   : > { %v22567_v11 = vand.u32 4294901760, %v22566_v50  ;;  %v23471_v12 = vand.u32 4294901760, %v23470_v39  ;;  %v24386_v63 = vand.u32 4294901760, %v24316_v46 }
0x3020   : > { %34170 = vmatmul.mubr.f32.vlgmr.msra.gmra.mrb[118].mxu0 %v38755_v37  ;;  %v23484_v42 = vand.u32 4294901760, %v23483_v20  ;;  %v24399_v45 = vand.u32 4294901760, %v24398_v30 }
0x3021   : > { %34173 = vmatpush3.xpose.msra.mxu0 %v21647_v14  ;;  %34228 = vmatpush3.xpose.msra.mxu1 %v22567_v11  ;;  %v23472_v55 = vsub.f32 %v23470_v39, %v23471_v12  ;;  %v24387_v19 = vsub.f32 %v24316_v46, %v24386_v63 }
0x3022   : > { %34232 = vmatprep.subr.mxu1 %v39469_v23  ;;  %34174 = vmatprep.mubr.msk.f32.mxu0 %vm36944_vm2, %v39469_v23  ;;  %v24400_v17 = vsub.f32 %v24398_v30, %v24399_v45 }
0x3023   : > { %34177 = vmatprep.subr.mxu0 %v39469_v23  ;;  %v23473_v57 = vand.u32 4294901760, %v23472_v55  ;;  %v24388_v36 = vand.u32 4294901760, %v24387_v19 }
0x3025   : > { %34230 = vmatmul.mubr.f32.vlgmr.msra.gmra.mrb[58].mxu1 %v38760_v29  ;;  %v24389_v58 = vsub.f32 %v24387_v19, %v24388_v36 }
0x3026   : > { %34233 = vmatpush3.xpose.msra.mxu1 %v22564_v15  ;;  %34234 = vmatprep.mubr.msk.f32.mxu1 %vm36944_vm2, %v39469_v23 }
0x3027   : > { %34237 = vmatprep.subr.mxu1 %v39469_v23 }
0x3028   : > { %34175 = vmatmul.mubr.f32.vlgmr.msra.gmra.mrb[118].mxu0 %v21636_v32  ;;  %v24401_v32 = vand.u32 4294901760, %v24400_v17 }
0x3029   : > { %34178 = vmatpush3.xpose.msra.mxu0 %v21570_v24  ;;  %34179 = vmatprep.mubr.msk.f32.mxu0 %vm36944_vm2, %v39469_v23 }
0x302a   : > { %34182 = vmatprep.subr.mxu0 %v39469_v23 }
0x302d   : > { %34235 = vmatmul.mubr.f32.vlgmr.msra.gmra.mrb[58].mxu1 %v22553_v5 }
0x302e   : > { %34238 = vmatpush3.xpose.msra.mxu1 %v22487_v41  ;;  %34239 = vmatprep.mubr.msk.f32.mxu1 %vm36944_vm2, %v39469_v23 }
0x302f   : > { %34242 = vmatprep.subr.mxu1 %v39469_v23 }
0x3030   : > { %34180 = vmatmul.mubr.f32.vlgmr.msra.gmra.mrb[118].mxu0 %v21637_v49  ;;  %v39497_v49 = vld [vmem:[#allocation20_spill] sm:$0xff] }
0x3031   : > { %34183 = vmatpush3.xpose.msra.mxu0 %v21648_v44  ;;  %34184 = vmatprep.mubr.msk.f32.mxu0 %vm36944_vm2, %v39469_v23 }
0x3032   : > { %34187 = vmatprep.subr.mxu0 %v39469_v23 }
0x3035   : > { %34240 = vmatmul.mubr.f32.vlgmr.msra.gmra.mrb[58].mxu1 %v22554_v53 }
0x3036   : > { %34243 = vmatpush3.xpose.msra.mxu1 %v22565_v47  ;;  %34244 = vmatprep.mubr.msk.f32.mxu1 %vm36944_vm2, %v39469_v23 }
0x3037   : > { %34247 = vmatprep.subr.mxu1 %v39469_v23 }
0x3038   : > { %34185 = vmatmul.mubr.f32.vlgmr.msra.gmra.mrb[118].mxu0 %v38755_v37 }
0x3039   : > { %34188 = vmatpush3.xpose.msra.mxu0 %v21570_v24  ;;  %34189 = vmatprep.mubr.msk.f32.mxu0 %vm36944_vm2, %v39469_v23 }
0x303a   : > { %34192 = vmatprep.subr.mxu0 %v39469_v23 }
0x303d   : > { %34245 = vmatmul.mubr.f32.vlgmr.msra.gmra.mrb[58].mxu1 %v38760_v29 }
0x303e   : > { %34248 = vmatpush3.xpose.msra.mxu1 %v22487_v41  ;;  %34249 = vmatprep.mubr.msk.f32.mxu1 %vm36944_vm2, %v39469_v23 }
0x303f   : > { %34282 = vmatprep.subr.mxu1 %v39469_v23 }
0x3040   : > { %34190 = vmatmul.mubr.f32.vlgmr.msra.gmra.mrb[118].mxu0 %v38755_v37  ;;  %v24390_v37 = vand.u32 4294901760, %v24389_v58 }
0x3041   : > { %34194 = vmatprep.mubr.msk.f32.mxu0 %vm36944_vm2, %v39469_v23 }
0x3045   : > { %34250 = vmatmul.mubr.f32.vlgmr.msra.gmra.mrb[58].mxu1 %v38760_v29 }
0x3046   : > { %34283 = vmatpush3.xpose.msra.mxu1 %v23404_v38  ;;  %34284 = vmatprep.mubr.msk.f32.mxu1 %vm36944_vm2, %v39469_v23 }
0x3047   : > { %34287 = vmatprep.subr.mxu1 %v39469_v23 }
0x3049   : > { %34285 = vmatmul.mubr.f32.vlgmr.msra.gmra.mrb[60].mxu1 %v23473_v57 }
0x304a   : > { %34288 = vmatpush3.xpose.msra.mxu1 %v23484_v42  ;;  %34289 = vmatprep.mubr.msk.f32.mxu1 %vm36944_vm2, %v39469_v23 }
0x304b   : > { %34292 = vmatprep.subr.mxu1 %v39469_v23 }
0x3051   : > { %34290 = vmatmul.mubr.f32.vlgmr.msra.gmra.mrb[60].mxu1 %v23469_v34 }
0x3052   : > { %34293 = vmatpush3.xpose.msra.mxu1 %v23481_v40  ;;  %34294 = vmatprep.mubr.msk.f32.mxu1 %vm36944_vm2, %v39469_v23 }
0x3053   : > { %34297 = vmatprep.subr.mxu1 %v39469_v23 }
0x3059   : > { %34295 = vmatmul.mubr.f32.vlgmr.msra.gmra.mrb[60].mxu1 %v23470_v39 }
0x305a   : > { %34298 = vmatpush3.xpose.msra.mxu1 %v23404_v38  ;;  %34299 = vmatprep.mubr.msk.f32.mxu1 %vm36944_vm2, %v39469_v23 }
0x305b   : > { %34302 = vmatprep.subr.mxu1 %v39469_v23 }
0x3061   : > { %34300 = vmatmul.mubr.f32.vlgmr.msra.gmra.mrb[60].mxu1 %v23471_v12 }
0x3062   : > { %34303 = vmatpush3.xpose.msra.mxu1 %v23482_v16  ;;  %34304 = vmatprep.mubr.msk.f32.mxu1 %vm36944_vm2, %v39469_v23 }
0x3063   : > { %34307 = vmatprep.subr.mxu1 %v39469_v23 }
0x3069   : > { %34305 = vmatmul.mubr.f32.vlgmr.msra.gmra.mrb[60].mxu1 %v23469_v34 }
0x306a   : > { %34308 = vmatpush3.xpose.msra.mxu1 %v23404_v38  ;;  %34309 = vmatprep.mubr.msk.f32.mxu1 %vm36944_vm2, %v39469_v23 }
0x306b   : > { %34342 = vmatprep.subr.mxu1 %v39469_v23 }
0x3071   : > { %34310 = vmatmul.mubr.f32.vlgmr.msra.gmra.mrb[60].mxu1 %v23469_v34 }
0x3072   : > { %34343 = vmatpush3.xpose.msra.mxu1 %v24321_v25  ;;  %34344 = vmatprep.mubr.msk.f32.mxu1 %vm36944_vm2, %v39469_v23 }
0x3073   : > { %34347 = vmatprep.subr.mxu1 %v39469_v23 }
0x3075   : > { %34345 = vmatmul.mubr.f32.vlgmr.msra.gmra.mrb[62].mxu1 %v24390_v37 }
0x3076   : > { %34348 = vmatpush3.xpose.msra.mxu1 %v24401_v32  ;;  %34349 = vmatprep.mubr.msk.f32.mxu1 %vm36944_vm2, %v39469_v23 }
0x3077   : > { %34352 = vmatprep.subr.mxu1 %v39469_v23 }
0x307d   : > { %34350 = vmatmul.mubr.f32.vlgmr.msra.gmra.mrb[62].mxu1 %v24386_v63 }
0x307e   : > { %34353 = vmatpush3.xpose.msra.mxu1 %v24398_v30  ;;  %34354 = vmatprep.mubr.msk.f32.mxu1 %vm36944_vm2, %v39469_v23 }
0x307f   : > { %34357 = vmatprep.subr.mxu1 %v39469_v23 }
0x3085   : > { %34355 = vmatmul.mubr.f32.vlgmr.msra.gmra.mrb[62].mxu1 %v24387_v19 }
0x3086   : > { %34358 = vmatpush3.xpose.msra.mxu1 %v24321_v25  ;;  %34359 = vmatprep.mubr.msk.f32.mxu1 %vm36944_vm2, %v39469_v23 }
0x3087   : > { %34362 = vmatprep.subr.mxu1 %v39469_v23 }
0x308d   : > { %34360 = vmatmul.mubr.f32.vlgmr.msra.gmra.mrb[62].mxu1 %v24388_v36 }
0x308e   : > { %34363 = vmatpush3.xpose.msra.mxu1 %v24399_v45  ;;  %34364 = vmatprep.mubr.msk.f32.mxu1 %vm36944_vm2, %v39469_v23 }
0x308f   : > { %34367 = vmatprep.subr.mxu1 %v39469_v23 }
0x3095   : > { %34365 = vmatmul.mubr.f32.vlgmr.msra.gmra.mrb[62].mxu1 %v24386_v63 }
0x3096   : > { %34368 = vmatpush3.xpose.msra.mxu1 %v24321_v25  ;;  %34369 = vmatprep.mubr.msk.f32.mxu1 %vm36944_vm2, %v39469_v23 }
0x3097   : > { %35764 = vmatprep.subr.bf16.mxu1 %v39470_v48 }
0x309d   : > { %34370 = vmatmul.mubr.f32.vlgmr.msra.gmra.mrb[62].mxu1 %v24386_v63 }
0x309e   : > { %35766 = vmatpush3.bf16.msra.mxu1 %v39497_v49  ;;  %34410 = vmatprep.mubr.msk.f32.mxu1 %vm36944_vm2, %v39469_v23 }
0x309f   : > { %35767 = vmatprep.subr.bf16.mxu1 %v39470_v48 }
0x30a2   : > { %35769 = vmatpush3.bf16.msra.mxu1 %v39498_v59 }
0x30a3   : > { %35776 = vmatprep.subr.bf16.mxu1 %v39470_v48 }
0x3113   : > { %v22011_v4 = vpop.f32.mrb[118].mxu0 }
0x3114   : > { %v34191_v8 = vpop.f32.mrb[119].mxu0  ;;  %v22015_v13 = vsel %vm4440_vm4, %v22011_v4, -inf }
0x3115   : > { %22016 = vmax.xlane.f32.xlu1 %v22015_v13 }
0x3118   : > { %v22928_v0 = vpop.f32.mrb[58].mxu1 }
0x3119   : > { %v34251_v29 = vpop.f32.mrb[59].mxu1  ;;  %v22932_v24 = vsel %vm4440_vm4, %v22928_v0, -inf }
0x311a   : > { %22933 = vmax.xlane.f32.xlu0 %v22932_v24 }
0x3126   : > { %22026 = vrot.lane.b32.xlu1 %v38737_v56, %s36953_s7  ;;  %s39368_s7 = scalar_lea.hbm %s39414_s3, %s30840_s29 }
0x3144   : > { %v23845_v5 = vpop.f32.mrb[60].mxu1 }
0x3145   : > { %v34311_v14 = vpop.f32.mrb[61].mxu1  ;;  %v23849_v50 = vsel %vm4440_vm4, %v23845_v5, -inf }
0x3170   : > { %v24762_v27 = vpop.f32.mrb[62].mxu1 }
0x3171   : > { %v34371_v43 = vpop.f32.mrb[63].mxu1  ;;  %v24766_v2 = vsel %vm4440_vm4, %v24762_v27, -inf }
0x31a2   : > { %v22017_v35 = vpop.xlane.xlu1 %22016 }
0x31a3   : > { %v22018_v53 = vsub.f32 %v22011_v4, %v22017_v35 }
0x31a5   : > { %v22019_v44 = vmul.f32 1.442695, %v22018_v53 }
0x31a6   : > { %v22027_v41 = vpop.permute.xlu1 %22026 }
0x31a7   : > { %36799 = vpow2.f32 %v22019_v44  ;;  %v38854_v3 = vand.u32 4294901760, %v22027_v41  ;;  %v22934_v52 = vpop.xlane.xlu0 %22933 }
0x31a8   : > { %v22935_v15 = vsub.f32 %v22928_v0, %v22934_v52 }
0x31a9   : > { %34193 = vmatpush3.msra.mxu0 %v38854_v3  ;;  %v22110_v12 = vsub.f32 %v22027_v41, %v38854_v3 }
0x31aa   : > { %v22936_v9 = vmul.f32 1.442695, %v22935_v15  ;;  %34197 = vmatprep.subr.mxu0 %v39469_v23 }
0x31ab   : > { %v22111_v22 = vand.u32 4294901760, %v22110_v12 }
0x31ac   : > { %36801 = vpow2.f32 %v22936_v9 }
0x31ad   : > { %v22112_v25 = vsub.f32 %v22110_v12, %v22111_v22 }
0x31af   : > { %v22113_v45 = vand.u32 4294901760, %v22112_v25  ;;  %v39499_v25 = vld [vmem:[#allocation18_spill] sm:$0xff] }
0x31b1   : > { %v36800_v10 = vpop.eup %36799 }
0x31b2   : > { %v22021_v47 = vsel %vm4440_vm4, %v36800_v10, 0.0 }
0x31b3   : > { %22022 = vadd.xlane.f32.xlu0 %v22021_v47 }
0x31b6   : > { %v36802_v11 = vpop.eup %36801 }
0x31b7   : > { %23850 = vmax.xlane.f32.xlu0 %v23849_v50  ;;  %v22938_v1 = vsel %vm4440_vm4, %v36802_v11, 0.0 }
0x31bb   : > { %22939 = vadd.xlane.f32.xlu0 %v22938_v1 }
0x31bf   : > { %24767 = vmax.xlane.f32.xlu0 %v24766_v2 }
0x31d5   : > { %22943 = vrot.lane.b32.xlu0 %v38737_v56, %s36954_s8  ;;  %s30714_s8 = scalar_lea.sflag [#allocation4], %s189_s19 }
0x31d9   : > { %23860 = vrot.lane.b32.xlu0 %v38737_v56, %s36955_s9 }
0x3240   : > { %v22023_v31 = vpop.xlane.xlu0 %22022 }
0x3241   : > { %36803 = vrcp.f32 %v22023_v31 }
0x3244   : > { %v23851_v33 = vpop.xlane.xlu0 %23850 }
0x3245   : > { %v23852_v34 = vsub.f32 %v23845_v5, %v23851_v33 }
0x3247   : > { %v23853_v38 = vmul.f32 1.442695, %v23852_v34 }
0x3248   : > { %v22940_v39 = vpop.xlane.xlu0 %22939 }
0x3249   : > { %36805 = vpow2.f32 %v23853_v38 }
0x324b   : > { %v36804_v40 = vpop.eup %36803 }
0x324c   : > { %v22025_v16 = vmul.f32 %v36804_v40, %v36800_v10  ;;  %v24768_v55 = vpop.xlane.xlu0 %24767 }
0x324d   : > { %v24769_v20 = vsub.f32 %v24762_v27, %v24768_v55 }
0x324e   : > { %v22030_v57 = vsel %vm4440_vm4, %v22025_v16, 0 }
0x324f   : > { %v24770_v42 = vmul.f32 1.442695, %v24769_v20  ;;  %v22098_v60 = vand.u32 4294901760, %v22030_v57 }
0x3250   : > { %v22944_v8 = vpop.permute.xlu0 %22943 }
0x3251   : > { %36807 = vpow2.f32 %v24770_v42  ;;  %v22099_v46 = vsub.f32 %v22030_v57, %v22098_v60  ;;  %v22950_v13 = vand.u32 4294901760, %v22944_v8 }
0x3252   : > { %36809 = vrcp.f32 %v22940_v39 }
0x3253   : > { %v38868_v7 = vpop.eup %36805  ;;  %v22100_v63 = vand.u32 4294901760, %v22099_v46  ;;  %v23027_v29 = vsub.f32 %v22944_v8, %v22950_v13 }
0x3254   : > { %v23855_v19 = vsel %vm4440_vm4, %v38868_v7, 0.0  ;;  %v23861_v53 = vpop.permute.xlu0 %23860 }
0x3255   : > { %23856 = vadd.xlane.f32.xlu1 %v23855_v19  ;;  %v22101_v30 = vsub.f32 %v22099_v46, %v22100_v63  ;;  %v23028_v5 = vand.u32 4294901760, %v23027_v29  ;;  %v23867_v44 = vand.u32 4294901760, %v23861_v53 }
0x3257   : > { %v22102_v36 = vand.u32 4294901760, %v22101_v30  ;;  %v23029_v27 = vsub.f32 %v23027_v29, %v23028_v5  ;;  %v23944_v52 = vsub.f32 %v23861_v53, %v23867_v44  ;;  %v39500_v30 = vld [vmem:[#allocation19_spill] sm:$0xff] }
0x3259   : > { %34195 = vmatmul.mubr.f32.vlgmr.msra.gmra.mrb[120].mxu0 %v22102_v36  ;;  %v23030_v35 = vand.u32 4294901760, %v23029_v27  ;;  %v23945_v47 = vand.u32 4294901760, %v23944_v52 }
0x325a   : > { %34198 = vmatpush3.msra.mxu0 %v22113_v45  ;;  %34199 = vmatprep.mubr.msk.f32.mxu0 %vm36944_vm2, %v39469_v23 }
0x325b   : > { %v38874_v58 = vpop.eup %36807  ;;  %34202 = vmatprep.subr.mxu0 %v39469_v23  ;;  %v23946_v1 = vsub.f32 %v23944_v52, %v23945_v47 }
0x325c   : > { %v24772_v17 = vsel %vm4440_vm4, %v38874_v58, 0.0  ;;  %v36810_v37 = vpop.eup %36809 }
0x325d   : > { %24773 = vadd.xlane.f32.xlu0 %v24772_v17  ;;  %v22942_v32 = vmul.f32 %v36810_v37, %v36802_v11  ;;  %v23947_v33 = vand.u32 4294901760, %v23946_v1 }
0x325f   : > { %v22947_v4 = vsel %vm4440_vm4, %v22942_v32, 0 }
0x3261   : > { %34200 = vmatmul.mubr.f32.vlgmr.msra.gmra.mrb[120].mxu0 %v22098_v60 }
0x3262   : > { %34203 = vmatpush3.msra.mxu0 %v22110_v12  ;;  %34204 = vmatprep.mubr.msk.f32.mxu0 %vm36944_vm2, %v39469_v23 }
0x3263   : > { %34207 = vmatprep.subr.mxu0 %v39469_v23 }
0x3266   : > { %24777 = vrot.lane.b32.xlu1 %v38737_v56, %s36956_s10  ;;  %v23015_v56 = vand.u32 4294901760, %v22947_v4  ;;  %s36876_s10 = sshll.u32 %s36960_s16, 4  ;;  %s36877_s10 = int_to_ptr.vmem [resolvable:$false] %s36876_s10 }
0x3268   : > { %v23016_v0 = vsub.f32 %v22947_v4, %v23015_v56 }
0x3269   : > { %34205 = vmatmul.mubr.f32.vlgmr.msra.gmra.mrb[120].mxu0 %v22099_v46 }
0x326a   : > { %34208 = vmatpush3.msra.mxu0 %v38854_v3  ;;  %34209 = vmatprep.mubr.msk.f32.mxu0 %vm36944_vm2, %v39469_v23  ;;  %v23017_v24 = vand.u32 4294901760, %v23016_v0 }
0x326b   : > { %34212 = vmatprep.subr.mxu0 %v39469_v23 }
0x326c   : > { %v23018_v14 = vsub.f32 %v23016_v0, %v23017_v24 }
0x326e   : > { %v23019_v43 = vand.u32 4294901760, %v23018_v14 }
0x3271   : > { %34210 = vmatmul.mubr.f32.vlgmr.msra.gmra.mrb[120].mxu0 %v22100_v63 }
0x3272   : > { %34213 = vmatpush3.msra.mxu0 %v22111_v22  ;;  %34214 = vmatprep.mubr.msk.f32.mxu0 %vm36944_vm2, %v39469_v23 }
0x3273   : > { %34217 = vmatprep.subr.mxu0 %v39469_v23 }
0x3279   : > { %34215 = vmatmul.mubr.f32.vlgmr.msra.gmra.mrb[120].mxu0 %v22098_v60 }
0x327a   : > { %34218 = vmatpush3.msra.mxu0 %v38854_v3  ;;  %34219 = vmatprep.mubr.msk.f32.mxu0 %vm36944_vm2, %v39469_v23 }
0x327b   : > { %34252 = vmatprep.subr.mxu0 %v39469_v23 }
0x3281   : > { %34220 = vmatmul.mubr.f32.vlgmr.msra.gmra.mrb[120].mxu0 %v22098_v60 }
0x3282   : > { %34253 = vmatpush3.msra.mxu0 %v22950_v13  ;;  %34254 = vmatprep.mubr.msk.f32.mxu0 %vm36944_vm2, %v39469_v23 }
0x3283   : > { %34257 = vmatprep.subr.mxu0 %v39469_v23 }
0x3285   : > { %34255 = vmatmul.mubr.f32.vlgmr.msra.gmra.mrb[122].mxu0 %v23019_v43 }
0x3286   : > { %34258 = vmatpush3.msra.mxu0 %v23030_v35  ;;  %34259 = vmatprep.mubr.msk.f32.mxu0 %vm36944_vm2, %v39469_v23 }
0x3287   : > { %34262 = vmatprep.subr.mxu0 %v39469_v23 }
0x328d   : > { %34260 = vmatmul.mubr.f32.vlgmr.msra.gmra.mrb[122].mxu0 %v23015_v56 }
0x328e   : > { %34263 = vmatpush3.msra.mxu0 %v23027_v29  ;;  %34264 = vmatprep.mubr.msk.f32.mxu0 %vm36944_vm2, %v39469_v23 }
0x328f   : > { %34267 = vmatprep.subr.mxu0 %v39469_v23 }
0x3295   : > { %34265 = vmatmul.mubr.f32.vlgmr.msra.gmra.mrb[122].mxu0 %v23016_v0 }
0x3296   : > { %34268 = vmatpush3.msra.mxu0 %v22950_v13  ;;  %34269 = vmatprep.mubr.msk.f32.mxu0 %vm36944_vm2, %v39469_v23 }
0x3297   : > { %34272 = vmatprep.subr.mxu0 %v39469_v23 }
0x329d   : > { %34270 = vmatmul.mubr.f32.vlgmr.msra.gmra.mrb[122].mxu0 %v23017_v24 }
0x329e   : > { %34273 = vmatpush3.msra.mxu0 %v23028_v5  ;;  %34274 = vmatprep.mubr.msk.f32.mxu0 %vm36944_vm2, %v39469_v23 }
0x329f   : > { %34277 = vmatprep.subr.mxu0 %v39469_v23 }
0x32a5   : > { %34275 = vmatmul.mubr.f32.vlgmr.msra.gmra.mrb[122].mxu0 %v23015_v56 }
0x32a6   : > { %34278 = vmatpush3.msra.mxu0 %v22950_v13  ;;  %34279 = vmatprep.mubr.msk.f32.mxu0 %vm36944_vm2, %v39469_v23 }
0x32a7   : > { %34312 = vmatprep.subr.mxu0 %v39469_v23 }
0x32ad   : > { %34280 = vmatmul.mubr.f32.vlgmr.msra.gmra.mrb[122].mxu0 %v23015_v56 }
0x32ae   : > { %34313 = vmatpush3.msra.mxu0 %v23867_v44  ;;  %34314 = vmatprep.mubr.msk.f32.mxu0 %vm36944_vm2, %v39469_v23 }
0x32af   : > { %34317 = vmatprep.subr.mxu0 %v39469_v23 }
0x32e2   : > { %v23857_v41 = vpop.xlane.xlu1 %23856 }
0x32e3   : > { %36811 = vrcp.f32 %v23857_v41  ;;  %v39502_v41 = vld [vmem:[#allocation23_spill] sm:$0xff] }
0x32e6   : > { %v24778_v12 = vpop.permute.xlu1 %24777 }
0x32e7   : > { %v24784_v55 = vand.u32 4294901760, %v24778_v12 }
0x32e9   : > { %v24861_v57 = vsub.f32 %v24778_v12, %v24784_v55 }
0x32ea   : > { %v24774_v34 = vpop.xlane.xlu0 %24773 }
0x32eb   : > { %36813 = vrcp.f32 %v24774_v34  ;;  %v24862_v60 = vand.u32 4294901760, %v24861_v57 }
0x32ed   : > { %v36812_v3 = vpop.eup %36811  ;;  %v24863_v46 = vsub.f32 %v24861_v57, %v24862_v60 }
0x32ee   : > { %v23859_v15 = vmul.f32 %v36812_v3, %v38868_v7  ;;  %v39505_v3 = vld [vmem:[#allocation26_spill] sm:$0xff] }
0x32ef   : > { %v24864_v63 = vand.u32 4294901760, %v24863_v46 }
0x32f0   : > { %v23864_v9 = vsel %vm4440_vm4, %v23859_v15, 0 }
0x32f1   : > { %v23932_v10 = vand.u32 4294901760, %v23864_v9 }
0x32f3   : > { %v23933_v50 = vsub.f32 %v23864_v9, %v23932_v10 }
0x32f5   : > { %v23934_v11 = vand.u32 4294901760, %v23933_v50  ;;  %v36814_v38 = vpop.eup %36813 }
0x32f6   : > { %v24776_v39 = vmul.f32 %v36814_v38, %v38874_v58 }
0x32f7   : > { %v23935_v2 = vsub.f32 %v23933_v50, %v23934_v11 }
0x32f8   : > { %v24781_v40 = vsel %vm4440_vm4, %v24776_v39, 0 }
0x32f9   : > { %v23936_v31 = vand.u32 4294901760, %v23935_v2  ;;  %v24849_v16 = vand.u32 4294901760, %v24781_v40 }
0x32fb   : > { %34315 = vmatmul.mubr.f32.vlgmr.msra.gmra.mrb[124].mxu0 %v23936_v31  ;;  %v24850_v20 = vsub.f32 %v24781_v40, %v24849_v16 }
0x32fc   : > { %34318 = vmatpush3.msra.mxu0 %v23947_v33  ;;  %34319 = vmatprep.mubr.msk.f32.mxu0 %vm36944_vm2, %v39469_v23 }
0x32fd   : > { %34322 = vmatprep.subr.mxu0 %v39469_v23  ;;  %v24851_v42 = vand.u32 4294901760, %v24850_v20 }
0x32ff   : > { %v24852_v22 = vsub.f32 %v24850_v20, %v24851_v42 }
0x3301   : > { %v24853_v7 = vand.u32 4294901760, %v24852_v22 }
0x3303   : > { %34320 = vmatmul.mubr.f32.vlgmr.msra.gmra.mrb[124].mxu0 %v23932_v10 }
0x3304   : > { %34323 = vmatpush3.msra.mxu0 %v23944_v52  ;;  %34324 = vmatprep.mubr.msk.f32.mxu0 %vm36944_vm2, %v39469_v23  ;;  %v39506_v52 = vld [vmem:[#allocation27_spill] sm:$0xff] }
0x3305   : > { %34327 = vmatprep.subr.mxu0 %v39469_v23 }
0x330b   : > { %34325 = vmatmul.mubr.f32.vlgmr.msra.gmra.mrb[124].mxu0 %v23933_v50  ;;  %v36841_v50 = vld [vmem:[#allocation2 + $0x1a8] ss:$0 sm:$0xff] }
0x330c   : > { %34328 = vmatpush3.msra.mxu0 %v23867_v44  ;;  %34329 = vmatprep.mubr.msk.f32.mxu0 %vm36944_vm2, %v39469_v23 }
0x330d   : > { %34332 = vmatprep.subr.mxu0 %v39469_v23 }
0x3313   : > { %34330 = vmatmul.mubr.f32.vlgmr.msra.gmra.mrb[124].mxu0 %v23934_v11 }
0x3314   : > { %34333 = vmatpush3.msra.mxu0 %v23945_v47  ;;  %34334 = vmatprep.mubr.msk.f32.mxu0 %vm36944_vm2, %v39469_v23 }
0x3315   : > { %34337 = vmatprep.subr.mxu0 %v39469_v23 }
0x331b   : > { %34335 = vmatmul.mubr.f32.vlgmr.msra.gmra.mrb[124].mxu0 %v23932_v10 }
0x331c   : > { %34338 = vmatpush3.msra.mxu0 %v23867_v44  ;;  %34339 = vmatprep.mubr.msk.f32.mxu0 %vm36944_vm2, %v39469_v23  ;;  %v39501_v44 = vld [vmem:[#allocation22_spill] sm:$0xff] }
0x331d   : > { %34372 = vmatprep.subr.mxu0 %v39469_v23 }
0x3323   : > { %34340 = vmatmul.mubr.f32.vlgmr.msra.gmra.mrb[124].mxu0 %v23932_v10 }
0x3324   : > { %34373 = vmatpush3.msra.mxu0 %v24784_v55  ;;  %34374 = vmatprep.mubr.msk.f32.mxu0 %vm36944_vm2, %v39469_v23 }
0x3325   : > { %34377 = vmatprep.subr.mxu0 %v39469_v23 }
0x3327   : > { %34375 = vmatmul.mubr.f32.vlgmr.msra.gmra.mrb[126].mxu0 %v24853_v7 }
0x3328   : > { %34378 = vmatpush3.msra.mxu0 %v24864_v63  ;;  %34379 = vmatprep.mubr.msk.f32.mxu0 %vm36944_vm2, %v39469_v23 }
0x3329   : > { %34382 = vmatprep.subr.mxu0 %v39469_v23 }
0x332f   : > { %34380 = vmatmul.mubr.f32.vlgmr.msra.gmra.mrb[126].mxu0 %v24849_v16 }
0x3330   : > { %34383 = vmatpush3.msra.mxu0 %v24861_v57  ;;  %34384 = vmatprep.mubr.msk.f32.mxu0 %vm36944_vm2, %v39469_v23 }
0x3331   : > { %34387 = vmatprep.subr.mxu0 %v39469_v23 }
0x3337   : > { %34385 = vmatmul.mubr.f32.vlgmr.msra.gmra.mrb[126].mxu0 %v24850_v20 }
0x3338   : > { %34388 = vmatpush3.msra.mxu0 %v24784_v55  ;;  %34389 = vmatprep.mubr.msk.f32.mxu0 %vm36944_vm2, %v39469_v23 }
0x3339   : > { %34392 = vmatprep.subr.mxu0 %v39469_v23 }
0x333f   : > { %34390 = vmatmul.mubr.f32.vlgmr.msra.gmra.mrb[126].mxu0 %v24851_v42 }
0x3340   : > { %34393 = vmatpush3.msra.mxu0 %v24862_v60  ;;  %34394 = vmatprep.mubr.msk.f32.mxu0 %vm36944_vm2, %v39469_v23 }
0x3341   : > { %34397 = vmatprep.subr.mxu0 %v39469_v23 }
0x3347   : > { %34395 = vmatmul.mubr.f32.vlgmr.msra.gmra.mrb[126].mxu0 %v24849_v16 }
0x3348   : > { %34398 = vmatpush3.msra.mxu0 %v24784_v55  ;;  %34399 = vmatprep.mubr.msk.f32.mxu0 %vm36944_vm2, %v39469_v23 }
0x3349   : > { %35770 = vmatprep.subr.bf16.mxu0 %v39470_v48 }
0x334f   : > { %34400 = vmatmul.mubr.f32.vlgmr.msra.gmra.mrb[126].mxu0 %v24849_v16 }
0x3350   : > { %35772 = vmatpush3.bf16.msra.mxu0 %v39499_v25  ;;  %34421 = vmatprep.mubr.msk.f32.mxu0 %vm36944_vm2, %v39469_v23 }
0x3351   : > { %35773 = vmatprep.subr.bf16.mxu0 %v39470_v48 }
0x3354   : > { %v22474_v19 = vpop.f32.mrb[120].mxu0  ;;  %35775 = vmatpush3.bf16.msra.mxu0 %v39500_v30 }
0x3355   : > { %v34221_v36 = vpop.f32.mrb[121].mxu0  ;;  %35782 = vmatprep.subr.bf16.mxu0 %v39470_v48 }
0x3380   : > { %v23391_v45 = vpop.f32.mrb[122].mxu0 }
0x3381   : > { %25230 = vrot.lane.b32.xlu0 %v23391_v45, %s36957_s11  ;;  %v34281_v58 = vpop.f32.mrb[123].mxu0  ;;  %s36878_s11 = scalar_lea.vmem %s36877_s10, 256 }
0x33f3   : > { %v25231_v8 = vpop.permute.xlu0 %25230 }
0x33f4   : > { %v25241_v13 = vsel %vm4440_vm4, %v22474_v19, %v25231_v8 }
0x33f6   : > { %v24308_v17 = vpop.f32.mrb[124].mxu0 }
0x33f7   : > { %25234 = vrot.lane.b32.xlu1 %v24308_v17, %s36958_s17  ;;  %v34341_v37 = vpop.f32.mrb[125].mxu0 }
0x3422   : > { %v25225_v32 = vpop.f32.mrb[126].mxu0 }
0x3423   : > { %25238 = vrot.lane.b32.xlu1 %v25225_v32, %s36959_s20  ;;  %v34401_v4 = vpop.f32.mrb[127].mxu0 }
0x3469   : > { %v25235_v56 = vpop.permute.xlu1 %25234 }
0x346a   : > { %v25242_v0 = vsel %vm719_vm1, %v25241_v13, %v25235_v56  ;;  %v39507_v56 = vld [vmem:[#allocation28_spill] sm:$0xff]  ;;  %v39508_v13 = vld [vmem:[#allocation29_spill] sm:$0xff] }
0x3495   : > { %v25239_v29 = vpop.permute.xlu1 %25238 }
0x3496   : > { %v25243_v24 = vsel %vm8119_vm5, %v25242_v0, %v25239_v29  ;;  %v39509_v0 = vld [vmem:[#allocation30_spill] sm:$0xff]  ;;  %v39510_v29 = vld [vmem:[#allocation31_spill] sm:$0xff] }
0x3497   : > { %v25245_v5 = vsel %vm207_vm0, %v25243_v24, 0  ;;  %v39511_v24 = vld [vmem:[#allocation32_spill] sm:$0xff] }
0x3498   : > { %v25316_v14 = vand.u32 4294901760, %v25245_v5 }
0x349a   : > { %v25317_v27 = vsub.f32 %v25245_v5, %v25316_v14  ;;  %34422 = vmatmul.mubr.f32.vlgmr.msra.gmra.mrb[128].mxu0 %v25316_v14  ;;  %v39512_v5 = vld [vmem:[#allocation33_spill] sm:$0xff] }
0x349b   : > { %35784 = vmatpush3.bf16.msra.mxu0 %v39497_v49  ;;  %34443 = vmatprep.mubr.msk.f32.mxu0 %vm36944_vm2, %v39469_v23 }
0x349c   : > { %35785 = vmatprep.subr.bf16.mxu0 %v39470_v48  ;;  %v25318_v43 = vand.u32 4294901760, %v25317_v27 }
0x349e   : > { %v25319_v35 = vsub.f32 %v25317_v27, %v25318_v43 }
0x349f   : > { %35787 = vmatpush3.bf16.msra.mxu0 %v39498_v59 }
0x34a0   : > { %35794 = vmatprep.subr.bf16.mxu0 %v39470_v48  ;;  %v25320_v53 = vand.u32 4294901760, %v25319_v35  ;;  %v36842_v35 = vld [vmem:[#allocation2 + $0x1d0] ss:$0 sm:$0xff] }
0x34a2   : > { %34444 = vmatmul.mubr.f32.vlgmr.msra.gmra.mrb[130].mxu0 %v25318_v43  ;;  %34411 = vmatmul.mubr.f32.vlgmr.msra.gmra.mrb[64].mxu1 %v25320_v53 }
0x34a3   : > { %35778 = vmatpush3.bf16.msra.mxu1 %v39501_v44  ;;  %35796 = vmatpush3.bf16.msra.mxu0 %v39497_v49  ;;  %v39503_v49 = vld [vmem:[#allocation24_spill] sm:$0xff] }
0x34a4   : > { %35779 = vmatprep.subr.bf16.mxu1 %v39470_v48  ;;  %35797 = vmatprep.subr.bf16.mxu0 %v39470_v48 }
0x34a5   : > { %34432 = vmatprep.mubr.msk.f32.mxu1 %vm36944_vm2, %v39469_v23  ;;  %34465 = vmatprep.mubr.msk.f32.mxu0 %vm36944_vm2, %v39469_v23 }
0x34a7   : > { %35781 = vmatpush3.bf16.msra.mxu1 %v39502_v41  ;;  %35799 = vmatpush3.bf16.msra.mxu0 %v39498_v59  ;;  %v39504_v59 = vld [vmem:[#allocation25_spill] sm:$0xff] }
0x34a8   : > { %35788 = vmatprep.subr.bf16.mxu1 %v39470_v48  ;;  %35836 = vmatprep.subr.bf16.mxu0 %v39470_v48 }
0x34aa   : > { %34433 = vmatmul.mubr.f32.vlgmr.msra.gmra.mrb[66].mxu1 %v25317_v27  ;;  %34466 = vmatmul.mubr.f32.vlgmr.msra.gmra.mrb[132].mxu0 %v25316_v14 }
0x34ab   : > { %35790 = vmatpush3.bf16.msra.mxu1 %v39503_v49  ;;  %34454 = vmatprep.mubr.msk.f32.mxu1 %vm36944_vm2, %v39469_v23 }
0x34ac   : > { %35791 = vmatprep.subr.bf16.mxu1 %v39470_v48  ;;  %35838 = vmatpush3.bf16.msra.mxu0 %v38261_v28 }
0x34ad   : > { %35839 = vmatprep.subr.bf16.mxu0 %v39470_v48  ;;  %34542 = vmatprep.mubr.msk.f32.mxu0 %vm36944_vm2, %v39469_v23 }
0x34af   : > { %35793 = vmatpush3.bf16.msra.mxu1 %v39504_v59 }
0x34b0   : > { %35800 = vmatprep.subr.bf16.mxu1 %v39470_v48  ;;  %35841 = vmatpush3.bf16.msra.mxu0 %v38265_v18 }
0x34b1   : > { %35842 = vmatprep.subr.bf16.mxu0 %v39470_v48 }
0x34b2   : > { %34455 = vmatmul.mubr.f32.vlgmr.msra.gmra.mrb[68].mxu1 %v25316_v14  ;;  %v39047_v14 = vld [vmem:[%s200_s28] sm:$0xff] }
0x34b3   : > { %35802 = vmatpush3.bf16.msra.mxu1 %v39505_v3  ;;  %34476 = vmatprep.mubr.msk.f32.mxu1 %vm36944_vm2, %v39469_v23  ;;  %v26749_v27 = vsel %vm207_vm0, %v39047_v14, 0.0 }
0x34b4   : > { %35803 = vmatprep.subr.bf16.mxu1 %v39470_v48 }
0x34b7   : > { %35805 = vmatpush3.bf16.msra.mxu1 %v39506_v52 }
0x34b8   : > { %35806 = vmatprep.subr.bf16.mxu1 %v39470_v48 }
0x356d   : > { %v25413_v15 = vpop.f32.mrb[128].mxu0 }
0x356e   : > { %v34423_v9 = vpop.f32.mrb[129].mxu0 }
0x3575   : > { %v25570_v10 = vpop.f32.mrb[130].mxu0  ;;  %v25322_v47 = vpop.f32.mrb[64].mxu1 }
0x3576   : > { %v25323_v11 = vadd.f32 %v36841_v50, %v25322_v47  ;;  %v34445_v1 = vpop.f32.mrb[131].mxu0  ;;  %v34412_v2 = vpop.f32.mrb[65].mxu1 }
0x3578   : > { %v25414_v31 = vadd.f32 %v25413_v15, %v25323_v11 }
0x357d   : > { %v25493_v33 = vpop.f32.mrb[66].mxu1  ;;  %v25728_v34 = vpop.f32.mrb[132].mxu0 }
0x357e   : > { %v25494_v38 = vadd.f32 %v25493_v33, %v25414_v31  ;;  %v34434_v39 = vpop.f32.mrb[67].mxu1  ;;  %v34467_v40 = vpop.f32.mrb[133].mxu0 }
0x3580   : > { %v25571_v12 = vadd.f32 %v25570_v10, %v25494_v38 }
0x3585   : > { %v25653_v16 = vpop.f32.mrb[68].mxu1 }
0x3586   : > { %v25654_v55 = vadd.f32 %v25653_v16, %v25571_v12  ;;  %v34456_v20 = vpop.f32.mrb[69].mxu1 }
0x3588   : > { %v25729_v57 = vadd.f32 %v25728_v34, %v25654_v55 }
0x358a   : > { %v39004_v42 = vadd.f32 %v25729_v57, %v38698_v51 }
0x358c   : > { %v25733_v60 = vsel %vm207_vm0, %v39004_v42, 0.0 }
0x358d   : > { %25734 = vadd.xlane.f32.xlu1 %v25733_v60 }
0x3591   : > { %26750 = vadd.xlane.f32.xlu1 %v26749_v27 }
0x361a   : > { %v25735_v22 = vpop.xlane.xlu1 %25734 }
0x361b   : > { %v25736_v46 = vmul.f32 0.03125, %v25735_v22 }
0x361d   : > { %v25737_v7 = vsub.f32 %v39004_v42, %v25736_v46 }
0x361f   : > { %v25738_v63 = vmul.f32 %v25737_v7, %v25737_v7 }
0x3621   : > { %v25739_v25 = vsel %vm207_vm0, %v25738_v63, 0.0 }
0x3622   : > { %25740 = vadd.xlane.f32.xlu0 %v25739_v25 }
0x36af   : > { %v25741_v19 = vpop.xlane.xlu0 %25740 }
0x36b0   : > { %v25742_v30 = vmul.f32 0.03125, %v25741_v19 }
0x36b2   : > { %v25743_v36 = vadd.f32 1e-05, %v25742_v30  ;;  %v26764_v30 = vld [vmem:[#allocation2 + $0x210] sm:$0xff] }
0x36b4   : > { %36815 = vrsqrt.f32 %v25743_v36 }
0x36be   : > { %v36816_v45 = vpop.eup %36815 }
0x36bf   : > { %v25745_v58 = vmul.f32 %v36816_v45, %v25737_v7 }
0x36c1   : > { %v25747_v51 = vsel %vm207_vm0, %v25745_v58, 0  ;;  %v26781_v58 = vand.u32 4294901760, %v26764_v30 }
0x36c2   : > { %v25818_v17 = vand.u32 4294901760, %v25747_v51 }
0x36c4   : > { %v25819_v37 = vsub.f32 %v25747_v51, %v25818_v17 }
0x36c6   : > { %v25820_v32 = vand.u32 4294901760, %v25819_v37 }
0x36c8   : > { %v25821_v4 = vsub.f32 %v25819_v37, %v25820_v32 }
0x36ca   : > { %v25822_v8 = vand.u32 4294901760, %v25821_v4  ;;  %v39088_v4 = vsub.f32 %v26764_v30, %v26781_v58 }
0x36cc   : > { %34477 = vmatmul.mubr.f32.vlgmr.msra.gmra.mrb[70].mxu1 %v25822_v8 }
0x36cd   : > { %35808 = vmatpush3.bf16.msra.mxu1 %v39507_v56  ;;  %34487 = vmatprep.mubr.msk.f32.mxu1 %vm36944_vm2, %v39469_v23 }
0x36ce   : > { %35809 = vmatprep.subr.bf16.mxu1 %v39470_v48 }
0x36d1   : > { %35811 = vmatpush3.bf16.msra.mxu1 %v39508_v13 }
0x36d2   : > { %35812 = vmatprep.subr.bf16.mxu1 %v39470_v48 }
0x36d4   : > { %34488 = vmatmul.mubr.f32.vlgmr.msra.gmra.mrb[70].mxu1 %v25818_v17 }
0x36d5   : > { %35814 = vmatpush3.bf16.msra.mxu1 %v39509_v0  ;;  %34498 = vmatprep.mubr.msk.f32.mxu1 %vm36944_vm2, %v39469_v23 }
0x36d6   : > { %35815 = vmatprep.subr.bf16.mxu1 %v39470_v48 }
0x36d9   : > { %35817 = vmatpush3.bf16.msra.mxu1 %v39510_v29  ;;  %v26870_v29 = vand.u32 4294901760, %v39088_v4 }
0x36da   : > { %35818 = vmatprep.subr.bf16.mxu1 %v39470_v48 }
0x36dc   : > { %34499 = vmatmul.mubr.f32.vlgmr.msra.gmra.mrb[70].mxu1 %v25819_v37 }
0x36dd   : > { %35820 = vmatpush3.bf16.msra.mxu1 %v39505_v3  ;;  %34509 = vmatprep.mubr.msk.f32.mxu1 %vm36944_vm2, %v39469_v23 }
0x36de   : > { %35821 = vmatprep.subr.bf16.mxu1 %v39470_v48 }
0x36e1   : > { %35823 = vmatpush3.bf16.msra.mxu1 %v39506_v52 }
0x36e2   : > { %35824 = vmatprep.subr.bf16.mxu1 %v39470_v48 }
0x36e4   : > { %34510 = vmatmul.mubr.f32.vlgmr.msra.gmra.mrb[70].mxu1 %v25820_v32 }
0x36e5   : > { %35826 = vmatpush3.bf16.msra.mxu1 %v39511_v24  ;;  %34520 = vmatprep.mubr.msk.f32.mxu1 %vm36944_vm2, %v39469_v23 }
0x36e6   : > { %35827 = vmatprep.subr.bf16.mxu1 %v39470_v48 }
0x36e9   : > { %35829 = vmatpush3.bf16.msra.mxu1 %v39512_v5 }
0x36ea   : > { %35830 = vmatprep.subr.bf16.mxu1 %v39470_v48 }
0x36ec   : > { %34521 = vmatmul.mubr.f32.vlgmr.msra.gmra.mrb[70].mxu1 %v25818_v17 }
0x36ed   : > { %35832 = vmatpush3.bf16.msra.mxu1 %v39505_v3  ;;  %34531 = vmatprep.mubr.msk.f32.mxu1 %vm36944_vm2, %v39469_v23 }
0x36ee   : > { %35833 = vmatprep.subr.bf16.mxu1 %v39470_v48 }
0x36f1   : > { %35835 = vmatpush3.bf16.msra.mxu1 %v39506_v52 }
0x36f2   : > { %35872 = vmatprep.subr.bf16.mxu1 %v39470_v48 }
0x36f4   : > { %34532 = vmatmul.mubr.f32.vlgmr.msra.gmra.mrb[70].mxu1 %v25818_v17 }
0x36f5   : > { %34608 = vmatprep.mubr.msk.f32.mxu1 %vm36944_vm2, %v39469_v23 }
0x37c7   : > { %v26230_v43 = vpop.f32.mrb[70].mxu1 }
0x37c8   : > { %v36106_v53 = vadd.f32 %v36842_v35, %v26230_v43  ;;  %v34533_v44 = vpop.f32.mrb[71].mxu1  ;;  %v26871_v35 = vsub.f32 %v39088_v4, %v26870_v29 }
0x37ca   : > { %v26235_v41 = vmul.f32 0.70710677, %v36106_v53  ;;  %v26234_v20 = vmul.f32 0.5, %v36106_v53 }
0x37cc   : > { %v26236_v49 = vand.u32 2147483647, %v26235_v41  ;;  %vm26255_vm9 = vcmp.ge.f32.partialorder %v26235_v41, 0.0 }
0x37ce   : > { %v26237_v59 = vmul.f32 0.3275911, %v26236_v49  ;;  %v26249_v52 = vsub.f32 0.0, %v26236_v49 }
0x37d0   : > { %v26238_v3 = vadd.f32 1.0, %v26237_v59  ;;  %v26250_v9 = vmul.f32 %v26249_v52, %v26236_v49 }
0x37d2   : > { %36817 = vrcp.f32 %v26238_v3  ;;  %v26251_v50 = vmul.f32 1.442695, %v26250_v9  ;;  %v26872_v3 = vand.u32 4294901760, %v26871_v35 }
0x37d4   : > { %36819 = vpow2.f32 %v26251_v50 }
0x37dc   : > { %v36818_v15 = vpop.eup %36817 }
0x37dd   : > { %v26240_v10 = vmul.f32 1.0614054, %v36818_v15 }
0x37de   : > { %v36820_v39 = vpop.eup %36819 }
0x37df   : > { %v26241_v47 = vadd.f32 -1.4531521, %v26240_v10 }
0x37e1   : > { %v26242_v11 = vmul.f32 %v36818_v15, %v26241_v47 }
0x37e3   : > { %v26243_v1 = vadd.f32 1.4214138, %v26242_v11 }
0x37e5   : > { %v26244_v2 = vmul.f32 %v36818_v15, %v26243_v1 }
0x37e7   : > { %v26245_v31 = vadd.f32 -0.28449672, %v26244_v2 }
0x37e9   : > { %v26246_v33 = vmul.f32 %v36818_v15, %v26245_v31  ;;  %v36843_v31 = vld [vmem:[#allocation2 + $0x1f8] ss:$0 sm:$0xff] }
0x37eb   : > { %v26247_v34 = vadd.f32 0.2548296, %v26246_v33 }
0x37ed   : > { %v26248_v38 = vmul.f32 %v36818_v15, %v26247_v34 }
0x37ef   : > { %v26253_v40 = vmul.f32 %v36820_v39, %v26248_v38 }
0x37f1   : > { %v26254_v12 = vsub.f32 1.0, %v26253_v40 }
0x37f3   : > { %v26256_v16 = vsub.f32 0.0, %v26254_v12 }
0x37f5   : > { %v26257_v55 = vsel %vm26255_vm9, %v26254_v12, %v26256_v16 }
0x37f6   : > { %v26258_v57 = vadd.f32 1.0, %v26257_v55 }
0x37f8   : > { %v26259_v60 = vmul.f32 %v26258_v57, %v26234_v20 }
0x37fa   : > { %v26261_v22 = vsel %vm207_vm0, %v26259_v60, 0 }
0x37fb   : > { %v26332_v46 = vand.u32 4294901760, %v26261_v22 }
0x37fd   : > { %v26333_v7 = vsub.f32 %v26261_v22, %v26332_v46 }
0x37ff   : > { %v26334_v63 = vand.u32 4294901760, %v26333_v7 }
0x3801   : > { %v26335_v25 = vsub.f32 %v26333_v7, %v26334_v63 }
0x3803   : > { %v26336_v19 = vand.u32 4294901760, %v26335_v25 }
0x3805   : > { %34543 = vmatmul.mubr.f32.vlgmr.msra.gmra.mrb[134].mxu0 %v26336_v19 }
0x3806   : > { %35844 = vmatpush3.bf16.msra.mxu0 %v38269_v61  ;;  %34553 = vmatprep.mubr.msk.f32.mxu0 %vm36944_vm2, %v39469_v23 }
0x3807   : > { %35845 = vmatprep.subr.bf16.mxu0 %v39470_v48 }
0x380a   : > { %35847 = vmatpush3.bf16.msra.mxu0 %v38271_v21  ;;  %v26751_v21 = vpop.xlane.xlu1 %26750 }
0x380b   : > { %35848 = vmatprep.subr.bf16.mxu0 %v39470_v48 }
0x380d   : > { %34554 = vmatmul.mubr.f32.vlgmr.msra.gmra.mrb[136].mxu0 %v26332_v46 }
0x380e   : > { %35850 = vmatpush3.bf16.msra.mxu0 %v38273_v6  ;;  %34564 = vmatprep.mubr.msk.f32.mxu0 %vm36944_vm2, %v39469_v23  ;;  %v26752_v6 = vmul.f32 0.03125, %v26751_v21 }
0x380f   : > { %35851 = vmatprep.subr.bf16.mxu0 %v39470_v48 }
0x3810   : > { %v26753_v61 = vsub.f32 %v39047_v14, %v26752_v6 }
0x3812   : > { %35853 = vmatpush3.bf16.msra.mxu0 %v38275_v54  ;;  %v26754_v54 = vmul.f32 %v26753_v61, %v26753_v61 }
0x3813   : > { %35854 = vmatprep.subr.bf16.mxu0 %v39470_v48 }
0x3815   : > { %34565 = vmatmul.mubr.f32.vlgmr.msra.gmra.mrb[138].mxu0 %v26333_v7 }
0x3816   : > { %35856 = vmatpush3.bf16.msra.mxu0 %v38261_v28  ;;  %34575 = vmatprep.mubr.msk.f32.mxu0 %vm36944_vm2, %v39469_v23 }
0x3817   : > { %35857 = vmatprep.subr.bf16.mxu0 %v39470_v48 }
0x381a   : > { %35859 = vmatpush3.bf16.msra.mxu0 %v38265_v18 }
0x381b   : > { %35860 = vmatprep.subr.bf16.mxu0 %v39470_v48 }
0x381d   : > { %34576 = vmatmul.mubr.f32.vlgmr.msra.gmra.mrb[140].mxu0 %v26334_v63 }
0x381e   : > { %35862 = vmatpush3.bf16.msra.mxu0 %v38277_v26  ;;  %34586 = vmatprep.mubr.msk.f32.mxu0 %vm36944_vm2, %v39469_v23  ;;  %v26762_v26 = vld [vmem:[#allocation2 + $0x200] sm:$0xff] }
0x381f   : > { %35863 = vmatprep.subr.bf16.mxu0 %v39470_v48  ;;  %v26775_v36 = vand.u32 4294901760, %v26762_v26 }
0x3821   : > { %v26855_v37 = vsub.f32 %v26762_v26, %v26775_v36 }
0x3822   : > { %35865 = vmatpush3.bf16.msra.mxu0 %v38279_v62  ;;  %v26763_v62 = vld [vmem:[#allocation2 + $0x208] sm:$0xff] }
0x3823   : > { %35866 = vmatprep.subr.bf16.mxu0 %v39470_v48  ;;  %v26778_v45 = vand.u32 4294901760, %v26763_v62  ;;  %v26856_v13 = vand.u32 4294901760, %v26855_v37 }
0x3825   : > { %34587 = vmatmul.mubr.f32.vlgmr.msra.gmra.mrb[142].mxu0 %v26332_v46  ;;  %v39086_v17 = vpack.c.bf16 %v26778_v45, %v26775_v36  ;;  %v26862_v32 = vsub.f32 %v26763_v62, %v26778_v45  ;;  %v26857_v27 = vsub.f32 %v26855_v37, %v26856_v13 }
0x3826   : > { %35868 = vmatpush3.bf16.msra.mxu0 %v38261_v28  ;;  %34597 = vmatprep.mubr.msk.f32.mxu0 %vm36944_vm2, %v39469_v23  ;;  %v26755_v28 = vsel %vm207_vm0, %v26754_v54, 0.0 }
0x3827   : > { %35869 = vmatprep.subr.bf16.mxu0 %v39470_v48  ;;  %26756 = vadd.xlane.f32.xlu0 %v26755_v28  ;;  %v26863_v0 = vand.u32 4294901760, %v26862_v32  ;;  %v35885_v24 = vpack.c.bf16 %v26862_v32, %v26855_v37  ;;  %v26858_v49 = vand.u32 4294901760, %v26857_v27  ;;  %v27274_v37 = vld [vmem:[#allocation2 + $0x238] sm:$0xff] }
0x3828   : > { %35874 = vmatpush3.bf16.msra.mxu1 %v39086_v17 }
0x3829   : > { %35875 = vmatprep.subr.bf16.mxu1 %v39470_v48  ;;  %v26864_v43 = vsub.f32 %v26862_v32, %v26863_v0  ;;  %v39097_v53 = vpack.c.bf16 %v26863_v0, %v26856_v13 }
0x382a   : > { %35871 = vmatpush3.bf16.msra.mxu0 %v38265_v18  ;;  %v26765_v18 = vld [vmem:[#allocation2 + $0x218] sm:$0xff] }
0x382b   : > { %35908 = vmatprep.subr.bf16.mxu0 %v39470_v48  ;;  %v26784_v51 = vand.u32 4294901760, %v26765_v18  ;;  %v26865_v59 = vand.u32 4294901760, %v26864_v43 }
0x382d   : > { %34598 = vmatmul.mubr.f32.vlgmr.msra.gmra.mrb[144].mxu0 %v26332_v46  ;;  %v39090_v8 = vpack.c.bf16 %v26784_v51, %v26781_v58  ;;  %v26876_v56 = vsub.f32 %v26765_v18, %v26784_v51  ;;  %v35879_v15 = vpack.c.bf16 %v26865_v59, %v26858_v49  ;;  %v27272_v51 = vld [vmem:[#allocation2 + $0x228] sm:$0xff] }
0x382e   : > { %34674 = vmatprep.mubr.msk.f32.mxu0 %vm36944_vm2, %v39469_v23  ;;  %v27285_v32 = vand.u32 4294901760, %v27272_v51 }
0x382f   : > { %v26877_v5 = vand.u32 4294901760, %v26876_v56  ;;  %v35888_v14 = vpack.c.bf16 %v26876_v56, %v39088_v4  ;;  %35877 = vmatpush3.bf16.msra.mxu1 %v39090_v8 }
0x3830   : > { %35878 = vmatprep.subr.bf16.mxu1 %v39470_v48 }
0x3831   : > { %v26878_v44 = vsub.f32 %v26876_v56, %v26877_v5  ;;  %v39099_v41 = vpack.c.bf16 %v26877_v5, %v26870_v29  ;;  %v27275_v56 = vld [vmem:[#allocation2 + $0x240] sm:$0xff]  ;;  %v27365_v29 = vsub.f32 %v27272_v51, %v27285_v32 }
0x3832   : > { %v27294_v13 = vand.u32 4294901760, %v27275_v56 }
0x3833   : > { %v26879_v52 = vand.u32 4294901760, %v26878_v44  ;;  %v27366_v43 = vand.u32 4294901760, %v27365_v29 }
0x3835   : > { %v35882_v9 = vpack.c.bf16 %v26879_v52, %v26872_v3 }
0x38b4   : > { %v26757_v10 = vpop.xlane.xlu0 %26756 }
0x38b5   : > { %v26758_v47 = vmul.f32 0.03125, %v26757_v10 }
0x38b7   : > { %v26759_v50 = vadd.f32 1e-05, %v26758_v47 }
0x38b9   : > { %36821 = vrsqrt.f32 %v26759_v50 }
0x38c3   : > { %v36822_v2 = vpop.eup %36821 }
0x38c4   : > { %v26761_v34 = vmul.f32 %v36822_v2, %v26753_v61 }
0x38c6   : > { %v26772_v12 = vsel %vm207_vm0, %v26761_v34, 0 }
0x38c7   : > { %v26843_v16 = vand.u32 4294901760, %v26772_v12 }
0x38c9   : > { %v26844_v55 = vsub.f32 %v26772_v12, %v26843_v16 }
0x38cb   : > { %v26845_v20 = vand.u32 4294901760, %v26844_v55 }
0x38cd   : > { %v26846_v60 = vsub.f32 %v26844_v55, %v26845_v20 }
0x38cf   : > { %v26847_v7 = vand.u32 4294901760, %v26846_v60 }
0x38d1   : > { %34609 = vmatmul.mubr.f32.vlgmr.msra.gmra.mrb[72].mxu1 %v26847_v7  ;;  %v30833_v7 = vld [vmem:[#allocation2 + $0x220] ss:$0 sm:$0xff] }
0x38d2   : > { %35880 = vmatpush3.bf16.msra.mxu1 %v35879_v15  ;;  %34619 = vmatprep.mubr.msk.f32.mxu1 %vm36944_vm2, %v39469_v23 }
0x38d3   : > { %35881 = vmatprep.subr.bf16.mxu1 %v39470_v48 }
0x38d6   : > { %35883 = vmatpush3.bf16.msra.mxu1 %v35882_v9 }
0x38d7   : > { %35884 = vmatprep.subr.bf16.mxu1 %v39470_v48 }
0x38d8   : > { %v26338_v11 = vpop.f32.mrb[134].mxu0 }
0x38d9   : > { %v34544_v1 = vpop.f32.mrb[135].mxu0  ;;  %v26339_v33 = vadd.f32 %v36843_v31, %v26338_v11  ;;  %34620 = vmatmul.mubr.f32.vlgmr.msra.gmra.mrb[72].mxu1 %v26843_v16 }
0x38da   : > { %35886 = vmatpush3.bf16.msra.mxu1 %v35885_v24  ;;  %34630 = vmatprep.mubr.msk.f32.mxu1 %vm36944_vm2, %v39469_v23 }
0x38db   : > { %35887 = vmatprep.subr.bf16.mxu1 %v39470_v48 }
0x38de   : > { %35889 = vmatpush3.bf16.msra.mxu1 %v35888_v14  ;;  %v27386_v14 = vsub.f32 %v27275_v56, %v27294_v13 }
0x38df   : > { %35890 = vmatprep.subr.bf16.mxu1 %v39470_v48 }
0x38e0   : > { %v26429_v38 = vpop.f32.mrb[136].mxu0  ;;  %v27387_v3 = vand.u32 4294901760, %v27386_v14 }
0x38e1   : > { %v26430_v39 = vadd.f32 %v26429_v38, %v26339_v33  ;;  %v34555_v40 = vpop.f32.mrb[137].mxu0  ;;  %34631 = vmatmul.mubr.f32.vlgmr.msra.gmra.mrb[72].mxu1 %v26844_v55 }
0x38e2   : > { %35892 = vmatpush3.bf16.msra.mxu1 %v39086_v17  ;;  %34641 = vmatprep.mubr.msk.f32.mxu1 %vm36944_vm2, %v39469_v23  ;;  %v27388_v9 = vsub.f32 %v27386_v14, %v27387_v3 }
0x38e3   : > { %35893 = vmatprep.subr.bf16.mxu1 %v39470_v48 }
0x38e4   : > { %v27389_v47 = vand.u32 4294901760, %v27388_v9  ;;  %v27769_v9 = vld [vmem:[#allocation2 + $0x250] sm:$0xff] }
0x38e6   : > { %35895 = vmatpush3.bf16.msra.mxu1 %v39090_v8 }
0x38e7   : > { %35896 = vmatprep.subr.bf16.mxu1 %v39470_v48 }
0x38e8   : > { %v26509_v57 = vpop.f32.mrb[138].mxu0 }
0x38e9   : > { %v26510_v22 = vadd.f32 %v26509_v57, %v26430_v39  ;;  %v34566_v46 = vpop.f32.mrb[139].mxu0  ;;  %34642 = vmatmul.mubr.f32.vlgmr.msra.gmra.mrb[72].mxu1 %v26845_v20 }
0x38ea   : > { %35898 = vmatpush3.bf16.msra.mxu1 %v39097_v53  ;;  %34652 = vmatprep.mubr.msk.f32.mxu1 %vm36944_vm2, %v39469_v23  ;;  %v27367_v53 = vsub.f32 %v27365_v29, %v27366_v43 }
0x38eb   : > { %35899 = vmatprep.subr.bf16.mxu1 %v39470_v48 }
0x38ee   : > { %35901 = vmatpush3.bf16.msra.mxu1 %v39099_v41  ;;  %v27368_v41 = vand.u32 4294901760, %v27367_v53 }
0x38ef   : > { %35902 = vmatprep.subr.bf16.mxu1 %v39470_v48 }
0x38f0   : > { %v26586_v63 = vpop.f32.mrb[140].mxu0 }
0x38f1   : > { %v26587_v25 = vadd.f32 %v26586_v63, %v26510_v22  ;;  %v34577_v19 = vpop.f32.mrb[141].mxu0  ;;  %34653 = vmatmul.mubr.f32.vlgmr.msra.gmra.mrb[72].mxu1 %v26843_v16 }
0x38f2   : > { %35904 = vmatpush3.bf16.msra.mxu1 %v39086_v17  ;;  %34663 = vmatprep.mubr.msk.f32.mxu1 %vm36944_vm2, %v39469_v23  ;;  %v27273_v17 = vld [vmem:[#allocation2 + $0x230] sm:$0xff] }
0x38f3   : > { %35905 = vmatprep.subr.bf16.mxu1 %v39470_v48  ;;  %v27288_v4 = vand.u32 4294901760, %v27273_v17 }
0x38f5   : > { %v39135_v0 = vpack.c.bf16 %v27288_v4, %v27285_v32  ;;  %v27372_v24 = vsub.f32 %v27273_v17, %v27288_v4 }
0x38f6   : > { %35907 = vmatpush3.bf16.msra.mxu1 %v39090_v8  ;;  %v27291_v8 = vand.u32 4294901760, %v27274_v37 }
0x38f7   : > { %34732 = vmatprep.subr.mxu1 %v39469_v23  ;;  %35910 = vmatpush3.bf16.msra.mxu0 %v39135_v0  ;;  %v27373_v35 = vand.u32 4294901760, %v27372_v24  ;;  %v35921_v11 = vpack.c.bf16 %v27372_v24, %v27365_v29 }
0x38f8   : > { %v26669_v21 = vpop.f32.mrb[142].mxu0  ;;  %v27379_v5 = vsub.f32 %v27274_v37, %v27291_v8  ;;  %v39138_v27 = vpack.c.bf16 %v27294_v13, %v27291_v8  ;;  %35911 = vmatprep.subr.bf16.mxu0 %v39470_v48 }
0x38f9   : > { %v26670_v6 = vadd.f32 %v26669_v21, %v26587_v25  ;;  %v34588_v61 = vpop.f32.mrb[143].mxu0  ;;  %34664 = vmatmul.mubr.f32.vlgmr.msra.gmra.mrb[72].mxu1 %v26843_v16  ;;  %v27374_v44 = vsub.f32 %v27372_v24, %v27373_v35  ;;  %v35933_v2 = vpack.c.bf16 %v27373_v35, %v27366_v43 }
0x38fa   : > { %34734 = vmatprep.mubr.msk.f32.mxu1 %vm36944_vm2, %v39469_v23  ;;  %v27380_v59 = vand.u32 4294901760, %v27379_v5  ;;  %v35924_v1 = vpack.c.bf16 %v27386_v14, %v27379_v5 }
0x38fb   : > { %35913 = vmatpush3.bf16.msra.mxu0 %v39138_v27  ;;  %v27375_v49 = vand.u32 4294901760, %v27374_v44 }
0x38fc   : > { %35914 = vmatprep.subr.bf16.mxu0 %v39470_v48  ;;  %v27381_v15 = vsub.f32 %v27379_v5, %v27380_v59  ;;  %v35936_v31 = vpack.c.bf16 %v27387_v3, %v27380_v59 }
0x38fd   : > { %v35915_v52 = vpack.c.bf16 %v27375_v49, %v27368_v41 }
0x38fe   : > { %v27382_v10 = vand.u32 4294901760, %v27381_v15 }
0x3900   : > { %v26744_v54 = vpop.f32.mrb[144].mxu0  ;;  %v35918_v50 = vpack.c.bf16 %v27389_v47, %v27382_v10  ;;  %v27770_v10 = vld [vmem:[#allocation2 + $0x258] sm:$0xff]  ;;  %v28697_v47 = vand.u32 4294901760, %v27769_v9 }
0x3901   : > { %v26745_v28 = vadd.f32 %v26744_v54, %v26670_v6  ;;  %v34599_v26 = vpop.f32.mrb[145].mxu0  ;;  %v30834_v6 = vld [vmem:[#allocation2 + $0x248] ss:$0 sm:$0xff] }
0x3903   : > { %v26748_v62 = vadd.f32 %v26745_v28, %v39004_v42 }
0x3905   : > { %v27259_v30 = vsel %vm207_vm0, %v26748_v62, 0.0 }
0x3906   : > { %27260 = vadd.xlane.f32.xlu1 %v27259_v30 }
0x3993   : > { %v27261_v42 = vpop.xlane.xlu1 %27260 }
0x3994   : > { %v27262_v36 = vmul.f32 0.03125, %v27261_v42 }
0x3996   : > { %v27263_v45 = vsub.f32 %v26748_v62, %v27262_v36 }
0x3998   : > { %v27264_v18 = vmul.f32 %v27263_v45, %v27263_v45 }
0x399a   : > { %v27265_v58 = vsel %vm207_vm0, %v27264_v18, 0.0 }
0x399b   : > { %27266 = vadd.xlane.f32.xlu1 %v27265_v58 }
0x39cc   : > { %v27255_v33 = vpop.f32.mrb[72].mxu1 }
0x39cd   : > { %v34665_v34 = vpop.f32.mrb[73].mxu1  ;;  %v36107_v63 = vadd.f32 %v30833_v7, %v27255_v33  ;;  %v27772_v33 = vld [vmem:[#allocation2 + $0x268] sm:$0xff] }
0x39cf   : > { %v27774_v25 = vsel %vm207_vm0, %v36107_v63, 0 }
0x39d0   : > { %v27845_v19 = vand.u32 4294901760, %v27774_v25 }
0x39d2   : > { %v27846_v21 = vsub.f32 %v27774_v25, %v27845_v19 }
0x39d4   : > { %v27847_v61 = vand.u32 4294901760, %v27846_v21 }
0x39d6   : > { %v27848_v30 = vsub.f32 %v27846_v21, %v27847_v61 }
0x3a28   : > { %v27267_v38 = vpop.xlane.xlu1 %27266 }
0x3a29   : > { %v27268_v39 = vmul.f32 0.03125, %v27267_v38  ;;  %v28706_v38 = vand.u32 4294901760, %v27772_v33 }
0x3a2b   : > { %v27269_v40 = vadd.f32 1e-05, %v27268_v39 }
0x3a2d   : > { %36823 = vrsqrt.f32 %v27269_v40 }
0x3a37   : > { %v36824_v12 = vpop.eup %36823 }
0x3a38   : > { %v27271_v16 = vmul.f32 %v36824_v12, %v27263_v45  ;;  %v27849_v45 = vand.u32 4294901760, %v27848_v30 }
0x3a3a   : > { %v27282_v55 = vsel %vm207_vm0, %v27271_v16, 0 }
0x3a3b   : > { %v27353_v20 = vand.u32 4294901760, %v27282_v55 }
0x3a3d   : > { %v27354_v57 = vsub.f32 %v27282_v55, %v27353_v20  ;;  %v28798_v55 = vsub.f32 %v27772_v33, %v28706_v38 }
0x3a3f   : > { %v27355_v60 = vand.u32 4294901760, %v27354_v57 }
0x3a41   : > { %v27356_v22 = vsub.f32 %v27354_v57, %v27355_v60 }
0x3a43   : > { %v27357_v46 = vand.u32 4294901760, %v27356_v22 }
0x3a45   : > { %34675 = vmatmul.mubr.f32.vlgmr.msra.gmra.mrb[146].mxu0 %v27357_v46  ;;  %v28799_v46 = vand.u32 4294901760, %v28798_v55 }
0x3a46   : > { %35916 = vmatpush3.bf16.msra.mxu0 %v35915_v52  ;;  %34685 = vmatprep.mubr.msk.f32.mxu0 %vm36944_vm2, %v39469_v23 }
0x3a47   : > { %35917 = vmatprep.subr.bf16.mxu0 %v39470_v48  ;;  %v28800_v25 = vsub.f32 %v28798_v55, %v28799_v46 }
0x3a4a   : > { %35919 = vmatpush3.bf16.msra.mxu0 %v35918_v50  ;;  %v28700_v50 = vand.u32 4294901760, %v27770_v10 }
0x3a4b   : > { %35920 = vmatprep.subr.bf16.mxu0 %v39470_v48 }
0x3a4d   : > { %34686 = vmatmul.mubr.f32.vlgmr.msra.gmra.mrb[146].mxu0 %v27353_v20 }
0x3a4e   : > { %35922 = vmatpush3.bf16.msra.mxu0 %v35921_v11  ;;  %34696 = vmatprep.mubr.msk.f32.mxu0 %vm36944_vm2, %v39469_v23  ;;  %v39212_v11 = vpack.c.bf16 %v28700_v50, %v28697_v47 }
0x3a4f   : > { %35923 = vmatprep.subr.bf16.mxu0 %v39470_v48 }
0x3a52   : > { %35925 = vmatpush3.bf16.msra.mxu0 %v35924_v1  ;;  %v28777_v1 = vsub.f32 %v27769_v9, %v28697_v47 }
0x3a53   : > { %35926 = vmatprep.subr.bf16.mxu0 %v39470_v48 }
0x3a54   : > { %v28778_v39 = vand.u32 4294901760, %v28777_v1 }
0x3a55   : > { %34697 = vmatmul.mubr.f32.vlgmr.msra.gmra.mrb[146].mxu0 %v27354_v57 }
0x3a56   : > { %35928 = vmatpush3.bf16.msra.mxu0 %v39135_v0  ;;  %34707 = vmatprep.mubr.msk.f32.mxu0 %vm36944_vm2, %v39469_v23 }
0x3a57   : > { %35929 = vmatprep.subr.bf16.mxu0 %v39470_v48 }
0x3a5a   : > { %35931 = vmatpush3.bf16.msra.mxu0 %v39138_v27 }
0x3a5b   : > { %35932 = vmatprep.subr.bf16.mxu0 %v39470_v48 }
0x3a5d   : > { %34708 = vmatmul.mubr.f32.vlgmr.msra.gmra.mrb[146].mxu0 %v27355_v60 }
0x3a5e   : > { %35934 = vmatpush3.bf16.msra.mxu0 %v35933_v2  ;;  %34718 = vmatprep.mubr.msk.f32.mxu0 %vm36944_vm2, %v39469_v23  ;;  %v28784_v2 = vsub.f32 %v27770_v10, %v28700_v50 }
0x3a5f   : > { %35935 = vmatprep.subr.bf16.mxu0 %v39470_v48 }
0x3a60   : > { %v28785_v40 = vand.u32 4294901760, %v28784_v2 }
0x3a62   : > { %35937 = vmatpush3.bf16.msra.mxu0 %v35936_v31  ;;  %v27771_v31 = vld [vmem:[#allocation2 + $0x260] sm:$0xff]  ;;  %v28786_v57 = vsub.f32 %v28784_v2, %v28785_v40 }
0x3a63   : > { %35938 = vmatprep.subr.bf16.mxu0 %v39470_v48  ;;  %v28703_v34 = vand.u32 4294901760, %v27771_v31 }
0x3a64   : > { %v28787_v7 = vand.u32 4294901760, %v28786_v57 }
0x3a65   : > { %34719 = vmatmul.mubr.f32.vlgmr.msra.gmra.mrb[146].mxu0 %v27353_v20  ;;  %v35948_v12 = vpack.c.bf16 %v28706_v38, %v28703_v34  ;;  %v28791_v16 = vsub.f32 %v27771_v31, %v28703_v34 }
0x3a66   : > { %35940 = vmatpush3.bf16.msra.mxu0 %v39135_v0  ;;  %34729 = vmatprep.mubr.msk.f32.mxu0 %vm36944_vm2, %v39469_v23 }
0x3a67   : > { %35941 = vmatprep.subr.bf16.mxu0 %v39470_v48  ;;  %v28792_v22 = vand.u32 4294901760, %v28791_v16 }
0x3a69   : > { %v28793_v63 = vsub.f32 %v28791_v16, %v28792_v22 }
0x3a6a   : > { %35943 = vmatpush3.bf16.msra.mxu0 %v39138_v27 }
0x3a6b   : > { %34762 = vmatprep.subr.mxu0 %v39469_v23 }
0x3a6d   : > { %34730 = vmatmul.mubr.f32.vlgmr.msra.gmra.mrb[146].mxu0 %v27353_v20  ;;  %v28779_v20 = vsub.f32 %v28777_v1, %v28778_v39 }
0x3a6e   : > { %34764 = vmatprep.mubr.msk.f32.mxu0 %vm36944_vm2, %v39469_v23 }
0x3a6f   : > { %v28780_v60 = vand.u32 4294901760, %v28779_v20 }
0x3b40   : > { %v27765_v54 = vpop.f32.mrb[146].mxu0 }
0x3b41   : > { %v36108_v28 = vadd.f32 %v30834_v6, %v27765_v54  ;;  %v34731_v26 = vpop.f32.mrb[147].mxu0  ;;  %v28801_v6 = vand.u32 4294901760, %v28800_v25  ;;  %v35957_v54 = vpack.c.bf16 %v28784_v2, %v28777_v1 }
0x3b42   : > { %v35969_v26 = vpack.c.bf16 %v28785_v40, %v28778_v39 }
0x3b43   : > { %v27777_v62 = vsel %vm207_vm0, %v36108_v28, 0 }
0x3b44   : > { %v27780_v42 = vand.u32 4294901760, %v27777_v62 }
0x3b46   : > { %v27857_v36 = vsub.f32 %v27777_v62, %v27780_v42  ;;  %34733 = vmatpush3.xpose.msra.mxu1 %v27780_v42  ;;  %v35972_v62 = vpack.c.bf16 %v28799_v46, %v28792_v22 }
0x3b47   : > { %34737 = vmatprep.subr.mxu1 %v39469_v23 }
0x3b48   : > { %v27858_v18 = vand.u32 4294901760, %v27857_v36 }
0x3b49   : > { %34735 = vmatmul.mubr.f32.vlgmr.msra.gmra.mrb[74].mxu1 %v27849_v45 }
0x3b4a   : > { %v27859_v58 = vsub.f32 %v27857_v36, %v27858_v18  ;;  %34739 = vmatprep.mubr.msk.f32.mxu1 %vm36944_vm2, %v39469_v23 }
0x3b4c   : > { %v27860_v51 = vand.u32 4294901760, %v27859_v58 }
0x3b4e   : > { %34738 = vmatpush3.xpose.msra.mxu1 %v27860_v51 }
0x3b4f   : > { %34742 = vmatprep.subr.mxu1 %v39469_v23 }
0x3b51   : > { %34740 = vmatmul.mubr.f32.vlgmr.msra.gmra.mrb[74].mxu1 %v27845_v19 }
0x3b52   : > { %34743 = vmatpush3.xpose.msra.mxu1 %v27857_v36  ;;  %34744 = vmatprep.mubr.msk.f32.mxu1 %vm36944_vm2, %v39469_v23 }
0x3b53   : > { %34747 = vmatprep.subr.mxu1 %v39469_v23 }
0x3b59   : > { %34745 = vmatmul.mubr.f32.vlgmr.msra.gmra.mrb[74].mxu1 %v27846_v21  ;;  %v28794_v21 = vand.u32 4294901760, %v28793_v63 }
0x3b5a   : > { %34748 = vmatpush3.xpose.msra.mxu1 %v27780_v42  ;;  %34749 = vmatprep.mubr.msk.f32.mxu1 %vm36944_vm2, %v39469_v23 }
0x3b5b   : > { %34752 = vmatprep.subr.mxu1 %v39469_v23 }
0x3b61   : > { %34750 = vmatmul.mubr.f32.vlgmr.msra.gmra.mrb[74].mxu1 %v27847_v61  ;;  %v35954_v61 = vpack.c.bf16 %v28801_v6, %v28794_v21 }
0x3b62   : > { %34753 = vmatpush3.xpose.msra.mxu1 %v27858_v18  ;;  %34754 = vmatprep.mubr.msk.f32.mxu1 %vm36944_vm2, %v39469_v23 }
0x3b63   : > { %34757 = vmatprep.subr.mxu1 %v39469_v23 }
0x3b69   : > { %34755 = vmatmul.mubr.f32.vlgmr.msra.gmra.mrb[74].mxu1 %v27845_v19 }
0x3b6a   : > { %34758 = vmatpush3.xpose.msra.mxu1 %v27780_v42  ;;  %34759 = vmatprep.mubr.msk.f32.mxu1 %vm36944_vm2, %v39469_v23 }
0x3b6b   : > { %35944 = vmatprep.subr.bf16.mxu1 %v39470_v48 }
0x3b71   : > { %34760 = vmatmul.mubr.f32.vlgmr.msra.gmra.mrb[74].mxu1 %v27845_v19  ;;  %v35951_v19 = vpack.c.bf16 %v28787_v7, %v28780_v60 }
0x3b72   : > { %34800 = vmatprep.mubr.msk.f32.mxu1 %vm36944_vm2, %v39469_v23  ;;  %35946 = vmatpush3.bf16.msra.mxu1 %v39212_v11 }
0x3b73   : > { %35947 = vmatprep.subr.bf16.mxu1 %v39470_v48 }
0x3b76   : > { %35949 = vmatpush3.bf16.msra.mxu1 %v35948_v12 }
0x3b77   : > { %35950 = vmatprep.subr.bf16.mxu1 %v39470_v48 }
0x3c44   : > { %v28221_v17 = vpop.f32.mrb[74].mxu1 }
0x3c45   : > { %v34761_v37 = vpop.f32.mrb[75].mxu1  ;;  %v28225_v32 = vsel %vm4440_vm4, %v28221_v17, -inf }
0x3c46   : > { %28226 = vmax.xlane.f32.xlu0 %v28225_v32  ;;  %v30835_v37 = vld [vmem:[#allocation2 + $0x270] ss:$0 sm:$0xff] }
0x3c5c   : > { %28236 = vrot.lane.b32.xlu0 %v36108_v28, %s36946_s24  ;;  %v35960_v28 = vpack.c.bf16 %v28798_v55, %v28791_v16  ;;  %s30816_s24 = sshll.u32 %s189_s19, 3 }
0x3c5d   : > { %s191_s30 = scalar_lea.vmem [#allocation5], %s30816_s24 }
0x3c5e   : > { %s30727_s4 = sshll.u32 %s191_s30, 4  ;;  %s39370_s4 = int_to_ptr.vmem [resolvable:$true] %s30727_s4 }
0x3c5f   : > { %s36872_s9 = scalar_lea.vmem %s39370_s4, 128  ;;  %p36879_p2 = scmp.lt.s32.totalorder %s39370_s4, %s36877_s10 }
0x3c60   : > { %p36873_p6 = scmp.ne.s32.totalorder %s39370_s4, %s36872_s9  ;;  %p36880_p3 = scmp.lt.s32.totalorder %s36878_s11, %s36872_s9 }
0x3c62   : > { %p36874_p10 = pnand %p36873_p6, %p39513_p9  ;;  %p36881_p4 = por %p36880_p3, %p36879_p2 }
0x3c64   : > { %p36875_p12 = pneg %p36874_p10 }
0x3c66   : > { %p36882_p7 = pnand %p36881_p4, %p36875_p12 }
0x3cd3   : > { %v28227_v4 = vpop.xlane.xlu0 %28226 }
0x3cd4   : > { %v28228_v56 = vsub.f32 %v28221_v17, %v28227_v4 }
0x3cd6   : > { %v28229_v8 = vmul.f32 1.442695, %v28228_v56 }
0x3cd7   : > { %v28237_v13 = vpop.permute.xlu0 %28236 }
0x3cd8   : > { %36825 = vpow2.f32 %v28229_v8  ;;  %v28243_v0 = vand.u32 4294901760, %v28237_v13 }
0x3cda   : > { %34763 = vmatpush3.msra.mxu0 %v28243_v0  ;;  %v28320_v27 = vsub.f32 %v28237_v13, %v28243_v0 }
0x3cdb   : > { %34767 = vmatprep.subr.mxu0 %v39469_v23 }
0x3cdc   : > { %v28321_v44 = vand.u32 4294901760, %v28320_v27 }
0x3cde   : > { %v28322_v59 = vsub.f32 %v28320_v27, %v28321_v44 }
0x3ce0   : > { %v28323_v15 = vand.u32 4294901760, %v28322_v59 }
0x3ce2   : > { %v36826_v29 = vpop.eup %36825 }
0x3ce3   : > { %v28231_v24 = vsel %vm4440_vm4, %v36826_v29, 0.0 }
0x3ce4   : > { %28232 = vadd.xlane.f32.xlu1 %v28231_v24 }
0x3d71   : > { %v28233_v5 = vpop.xlane.xlu1 %28232 }
0x3d72   : > { %36827 = vrcp.f32 %v28233_v5 }
0x3d7c   : > { %v36828_v14 = vpop.eup %36827 }
0x3d7d   : > { %v28235_v43 = vmul.f32 %v36828_v14, %v36826_v29  ;;  %v29194_v14 = vld [vmem:[#allocation2 + $0x278] sm:$0xff] }
0x3d7f   : > { %v28240_v35 = vsel %vm4440_vm4, %v28235_v43, 0  ;;  %v29196_v43 = vld [vmem:[#allocation2 + $0x288] sm:$0xff] }
0x3d80   : > { %v28308_v53 = vand.u32 4294901760, %v28240_v35 }
0x3d82   : > { %v28309_v41 = vsub.f32 %v28240_v35, %v28308_v53  ;;  %v29207_v35 = vand.u32 4294901760, %v29194_v14 }
0x3d84   : > { %v28310_v49 = vand.u32 4294901760, %v28309_v41 }
0x3d86   : > { %v28311_v3 = vsub.f32 %v28309_v41, %v28310_v49 }
0x3d88   : > { %v28312_v52 = vand.u32 4294901760, %v28311_v3  ;;  %v29287_v3 = vsub.f32 %v29194_v14, %v29207_v35 }
0x3d8a   : > { %34765 = vmatmul.mubr.f32.vlgmr.msra.gmra.mrb[148].mxu0 %v28312_v52  ;;  %v29288_v47 = vand.u32 4294901760, %v29287_v3 }
0x3d8b   : > { %34768 = vmatpush3.msra.mxu0 %v28323_v15  ;;  %34769 = vmatprep.mubr.msk.f32.mxu0 %vm36944_vm2, %v39469_v23 }
0x3d8c   : > { %34772 = vmatprep.subr.mxu0 %v39469_v23 }
0x3d92   : > { %34770 = vmatmul.mubr.f32.vlgmr.msra.gmra.mrb[148].mxu0 %v28308_v53 }
0x3d93   : > { %34773 = vmatpush3.msra.mxu0 %v28320_v27  ;;  %34774 = vmatprep.mubr.msk.f32.mxu0 %vm36944_vm2, %v39469_v23  ;;  %v29195_v27 = vld [vmem:[#allocation2 + $0x280] sm:$0xff] }
0x3d94   : > { %34777 = vmatprep.subr.mxu0 %v39469_v23 }
0x3d9a   : > { %34775 = vmatmul.mubr.f32.vlgmr.msra.gmra.mrb[148].mxu0 %v28309_v41  ;;  %v29213_v41 = vand.u32 4294901760, %v29196_v43 }
0x3d9b   : > { %34778 = vmatpush3.msra.mxu0 %v28243_v0  ;;  %34779 = vmatprep.mubr.msk.f32.mxu0 %vm36944_vm2, %v39469_v23 }
0x3d9c   : > { %34782 = vmatprep.subr.mxu0 %v39469_v23  ;;  %v29301_v15 = vsub.f32 %v29196_v43, %v29213_v41 }
0x3d9e   : > { %v29302_v33 = vand.u32 4294901760, %v29301_v15 }
0x3da0   : > { %v29303_v39 = vsub.f32 %v29301_v15, %v29302_v33 }
0x3da2   : > { %34780 = vmatmul.mubr.f32.vlgmr.msra.gmra.mrb[148].mxu0 %v28310_v49 }
0x3da3   : > { %34783 = vmatpush3.msra.mxu0 %v28321_v44  ;;  %34784 = vmatprep.mubr.msk.f32.mxu0 %vm36944_vm2, %v39469_v23  ;;  %v29197_v44 = vld [vmem:[#allocation2 + $0x290] sm:$0xff] }
0x3da4   : > { %34787 = vmatprep.subr.mxu0 %v39469_v23  ;;  %v29216_v49 = vand.u32 4294901760, %v29197_v44 }
0x3da6   : > { %v29308_v9 = vsub.f32 %v29197_v44, %v29216_v49  ;;  %v35984_v10 = vpack.c.bf16 %v29216_v49, %v29213_v41 }
0x3da8   : > { %v29309_v34 = vand.u32 4294901760, %v29308_v9  ;;  %v35996_v57 = vpack.c.bf16 %v29308_v9, %v29301_v15 }
0x3daa   : > { %34785 = vmatmul.mubr.f32.vlgmr.msra.gmra.mrb[148].mxu0 %v28308_v53  ;;  %v29310_v40 = vsub.f32 %v29308_v9, %v29309_v34  ;;  %v36008_v22 = vpack.c.bf16 %v29309_v34, %v29302_v33 }
0x3dab   : > { %34788 = vmatpush3.msra.mxu0 %v28243_v0  ;;  %34789 = vmatprep.mubr.msk.f32.mxu0 %vm36944_vm2, %v39469_v23 }
0x3dac   : > { %35980 = vmatprep.subr.bf16.mxu0 %v39470_v48  ;;  %v29311_v16 = vand.u32 4294901760, %v29310_v40 }
0x3db2   : > { %34790 = vmatmul.mubr.f32.vlgmr.msra.gmra.mrb[148].mxu0 %v28308_v53  ;;  %v29210_v53 = vand.u32 4294901760, %v29195_v27 }
0x3db3   : > { %34866 = vmatprep.mubr.msk.f32.mxu0 %vm36944_vm2, %v39469_v23 }
0x3db4   : > { %v39248_v59 = vpack.c.bf16 %v29210_v53, %v29207_v35  ;;  %v29294_v52 = vsub.f32 %v29195_v27, %v29210_v53 }
0x3db6   : > { %35982 = vmatpush3.bf16.msra.mxu0 %v39248_v59  ;;  %v29295_v50 = vand.u32 4294901760, %v29294_v52  ;;  %v35993_v20 = vpack.c.bf16 %v29294_v52, %v29287_v3 }
0x3db7   : > { %35983 = vmatprep.subr.bf16.mxu0 %v39470_v48 }
0x3db8   : > { %v29296_v1 = vsub.f32 %v29294_v52, %v29295_v50  ;;  %v36005_v60 = vpack.c.bf16 %v29295_v50, %v29288_v47 }
0x3dba   : > { %35985 = vmatpush3.bf16.msra.mxu0 %v35984_v10  ;;  %v29297_v31 = vand.u32 4294901760, %v29296_v1 }
0x3dbb   : > { %35986 = vmatprep.subr.bf16.mxu0 %v39470_v48 }
0x3e85   : > { %v28684_v30 = vpop.f32.mrb[148].mxu0 }
0x3e86   : > { %v28694_v42 = vsel %vm207_vm0, %v28684_v30, 0  ;;  %v34791_v36 = vpop.f32.mrb[149].mxu0  ;;  %v29718_v30 = vld [vmem:[#allocation2 + $0x2a8] sm:$0xff] }
0x3e87   : > { %v28765_v45 = vand.u32 4294901760, %v28694_v42  ;;  %v29733_v36 = vand.u32 4294901760, %v29718_v30 }
0x3e89   : > { %v28766_v18 = vsub.f32 %v28694_v42, %v28765_v45 }
0x3e8b   : > { %v28767_v58 = vand.u32 4294901760, %v28766_v18 }
0x3e8d   : > { %v28768_v51 = vsub.f32 %v28766_v18, %v28767_v58 }
0x3e8f   : > { %v28769_v17 = vand.u32 4294901760, %v28768_v51  ;;  %v29720_v51 = vld [vmem:[#allocation2 + $0x2b8] sm:$0xff] }
0x3e91   : > { %34801 = vmatmul.mubr.f32.vlgmr.msra.gmra.mrb[76].mxu1 %v28769_v17 }
0x3e92   : > { %35952 = vmatpush3.bf16.msra.mxu1 %v35951_v19  ;;  %34811 = vmatprep.mubr.msk.f32.mxu1 %vm36944_vm2, %v39469_v23 }
0x3e93   : > { %35953 = vmatprep.subr.bf16.mxu1 %v39470_v48 }
0x3e96   : > { %35955 = vmatpush3.bf16.msra.mxu1 %v35954_v61 }
0x3e97   : > { %35956 = vmatprep.subr.bf16.mxu1 %v39470_v48 }
0x3e99   : > { %34812 = vmatmul.mubr.f32.vlgmr.msra.gmra.mrb[76].mxu1 %v28765_v45 }
0x3e9a   : > { %35958 = vmatpush3.bf16.msra.mxu1 %v35957_v54  ;;  %34822 = vmatprep.mubr.msk.f32.mxu1 %vm36944_vm2, %v39469_v23 }
0x3e9b   : > { %35959 = vmatprep.subr.bf16.mxu1 %v39470_v48 }
0x3e9e   : > { %35961 = vmatpush3.bf16.msra.mxu1 %v35960_v28 }
0x3e9f   : > { %35962 = vmatprep.subr.bf16.mxu1 %v39470_v48 }
0x3ea1   : > { %34823 = vmatmul.mubr.f32.vlgmr.msra.gmra.mrb[76].mxu1 %v28766_v18  ;;  %v39280_v18 = vsub.f32 %v29718_v30, %v29733_v36 }
0x3ea2   : > { %35964 = vmatpush3.bf16.msra.mxu1 %v39212_v11  ;;  %34833 = vmatprep.mubr.msk.f32.mxu1 %vm36944_vm2, %v39469_v23 }
0x3ea3   : > { %35965 = vmatprep.subr.bf16.mxu1 %v39470_v48 }
0x3ea6   : > { %35967 = vmatpush3.bf16.msra.mxu1 %v35948_v12 }
0x3ea7   : > { %35968 = vmatprep.subr.bf16.mxu1 %v39470_v48 }
0x3ea9   : > { %34834 = vmatmul.mubr.f32.vlgmr.msra.gmra.mrb[76].mxu1 %v28767_v58  ;;  %v29719_v58 = vld [vmem:[#allocation2 + $0x2b0] sm:$0xff] }
0x3eaa   : > { %35970 = vmatpush3.bf16.msra.mxu1 %v35969_v26  ;;  %34844 = vmatprep.mubr.msk.f32.mxu1 %vm36944_vm2, %v39469_v23 }
0x3eab   : > { %35971 = vmatprep.subr.bf16.mxu1 %v39470_v48 }
0x3eae   : > { %35973 = vmatpush3.bf16.msra.mxu1 %v35972_v62  ;;  %v29717_v62 = vld [vmem:[#allocation2 + $0x2a0] sm:$0xff] }
0x3eaf   : > { %35974 = vmatprep.subr.bf16.mxu1 %v39470_v48  ;;  %v29730_v42 = vand.u32 4294901760, %v29717_v62 }
0x3eb1   : > { %34845 = vmatmul.mubr.f32.vlgmr.msra.gmra.mrb[76].mxu1 %v28765_v45 }
0x3eb2   : > { %35976 = vmatpush3.bf16.msra.mxu1 %v39212_v11  ;;  %34855 = vmatprep.mubr.msk.f32.mxu1 %vm36944_vm2, %v39469_v23  ;;  %v29289_v11 = vsub.f32 %v29287_v3, %v29288_v47  ;;  %v30836_v47 = vld [vmem:[#allocation2 + $0x298] ss:$0 sm:$0xff] }
0x3eb3   : > { %35977 = vmatprep.subr.bf16.mxu1 %v39470_v48 }
0x3eb4   : > { %v29290_v2 = vand.u32 4294901760, %v29289_v11 }
0x3eb6   : > { %35979 = vmatpush3.bf16.msra.mxu1 %v35948_v12  ;;  %v35987_v38 = vpack.c.bf16 %v29297_v31, %v29290_v2  ;;  %v29304_v12 = vand.u32 4294901760, %v29303_v39 }
0x3eb7   : > { %36016 = vmatprep.subr.bf16.mxu1 %v39470_v48 }
0x3eb8   : > { %v35990_v55 = vpack.c.bf16 %v29311_v16, %v29304_v12 }
0x3eb9   : > { %34856 = vmatmul.mubr.f32.vlgmr.msra.gmra.mrb[76].mxu1 %v28765_v45  ;;  %v39278_v45 = vsub.f32 %v29717_v62, %v29730_v42 }
0x3eba   : > { %34932 = vmatprep.mubr.msk.f32.mxu1 %vm36944_vm2, %v39469_v23 }
0x3ebb   : > { %v29811_v17 = vand.u32 4294901760, %v39278_v45  ;;  %v36029_v52 = vpack.c.bf16 %v39280_v18, %v39278_v45 }
0x3f8c   : > { %v29177_v32 = vpop.f32.mrb[76].mxu1 }
0x3f8d   : > { %v39242_v4 = vadd.f32 %v30835_v37, %v29177_v32  ;;  %v34857_v56 = vpop.f32.mrb[77].mxu1  ;;  %v29818_v37 = vand.u32 4294901760, %v39280_v18  ;;  %v29736_v32 = vand.u32 4294901760, %v29719_v58 }
0x3f8e   : > { %v29739_v56 = vand.u32 4294901760, %v29720_v51 }
0x3f8f   : > { %v29181_v8 = vsel %vm207_vm0, %v39242_v4, 0.0  ;;  %v36041_v9 = vpack.c.bf16 %v29818_v37, %v29811_v17 }
0x3f90   : > { %29182 = vadd.xlane.f32.xlu1 %v29181_v8  ;;  %v29812_v8 = vsub.f32 %v39278_v45, %v29811_v17  ;;  %v36020_v3 = vpack.c.bf16 %v29739_v56, %v29736_v32 }
0x401d   : > { %v29183_v13 = vpop.xlane.xlu1 %29182 }
0x401e   : > { %v29184_v0 = vmul.f32 0.03125, %v29183_v13  ;;  %v29819_v13 = vsub.f32 %v39280_v18, %v29818_v37 }
0x4020   : > { %v29185_v29 = vsub.f32 %v39242_v4, %v29184_v0  ;;  %v39286_v0 = vsub.f32 %v29719_v58, %v29736_v32  ;;  %v30215_v58 = vld [vmem:[#allocation2 + $0x2c8] sm:$0xff] }
0x4021   : > { %v30228_v17 = vand.u32 4294901760, %v30215_v58 }
0x4022   : > { %v29186_v24 = vmul.f32 %v29185_v29, %v29185_v29  ;;  %v29825_v14 = vand.u32 4294901760, %v39286_v0 }
0x4024   : > { %v29187_v5 = vsel %vm207_vm0, %v29186_v24, 0.0  ;;  %v29813_v24 = vand.u32 4294901760, %v29812_v8  ;;  %v29826_v35 = vsub.f32 %v39286_v0, %v29825_v14 }
0x4025   : > { %29188 = vadd.xlane.f32.xlu1 %v29187_v5  ;;  %v29820_v5 = vand.u32 4294901760, %v29819_v13  ;;  %v30217_v13 = vld [vmem:[#allocation2 + $0x2d8] sm:$0xff] }
0x4026   : > { %v29827_v44 = vand.u32 4294901760, %v29826_v35 }
0x4027   : > { %v36023_v43 = vpack.c.bf16 %v29820_v5, %v29813_v24 }
0x40b2   : > { %v29189_v46 = vpop.xlane.xlu1 %29188 }
0x40b3   : > { %v29190_v7 = vmul.f32 0.03125, %v29189_v46 }
0x40b5   : > { %v29191_v63 = vadd.f32 1e-05, %v29190_v7 }
0x40b7   : > { %36829 = vrsqrt.f32 %v29191_v63 }
0x40c1   : > { %v36830_v25 = vpop.eup %36829 }
0x40c2   : > { %v29193_v19 = vmul.f32 %v36830_v25, %v29185_v29  ;;  %v39288_v29 = vsub.f32 %v29720_v51, %v29739_v56  ;;  %v30216_v51 = vld [vmem:[#allocation2 + $0x2d0] sm:$0xff]  ;;  %v39322_v56 = vsub.f32 %v30215_v58, %v30228_v17 }
0x40c3   : > { %v30231_v37 = vand.u32 4294901760, %v30216_v51 }
0x40c4   : > { %v29204_v21 = vsel %vm207_vm0, %v29193_v19, 0  ;;  %v29832_v27 = vand.u32 4294901760, %v39288_v29  ;;  %v36032_v15 = vpack.c.bf16 %v39288_v29, %v39286_v0  ;;  %v30218_v0 = vld [vmem:[#allocation2 + $0x2e0] sm:$0xff]  ;;  %v30309_v5 = vand.u32 4294901760, %v39322_v56 }
0x40c5   : > { %v29275_v6 = vand.u32 4294901760, %v29204_v21  ;;  %v39320_v32 = vpack.c.bf16 %v30231_v37, %v30228_v17  ;;  %v39324_v8 = vsub.f32 %v30216_v51, %v30231_v37  ;;  %v30237_v24 = vand.u32 4294901760, %v30218_v0 }
0x40c6   : > { %v29833_v53 = vsub.f32 %v39288_v29, %v29832_v27  ;;  %v30234_v29 = vand.u32 4294901760, %v30217_v13 }
0x40c7   : > { %v29276_v61 = vsub.f32 %v29204_v21, %v29275_v6  ;;  %v30329_v35 = vsub.f32 %v30218_v0, %v30237_v24 }
0x40c8   : > { %v29834_v41 = vand.u32 4294901760, %v29833_v53  ;;  %v30310_v53 = vsub.f32 %v39322_v56, %v30309_v5 }
0x40c9   : > { %v29277_v54 = vand.u32 4294901760, %v29276_v61 }
0x40ca   : > { %v36026_v49 = vpack.c.bf16 %v29834_v41, %v29827_v44  ;;  %v30311_v41 = vand.u32 4294901760, %v30310_v53 }
0x40cb   : > { %v29278_v28 = vsub.f32 %v29276_v61, %v29277_v54 }
0x40cd   : > { %v29279_v26 = vand.u32 4294901760, %v29278_v28 }
0x40cf   : > { %34867 = vmatmul.mubr.f32.vlgmr.msra.gmra.mrb[150].mxu0 %v29279_v26 }
0x40d0   : > { %35988 = vmatpush3.bf16.msra.mxu0 %v35987_v38  ;;  %34877 = vmatprep.mubr.msk.f32.mxu0 %vm36944_vm2, %v39469_v23 }
0x40d1   : > { %35989 = vmatprep.subr.bf16.mxu0 %v39470_v48 }
0x40d4   : > { %35991 = vmatpush3.bf16.msra.mxu0 %v35990_v55 }
0x40d5   : > { %35992 = vmatprep.subr.bf16.mxu0 %v39470_v48 }
0x40d7   : > { %34878 = vmatmul.mubr.f32.vlgmr.msra.gmra.mrb[150].mxu0 %v29275_v6 }
0x40d8   : > { %35994 = vmatpush3.bf16.msra.mxu0 %v35993_v20  ;;  %34888 = vmatprep.mubr.msk.f32.mxu0 %vm36944_vm2, %v39469_v23 }
0x40d9   : > { %35995 = vmatprep.subr.bf16.mxu0 %v39470_v48 }
0x40dc   : > { %35997 = vmatpush3.bf16.msra.mxu0 %v35996_v57 }
0x40dd   : > { %35998 = vmatprep.subr.bf16.mxu0 %v39470_v48 }
0x40df   : > { %34889 = vmatmul.mubr.f32.vlgmr.msra.gmra.mrb[150].mxu0 %v29276_v61 }
0x40e0   : > { %36000 = vmatpush3.bf16.msra.mxu0 %v39248_v59  ;;  %34899 = vmatprep.mubr.msk.f32.mxu0 %vm36944_vm2, %v39469_v23 }
0x40e1   : > { %36001 = vmatprep.subr.bf16.mxu0 %v39470_v48 }
0x40e4   : > { %36003 = vmatpush3.bf16.msra.mxu0 %v35984_v10 }
0x40e5   : > { %36004 = vmatprep.subr.bf16.mxu0 %v39470_v48 }
0x40e7   : > { %34900 = vmatmul.mubr.f32.vlgmr.msra.gmra.mrb[150].mxu0 %v29277_v54 }
0x40e8   : > { %36006 = vmatpush3.bf16.msra.mxu0 %v36005_v60  ;;  %34910 = vmatprep.mubr.msk.f32.mxu0 %vm36944_vm2, %v39469_v23 }
0x40e9   : > { %36007 = vmatprep.subr.bf16.mxu0 %v39470_v48 }
0x40ec   : > { %36009 = vmatpush3.bf16.msra.mxu0 %v36008_v22 }
0x40ed   : > { %36010 = vmatprep.subr.bf16.mxu0 %v39470_v48 }
0x40ef   : > { %34911 = vmatmul.mubr.f32.vlgmr.msra.gmra.mrb[150].mxu0 %v29275_v6 }
0x40f0   : > { %36012 = vmatpush3.bf16.msra.mxu0 %v39248_v59  ;;  %34921 = vmatprep.mubr.msk.f32.mxu0 %vm36944_vm2, %v39469_v23  ;;  %v36017_v59 = vpack.c.bf16 %v29733_v36, %v29730_v42 }
0x40f1   : > { %36013 = vmatprep.subr.bf16.mxu0 %v39470_v48 }
0x40f2   : > { %36018 = vmatpush3.bf16.msra.mxu1 %v36017_v59 }
0x40f3   : > { %36019 = vmatprep.subr.bf16.mxu1 %v39470_v48 }
0x40f4   : > { %36015 = vmatpush3.bf16.msra.mxu0 %v35984_v10  ;;  %v36044_v10 = vpack.c.bf16 %v29832_v27, %v29825_v14  ;;  %v30316_v14 = vand.u32 4294901760, %v39324_v8  ;;  %v39330_v27 = vpack.c.bf16 %v30237_v24, %v30234_v29 }
0x40f5   : > { %36022 = vmatprep.subr.bf16.mxu0 %v39470_v48 }
0x40f6   : > { %36021 = vmatpush3.bf16.msra.mxu1 %v36020_v3  ;;  %v30317_v44 = vsub.f32 %v39324_v8, %v30316_v14 }
0x40f7   : > { %34922 = vmatmul.mubr.f32.vlgmr.msra.gmra.mrb[150].mxu0 %v29275_v6  ;;  %36028 = vmatprep.subr.bf16.mxu1 %v39470_v48 }
0x40f8   : > { %34943 = vmatprep.mubr.msk.f32.mxu0 %vm36944_vm2, %v39469_v23  ;;  %36024 = vmatpush3.bf16.msra.mxu0 %v36023_v43  ;;  %v30322_v43 = vsub.f32 %v30217_v13, %v30234_v29 }
0x40f9   : > { %36025 = vmatprep.subr.bf16.mxu0 %v39470_v48 }
0x40fc   : > { %36027 = vmatpush3.bf16.msra.mxu0 %v36026_v49  ;;  %v30323_v49 = vand.u32 4294901760, %v30322_v43 }
0x40fd   : > { %36034 = vmatprep.subr.bf16.mxu0 %v39470_v48 }
0x41ca   : > { %v29687_v50 = vpop.f32.mrb[150].mxu0 }
0x41cb   : > { %v36110_v11 = vadd.f32 %v30836_v47, %v29687_v50  ;;  %v34923_v1 = vpop.f32.mrb[151].mxu0 }
0x41cc   : > { %v36068_v1 = vpack.c.bf16 %v30329_v35, %v30322_v43 }
0x41cd   : > { %v29692_v2 = vmul.f32 0.70710677, %v36110_v11  ;;  %v29691_v54 = vmul.f32 0.5, %v36110_v11  ;;  %v36065_v11 = vpack.c.bf16 %v39324_v8, %v39322_v56 }
0x41cf   : > { %v29693_v31 = vand.u32 2147483647, %v29692_v2  ;;  %vm29712_vm10 = vcmp.ge.f32.partialorder %v29692_v2, 0.0  ;;  %v36077_v2 = vpack.c.bf16 %v30316_v14, %v30309_v5 }
0x41d1   : > { %v29694_v33 = vmul.f32 0.3275911, %v29693_v31  ;;  %v29706_v38 = vsub.f32 0.0, %v29693_v31 }
0x41d3   : > { %v29695_v34 = vadd.f32 1.0, %v29694_v33  ;;  %v29707_v40 = vmul.f32 %v29706_v38, %v29693_v31  ;;  %v30837_v38 = vld [vmem:[#allocation2 + $0x2c0] ss:$0 sm:$0xff] }
0x41d5   : > { %36831 = vrcp.f32 %v29695_v34  ;;  %v29708_v55 = vmul.f32 1.442695, %v29707_v40 }
0x41d7   : > { %36833 = vpow2.f32 %v29708_v55 }
0x41df   : > { %v36832_v39 = vpop.eup %36831 }
0x41e0   : > { %v29697_v12 = vmul.f32 1.0614054, %v36832_v39 }
0x41e1   : > { %v36834_v25 = vpop.eup %36833 }
0x41e2   : > { %v29698_v16 = vadd.f32 -1.4531521, %v29697_v12 }
0x41e4   : > { %v29699_v20 = vmul.f32 %v36832_v39, %v29698_v16 }
0x41e6   : > { %v29700_v57 = vadd.f32 1.4214138, %v29699_v20 }
0x41e8   : > { %v29701_v60 = vmul.f32 %v36832_v39, %v29700_v57 }
0x41ea   : > { %v29702_v22 = vadd.f32 -0.28449672, %v29701_v60 }
0x41ec   : > { %v29703_v46 = vmul.f32 %v36832_v39, %v29702_v22 }
0x41ee   : > { %v29704_v7 = vadd.f32 0.2548296, %v29703_v46 }
0x41f0   : > { %v29705_v63 = vmul.f32 %v36832_v39, %v29704_v7 }
0x41f2   : > { %v29710_v19 = vmul.f32 %v36834_v25, %v29705_v63 }
0x41f4   : > { %v29711_v21 = vsub.f32 1.0, %v29710_v19 }
0x41f6   : > { %v29713_v6 = vsub.f32 0.0, %v29711_v21 }
0x41f8   : > { %v29714_v61 = vsel %vm29712_vm10, %v29711_v21, %v29713_v6 }
0x41f9   : > { %v29715_v28 = vadd.f32 1.0, %v29714_v61 }
0x41fb   : > { %v29716_v26 = vmul.f32 %v29715_v28, %v29691_v54 }
0x41fd   : > { %v29727_v62 = vsel %vm207_vm0, %v29716_v26, 0 }
0x41fe   : > { %v29798_v30 = vand.u32 4294901760, %v29727_v62 }
0x4200   : > { %v29799_v42 = vsub.f32 %v29727_v62, %v29798_v30  ;;  %34944 = vmatmul.mubr.f32.vlgmr.msra.gmra.mrb[152].mxu0 %v29798_v30 }
0x4201   : > { %36036 = vmatpush3.bf16.msra.mxu0 %v36017_v59  ;;  %34965 = vmatprep.mubr.msk.f32.mxu0 %vm36944_vm2, %v39469_v23 }
0x4202   : > { %36037 = vmatprep.subr.bf16.mxu0 %v39470_v48  ;;  %v29800_v36 = vand.u32 4294901760, %v29799_v42 }
0x4204   : > { %v29801_v45 = vsub.f32 %v29799_v42, %v29800_v36 }
0x4205   : > { %36039 = vmatpush3.bf16.msra.mxu0 %v36020_v3 }
0x4206   : > { %36046 = vmatprep.subr.bf16.mxu0 %v39470_v48  ;;  %v29802_v18 = vand.u32 4294901760, %v29801_v45 }
0x4208   : > { %34966 = vmatmul.mubr.f32.vlgmr.msra.gmra.mrb[154].mxu0 %v29800_v36  ;;  %34933 = vmatmul.mubr.f32.vlgmr.msra.gmra.mrb[78].mxu1 %v29802_v18 }
0x4209   : > { %36030 = vmatpush3.bf16.msra.mxu1 %v36029_v52  ;;  %36048 = vmatpush3.bf16.msra.mxu0 %v36017_v59  ;;  %v30330_v59 = vand.u32 4294901760, %v30329_v35  ;;  %v30324_v52 = vsub.f32 %v30322_v43, %v30323_v49 }
0x420a   : > { %36031 = vmatprep.subr.bf16.mxu1 %v39470_v48  ;;  %36049 = vmatprep.subr.bf16.mxu0 %v39470_v48 }
0x420b   : > { %34954 = vmatprep.mubr.msk.f32.mxu1 %vm36944_vm2, %v39469_v23  ;;  %34987 = vmatprep.mubr.msk.f32.mxu0 %vm36944_vm2, %v39469_v23  ;;  %v36080_v31 = vpack.c.bf16 %v30330_v59, %v30323_v49 }
0x420d   : > { %36033 = vmatpush3.bf16.msra.mxu1 %v36032_v15  ;;  %36051 = vmatpush3.bf16.msra.mxu0 %v36020_v3  ;;  %v30318_v3 = vand.u32 4294901760, %v30317_v44  ;;  %v30331_v15 = vsub.f32 %v30329_v35, %v30330_v59 }
0x420e   : > { %36040 = vmatprep.subr.bf16.mxu1 %v39470_v48 }
0x420f   : > { %v30332_v47 = vand.u32 4294901760, %v30331_v15 }
0x4210   : > { %34955 = vmatmul.mubr.f32.vlgmr.msra.gmra.mrb[80].mxu1 %v29799_v42  ;;  %34988 = vmatmul.mubr.f32.vlgmr.msra.gmra.mrb[156].mxu0 %v29798_v30 }
0x4211   : > { %36042 = vmatpush3.bf16.msra.mxu1 %v36041_v9  ;;  %34976 = vmatprep.mubr.msk.f32.mxu1 %vm36944_vm2, %v39469_v23  ;;  %v36059_v9 = vpack.c.bf16 %v30318_v3, %v30311_v41 }
0x4212   : > { %36043 = vmatprep.subr.bf16.mxu1 %v39470_v48 }
0x4215   : > { %36045 = vmatpush3.bf16.msra.mxu1 %v36044_v10  ;;  %v30325_v10 = vand.u32 4294901760, %v30324_v52 }
0x4216   : > { %36052 = vmatprep.subr.bf16.mxu1 %v39470_v48 }
0x4217   : > { %v36062_v50 = vpack.c.bf16 %v30332_v47, %v30325_v10 }
0x4218   : > { %34977 = vmatmul.mubr.f32.vlgmr.msra.gmra.mrb[82].mxu1 %v29798_v30 }
0x4219   : > { %34998 = vmatprep.mubr.msk.f32.mxu1 %vm36944_vm2, %v39469_v23  ;;  %36054 = vmatpush3.bf16.msra.mxu1 %v39320_v32 }
0x421a   : > { %36055 = vmatprep.subr.bf16.mxu1 %v39470_v48 }
0x421d   : > { %36057 = vmatpush3.bf16.msra.mxu1 %v39330_v27 }
0x421e   : > { %36058 = vmatprep.subr.bf16.mxu1 %v39470_v48 }
0x42d3   : > { %v29895_v33 = vpop.f32.mrb[152].mxu0 }
0x42d4   : > { %v34945_v34 = vpop.f32.mrb[153].mxu0 }
0x42db   : > { %v30052_v39 = vpop.f32.mrb[154].mxu0  ;;  %v29804_v40 = vpop.f32.mrb[78].mxu1 }
0x42dc   : > { %v29805_v12 = vadd.f32 %v30837_v38, %v29804_v40  ;;  %v34967_v16 = vpop.f32.mrb[155].mxu0  ;;  %v34934_v55 = vpop.f32.mrb[79].mxu1 }
0x42de   : > { %v29896_v20 = vadd.f32 %v29895_v33, %v29805_v12 }
0x42e3   : > { %v29975_v57 = vpop.f32.mrb[80].mxu1  ;;  %v30210_v60 = vpop.f32.mrb[156].mxu0 }
0x42e4   : > { %v29976_v22 = vadd.f32 %v29975_v57, %v29896_v20  ;;  %v34956_v46 = vpop.f32.mrb[81].mxu1  ;;  %v34989_v7 = vpop.f32.mrb[157].mxu0 }
0x42e6   : > { %v30053_v63 = vadd.f32 %v30052_v39, %v29976_v22 }
0x42eb   : > { %v30135_v25 = vpop.f32.mrb[82].mxu1 }
0x42ec   : > { %v30136_v19 = vadd.f32 %v30135_v25, %v30053_v63  ;;  %v34978_v21 = vpop.f32.mrb[83].mxu1 }
0x42ee   : > { %v30211_v6 = vadd.f32 %v30210_v60, %v30136_v19 }
0x42f0   : > { %v30214_v61 = vadd.f32 %v39242_v4, %v30211_v6  ;;  %v30838_v4 = vld [vmem:[#allocation2 + $0x2e8] ss:$0 sm:$0xff] }
0x42f2   : > { %v30225_v54 = vsel %vm207_vm0, %v30214_v61, 0 }
0x42f3   : > { %v30296_v28 = vand.u32 4294901760, %v30225_v54 }
0x42f5   : > { %v30297_v26 = vsub.f32 %v30225_v54, %v30296_v28 }
0x42f7   : > { %v30298_v62 = vand.u32 4294901760, %v30297_v26 }
0x42f9   : > { %v30299_v30 = vsub.f32 %v30297_v26, %v30298_v62 }
0x42fb   : > { %v30300_v42 = vand.u32 4294901760, %v30299_v30 }
0x42fd   : > { %34999 = vmatmul.mubr.f32.vlgmr.msra.gmra.mrb[84].mxu1 %v30300_v42 }
0x42fe   : > { %36060 = vmatpush3.bf16.msra.mxu1 %v36059_v9  ;;  %35009 = vmatprep.mubr.msk.f32.mxu1 %vm36944_vm2, %v39469_v23 }
0x42ff   : > { %36061 = vmatprep.subr.bf16.mxu1 %v39470_v48 }
0x4302   : > { %36063 = vmatpush3.bf16.msra.mxu1 %v36062_v50 }
0x4303   : > { %36064 = vmatprep.subr.bf16.mxu1 %v39470_v48 }
0x4305   : > { %35010 = vmatmul.mubr.f32.vlgmr.msra.gmra.mrb[84].mxu1 %v30296_v28 }
0x4306   : > { %36066 = vmatpush3.bf16.msra.mxu1 %v36065_v11  ;;  %35020 = vmatprep.mubr.msk.f32.mxu1 %vm36944_vm2, %v39469_v23 }
0x4307   : > { %36067 = vmatprep.subr.bf16.mxu1 %v39470_v48 }
0x430a   : > { %36069 = vmatpush3.bf16.msra.mxu1 %v36068_v1 }
0x430b   : > { %36070 = vmatprep.subr.bf16.mxu1 %v39470_v48 }
0x430d   : > { %35021 = vmatmul.mubr.f32.vlgmr.msra.gmra.mrb[84].mxu1 %v30297_v26 }
0x430e   : > { %36072 = vmatpush3.bf16.msra.mxu1 %v39320_v32  ;;  %35031 = vmatprep.mubr.msk.f32.mxu1 %vm36944_vm2, %v39469_v23 }
0x430f   : > { %36073 = vmatprep.subr.bf16.mxu1 %v39470_v48 }
0x4312   : > { %36075 = vmatpush3.bf16.msra.mxu1 %v39330_v27 }
0x4313   : > { %36076 = vmatprep.subr.bf16.mxu1 %v39470_v48 }
0x4315   : > { %35032 = vmatmul.mubr.f32.vlgmr.msra.gmra.mrb[84].mxu1 %v30298_v62 }
0x4316   : > { %36078 = vmatpush3.bf16.msra.mxu1 %v36077_v2  ;;  %35042 = vmatprep.mubr.msk.f32.mxu1 %vm36944_vm2, %v39469_v23 }
0x4317   : > { %36079 = vmatprep.subr.bf16.mxu1 %v39470_v48 }
0x431a   : > { %36081 = vmatpush3.bf16.msra.mxu1 %v36080_v31 }
0x431b   : > { %36082 = vmatprep.subr.bf16.mxu1 %v39470_v48 }
0x431d   : > { %35043 = vmatmul.mubr.f32.vlgmr.msra.gmra.mrb[84].mxu1 %v30296_v28 }
0x431e   : > { %36084 = vmatpush3.bf16.msra.mxu1 %v39320_v32  ;;  %35053 = vmatprep.mubr.msk.f32.mxu1 %vm36944_vm2, %v39469_v23 }
0x431f   : > { %36085 = vmatprep.subr.bf16.mxu1 %v39470_v48 }
0x4322   : > { %36087 = vmatpush3.bf16.msra.mxu1 %v39330_v27 }
0x4325   : > { %35054 = vmatmul.mubr.f32.vlgmr.msra.gmra.mrb[84].mxu1 %v30296_v28 }
0x43f8   : > { %v30708_v36 = vpop.f32.mrb[84].mxu1 }
0x43f9   : > { %v36111_v45 = vadd.f32 %v30838_v4, %v30708_v36  ;;  %v35055_v18 = vpop.f32.mrb[85].mxu1 }
0x43fb   : > { %30712 = vst.msk [vmem:[%s191_s30] sm:$0xff] %vm719_vm1, %v36111_v45 }
0x43fc   : > { %36885 = shalt.err (!%p36882_p7)
}
0x43fd   : > { %s36886_s17 = scalar_lea.hbm %s39368_s7, 128  ;;  %s36890_s27 = scalar_lea.hbm %s39414_s3, 256 }
0x43fe   : > { %p36887_p8 = scmp.ne.s32.totalorder %s39368_s7, %s36886_s17  ;;  %p36891_p1 = scmp.lt.u32.totalorder %s39368_s7, %s39414_s3 }
0x43ff   : > { %p36892_p0 = scmp.lt.u32.totalorder %s36890_s27, %s36886_s17  ;;  %p36894_p6 = scmp.lt.u32.totalorder %s36886_s17, %s39368_s7 }
0x4400   : > { %p36888_p11 = pnand %p36887_p8, %p39513_p9 }
0x4401   : > { %p36893_p5 = por %p36892_p0, %p36891_p1 }
0x4402   : > { %p36889_p13 = pneg %p36888_p11 }
0x4403   : > { %p36895_p10 = por %p36894_p6, %p36893_p5 }
0x4405   : > { %p36896_p12 = pnand %p36895_p10, %p36889_p13 }
0x4407   : > { %36899 = shalt.err (!%p36896_p12)
}
0x4408   : > { %36640 = dma.vmem_to_hbm [thread:$0]  (%p39513_p9), %s39370_s4, 128, %s39368_s7, %s30714_s8  }
0x4409 PF: > { %p36652_p2 = scmp.ge.s32.totalorder %s36938_s15, 2  ;;  %s30739_s19 = sand.u32 1, %s36926_s12  }
0x440a   : > { %p39514_p3 = scmp.ne.s32.totalorder %s39453_s23, 0  ;;  %s30740_s24 = scalar_lea.sflag [#allocation4], %s30739_s19 }
0x440c   : > { %p36647_p4 = pnand %p36652_p2, %p39514_p3 }
0x440e   : > { %36921 = dma.done.wait (!%p36647_p4), %s30740_s24, 128  }
0x440f   : > { %36923 = vsyncadd (!%p36647_p4), %s30740_s24, 4294967168  ;;  %p14_p7 = scmp.ge.s32.totalorder %s37006_s18, 4   ;;  %s39515_s12 = smov %s36930_s13 }
0x4410   : > { %s39516_s13 = smov %s36934_s14  ;;  %s39517_s14 = smov %s37017_s21 }
0x4411   : > { %s39518_s15 = smov %s37006_s18  ;;  %16 = sbr.rel (!%p14_p7) target bundleno = 4 (0x4), region = 75 }
0x4418   :  { %30745 = vsyncpa [#allocation3], 1 }
0x4419   :  { %30747 = vsyncpa [#allocation3 + $0x1], 1 }
0x441a   :  { %30748 = vsyncpa [#allocation4], 1 }
0x441b   :  { %30750 = vsyncpa [#allocation4 + $0x1], 1 }

</bundles_post_ra>
